<compile_context>
chip_gen: v5e
topology: v5e:2x2
jax: 0.10.0
libtpu: 0.0.40
codegen_flags: <defaults>
</compile_context>

<pallas_src>
import functools
import math

import numpy as np
import jax
import jax.numpy as jnp
from jax import lax
from jax.experimental import pallas as pl
from jax.experimental.pallas import tpu as pltpu

_VMEM = pl.BlockSpec(memory_space=pltpu.MemorySpace.VMEM)


# ------------------------------ fused kernel ---------------------------------

def _decoder_kernel(x_ref, w1_ref, b1_ref, w2_ref, b2_ref,
                    g1_ref, a1_ref, at1_ref, m1_ref, bb1_ref,
                    g2_ref, a2_ref, at2_ref, m2_ref, bb2_ref,
                    g3_ref, a3_ref, at3_ref, m3_ref, bb3_ref,
                    o_ref, *, inv_counts):
    dot = functools.partial(jnp.dot, preferred_element_type=jnp.float32)

    # decoder_lin: Linear -> ReLU -> Linear -> ReLU.  The 2nd linear's columns
    # are pre-permuted so its output is already in channel-last (HWC) order.
    y = jnp.maximum(dot(x_ref[...], w1_ref[...]) + b1_ref[...], 0.0)
    y = jnp.maximum(dot(y, w2_ref[...]) + b2_ref[...], 0.0)          # (N, H*W*C)

    def bn_deconv(y, g_ref, a_ref, at_ref, m_ref, bb_ref, inv_count, act):
        a, at = a_ref[...], at_ref[...]            # (HWC, C) / (C, HWC) 0/1 maps
        # training-mode BatchNorm2d statistics (biased variance, eps=1e-5)
        mean_c = jnp.sum(dot(y, a), axis=0, keepdims=True) * inv_count      # (1, C)
        yc = y - dot(mean_c, at)                                            # center
        var_c = jnp.sum(dot(yc * yc, a), axis=0, keepdims=True) * inv_count # (1, C)
        scale_c = g_ref[...] * lax.rsqrt(var_c + 1e-5)
        yn = yc * dot(scale_c, at)        # BN beta is pre-folded into bb_ref
        # ConvTranspose2d as ONE dense MXU matmul (+ folded bias)
        z = dot(yn, m_ref[...]) + bb_ref[...]
        return jnp.maximum(z, 0.0) if act == "relu" else jax.nn.sigmoid(z)

    y = bn_deconv(y, g1_ref, a1_ref, at1_ref, m1_ref, bb1_ref, inv_counts[0], "relu")
    y = bn_deconv(y, g2_ref, a2_ref, at2_ref, m2_ref, bb2_ref, inv_counts[1], "relu")
    y = bn_deconv(y, g3_ref, a3_ref, at3_ref, m3_ref, bb3_ref, inv_counts[2], "sigmoid")

    o_ref[...] = y            # (N, Ho*Wo): lane-dense (final Cout = 1)


def decoder_forward(x, W):
    n = x.shape[0]
    inv_counts = tuple(1.0 / (n * hw) for hw in W["in_hw"])   # 1/(N*H*W) per BN
    ho, wo = W["out_hw"]
    kern = functools.partial(_decoder_kernel, inv_counts=inv_counts)
    args = (x, W["w1t"], W["b1"], W["w2t"], W["b2"],
            W["g1"], W["a1"], W["at1"], W["m1"], W["bb1"],
            W["g2"], W["a2"], W["at2"], W["m2"], W["bb2"],
            W["g3"], W["a3"], W["at3"], W["m3"], W["bb3"])
    out2d = pl.pallas_call(
        kern,
        out_shape=jax.ShapeDtypeStruct((n, ho * wo), jnp.float32),
        in_specs=[_VMEM] * len(args),
        out_specs=_VMEM,
        compiler_params=pltpu.CompilerParams(vmem_limit_bytes=32 * 1024 * 1024),
    )(*args)
    return out2d.reshape(n, ho, wo, 1).transpose(0, 3, 1, 2)   # back to NCHW


# --------------------- one-time host-side weight preparation ------------------

def _deconv_dense_matrix(w_pt, hin, win, *, stride, padding, output_padding):
    """Dense HWC->HWC matrix realizing torch ConvTranspose2d (no bias).
    w_pt: (Cin, Cout, kh, kw) torch layout; returns (Hin*Win*Cin, Ho*Wo*Cout)."""
    cin, cout, kh, kw = w_pt.shape
    s, p, op = stride, padding, output_padding
    ho = (hin - 1) * s - 2 * p + kh + op
    wo = (win - 1) * s - 2 * p + kw + op
    w_np = np.asarray(w_pt, np.float32)
    m = np.zeros((hin, win, cin, ho, wo, cout), np.float32)
    for h in range(hin):
        for w in range(win):
            for ki in range(kh):
                oi = h * s - p + ki
                if not 0 <= oi < ho:
                    continue
                for kj in range(kw):
                    oj = w * s - p + kj
                    if 0 <= oj < wo:
                        m[h, w, :, oi, oj, :] = w_np[:, :, ki, kj]
    return m.reshape(hin * win * cin, ho * wo * cout), (ho, wo)


def prepare_decoder_weights(P, conv_in, params):
    """Hoisted weight prep: transposes, HWC permutation of the 2nd linear,
    dense deconv matrices, channel-aggregation maps, BN-beta/bias folding."""
    c3, h3, w3 = conv_in
    f32 = lambda a: np.asarray(a, np.float32)

    # permute 2nd-linear outputs from torch CHW order to channel-last HWC order
    perm = np.arange(c3 * h3 * w3).reshape(c3, h3, w3).transpose(1, 2, 0).reshape(-1)
    W = dict(
        w1t=jnp.asarray(f32(P["w1"]).T), b1=jnp.asarray(f32(P["b1"])[None, :]),
        w2t=jnp.asarray(f32(P["w2"]).T[:, perm]),
        b2=jnp.asarray(f32(P["b2"])[perm][None, :]),
    )

    stages = [  # (weight, bias, gamma, beta, stride, padding, output_padding)
        (P["wd1"], P["bd1"], P["g1"], P["be1"],
         params["conv2"]["stride"], 0, params["conv3"]["padding"]),
        (P["wd2"], P["bd2"], P["g2"], P["be2"],
         params["conv2"]["stride"], params["conv2"]["padding"],
         params["conv2"]["padding"]),
        (P["wd3"], P["bd3"], P["g3"], P["be3"],
         params["conv1"]["stride"], params["conv1"]["padding"],
         params["conv1"]["padding"]),
    ]

    in_hw, (hin, win) = [], (h3, w3)
    for i, (wd, bd, g, be, s, p, op) in enumerate(stages, start=1):
        wd, bd, g, be = f32(wd), f32(bd), f32(g), f32(be)
        cin = wd.shape[0]
        m, (ho, wo) = _deconv_dense_matrix(wd, hin, win, stride=s, padding=p,
                                           output_padding=op)
        a = np.tile(np.eye(cin, dtype=np.float32), (hin * win, 1))     # (HWC, C)
        # conv bias tiled over output HWC  +  BN beta folded through the deconv
        bb = np.tile(bd, ho * wo)[None, :] + np.tile(be, hin * win)[None, :] @ m
        W[f"g{i}"] = jnp.asarray(g[None, :])
        W[f"a{i}"], W[f"at{i}"] = jnp.asarray(a), jnp.asarray(a.T)
        W[f"m{i}"], W[f"bb{i}"] = jnp.asarray(m), jnp.asarray(bb)
        in_hw.append(hin * win)
        hin, win = ho, wo

    W["in_hw"], W["out_hw"] = tuple(in_hw), (hin, win)
    return W


# --------------------------- params / reference ------------------------------

def init_decoder_params(key, params, conv_in):
    c3, h3, w3 = conv_in
    latent, lin1 = params["latent_space"], params["lin1"]
    conv_flat = c3 * h3 * w3
    c2, c1 = params["conv2"]["filters"], params["conv1"]["filters"]
    k2, k1 = params["conv2"]["kernel"], params["conv1"]["kernel"]

    ks = jax.random.split(key, 10)

    def u(k, shape, fan_in):
        bound = 1.0 / math.sqrt(fan_in)
        return jax.random.uniform(k, shape, jnp.float32, -bound, bound)

    return dict(
        w1=u(ks[0], (lin1, latent), latent), b1=u(ks[1], (lin1,), latent),
        w2=u(ks[2], (conv_flat, lin1), lin1), b2=u(ks[3], (conv_flat,), lin1),
        g1=jnp.ones((c3,), jnp.float32), be1=jnp.zeros((c3,), jnp.float32),
        wd1=u(ks[4], (c3, c2, k2, k2), c3 * k2 * k2),
        bd1=u(ks[5], (c2,), c3 * k2 * k2),
        g2=jnp.ones((c2,), jnp.float32), be2=jnp.zeros((c2,), jnp.float32),
        wd2=u(ks[6], (c2, c1, k1, k1), c2 * k1 * k1),
        bd2=u(ks[7], (c1,), c2 * k1 * k1),
        g3=jnp.ones((c1,), jnp.float32), be3=jnp.zeros((c1,), jnp.float32),
        wd3=u(ks[8], (c1, 1, k1, k1), c1 * k1 * k1),
        bd3=u(ks[9], (1,), c1 * k1 * k1),
    )


def reference_forward(x, P, conv_in, params):
    """Pure-JAX NCHW reference (no Pallas), for numerical cross-check."""
    def deconv(x, w_pt, b, s, p, op):
        kh, kw = w_pt.shape[2], w_pt.shape[3]
        w = jnp.flip(w_pt, axis=(2, 3)).transpose(1, 0, 2, 3)   # -> OIHW
        y = lax.conv_general_dilated(
            x, w, window_strides=(1, 1),
            padding=((kh - 1 - p, kh - 1 - p + op),
                     (kw - 1 - p, kw - 1 - p + op)),
            lhs_dilation=(s, s),
            dimension_numbers=("NCHW", "OIHW", "NCHW"))
        return y + b.reshape(1, -1, 1, 1)

    def bn(x, g, be):
        m = jnp.mean(x, axis=(0, 2, 3), keepdims=True)
        v = jnp.mean(jnp.square(x - m), axis=(0, 2, 3), keepdims=True)
        return (x - m) / jnp.sqrt(v + 1e-5) * g.reshape(1, -1, 1, 1) \
            + be.reshape(1, -1, 1, 1)

    y = jnp.maximum(x @ P["w1"].T + P["b1"], 0.0)
    y = jnp.maximum(y @ P["w2"].T + P["b2"], 0.0)
    y = y.reshape(x.shape[0], *conv_in)
    y = bn(y, P["g1"], P["be1"])
    y = jnp.maximum(deconv(y, P["wd1"], P["bd1"], params["conv2"]["stride"], 0,
                           params["conv3"]["padding"]), 0.0)
    y = bn(y, P["g2"], P["be2"])
    y = jnp.maximum(deconv(y, P["wd2"], P["bd2"], params["conv2"]["stride"],
                           params["conv2"]["padding"],
                           params["conv2"]["padding"]), 0.0)
    y = bn(y, P["g3"], P["be3"])
    y = jax.nn.sigmoid(deconv(y, P["wd3"], P["bd3"], params["conv1"]["stride"],
                              params["conv1"]["padding"],
                              params["conv1"]["padding"]))
    return y


# --------------------------------- main --------------------------------------

if __name__ == "__main__":
    params = {
        "latent_space": 8,
        "lin1": 32,
        "conv1": {"filters": 8, "kernel": 3, "stride": 2, "padding": 1},
        "conv2": {"filters": 8, "kernel": 3, "stride": 2, "padding": 1},
        "conv3": {"filters": 8, "kernel": 3, "stride": 2, "padding": 0},
    }
    conv_in = (params["conv3"]["filters"], 3, 3)   # (C3,H,W): 3x3 -> 7 -> 14 -> 28

    key = jax.random.PRNGKey(0)
    kp, kx = jax.random.split(key)
    P = init_decoder_params(kp, params, conv_in)
    W = prepare_decoder_weights(P, conv_in, params)     # hoisted one-time prep
    x = jax.random.normal(kx, (2, params["latent_space"]), jnp.float32)

    out = jax.block_until_ready(decoder_forward(x, W))
    assert out.shape == (2, 1, 28, 28), out.shape

    ref = jax.block_until_ready(reference_forward(x, P, conv_in, params))
    max_err = float(jnp.max(jnp.abs(out - ref)))
    assert jnp.allclose(out, ref, atol=2e-3, rtol=2e-3), max_err

    print("KERNEL_OK")
</pallas_src>

<mosaic_0001>
module attributes {stable_mosaic.version = 11 : i64} {
  func.func @_decoder_kernel(%arg0: memref<2x8xf32, #tpu.memory_space<vmem>>, %arg1: memref<8x32xf32, #tpu.memory_space<vmem>>, %arg2: memref<1x32xf32, #tpu.memory_space<vmem>>, %arg3: memref<32x72xf32, #tpu.memory_space<vmem>>, %arg4: memref<1x72xf32, #tpu.memory_space<vmem>>, %arg5: memref<1x8xf32, #tpu.memory_space<vmem>>, %arg6: memref<72x8xf32, #tpu.memory_space<vmem>>, %arg7: memref<8x72xf32, #tpu.memory_space<vmem>>, %arg8: memref<72x392xf32, #tpu.memory_space<vmem>>, %arg9: memref<1x392xf32, #tpu.memory_space<vmem>>, %arg10: memref<1x8xf32, #tpu.memory_space<vmem>>, %arg11: memref<392x8xf32, #tpu.memory_space<vmem>>, %arg12: memref<8x392xf32, #tpu.memory_space<vmem>>, %arg13: memref<392x1568xf32, #tpu.memory_space<vmem>>, %arg14: memref<1x1568xf32, #tpu.memory_space<vmem>>, %arg15: memref<1x8xf32, #tpu.memory_space<vmem>>, %arg16: memref<1568x8xf32, #tpu.memory_space<vmem>>, %arg17: memref<8x1568xf32, #tpu.memory_space<vmem>>, %arg18: memref<1568x784xf32, #tpu.memory_space<vmem>>, %arg19: memref<1x784xf32, #tpu.memory_space<vmem>>, %arg20: memref<2x784xf32, #tpu.memory_space<vmem>>) attributes {dimension_semantics = [], scalar_prefetch = 0 : i64, scratch_operands = 0 : i64, tpu.core_type = #tpu.core_type<tc>} {
    %c0 = arith.constant 0 : index
    %c0_0 = arith.constant 0 : index
    %0 = vector.load %arg0[%c0, %c0_0] : memref<2x8xf32, #tpu.memory_space<vmem>>, vector<2x8xf32>
    %c0_1 = arith.constant 0 : index
    %c0_2 = arith.constant 0 : index
    %1 = vector.load %arg1[%c0_1, %c0_2] : memref<8x32xf32, #tpu.memory_space<vmem>>, vector<8x32xf32>
    %cst = arith.constant dense<0.000000e+00> : vector<2x32xf32>
    %2 = tpu.matmul %0, %1, %cst {dimension_numbers = #tpu.dot_dimension_numbers<[1], [0], [0], [1], [0, 0, 1, 1], [], []>} : vector<2x8xf32>, vector<8x32xf32>, vector<2x32xf32> -> vector<2x32xf32>
    %c0_3 = arith.constant 0 : index
    %c0_4 = arith.constant 0 : index
    %3 = vector.load %arg2[%c0_3, %c0_4] : memref<1x32xf32, #tpu.memory_space<vmem>>, vector<1x32xf32>
    %4 = vector.broadcast %3 : vector<1x32xf32> to vector<2x32xf32>
    %5 = arith.addf %2, %4 : vector<2x32xf32>
    %cst_5 = arith.constant 0.000000e+00 : f32
    %6 = vector.broadcast %cst_5 : f32 to vector<2x32xf32>
    %7 = arith.maximumf %5, %6 : vector<2x32xf32>
    %c0_6 = arith.constant 0 : index
    %c0_7 = arith.constant 0 : index
    %8 = vector.load %arg3[%c0_6, %c0_7] : memref<32x72xf32, #tpu.memory_space<vmem>>, vector<32x72xf32>
    %cst_8 = arith.constant dense<0.000000e+00> : vector<2x72xf32>
    %9 = tpu.matmul %7, %8, %cst_8 {dimension_numbers = #tpu.dot_dimension_numbers<[1], [0], [0], [1], [0, 0, 1, 1], [], []>} : vector<2x32xf32>, vector<32x72xf32>, vector<2x72xf32> -> vector<2x72xf32>
    %c0_9 = arith.constant 0 : index
    %c0_10 = arith.constant 0 : index
    %10 = vector.load %arg4[%c0_9, %c0_10] : memref<1x72xf32, #tpu.memory_space<vmem>>, vector<1x72xf32>
    %11 = vector.broadcast %10 : vector<1x72xf32> to vector<2x72xf32>
    %12 = arith.addf %9, %11 : vector<2x72xf32>
    %cst_11 = arith.constant 0.000000e+00 : f32
    %13 = vector.broadcast %cst_11 : f32 to vector<2x72xf32>
    %14 = arith.maximumf %12, %13 : vector<2x72xf32>
    %c0_12 = arith.constant 0 : index
    %c0_13 = arith.constant 0 : index
    %15 = vector.load %arg6[%c0_12, %c0_13] : memref<72x8xf32, #tpu.memory_space<vmem>>, vector<72x8xf32>
    %c0_14 = arith.constant 0 : index
    %c0_15 = arith.constant 0 : index
    %16 = vector.load %arg7[%c0_14, %c0_15] : memref<8x72xf32, #tpu.memory_space<vmem>>, vector<8x72xf32>
    %cst_16 = arith.constant dense<0.000000e+00> : vector<2x8xf32>
    %17 = tpu.matmul %14, %15, %cst_16 {dimension_numbers = #tpu.dot_dimension_numbers<[1], [0], [0], [1], [0, 0, 1, 1], [], []>} : vector<2x72xf32>, vector<72x8xf32>, vector<2x8xf32> -> vector<2x8xf32>
    %cst_17 = arith.constant dense<0.000000e+00> : vector<8xf32>
    %18 = vector.multi_reduction <add>, %17, %cst_17 [0] : vector<2x8xf32> to vector<8xf32>
    %19 = vector.shape_cast %18 : vector<8xf32> to vector<1x8xf32>
    %cst_18 = arith.constant 0.055555556 : f32
    %20 = vector.broadcast %cst_18 : f32 to vector<1x8xf32>
    %21 = arith.mulf %19, %20 : vector<1x8xf32>
    %cst_19 = arith.constant dense<0.000000e+00> : vector<1x72xf32>
    %22 = tpu.matmul %21, %16, %cst_19 {dimension_numbers = #tpu.dot_dimension_numbers<[1], [0], [0], [1], [0, 0, 1, 1], [], []>} : vector<1x8xf32>, vector<8x72xf32>, vector<1x72xf32> -> vector<1x72xf32>
    %23 = vector.broadcast %22 : vector<1x72xf32> to vector<2x72xf32>
    %24 = arith.subf %14, %23 : vector<2x72xf32>
    %25 = arith.mulf %24, %24 : vector<2x72xf32>
    %cst_20 = arith.constant dense<0.000000e+00> : vector<2x8xf32>
    %26 = tpu.matmul %25, %15, %cst_20 {dimension_numbers = #tpu.dot_dimension_numbers<[1], [0], [0], [1], [0, 0, 1, 1], [], []>} : vector<2x72xf32>, vector<72x8xf32>, vector<2x8xf32> -> vector<2x8xf32>
    %cst_21 = arith.constant dense<0.000000e+00> : vector<8xf32>
    %27 = vector.multi_reduction <add>, %26, %cst_21 [0] : vector<2x8xf32> to vector<8xf32>
    %28 = vector.shape_cast %27 : vector<8xf32> to vector<1x8xf32>
    %cst_22 = arith.constant 0.055555556 : f32
    %29 = vector.broadcast %cst_22 : f32 to vector<1x8xf32>
    %30 = arith.mulf %28, %29 : vector<1x8xf32>
    %c0_23 = arith.constant 0 : index
    %c0_24 = arith.constant 0 : index
    %31 = vector.load %arg5[%c0_23, %c0_24] : memref<1x8xf32, #tpu.memory_space<vmem>>, vector<1x8xf32>
    %cst_25 = arith.constant 9.99999974E-6 : f32
    %32 = vector.broadcast %cst_25 : f32 to vector<1x8xf32>
    %33 = arith.addf %30, %32 : vector<1x8xf32>
    %34 = math.rsqrt %33 : vector<1x8xf32>
    %35 = arith.mulf %31, %34 : vector<1x8xf32>
    %cst_26 = arith.constant dense<0.000000e+00> : vector<1x72xf32>
    %36 = tpu.matmul %35, %16, %cst_26 {dimension_numbers = #tpu.dot_dimension_numbers<[1], [0], [0], [1], [0, 0, 1, 1], [], []>} : vector<1x8xf32>, vector<8x72xf32>, vector<1x72xf32> -> vector<1x72xf32>
    %37 = vector.broadcast %36 : vector<1x72xf32> to vector<2x72xf32>
    %38 = arith.mulf %24, %37 : vector<2x72xf32>
    %c0_27 = arith.constant 0 : index
    %c0_28 = arith.constant 0 : index
    %39 = vector.load %arg8[%c0_27, %c0_28] : memref<72x392xf32, #tpu.memory_space<vmem>>, vector<72x392xf32>
    %cst_29 = arith.constant dense<0.000000e+00> : vector<2x392xf32>
    %40 = tpu.matmul %38, %39, %cst_29 {dimension_numbers = #tpu.dot_dimension_numbers<[1], [0], [0], [1], [0, 0, 1, 1], [], []>} : vector<2x72xf32>, vector<72x392xf32>, vector<2x392xf32> -> vector<2x392xf32>
    %c0_30 = arith.constant 0 : index
    %c0_31 = arith.constant 0 : index
    %41 = vector.load %arg9[%c0_30, %c0_31] : memref<1x392xf32, #tpu.memory_space<vmem>>, vector<1x392xf32>
    %42 = vector.broadcast %41 : vector<1x392xf32> to vector<2x392xf32>
    %43 = arith.addf %40, %42 : vector<2x392xf32>
    %cst_32 = arith.constant 0.000000e+00 : f32
    %44 = vector.broadcast %cst_32 : f32 to vector<2x392xf32>
    %45 = arith.maximumf %43, %44 : vector<2x392xf32>
    %c0_33 = arith.constant 0 : index
    %c0_34 = arith.constant 0 : index
    %46 = vector.load %arg11[%c0_33, %c0_34] : memref<392x8xf32, #tpu.memory_space<vmem>>, vector<392x8xf32>
    %c0_35 = arith.constant 0 : index
    %c0_36 = arith.constant 0 : index
    %47 = vector.load %arg12[%c0_35, %c0_36] : memref<8x392xf32, #tpu.memory_space<vmem>>, vector<8x392xf32>
    %cst_37 = arith.constant dense<0.000000e+00> : vector<2x8xf32>
    %48 = tpu.matmul %45, %46, %cst_37 {dimension_numbers = #tpu.dot_dimension_numbers<[1], [0], [0], [1], [0, 0, 1, 1], [], []>} : vector<2x392xf32>, vector<392x8xf32>, vector<2x8xf32> -> vector<2x8xf32>
    %cst_38 = arith.constant dense<0.000000e+00> : vector<8xf32>
    %49 = vector.multi_reduction <add>, %48, %cst_38 [0] : vector<2x8xf32> to vector<8xf32>
    %50 = vector.shape_cast %49 : vector<8xf32> to vector<1x8xf32>
    %cst_39 = arith.constant 0.0102040814 : f32
    %51 = vector.broadcast %cst_39 : f32 to vector<1x8xf32>
    %52 = arith.mulf %50, %51 : vector<1x8xf32>
    %cst_40 = arith.constant dense<0.000000e+00> : vector<1x392xf32>
    %53 = tpu.matmul %52, %47, %cst_40 {dimension_numbers = #tpu.dot_dimension_numbers<[1], [0], [0], [1], [0, 0, 1, 1], [], []>} : vector<1x8xf32>, vector<8x392xf32>, vector<1x392xf32> -> vector<1x392xf32>
    %54 = vector.broadcast %53 : vector<1x392xf32> to vector<2x392xf32>
    %55 = arith.subf %45, %54 : vector<2x392xf32>
    %56 = arith.mulf %55, %55 : vector<2x392xf32>
    %cst_41 = arith.constant dense<0.000000e+00> : vector<2x8xf32>
    %57 = tpu.matmul %56, %46, %cst_41 {dimension_numbers = #tpu.dot_dimension_numbers<[1], [0], [0], [1], [0, 0, 1, 1], [], []>} : vector<2x392xf32>, vector<392x8xf32>, vector<2x8xf32> -> vector<2x8xf32>
    %cst_42 = arith.constant dense<0.000000e+00> : vector<8xf32>
    %58 = vector.multi_reduction <add>, %57, %cst_42 [0] : vector<2x8xf32> to vector<8xf32>
    %59 = vector.shape_cast %58 : vector<8xf32> to vector<1x8xf32>
    %cst_43 = arith.constant 0.0102040814 : f32
    %60 = vector.broadcast %cst_43 : f32 to vector<1x8xf32>
    %61 = arith.mulf %59, %60 : vector<1x8xf32>
    %c0_44 = arith.constant 0 : index
    %c0_45 = arith.constant 0 : index
    %62 = vector.load %arg10[%c0_44, %c0_45] : memref<1x8xf32, #tpu.memory_space<vmem>>, vector<1x8xf32>
    %cst_46 = arith.constant 9.99999974E-6 : f32
    %63 = vector.broadcast %cst_46 : f32 to vector<1x8xf32>
    %64 = arith.addf %61, %63 : vector<1x8xf32>
    %65 = math.rsqrt %64 : vector<1x8xf32>
    %66 = arith.mulf %62, %65 : vector<1x8xf32>
    %cst_47 = arith.constant dense<0.000000e+00> : vector<1x392xf32>
    %67 = tpu.matmul %66, %47, %cst_47 {dimension_numbers = #tpu.dot_dimension_numbers<[1], [0], [0], [1], [0, 0, 1, 1], [], []>} : vector<1x8xf32>, vector<8x392xf32>, vector<1x392xf32> -> vector<1x392xf32>
    %68 = vector.broadcast %67 : vector<1x392xf32> to vector<2x392xf32>
    %69 = arith.mulf %55, %68 : vector<2x392xf32>
    %c0_48 = arith.constant 0 : index
    %c0_49 = arith.constant 0 : index
    %70 = vector.load %arg13[%c0_48, %c0_49] : memref<392x1568xf32, #tpu.memory_space<vmem>>, vector<392x1568xf32>
    %cst_50 = arith.constant dense<0.000000e+00> : vector<2x1568xf32>
    %71 = tpu.matmul %69, %70, %cst_50 {dimension_numbers = #tpu.dot_dimension_numbers<[1], [0], [0], [1], [0, 0, 1, 1], [], []>} : vector<2x392xf32>, vector<392x1568xf32>, vector<2x1568xf32> -> vector<2x1568xf32>
    %c0_51 = arith.constant 0 : index
    %c0_52 = arith.constant 0 : index
    %72 = vector.load %arg14[%c0_51, %c0_52] : memref<1x1568xf32, #tpu.memory_space<vmem>>, vector<1x1568xf32>
    %73 = vector.broadcast %72 : vector<1x1568xf32> to vector<2x1568xf32>
    %74 = arith.addf %71, %73 : vector<2x1568xf32>
    %cst_53 = arith.constant 0.000000e+00 : f32
    %75 = vector.broadcast %cst_53 : f32 to vector<2x1568xf32>
    %76 = arith.maximumf %74, %75 : vector<2x1568xf32>
    %c0_54 = arith.constant 0 : index
    %c0_55 = arith.constant 0 : index
    %77 = vector.load %arg16[%c0_54, %c0_55] : memref<1568x8xf32, #tpu.memory_space<vmem>>, vector<1568x8xf32>
    %c0_56 = arith.constant 0 : index
    %c0_57 = arith.constant 0 : index
    %78 = vector.load %arg17[%c0_56, %c0_57] : memref<8x1568xf32, #tpu.memory_space<vmem>>, vector<8x1568xf32>
    %cst_58 = arith.constant dense<0.000000e+00> : vector<2x8xf32>
    %79 = tpu.matmul %76, %77, %cst_58 {dimension_numbers = #tpu.dot_dimension_numbers<[1], [0], [0], [1], [0, 0, 1, 1], [], []>} : vector<2x1568xf32>, vector<1568x8xf32>, vector<2x8xf32> -> vector<2x8xf32>
    %cst_59 = arith.constant dense<0.000000e+00> : vector<8xf32>
    %80 = vector.multi_reduction <add>, %79, %cst_59 [0] : vector<2x8xf32> to vector<8xf32>
    %81 = vector.shape_cast %80 : vector<8xf32> to vector<1x8xf32>
    %cst_60 = arith.constant 0.00255102036 : f32
    %82 = vector.broadcast %cst_60 : f32 to vector<1x8xf32>
    %83 = arith.mulf %81, %82 : vector<1x8xf32>
    %cst_61 = arith.constant dense<0.000000e+00> : vector<1x1568xf32>
    %84 = tpu.matmul %83, %78, %cst_61 {dimension_numbers = #tpu.dot_dimension_numbers<[1], [0], [0], [1], [0, 0, 1, 1], [], []>} : vector<1x8xf32>, vector<8x1568xf32>, vector<1x1568xf32> -> vector<1x1568xf32>
    %85 = vector.broadcast %84 : vector<1x1568xf32> to vector<2x1568xf32>
    %86 = arith.subf %76, %85 : vector<2x1568xf32>
    %87 = arith.mulf %86, %86 : vector<2x1568xf32>
    %cst_62 = arith.constant dense<0.000000e+00> : vector<2x8xf32>
    %88 = tpu.matmul %87, %77, %cst_62 {dimension_numbers = #tpu.dot_dimension_numbers<[1], [0], [0], [1], [0, 0, 1, 1], [], []>} : vector<2x1568xf32>, vector<1568x8xf32>, vector<2x8xf32> -> vector<2x8xf32>
    %cst_63 = arith.constant dense<0.000000e+00> : vector<8xf32>
    %89 = vector.multi_reduction <add>, %88, %cst_63 [0] : vector<2x8xf32> to vector<8xf32>
    %90 = vector.shape_cast %89 : vector<8xf32> to vector<1x8xf32>
    %cst_64 = arith.constant 0.00255102036 : f32
    %91 = vector.broadcast %cst_64 : f32 to vector<1x8xf32>
    %92 = arith.mulf %90, %91 : vector<1x8xf32>
    %c0_65 = arith.constant 0 : index
    %c0_66 = arith.constant 0 : index
    %93 = vector.load %arg15[%c0_65, %c0_66] : memref<1x8xf32, #tpu.memory_space<vmem>>, vector<1x8xf32>
    %cst_67 = arith.constant 9.99999974E-6 : f32
    %94 = vector.broadcast %cst_67 : f32 to vector<1x8xf32>
    %95 = arith.addf %92, %94 : vector<1x8xf32>
    %96 = math.rsqrt %95 : vector<1x8xf32>
    %97 = arith.mulf %93, %96 : vector<1x8xf32>
    %cst_68 = arith.constant dense<0.000000e+00> : vector<1x1568xf32>
    %98 = tpu.matmul %97, %78, %cst_68 {dimension_numbers = #tpu.dot_dimension_numbers<[1], [0], [0], [1], [0, 0, 1, 1], [], []>} : vector<1x8xf32>, vector<8x1568xf32>, vector<1x1568xf32> -> vector<1x1568xf32>
    %99 = vector.broadcast %98 : vector<1x1568xf32> to vector<2x1568xf32>
    %100 = arith.mulf %86, %99 : vector<2x1568xf32>
    %c0_69 = arith.constant 0 : index
    %c0_70 = arith.constant 0 : index
    %101 = vector.load %arg18[%c0_69, %c0_70] : memref<1568x784xf32, #tpu.memory_space<vmem>>, vector<1568x784xf32>
    %cst_71 = arith.constant dense<0.000000e+00> : vector<2x784xf32>
    %102 = tpu.matmul %100, %101, %cst_71 {dimension_numbers = #tpu.dot_dimension_numbers<[1], [0], [0], [1], [0, 0, 1, 1], [], []>} : vector<2x1568xf32>, vector<1568x784xf32>, vector<2x784xf32> -> vector<2x784xf32>
    %c0_72 = arith.constant 0 : index
    %c0_73 = arith.constant 0 : index
    %103 = vector.load %arg19[%c0_72, %c0_73] : memref<1x784xf32, #tpu.memory_space<vmem>>, vector<1x784xf32>
    %104 = vector.broadcast %103 : vector<1x784xf32> to vector<2x784xf32>
    %105 = arith.addf %102, %104 : vector<2x784xf32>
    %106 = arith.negf %105 : vector<2x784xf32>
    %107 = math.exp %106 : vector<2x784xf32>
    %cst_74 = arith.constant 1.000000e+00 : f32
    %108 = vector.broadcast %cst_74 : f32 to vector<2x784xf32>
    %109 = arith.addf %108, %107 : vector<2x784xf32>
    %110 = arith.divf %108, %109 : vector<2x784xf32>
    %c0_75 = arith.constant 0 : index
    %c0_76 = arith.constant 0 : index
    %111 = vector.load %arg20[%c0_75, %c0_76] : memref<2x784xf32, #tpu.memory_space<vmem>>, vector<2x784xf32>
    tpu.vector_store %arg20[%c0_75, %c0_76], %110 {strides = array<i32>} : memref<2x784xf32, #tpu.memory_space<vmem>>, vector<2x784xf32>,
    return
  }
}

</mosaic_0001>

<bundles_post_ra>
// kernel: tpu_custom_call.1
= control target key start
LH: loop header
LB: loop body
LE: loop exit
PB: predicated region body
PF: predicated region fallthrough
CT: control target
= control target key end

     0   :  { %s16261_s0 = inlined_call_operand.vmem [shape: f32[2,8], index: 0, kind: input, shape index: {}]   ;;  %s16262_s1 = inlined_call_operand.vmem [shape: f32[8,32], index: 1, kind: input, shape index: {}]   ;;  %s16263_s2 = inlined_call_operand.vmem [shape: f32[1,32], index: 2, kind: input, shape index: {}]   ;;  %s16264_s3 = inlined_call_operand.vmem [shape: f32[32,72], index: 3, kind: input, shape index: {}]   ;;  %s16265_s4 = inlined_call_operand.vmem [shape: f32[1,72], index: 4, kind: input, shape index: {}]   ;;  %s16266_s5 = inlined_call_operand.vmem [shape: f32[1,8], index: 5, kind: input, shape index: {}]   ;;  %s16267_s6 = inlined_call_operand.vmem [shape: f32[72,8], index: 6, kind: input, shape index: {}]   ;;  %s16268_s7 = inlined_call_operand.vmem [shape: f32[8,72], index: 7, kind: input, shape index: {}]   ;;  %s16269_s8 = inlined_call_operand.vmem [shape: f32[72,392], index: 8, kind: input, shape index: {}]   ;;  %s16270_s9 = inlined_call_operand.vmem [shape: f32[1,392], index: 9, kind: input, shape index: {}]   ;;  %s16271_s10 = inlined_call_operand.vmem [shape: f32[1,8], index: 10, kind: input, shape index: {}]   ;;  %s16272_s11 = inlined_call_operand.vmem [shape: f32[392,8], index: 11, kind: input, shape index: {}]   ;;  %s16273_s12 = inlined_call_operand.vmem [shape: f32[8,392], index: 12, kind: input, shape index: {}]   ;;  %s16274_s13 = inlined_call_operand.vmem [shape: f32[392,1568], index: 13, kind: input, shape index: {}]   ;;  %s16275_s14 = inlined_call_operand.vmem [shape: f32[1,1568], index: 14, kind: input, shape index: {}]   ;;  %s16276_s15 = inlined_call_operand.vmem [shape: f32[1,8], index: 15, kind: input, shape index: {}]   ;;  %s16277_s16 = inlined_call_operand.vmem [shape: f32[1568,8], index: 16, kind: input, shape index: {}]   ;;  %s16278_s17 = inlined_call_operand.vmem [shape: f32[8,1568], index: 17, kind: input, shape index: {}]   ;;  %s16279_s18 = inlined_call_operand.vmem [shape: f32[1568,784], index: 18, kind: input, shape index: {}]   ;;  %s16280_s19 = inlined_call_operand.vmem [shape: f32[1,784], index: 19, kind: input, shape index: {}]   ;;  %s16281_s20 = inlined_call_operand.hbm [shape: f32[2,784], index: 20, kind: output, shape index: {}]  }
   0x1   :  { %16389 = sst [smem:[#allocation102_spill]] %s16261_s0 }
   0x2   :  { %16390 = sst [smem:[#allocation103_spill]] %s16262_s1 }
   0x3   :  { %16391 = sst [smem:[#allocation104_spill]] %s16263_s2 }
   0x4   :  { %16392 = sst [smem:[#allocation105_spill]] %s16264_s3 }
   0x5   :  { %16393 = sst [smem:[#allocation106_spill]] %s16265_s4 }
   0x6   :  { %16394 = sst [smem:[#allocation107_spill]] %s16276_s15 }
   0x7   :  { %s16395_s23 = sld [smem:[#allocation103_spill]]  ;;  %vm72_vm0 = vcmask 64512  }
   0x8   :  { %s16396_s15 = sld [smem:[#allocation102_spill]] }
   0x9   :  { %s16397_s26 = sld [smem:[#allocation105_spill]] }
   0xd   :  { %v67_v0 = vld [vmem:[%s16395_s23] sm:$0xff] }
   0xe   :  { %v66_v1 = vld [vmem:[%s16396_s15] sm:$0x3]  ;;  %91 = vmatpush.msra.mxu1 %v67_v0 }
   0xf   :  { %v100_v2 = vld [vmem:[%s16397_s26 + $0x18] sm:$0xff]  ;;  %7301 = vmatmul.msk.f32.vlgmr.msra.gmra.mxu1 %vm72_vm0, %v66_v1 }
  0x10   :  { %25 = vsyncpa [#allocation3], 0  ;;  %121 = vmatpush.msrb.mxu1 %v100_v2  ;;  %v99_v3 = vld [vmem:[%s16397_s26 + $0x10] sm:$0xff]  ;;  %v98_v4 = vld [vmem:[%s16397_s26 + $0x8] sm:$0xff]  ;;  %s16398_s15 = sld [smem:[#allocation104_spill]]  ;;  %vm105_vm1 = vcmask 261120  }
  0x11   :  { %v97_v5 = vld [vmem:[%s16397_s26] sm:$0xff]  ;;  %v137_v7 = vld [vmem:[%s16267_s6 + $0x38] sm:$0xff]  ;;  %v136_v8 = vld [vmem:[%s16267_s6 + $0x30] sm:$0xff]  ;;  %s16399_s25 = sld [smem:[#allocation106_spill]]  ;;  %vm140_vm2 = vcmask 588800   ;;  %vm164_vm3 = vcmask 58368  }
  0x12   :  { %122 = vmatpush.msrb.mxu1 %v99_v3  ;;  %v138_v6 = vld [vmem:[%s16267_s6 + $0x40] sm:$0xff]  ;;  %v135_v9 = vld [vmem:[%s16267_s6 + $0x28] sm:$0xff]  ;;  %v133_v11 = vld [vmem:[%s16267_s6 + $0x18] sm:$0xff]  ;;  %s16611_s26 = sld [smem:[#allocation107_spill]]  ;;  %s7292_s4 = sshll.u32 %s16281_s20, 4  ;;  %s7293_s4 = int_to_ptr.hbm [resolvable:$true] %s7292_s4 }
  0x13   :  { %151 = vmatpush.msra.mxu2 %v138_v6  ;;  %209 = vmatpush.msra.mxu0 %v138_v6  ;;  %v134_v10 = vld [vmem:[%s16267_s6 + $0x20] sm:$0xff]  ;;  %v132_v16 = vld [vmem:[%s16267_s6 + $0x10] sm:$0xff]  ;;  %v131_v17 = vld [vmem:[%s16267_s6 + $0x8] sm:$0xff] }
  0x14   :  { %123 = vmatpush.msrb.mxu1 %v98_v4  ;;  %v130_v18 = vld [vmem:[%s16267_s6] sm:$0xff]  ;;  %v301_v43 = vld [vmem:[%s16269_s8 + $0x108] sm:$0xff]  ;;  %v302_v44 = vld [vmem:[%s16269_s8 + $0x110] sm:$0xff] }
  0x15   :  { %152 = vmatpush.msra.mxu2 %v137_v7  ;;  %210 = vmatpush.msra.mxu0 %v137_v7  ;;  %v139_v23 = vld [vmem:[%s16268_s7] sm:$0xff]  ;;  %v303_v45 = vld [vmem:[%s16269_s8 + $0x118] sm:$0xff]  ;;  %v297_v47 = vld [vmem:[%s16269_s8 + $0xe8] sm:$0xff] }
  0x16   :  { %124 = vmatpush.msrb.mxu1 %v97_v5  ;;  %v7377_v12 = vld [vmem:[%s16398_s15] ss:$0 sm:$0xff]  ;;  %191 = vmatpush.msra.mxu3 %v139_v23  ;;  %v298_v49 = vld [vmem:[%s16269_s8 + $0xf0] sm:$0xff]  ;;  %v299_v50 = vld [vmem:[%s16269_s8 + $0xf8] sm:$0xff] }
  0x17   :  { %153 = vmatpush.msra.mxu2 %v136_v8  ;;  %211 = vmatpush.msra.mxu0 %v136_v8  ;;  %v7378_v19 = vld [vmem:[%s16399_s25] ss:$0 sm:$0xff]  ;;  %v293_v52 = vld [vmem:[%s16269_s8 + $0xc8] sm:$0xff]  ;;  %v294_v53 = vld [vmem:[%s16269_s8 + $0xd0] sm:$0xff] }
  0x18   :  { %261 = vmatpush.msrb.mxu3 %v139_v23  ;;  %v300_v42 = vld [vmem:[%s16269_s8 + $0x100] sm:$0xff]  ;;  %v295_v54 = vld [vmem:[%s16269_s8 + $0xd8] sm:$0xff]  ;;  %v289_v57 = vld [vmem:[%s16269_s8 + $0xa8] sm:$0xff] }
  0x19   :  { %154 = vmatpush.msra.mxu2 %v135_v9  ;;  %212 = vmatpush.msra.mxu0 %v135_v9  ;;  %v296_v46 = vld [vmem:[%s16269_s8 + $0xe0] sm:$0xff]  ;;  %v290_v58 = vld [vmem:[%s16269_s8 + $0xb0] sm:$0xff]  ;;  %v291_v59 = vld [vmem:[%s16269_s8 + $0xb8] sm:$0xff] }
  0x1a   :  { %324 = vmatpush.msra.mxu1 %v300_v42  ;;  %v292_v51 = vld [vmem:[%s16269_s8 + $0xc0] sm:$0xff]  ;;  %v285_v62 = vld [vmem:[%s16269_s8 + $0x88] sm:$0xff]  ;;  %v286_v63 = vld [vmem:[%s16269_s8 + $0x90] sm:$0xff] }
  0x1b   :  { %155 = vmatpush.msra.mxu2 %v134_v10  ;;  %213 = vmatpush.msra.mxu0 %v134_v10  ;;  %v288_v56 = vld [vmem:[%s16269_s8 + $0xa0] sm:$0xff]  ;;  %v287_v0 = vld [vmem:[%s16269_s8 + $0x98] sm:$0xff]  ;;  %v281_v3 = vld [vmem:[%s16269_s8 + $0x68] sm:$0xff] }
  0x1c   :  { %325 = vmatpush.msra.mxu1 %v296_v46  ;;  %v284_v61 = vld [vmem:[%s16269_s8 + $0x80] sm:$0xff]  ;;  %v282_v4 = vld [vmem:[%s16269_s8 + $0x70] sm:$0xff]  ;;  %v283_v5 = vld [vmem:[%s16269_s8 + $0x78] sm:$0xff] }
  0x1d   :  { %156 = vmatpush.msra.mxu2 %v133_v11  ;;  %214 = vmatpush.msra.mxu0 %v133_v11  ;;  %v280_v2 = vld [vmem:[%s16269_s8 + $0x60] sm:$0xff]  ;;  %v275_v23 = vld [vmem:[%s16269_s8 + $0x38] sm:$0xff]  ;;  %v7900_v46 = vld [vmem:[%s16272_s11 + $0x150] sm:$0xff] }
  0x1e   :  { %326 = vmatpush.msra.mxu1 %v292_v51  ;;  %v7877_v42 = vld [vmem:[%s16272_s11 + $0xd8] sm:$0xff]  ;;  %v7931_v51 = vld [vmem:[%s16272_s11 + $0xc0] sm:$0xff] }
  0x1f   :  { %157 = vmatpush.msra.mxu2 %v132_v16  ;;  %215 = vmatpush.msra.mxu0 %v132_v16  ;;  %v276_v16 = vld [vmem:[%s16269_s8 + $0x40] sm:$0xff] }
  0x20   :  { %327 = vmatpush.msra.mxu1 %v288_v56  ;;  %v7959_v56 = vld [vmem:[%s16272_s11 + $0x30] sm:$0xff] }
  0x21   :  { %158 = vmatpush.msra.mxu2 %v131_v17  ;;  %216 = vmatpush.msra.mxu0 %v131_v17  ;;  %v277_v17 = vld [vmem:[%s16269_s8 + $0x48] sm:$0xff] }
  0x22   :  { %328 = vmatpush.msra.mxu1 %v284_v61  ;;  %v7990_v61 = vld [vmem:[%s16272_s11 + $0x18] sm:$0xff] }
  0x23   :  { %159 = vmatpush.msra.mxu2 %v130_v18  ;;  %217 = vmatpush.msra.mxu0 %v130_v18  ;;  %v278_v18 = vld [vmem:[%s16269_s8 + $0x50] sm:$0xff] }
  0x24   :  { %329 = vmatpush.msra.mxu1 %v280_v2  ;;  %v8007_v2 = vld [vmem:[%s16272_s11 + $0xa8] sm:$0xff] }
  0x25   :  { %364 = vmatpush.msrb.mxu2 %v302_v44  ;;  %384 = vmatpush.msrb.mxu0 %v303_v45  ;;  %v7887_v44 = vld [vmem:[%s16272_s11 + $0x50] sm:$0xff] }
  0x26   :  { %330 = vmatpush.msra.mxu1 %v276_v16  ;;  %v7895_v45 = vld [vmem:[%s16272_s11 + $0xd0] sm:$0xff]  ;;  %v304_v16 = vld [vmem:[%s16270_s9] sm:$0xf] }
  0x27   :  { %365 = vmatpush.msrb.mxu2 %v298_v49  ;;  %385 = vmatpush.msrb.mxu0 %v299_v50  ;;  %v7918_v49 = vld [vmem:[%s16272_s11 + $0x148] sm:$0xff]  ;;  %v7923_v50 = vld [vmem:[%s16272_s11 + $0x40] sm:$0xff] }
  0x29   :  { %366 = vmatpush.msrb.mxu2 %v294_v53  ;;  %386 = vmatpush.msrb.mxu0 %v295_v54  ;;  %v7941_v53 = vld [vmem:[%s16272_s11 + $0x38] sm:$0xff] }
  0x2a   :  { %v7949_v54 = vld [vmem:[%s16272_s11 + $0xb8] sm:$0xff] }
  0x2b   :  { %367 = vmatpush.msrb.mxu2 %v290_v58  ;;  %387 = vmatpush.msrb.mxu0 %v291_v59  ;;  %v439_v58 = vld [vmem:[%s16272_s11 + $0x130] sm:$0xff]  ;;  %v7975_v59 = vld [vmem:[%s16272_s11 + $0x28] sm:$0xff] }
  0x2d   :  { %368 = vmatpush.msrb.mxu2 %v286_v63  ;;  %388 = vmatpush.msrb.mxu0 %v287_v0 }
  0x2f   :  { %369 = vmatpush.msrb.mxu2 %v282_v4  ;;  %389 = vmatpush.msrb.mxu0 %v283_v5  ;;  %v8022_v4 = vld [vmem:[%s16272_s11 + $0xa0] sm:$0xff] }
  0x30   :  { %v437_v5 = vld [vmem:[%s16272_s11 + $0x120] sm:$0xff] }
  0x31   :  { %370 = vmatpush.msrb.mxu2 %v278_v18  ;;  %v309_v18 = vperm.slane %v304_v16, 3 }
  0x8c   :  { %v93_v13 = vpop.f32.mrf.mxu1 }
  0x8d   :  { %v94_v14 = vadd.f32 %v7377_v12, %v93_v13  ;;  %v230_v12 = vld [vmem:[%s16266_s5] sm:$0x1] }
  0x8f   :  { %v96_v15 = vmax.f32 %v94_v14, 0.0 }
  0x91   :  { %7302 = vmatmul.msk.f32.vlgmr.msrb.gmra.mxu1 %vm105_vm1, %v96_v15 }
 0x10e   :  { %v126_v20 = vpop.f32.mrf.mxu1 }
 0x10f   :  { %v127_v21 = vadd.f32 %v7378_v19, %v126_v20  ;;  %v279_v19 = vld [vmem:[%s16269_s8 + $0x58] sm:$0xff]  ;;  %v272_v20 = vld [vmem:[%s16269_s8 + $0x20] sm:$0xff] }
 0x110   :  { %390 = vmatpush.msrb.mxu0 %v279_v19  ;;  %331 = vmatpush.msra.mxu1 %v272_v20 }
 0x111   :  { %v129_v22 = vmax.f32 %v127_v21, 0.0  ;;  %v273_v21 = vld [vmem:[%s16269_s8 + $0x28] sm:$0xff] }
 0x112   :  { %391 = vmatpush.msrb.mxu0 %v275_v23 }
 0x113   :  { %7303 = vmatmul.msk.f32.vlgmr.msra.gmra.mxu2 %vm140_vm2, %v129_v22 }
 0x196   :  { %v161_v24 = vpop.f32.mrf.mxu2 }
 0x197   :  { %v165_v25 = vsel %vm164_vm3, %v161_v24, 0.0  ;;  %v268_v24 = vld [vmem:[%s16269_s8] sm:$0xff] }
 0x198   :  { %v166_v26 = vrot.slane %v165_v25, 4  ;;  %332 = vmatpush.msra.mxu1 %v268_v24  ;;  %v307_v24 = vperm.slane %v304_v16, 1 }
 0x19a   :  { %v167_v27 = vadd.f32 %v166_v26, %v165_v25  ;;  %v269_v25 = vld [vmem:[%s16269_s8 + $0x8] sm:$0xff]  ;;  %v270_v26 = vld [vmem:[%s16269_s8 + $0x10] sm:$0xff] }
 0x19c   :  { %v168_v28 = vrot.slane %v167_v27, 2 }
 0x19e   :  { %v169_v29 = vadd.f32 %v168_v28, %v167_v27  ;;  %v271_v27 = vld [vmem:[%s16269_s8 + $0x18] sm:$0xff] }
 0x19f   :  { %392 = vmatpush.msrb.mxu0 %v271_v27  ;;  %v7802_v28 = vld [vmem:[%s16272_s11 + $0x78] sm:$0xff] }
 0x1a0   :  { %v170_v30 = vrot.slane %v169_v29, 1  ;;  %457 = vmatpush.msrb.mxu1 %v7802_v28 }
 0x1a2   :  { %v171_v31 = vadd.f32 %v170_v30, %v169_v29  ;;  %v7807_v29 = vld [vmem:[%s16272_s11 + $0x70] sm:$0xff]  ;;  %v7813_v30 = vld [vmem:[%s16272_s11 + $0xf8] sm:$0xff] }
 0x1a3   :  { %458 = vmatpush.msrb.mxu1 %v7807_v29 }
 0x1a4   :  { %v172_v32 = vmul.f32 0.055555556, %v171_v31  ;;  %v7818_v31 = vld [vmem:[%s16272_s11 + $0x178] sm:$0xff] }
 0x1a6   :  { %7304 = vmatmul.msk.f32.vlgmr.msra.gmra.mxu3 %vm72_vm0, %v172_v32  ;;  %v7823_v32 = vld [vmem:[%s16272_s11 + $0x68] sm:$0xff] }
 0x1a7   :  { %344 = vmatpush.msra.mxu3 %v301_v43  ;;  %459 = vmatpush.msrb.mxu1 %v7823_v32  ;;  %v7882_v43 = vld [vmem:[%s16272_s11 + $0x158] sm:$0xff] }
 0x1a9   :  { %345 = vmatpush.msra.mxu3 %v297_v47  ;;  %v7905_v47 = vld [vmem:[%s16272_s11 + $0x48] sm:$0xff] }
 0x1ab   :  { %346 = vmatpush.msra.mxu3 %v293_v52  ;;  %v7936_v52 = vld [vmem:[%s16272_s11 + $0x140] sm:$0xff] }
 0x1ad   :  { %347 = vmatpush.msra.mxu3 %v289_v57  ;;  %v7967_v57 = vld [vmem:[%s16272_s11 + $0xb0] sm:$0xff] }
 0x1af   :  { %348 = vmatpush.msra.mxu3 %v285_v62 }
 0x1b1   :  { %349 = vmatpush.msra.mxu3 %v281_v3  ;;  %v8017_v3 = vld [vmem:[%s16272_s11 + $0x8] sm:$0xff] }
 0x1b3   :  { %350 = vmatpush.msra.mxu3 %v277_v17  ;;  %v306_v17 = vperm.slane %v304_v16, 0 }
 0x1b5   :  { %351 = vmatpush.msra.mxu3 %v273_v21 }
 0x1b7   :  { %352 = vmatpush.msra.mxu3 %v269_v25 }
 0x229   :  { %v193_v33 = vpop.f32.mrf.mxu3 }
 0x22a   :  { %v196_v34 = vperm.slane %v193_v33, 0  ;;  %v7830_v33 = vld [vmem:[%s16272_s11 + $0xf0] sm:$0xff] }
 0x22c   :  { %v7681_v35 = vsub.f32 %v129_v22, %v196_v34  ;;  %v274_v22 = vld [vmem:[%s16269_s8 + $0x30] sm:$0xff] }
 0x22d   :  { %371 = vmatpush.msrb.mxu2 %v274_v22  ;;  %v7835_v34 = vld [vmem:[%s16272_s11 + $0x170] sm:$0xff] }
 0x22e   :  { %v198_v36 = vmul.f32 %v7681_v35, %v7681_v35 }
 0x22f   :  { %372 = vmatpush.msrb.mxu2 %v270_v26  ;;  %v308_v26 = vperm.slane %v304_v16, 2 }
 0x230   :  { %7305 = vmatmul.msk.f32.vlgmr.msra.gmra.mxu0 %vm140_vm2, %v198_v36  ;;  %v7841_v36 = vld [vmem:[%s16272_s11 + $0xe8] sm:$0xff] }
 0x231   :  { %497 = vmatpush.msra.mxu2 %v7818_v31 }
 0x233   :  { %498 = vmatpush.msra.mxu2 %v7835_v34 }
 0x2ad   :  { %v219_v37 = vpop.f32.mrf.mxu0 }
 0x2ae   :  { %v222_v38 = vsel %vm164_vm3, %v219_v37, 0.0  ;;  %v7846_v37 = vld [vmem:[%s16272_s11 + $0x168] sm:$0xff] }
 0x2af   :  { %v223_v39 = vrot.slane %v222_v38, 4  ;;  %499 = vmatpush.msra.mxu2 %v7846_v37 }
 0x2b1   :  { %v224_v40 = vadd.f32 %v223_v39, %v222_v38  ;;  %v7851_v38 = vld [vmem:[%s16272_s11 + $0x60] sm:$0xff] }
 0x2b2   :  { %v7859_v39 = vld [vmem:[%s16272_s11 + $0xe0] sm:$0xff]  ;;  %460 = vmatpush.msrb.mxu1 %v7851_v38 }
 0x2b3   :  { %v225_v41 = vrot.slane %v224_v40, 2 }
 0x2b5   :  { %v226_v48 = vadd.f32 %v225_v41, %v224_v40  ;;  %v7864_v40 = vld [vmem:[%s16272_s11 + $0x160] sm:$0xff]  ;;  %v7869_v41 = vld [vmem:[%s16272_s11 + $0x58] sm:$0xff] }
 0x2b6   :  { %500 = vmatpush.msra.mxu2 %v7864_v40  ;;  %461 = vmatpush.msrb.mxu1 %v7869_v41 }
 0x2b7   :  { %v227_v55 = vrot.slane %v226_v48, 1 }
 0x2b8   :  { %501 = vmatpush.msra.mxu2 %v7882_v43  ;;  %462 = vmatpush.msrb.mxu1 %v7887_v44 }
 0x2b9   :  { %v228_v60 = vadd.f32 %v227_v55, %v226_v48  ;;  %v7913_v48 = vld [vmem:[%s16272_s11 + $0xc8] sm:$0xff]  ;;  %v7954_v55 = vld [vmem:[%s16272_s11 + $0x138] sm:$0xff] }
 0x2ba   :  { %502 = vmatpush.msra.mxu2 %v7900_v46  ;;  %463 = vmatpush.msrb.mxu1 %v7905_v47 }
 0x2bb   :  { %v229_v1 = vmul.f32 0.055555556, %v228_v60  ;;  %v7983_v60 = vld [vmem:[%s16272_s11 + $0x20] sm:$0xff] }
 0x2bc   :  { %503 = vmatpush.msra.mxu2 %v7918_v49  ;;  %464 = vmatpush.msrb.mxu1 %v7923_v50 }
 0x2bd   :  { %v231_v6 = vadd.f32 1e-05, %v229_v1  ;;  %v8002_v1 = vld [vmem:[%s16272_s11 + $0x10] sm:$0xff] }
 0x2be   :  { %504 = vmatpush.msra.mxu2 %v7936_v52  ;;  %465 = vmatpush.msrb.mxu1 %v7941_v53 }
 0x2bf   :  { %7379 = vrsqrt.f32 %v231_v6  ;;  %vm238_vm5 = vweird.f32 %v231_v6 }
 0x2c0   :  { %505 = vmatpush.msra.mxu2 %v7954_v55  ;;  %466 = vmatpush.msrb.mxu1 %v7959_v56 }
 0x2c2   :  { %506 = vmatpush.msra.mxu2 %v439_v58  ;;  %467 = vmatpush.msrb.mxu1 %v7975_v59 }
 0x2c4   :  { %468 = vmatpush.msrb.mxu1 %v7983_v60 }
 0x2c5   :  { %v7380_v7 = vpop.eup %7379 }
 0x2c6   :  { %v233_v8 = vmul.f32 %v7380_v7, %v231_v6  ;;  %vm239_vm4 = vweird.f32 %v7380_v7  ;;  %469 = vmatpush.msrb.mxu1 %v7990_v61  ;;  %v8032_v6 = vld [vmem:[%s16272_s11] sm:$0xff] }
 0x2c7   :  { %vm240_vm6 = vmor %vm238_vm5, %vm239_vm4 }
 0x2c8   :  { %v234_v9 = vmul.f32 %v7380_v7, %v233_v8  ;;  %470 = vmatpush.msrb.mxu1 %v8002_v1  ;;  %v436_v8 = vld [vmem:[%s16272_s11 + $0x118] sm:$0xff] }
 0x2ca   :  { %v235_v10 = vmul.f32 0.5, %v234_v9  ;;  %471 = vmatpush.msrb.mxu1 %v8017_v3  ;;  %v449_v9 = vld [vmem:[%s16272_s11 + $0x180] sm:$0xff] }
 0x2cb   :  { %532 = vmatpush.msra.mxu0 %v449_v9 }
 0x2cc   :  { %v236_v11 = vsub.f32 1.5, %v235_v10  ;;  %472 = vmatpush.msrb.mxu1 %v8032_v6  ;;  %v8050_v10 = vld [vmem:[%s16272_s11 + $0x90] sm:$0xff] }
 0x2ce   :  { %v237_v13 = vmul.f32 %v7380_v7, %v236_v11  ;;  %v435_v11 = vld [vmem:[%s16272_s11 + $0x110] sm:$0xff] }
 0x2d0   :  { %v241_v14 = vsel %vm240_vm6, %v7380_v7, %v237_v13  ;;  %v8037_v7 = vld [vmem:[%s16272_s11 + $0x98] sm:$0xff]  ;;  %v434_v13 = vld [vmem:[%s16272_s11 + $0x108] sm:$0xff] }
 0x2d1   :  { %v242_v15 = vmul.f32 %v241_v14, %v230_v12  ;;  %v8059_v12 = vld [vmem:[%s16272_s11 + $0x88] sm:$0xff]  ;;  %v8068_v14 = vld [vmem:[%s16272_s11 + $0x80] sm:$0xff] }
 0x2d3   :  { %7306 = vmatmul.msk.f32.vlgmr.msrb.gmra.mxu3 %vm72_vm0, %v242_v15  ;;  %v433_v15 = vld [vmem:[%s16272_s11 + $0x100] sm:$0xff] }
 0x2d4   :  { %477 = vmatpush.msrb.mxu3 %v7813_v30 }
 0x2d6   :  { %478 = vmatpush.msrb.mxu3 %v7830_v33 }
 0x2d8   :  { %479 = vmatpush.msrb.mxu3 %v7841_v36 }
 0x2da   :  { %480 = vmatpush.msrb.mxu3 %v7859_v39 }
 0x2dc   :  { %481 = vmatpush.msrb.mxu3 %v7877_v42 }
 0x2de   :  { %482 = vmatpush.msrb.mxu3 %v7895_v45 }
 0x2e0   :  { %483 = vmatpush.msrb.mxu3 %v7913_v48 }
 0x2e2   :  { %484 = vmatpush.msrb.mxu3 %v7931_v51 }
 0x2e4   :  { %485 = vmatpush.msrb.mxu3 %v7949_v54 }
 0x2e6   :  { %486 = vmatpush.msrb.mxu3 %v7967_v57 }
 0x2e8   :  { %487 = vmatpush.msrb.mxu3 %v8007_v2 }
 0x2ea   :  { %488 = vmatpush.msrb.mxu3 %v8022_v4 }
 0x2ec   :  { %489 = vmatpush.msrb.mxu3 %v8037_v7 }
 0x2ee   :  { %490 = vmatpush.msrb.mxu3 %v8050_v10 }
 0x2f0   :  { %491 = vmatpush.msrb.mxu3 %v8059_v12 }
 0x2f2   :  { %492 = vmatpush.msrb.mxu3 %v8068_v14 }
 0x356   :  { %v263_v62 = vpop.f32.mrf.mxu3 }
 0x357   :  { %v266_v63 = vperm.slane %v263_v62, 0 }
 0x359   :  { %v267_v0 = vmul.f32 %v266_v63, %v7681_v35  ;;  %v438_v35 = vld [vmem:[%s16272_s11 + $0x128] sm:$0xff] }
 0x35a   :  { %507 = vmatpush.msra.mxu2 %v438_v35 }
 0x35b   :  { %7307 = vmatmul.msk.f32.vlgmr.msra.gmra.mxu1 %vm140_vm2, %v267_v0  ;;  %7308 = vmatmul.msk.f32.vlgmr.msra.gmra.mxu3 %vm140_vm2, %v267_v0 }
 0x35c   :  { %7309 = vmatmul.msk.f32.vlgmr.msrb.gmra.mxu2 %vm140_vm2, %v267_v0  ;;  %7310 = vmatmul.msk.f32.vlgmr.msrb.gmra.mxu0 %vm140_vm2, %v267_v0 }
 0x35d   :  { %508 = vmatpush.msra.mxu2 %v437_v5 }
 0x35f   :  { %509 = vmatpush.msra.mxu2 %v436_v8 }
 0x361   :  { %510 = vmatpush.msra.mxu2 %v435_v11 }
 0x363   :  { %511 = vmatpush.msra.mxu2 %v434_v13 }
 0x365   :  { %512 = vmatpush.msra.mxu2 %v433_v15 }
 0x367   :  { %683 = vmatpush.msrb.mxu2 %v7818_v31 }
 0x369   :  { %684 = vmatpush.msrb.mxu2 %v7835_v34 }
 0x36b   :  { %685 = vmatpush.msrb.mxu2 %v7846_v37 }
 0x36d   :  { %686 = vmatpush.msrb.mxu2 %v7864_v40 }
 0x36f   :  { %687 = vmatpush.msrb.mxu2 %v7882_v43 }
 0x371   :  { %688 = vmatpush.msrb.mxu2 %v7900_v46  ;;  %v450_v46 = vld [vmem:[%s16273_s12] sm:$0xff] }
 0x372   :  { %563 = vmatpush.msrb.mxu0 %v450_v46 }
 0x373   :  { %689 = vmatpush.msrb.mxu2 %v7918_v49  ;;  %v8113_v49 = vld [vmem:[%s16273_s12 + $0x10] sm:$0xff] }
 0x374   :  { %603 = vmatpush.msra.mxu1 %v8113_v49 }
 0x375   :  { %690 = vmatpush.msrb.mxu2 %v7936_v52  ;;  %v453_v52 = vld [vmem:[%s16273_s12 + $0x18] sm:$0xff] }
 0x376   :  { %623 = vmatpush.msra.mxu3 %v453_v52 }
 0x377   :  { %691 = vmatpush.msrb.mxu2 %v7954_v55  ;;  %v8123_v55 = vld [vmem:[%s16273_s12 + $0x8] sm:$0xff] }
 0x379   :  { %692 = vmatpush.msrb.mxu2 %v439_v58 }
 0x37b   :  { %693 = vmatpush.msrb.mxu2 %v438_v35 }
 0x37d   :  { %694 = vmatpush.msrb.mxu2 %v437_v5 }
 0x37f   :  { %695 = vmatpush.msrb.mxu2 %v436_v8 }
 0x381   :  { %696 = vmatpush.msrb.mxu2 %v435_v11 }
 0x383   :  { %697 = vmatpush.msrb.mxu2 %v434_v13 }
 0x385   :  { %698 = vmatpush.msrb.mxu2 %v433_v15 }
 0x3d8   :  { %v334_v19 = vpop.f32.mrf.mxu1 }
 0x3d9   :  { %v8086_v20 = vadd.f32 %v334_v19, %v306_v17  ;;  %v394_v21 = vpop.f32.mrf.mxu0 }
 0x3da   :  { %v8088_v22 = vadd.f32 %v394_v21, %v309_v18  ;;  %v1017_v21 = vld [vmem:[%s16274_s13 + $0x5b0] sm:$0xff] }
 0x3db   :  { %v397_v23 = vmax.f32 %v8086_v20, 0.0  ;;  %v1030_v20 = vld [vmem:[%s16274_s13 + $0x618] sm:$0xff] }
 0x3dc   :  { %v400_v25 = vmax.f32 %v8088_v22, 0.0 }
 0x3dd   :  { %473 = vmatmul.f32.vlgmr.msrb.gmra.mxu1 %v397_v23 }
 0x3de   :  { %7311 = vmatmul.msk.f32.vlgmr.msra.gmra.mxu0 %vm72_vm0, %v400_v25  ;;  %v354_v27 = vpop.f32.mrf.mxu3  ;;  %663 = vmatpush.msrb.mxu1 %v7813_v30 }
 0x3df   :  { %v8097_v31 = vadd.f32 %v354_v27, %v307_v24  ;;  %v374_v34 = vpop.f32.mrf.mxu2  ;;  %583 = vmatpush.msra.mxu0 %v8123_v55  ;;  %v1238_v24 = vld [vmem:[%s16274_s13 + $0xc98] sm:$0xff]  ;;  %v991_v27 = vld [vmem:[%s16274_s13 + $0x4e0] sm:$0xff] }
 0x3e0   :  { %v8099_v37 = vadd.f32 %v374_v34, %v308_v26  ;;  %664 = vmatpush.msrb.mxu1 %v7830_v33  ;;  %v1225_v26 = vld [vmem:[%s16274_s13 + $0xc30] sm:$0xff] }
 0x3e1   :  { %v398_v40 = vmax.f32 %v8097_v31, 0.0  ;;  %v1212_v31 = vld [vmem:[%s16274_s13 + $0xbc8] sm:$0xff] }
 0x3e2   :  { %v399_v43 = vmax.f32 %v8099_v37, 0.0  ;;  %665 = vmatpush.msrb.mxu1 %v7841_v36  ;;  %v978_v37 = vld [vmem:[%s16274_s13 + $0x478] sm:$0xff] }
 0x3e3   :  { %493 = vmatmul.f32.vlgmr.msrb.gmra.mxu3 %v398_v40 }
 0x3e4   :  { %513 = vmatmul.f32.vlgmr.msra.gmra.mxu2 %v399_v43  ;;  %718 = vmatpush.msrb.mxu3 %v449_v9 }
 0x3e5   :  { %666 = vmatpush.msrb.mxu1 %v7859_v39  ;;  %1525 = vmatpush.msra.mxu2 %v1238_v24  ;;  %v888_v24 = vld [vmem:[%s16274_s13 + $0x1a8] sm:$0xff] }
 0x3e7   :  { %667 = vmatpush.msrb.mxu1 %v7877_v42  ;;  %1526 = vmatpush.msra.mxu2 %v1225_v26  ;;  %v875_v26 = vld [vmem:[%s16274_s13 + $0x140] sm:$0xff] }
 0x3e9   :  { %668 = vmatpush.msrb.mxu1 %v7895_v45  ;;  %1527 = vmatpush.msra.mxu2 %v1212_v31  ;;  %v1148_v31 = vld [vmem:[%s16274_s13 + $0x9c8] sm:$0xff] }
 0x3eb   :  { %669 = vmatpush.msrb.mxu1 %v7913_v48 }
 0x3ed   :  { %670 = vmatpush.msrb.mxu1 %v7931_v51 }
 0x3ef   :  { %671 = vmatpush.msrb.mxu1 %v7949_v54 }
 0x3f1   :  { %672 = vmatpush.msrb.mxu1 %v7967_v57 }
 0x3f3   :  { %673 = vmatpush.msrb.mxu1 %v8007_v2 }
 0x3f5   :  { %674 = vmatpush.msrb.mxu1 %v8022_v4 }
 0x3f7   :  { %675 = vmatpush.msrb.mxu1 %v8037_v7 }
 0x3f9   :  { %676 = vmatpush.msrb.mxu1 %v8050_v10 }
 0x3fb   :  { %677 = vmatpush.msrb.mxu1 %v8059_v12 }
 0x3fd   :  { %678 = vmatpush.msrb.mxu1 %v8068_v14 }
 0x45a   :  { %v474_v58 = vpop.f32.mrf.mxu1 }
 0x45b   :  { %v534_v35 = vpop.f32.mrf.mxu0 }
 0x466   :  { %v494_v62 = vpop.f32.mrf.mxu3 }
 0x467   :  { %v495_v30 = vadd.f32 %v494_v62, %v474_v58  ;;  %v514_v63 = vpop.f32.mrf.mxu2  ;;  %v952_v62 = vld [vmem:[%s16274_s13 + $0x3a8] sm:$0xff] }
 0x469   :  { %v515_v0 = vadd.f32 %v514_v63, %v495_v30  ;;  %v1173_v30 = vld [vmem:[%s16274_s13 + $0xa90] sm:$0xff]  ;;  %v731_v63 = vld [vmem:[%s16271_s10] sm:$0x1] }
 0x46b   :  { %v535_v5 = vadd.f32 %v534_v35, %v515_v0  ;;  %v939_v35 = vld [vmem:[%s16274_s13 + $0x340] sm:$0xff] }
 0x46d   :  { %v537_v33 = vsel %vm164_vm3, %v535_v5, 0.0  ;;  %v1160_v5 = vld [vmem:[%s16274_s13 + $0xa28] sm:$0xff] }
 0x46e   :  { %v538_v36 = vrot.slane %v537_v33, 4 }
 0x470   :  { %v539_v39 = vadd.f32 %v538_v36, %v537_v33 }
 0x472   :  { %v540_v42 = vrot.slane %v539_v39, 2 }
 0x474   :  { %v541_v45 = vadd.f32 %v540_v42, %v539_v39  ;;  %v926_v39 = vld [vmem:[%s16274_s13 + $0x2d8] sm:$0xff]  ;;  %v1031_v42 = vld [vmem:[%s16274_s13 + $0x620] sm:$0xff] }
 0x476   :  { %v542_v48 = vrot.slane %v541_v45, 1 }
 0x478   :  { %v543_v51 = vadd.f32 %v542_v48, %v541_v45  ;;  %v1147_v45 = vld [vmem:[%s16274_s13 + $0x9c0] sm:$0xff]  ;;  %v913_v48 = vld [vmem:[%s16274_s13 + $0x270] sm:$0xff] }
 0x47a   :  { %v544_v54 = vmul.f32 0.010204081, %v543_v51  ;;  %v1018_v51 = vld [vmem:[%s16274_s13 + $0x5b8] sm:$0xff] }
 0x47c   :  { %7312 = vmatmul.msk.f32.vlgmr.msrb.gmra.mxu0 %vm72_vm0, %v544_v54  ;;  %7314 = vmatmul.msk.f32.vlgmr.msra.gmra.mxu1 %vm72_vm0, %v544_v54 }
 0x47d   :  { %7315 = vmatmul.msk.f32.vlgmr.msra.gmra.mxu3 %vm72_vm0, %v544_v54  ;;  %643 = vmatpush.msrb.mxu0 %v7802_v28 }
 0x47e   :  { %762 = vmatpush.msra.mxu3 %v450_v46  ;;  %1505 = vmatpush.msra.mxu1 %v1030_v20  ;;  %v1434_v20 = vld [vmem:[%s16274_s13 + $0x12b8] sm:$0xff] }
 0x47f   :  { %644 = vmatpush.msrb.mxu0 %v7807_v29 }
 0x480   :  { %1506 = vmatpush.msra.mxu1 %v1017_v21  ;;  %v901_v21 = vld [vmem:[%s16274_s13 + $0x210] sm:$0xff] }
 0x481   :  { %645 = vmatpush.msrb.mxu0 %v7823_v32 }
 0x483   :  { %646 = vmatpush.msrb.mxu0 %v7851_v38 }
 0x484   :  { %7313 = vmatmul.msk.f32.vlgmr.msra.gmra.mxu0 %vm72_vm0, %v544_v54  ;;  %v1134_v54 = vld [vmem:[%s16274_s13 + $0x958] sm:$0xff] }
 0x485   :  { %647 = vmatpush.msrb.mxu0 %v7869_v41 }
 0x487   :  { %648 = vmatpush.msrb.mxu0 %v7887_v44 }
 0x489   :  { %649 = vmatpush.msrb.mxu0 %v7905_v47 }
 0x48b   :  { %650 = vmatpush.msrb.mxu0 %v7923_v50 }
 0x48d   :  { %651 = vmatpush.msrb.mxu0 %v7941_v53 }
 0x48f   :  { %652 = vmatpush.msrb.mxu0 %v7959_v56 }
 0x491   :  { %653 = vmatpush.msrb.mxu0 %v7975_v59 }
 0x493   :  { %654 = vmatpush.msrb.mxu0 %v7983_v60 }
 0x495   :  { %655 = vmatpush.msrb.mxu0 %v7990_v61 }
 0x497   :  { %656 = vmatpush.msrb.mxu0 %v8002_v1 }
 0x499   :  { %657 = vmatpush.msrb.mxu0 %v8017_v3 }
 0x49b   :  { %658 = vmatpush.msrb.mxu0 %v8032_v6 }
 0x49d   :  { %822 = vmatpush.msra.mxu0 %v453_v52  ;;  %v965_v52 = vld [vmem:[%s16274_s13 + $0x410] sm:$0xff] }
 0x4f9   :  { %v565_v28 = vpop.f32.mrf.mxu0  ;;  %v605_v29 = vpop.f32.mrf.mxu1 }
 0x4fa   :  { %v628_v32 = vperm.slane %v565_v28, 0  ;;  %v630_v38 = vperm.slane %v605_v29, 0  ;;  %v900_v28 = vld [vmem:[%s16274_s13 + $0x208] sm:$0xff]  ;;  %v1121_v29 = vld [vmem:[%s16274_s13 + $0x8f0] sm:$0xff] }
 0x4fc   :  { %v8164_v41 = vsub.f32 %v397_v23, %v628_v32  ;;  %v8168_v44 = vsub.f32 %v399_v43, %v630_v38  ;;  %v1004_v23 = vld [vmem:[%s16274_s13 + $0x548] sm:$0xff]  ;;  %v1459_v43 = vld [vmem:[%s16274_s13 + $0x1380] sm:$0xff] }
 0x4fd   :  { %1507 = vmatpush.msra.mxu1 %v1004_v23  ;;  %v887_v32 = vld [vmem:[%s16274_s13 + $0x1a0] sm:$0xff]  ;;  %v992_v38 = vld [vmem:[%s16274_s13 + $0x4e8] sm:$0xff]  ;;  %v1421_v23 = vld [vmem:[%s16274_s13 + $0x1250] sm:$0xff] }
 0x4fe   :  { %v636_v47 = vmul.f32 %v8164_v41, %v8164_v41  ;;  %v638_v50 = vmul.f32 %v8168_v44, %v8168_v44 }
 0x4ff   :  { %1508 = vmatpush.msra.mxu1 %v991_v27  ;;  %v1161_v27 = vld [vmem:[%s16274_s13 + $0xa30] sm:$0xff] }
 0x500   :  { %v625_v53 = vpop.f32.mrf.mxu3  ;;  %659 = vmatmul.f32.vlgmr.msrb.gmra.mxu0 %v636_v47  ;;  %699 = vmatmul.f32.vlgmr.msrb.gmra.mxu2 %v638_v50  ;;  %v874_v47 = vld [vmem:[%s16274_s13 + $0x138] sm:$0xff]  ;;  %v1108_v50 = vld [vmem:[%s16274_s13 + $0x888] sm:$0xff] }
 0x501   :  { %v631_v56 = vperm.slane %v625_v53, 0  ;;  %v585_v57 = vpop.f32.mrf.mxu0  ;;  %1580 = vmatpush.msrb.mxu0 %v1459_v43  ;;  %1509 = vmatpush.msra.mxu1 %v978_v37  ;;  %v979_v53 = vld [vmem:[%s16274_s13 + $0x480] sm:$0xff]  ;;  %v1122_v37 = vld [vmem:[%s16274_s13 + $0x8f8] sm:$0xff]  ;;  %v1109_v43 = vld [vmem:[%s16274_s13 + $0x890] sm:$0xff] }
 0x502   :  { %v629_v59 = vperm.slane %v585_v57, 0  ;;  %v861_v57 = vld [vmem:[%s16274_s13 + $0xd0] sm:$0xff] }
 0x503   :  { %v8176_v60 = vsub.f32 %v400_v25, %v631_v56  ;;  %1510 = vmatpush.msra.mxu1 %v965_v52  ;;  %v1446_v56 = vld [vmem:[%s16274_s13 + $0x1318] sm:$0xff]  ;;  %v1408_v52 = vld [vmem:[%s16274_s13 + $0x11e8] sm:$0xff] }
 0x504   :  { %v8180_v61 = vsub.f32 %v398_v40, %v629_v59  ;;  %v1199_v40 = vld [vmem:[%s16274_s13 + $0xb60] sm:$0xff] }
 0x505   :  { %v639_v1 = vmul.f32 %v8176_v60, %v8176_v60  ;;  %1528 = vmatpush.msra.mxu2 %v1199_v40  ;;  %1511 = vmatpush.msra.mxu1 %v952_v62  ;;  %v1095_v59 = vld [vmem:[%s16274_s13 + $0x820] sm:$0xff]  ;;  %v862_v40 = vld [vmem:[%s16274_s13 + $0xd8] sm:$0xff] }
 0x506   :  { %v637_v2 = vmul.f32 %v8180_v61, %v8180_v61  ;;  %v1394_v62 = vld [vmem:[%s16274_s13 + $0x1178] sm:$0xff] }
 0x507   :  { %7316 = vmatmul.msk.f32.vlgmr.msrb.gmra.mxu3 %vm72_vm0, %v639_v1  ;;  %1512 = vmatpush.msra.mxu1 %v939_v35  ;;  %v966_v1 = vld [vmem:[%s16274_s13 + $0x418] sm:$0xff]  ;;  %v1381_v35 = vld [vmem:[%s16274_s13 + $0x1110] sm:$0xff] }
 0x508   :  { %679 = vmatmul.f32.vlgmr.msrb.gmra.mxu1 %v637_v2  ;;  %782 = vmatpush.msrb.mxu3 %v8123_v55  ;;  %v1186_v55 = vld [vmem:[%s16274_s13 + $0xaf8] sm:$0xff]  ;;  %v1433_v2 = vld [vmem:[%s16274_s13 + $0x12b0] sm:$0xff] }
 0x509   :  { %1529 = vmatpush.msra.mxu2 %v1186_v55  ;;  %1513 = vmatpush.msra.mxu1 %v926_v39  ;;  %v849_v55 = vld [vmem:[%s16274_s13 + $0x70] sm:$0xff] }
 0x50a   :  { %v1369_v39 = vld [vmem:[%s16274_s13 + $0x10b0] sm:$0xff] }
 0x50b   :  { %1530 = vmatpush.msra.mxu2 %v1173_v30  ;;  %1514 = vmatpush.msra.mxu1 %v913_v48  ;;  %v1395_v30 = vld [vmem:[%s16274_s13 + $0x1180] sm:$0xff]  ;;  %v1356_v48 = vld [vmem:[%s16274_s13 + $0x1048] sm:$0xff] }
 0x50d   :  { %1531 = vmatpush.msra.mxu2 %v1160_v5  ;;  %1515 = vmatpush.msra.mxu1 %v900_v28  ;;  %v1382_v5 = vld [vmem:[%s16274_s13 + $0x1118] sm:$0xff]  ;;  %v1343_v28 = vld [vmem:[%s16274_s13 + $0xfe0] sm:$0xff] }
 0x50f   :  { %1532 = vmatpush.msra.mxu2 %v1147_v45  ;;  %1516 = vmatpush.msra.mxu1 %v887_v32  ;;  %v1355_v45 = vld [vmem:[%s16274_s13 + $0x1040] sm:$0xff]  ;;  %v1316_v32 = vld [vmem:[%s16274_s13 + $0xf08] sm:$0xff] }
 0x511   :  { %1533 = vmatpush.msra.mxu2 %v1134_v54  ;;  %1517 = vmatpush.msra.mxu1 %v874_v47  ;;  %v1342_v54 = vld [vmem:[%s16274_s13 + $0xfd8] sm:$0xff]  ;;  %v1303_v47 = vld [vmem:[%s16274_s13 + $0xea0] sm:$0xff] }
 0x513   :  { %1534 = vmatpush.msra.mxu2 %v1121_v29  ;;  %1518 = vmatpush.msra.mxu1 %v861_v57  ;;  %v1330_v29 = vld [vmem:[%s16274_s13 + $0xf78] sm:$0xff]  ;;  %v1277_v57 = vld [vmem:[%s16274_s13 + $0xdd0] sm:$0xff] }
 0x515   :  { %1535 = vmatpush.msra.mxu2 %v1108_v50  ;;  %v1304_v50 = vld [vmem:[%s16274_s13 + $0xea8] sm:$0xff] }
 0x517   :  { %1536 = vmatpush.msra.mxu2 %v1095_v59  ;;  %v1278_v59 = vld [vmem:[%s16274_s13 + $0xdd8] sm:$0xff] }
 0x57d   :  { %v660_v3 = vpop.f32.mrf.mxu0 }
 0x583   :  { %v700_v7 = vpop.f32.mrf.mxu2 }
 0x585   :  { %v680_v4 = vpop.f32.mrf.mxu1 }
 0x586   :  { %v681_v6 = vadd.f32 %v680_v4, %v660_v3  ;;  %v848_v3 = vld [vmem:[%s16274_s13 + $0x68] sm:$0xff]  ;;  %v1082_v4 = vld [vmem:[%s16274_s13 + $0x7b8] sm:$0xff] }
 0x587   :  { %1519 = vmatpush.msra.mxu1 %v848_v3  ;;  %1537 = vmatpush.msra.mxu2 %v1082_v4  ;;  %v1251_v3 = vld [vmem:[%s16274_s13 + $0xd00] sm:$0xff]  ;;  %v1252_v4 = vld [vmem:[%s16274_s13 + $0xd08] sm:$0xff] }
 0x588   :  { %v701_v8 = vadd.f32 %v700_v7, %v681_v6  ;;  %v953_v6 = vld [vmem:[%s16274_s13 + $0x3b0] sm:$0xff]  ;;  %v1420_v7 = vld [vmem:[%s16274_s13 + $0x1248] sm:$0xff] }
 0x58a   :  { %v720_v9 = vpop.f32.mrf.mxu3 }
 0x58b   :  { %v721_v10 = vadd.f32 %v720_v9, %v701_v8  ;;  %v835_v8 = vld [vmem:[%s16274_s13] sm:$0xff]  ;;  %v1069_v9 = vld [vmem:[%s16274_s13 + $0x750] sm:$0xff] }
 0x58c   :  { %1520 = vmatpush.msra.mxu1 %v835_v8  ;;  %1538 = vmatpush.msra.mxu2 %v1069_v9 }
 0x58d   :  { %v723_v11 = vsel %vm164_vm3, %v721_v10, 0.0  ;;  %v1239_v10 = vld [vmem:[%s16274_s13 + $0xca0] sm:$0xff] }
 0x58e   :  { %v724_v12 = vrot.slane %v723_v11, 4  ;;  %1605 = vmatpush.msrb.mxu1 %v1239_v10  ;;  %v1240_v10 = vld [vmem:[%s16274_s13 + $0xca8] sm:$0xff] }
 0x590   :  { %v725_v13 = vadd.f32 %v724_v12, %v723_v11  ;;  %v940_v11 = vld [vmem:[%s16274_s13 + $0x348] sm:$0xff] }
 0x591   :  { %v1056_v12 = vld [vmem:[%s16274_s13 + $0x6e8] sm:$0xff] }
 0x592   :  { %v726_v14 = vrot.slane %v725_v13, 2  ;;  %1539 = vmatpush.msra.mxu2 %v1056_v12 }
 0x594   :  { %v727_v15 = vadd.f32 %v726_v14, %v725_v13  ;;  %v1226_v13 = vld [vmem:[%s16274_s13 + $0xc38] sm:$0xff]  ;;  %v927_v14 = vld [vmem:[%s16274_s13 + $0x2e0] sm:$0xff] }
 0x595   :  { %1606 = vmatpush.msrb.mxu1 %v1226_v13 }
 0x596   :  { %v728_v16 = vrot.slane %v727_v15, 1 }
 0x598   :  { %v729_v17 = vadd.f32 %v728_v16, %v727_v15  ;;  %v1043_v15 = vld [vmem:[%s16274_s13 + $0x680] sm:$0xff]  ;;  %v1213_v16 = vld [vmem:[%s16274_s13 + $0xbd0] sm:$0xff] }
 0x599   :  { %1540 = vmatpush.msra.mxu2 %v1043_v15  ;;  %1607 = vmatpush.msrb.mxu1 %v1213_v16  ;;  %v1201_v15 = vld [vmem:[%s16274_s13 + $0xb70] sm:$0xff]  ;;  %v1448_v16 = vld [vmem:[%s16274_s13 + $0x1328] sm:$0xff] }
 0x59a   :  { %v730_v18 = vmul.f32 0.010204081, %v729_v17  ;;  %v1447_v17 = vld [vmem:[%s16274_s13 + $0x1320] sm:$0xff] }
 0x59b   :  { %1625 = vmatpush.msrb.mxu2 %v1447_v17  ;;  %v1188_v17 = vld [vmem:[%s16274_s13 + $0xb08] sm:$0xff] }
 0x59c   :  { %v732_v19 = vadd.f32 1e-05, %v730_v18  ;;  %v914_v18 = vld [vmem:[%s16274_s13 + $0x278] sm:$0xff] }
 0x59d   :  { %1626 = vmatpush.msrb.mxu2 %v1434_v20 }
 0x59e   :  { %7381 = vrsqrt.f32 %v732_v19  ;;  %vm739_vm8 = vweird.f32 %v732_v19 }
 0x59f   :  { %1627 = vmatpush.msrb.mxu2 %v1421_v23  ;;  %v1409_v23 = vld [vmem:[%s16274_s13 + $0x11f0] sm:$0xff] }
 0x5a1   :  { %1628 = vmatpush.msrb.mxu2 %v1408_v52  ;;  %v1357_v52 = vld [vmem:[%s16274_s13 + $0x1050] sm:$0xff] }
 0x5a3   :  { %1629 = vmatpush.msrb.mxu2 %v1395_v30  ;;  %v1344_v30 = vld [vmem:[%s16274_s13 + $0xfe8] sm:$0xff] }
 0x5a4   :  { %v7382_v22 = vpop.eup %7381 }
 0x5a5   :  { %v734_v25 = vmul.f32 %v7382_v22, %v732_v19  ;;  %vm740_vm7 = vweird.f32 %v7382_v22  ;;  %v1200_v19 = vld [vmem:[%s16274_s13 + $0xb68] sm:$0xff]  ;;  %1630 = vmatpush.msrb.mxu2 %v1382_v5 }
 0x5a6   :  { %vm741_vm9 = vmor %vm739_vm8, %vm740_vm7  ;;  %1608 = vmatpush.msrb.mxu1 %v1200_v19  ;;  %v1422_v19 = vld [vmem:[%s16274_s13 + $0x1258] sm:$0xff]  ;;  %v1020_v5 = vld [vmem:[%s16274_s13 + $0x5c8] sm:$0xff] }
 0x5a7   :  { %v735_v34 = vmul.f32 %v7382_v22, %v734_v25  ;;  %v1174_v25 = vld [vmem:[%s16274_s13 + $0xa98] sm:$0xff]  ;;  %1631 = vmatpush.msrb.mxu2 %v1369_v39 }
 0x5a8   :  { %v1318_v39 = vld [vmem:[%s16274_s13 + $0xf18] sm:$0xff] }
 0x5a9   :  { %v736_v46 = vmul.f32 0.5, %v735_v34  ;;  %v1135_v34 = vld [vmem:[%s16274_s13 + $0x960] sm:$0xff]  ;;  %1632 = vmatpush.msrb.mxu2 %v1356_v48  ;;  %v1058_v48 = vld [vmem:[%s16274_s13 + $0x6f8] sm:$0xff] }
 0x5ab   :  { %v737_v58 = vsub.f32 1.5, %v736_v46  ;;  %v1407_v46 = vld [vmem:[%s16274_s13 + $0x11e0] sm:$0xff]  ;;  %1633 = vmatpush.msrb.mxu2 %v1343_v28  ;;  %v1045_v28 = vld [vmem:[%s16274_s13 + $0x690] sm:$0xff] }
 0x5ad   :  { %v738_v0 = vmul.f32 %v7382_v22, %v737_v58  ;;  %v1096_v58 = vld [vmem:[%s16274_s13 + $0x828] sm:$0xff]  ;;  %1634 = vmatpush.msrb.mxu2 %v1330_v29 }
 0x5ae   :  { %v1292_v29 = vld [vmem:[%s16274_s13 + $0xe48] sm:$0xff] }
 0x5af   :  { %v742_v33 = vsel %vm741_vm9, %v7382_v22, %v738_v0  ;;  %v1187_v22 = vld [vmem:[%s16274_s13 + $0xb00] sm:$0xff] }
 0x5b0   :  { %v743_v36 = vmul.f32 %v742_v33, %v731_v63  ;;  %1609 = vmatpush.msrb.mxu1 %v1187_v22  ;;  %v836_v63 = vld [vmem:[%s16274_s13 + $0x8] sm:$0xff]  ;;  %v1083_v0 = vld [vmem:[%s16274_s13 + $0x7c0] sm:$0xff]  ;;  %v1070_v33 = vld [vmem:[%s16274_s13 + $0x758] sm:$0xff] }
 0x5b1   :  { %v1162_v22 = vld [vmem:[%s16274_s13 + $0xa38] sm:$0xff] }
 0x5b2   :  { %7317 = vmatmul.msk.f32.vlgmr.msra.gmra.mxu3 %vm72_vm0, %v743_v36  ;;  %7320 = vmatmul.msk.f32.vlgmr.msra.gmra.mxu0 %vm72_vm0, %v743_v36 }
 0x5b3   :  { %802 = vmatpush.msra.mxu3 %v8113_v49  ;;  %1585 = vmatpush.msra.mxu0 %v1031_v42  ;;  %v1005_v49 = vld [vmem:[%s16274_s13 + $0x550] sm:$0xff] }
 0x5b4   :  { %1610 = vmatpush.msrb.mxu1 %v1174_v25  ;;  %v1057_v42 = vld [vmem:[%s16274_s13 + $0x6f0] sm:$0xff] }
 0x5b5   :  { %1586 = vmatpush.msra.mxu0 %v1018_v51  ;;  %v1044_v51 = vld [vmem:[%s16274_s13 + $0x688] sm:$0xff]  ;;  %v1149_v25 = vld [vmem:[%s16274_s13 + $0x9d0] sm:$0xff] }
 0x5b6   :  { %1611 = vmatpush.msrb.mxu1 %v1161_v27  ;;  %v1461_v27 = vld [vmem:[%s16274_s13 + $0x1390] sm:$0xff] }
 0x5b7   :  { %1587 = vmatpush.msra.mxu0 %v1005_v49  ;;  %v1329_v49 = vld [vmem:[%s16274_s13 + $0xf70] sm:$0xff] }
 0x5b8   :  { %1612 = vmatpush.msrb.mxu1 %v1148_v31  ;;  %v1383_v31 = vld [vmem:[%s16274_s13 + $0x1120] sm:$0xff] }
 0x5b9   :  { %1588 = vmatpush.msra.mxu0 %v992_v38  ;;  %v1317_v38 = vld [vmem:[%s16274_s13 + $0xf10] sm:$0xff] }
 0x5ba   :  { %7318 = vmatmul.msk.f32.vlgmr.msrb.gmra.mxu3 %vm72_vm0, %v743_v36  ;;  %1613 = vmatpush.msrb.mxu1 %v1135_v34  ;;  %v1123_v34 = vld [vmem:[%s16274_s13 + $0x900] sm:$0xff] }
 0x5bb   :  { %1589 = vmatpush.msra.mxu0 %v979_v53  ;;  %1545 = vmatpush.msrb.mxu3 %v1446_v56  ;;  %v1290_v53 = vld [vmem:[%s16274_s13 + $0xe38] sm:$0xff]  ;;  %v1291_v56 = vld [vmem:[%s16274_s13 + $0xe40] sm:$0xff] }
 0x5bc   :  { %1614 = vmatpush.msrb.mxu1 %v1122_v37  ;;  %1635 = vmatpush.msrb.mxu2 %v1317_v38  ;;  %v1370_v37 = vld [vmem:[%s16274_s13 + $0x10b8] sm:$0xff]  ;;  %v1449_v38 = vld [vmem:[%s16274_s13 + $0x1330] sm:$0xff] }
 0x5bd   :  { %1590 = vmatpush.msra.mxu0 %v966_v1  ;;  %1546 = vmatpush.msrb.mxu3 %v1433_v2  ;;  %v1264_v1 = vld [vmem:[%s16274_s13 + $0xd68] sm:$0xff]  ;;  %v1265_v2 = vld [vmem:[%s16274_s13 + $0xd70] sm:$0xff] }
 0x5be   :  { %1615 = vmatpush.msrb.mxu1 %v1109_v43  ;;  %1636 = vmatpush.msrb.mxu2 %v1304_v50  ;;  %v1279_v50 = vld [vmem:[%s16274_s13 + $0xde0] sm:$0xff] }
 0x5bf   :  { %1591 = vmatpush.msra.mxu0 %v953_v6  ;;  %1547 = vmatpush.msrb.mxu3 %v1420_v7  ;;  %v1460_v6 = vld [vmem:[%s16274_s13 + $0x1388] sm:$0xff] }
 0x5c0   :  { %1616 = vmatpush.msrb.mxu1 %v1096_v58  ;;  %1637 = vmatpush.msrb.mxu2 %v1291_v56  ;;  %v1032_v58 = vld [vmem:[%s16274_s13 + $0x628] sm:$0xff] }
 0x5c1   :  { %1592 = vmatpush.msra.mxu0 %v940_v11  ;;  %1548 = vmatpush.msrb.mxu3 %v1407_v46  ;;  %v1227_v11 = vld [vmem:[%s16274_s13 + $0xc40] sm:$0xff]  ;;  %v1110_v46 = vld [vmem:[%s16274_s13 + $0x898] sm:$0xff]  ;;  %v1436_v56 = vld [vmem:[%s16274_s13 + $0x12c8] sm:$0xff] }
 0x5c2   :  { %7319 = vmatmul.msk.f32.vlgmr.msra.gmra.mxu3 %vm72_vm0, %v743_v36  ;;  %1617 = vmatpush.msrb.mxu1 %v1083_v0  ;;  %v1368_v36 = vld [vmem:[%s16274_s13 + $0x10a8] sm:$0xff] }
 0x5c3   :  { %1593 = vmatpush.msra.mxu0 %v927_v14  ;;  %1549 = vmatpush.msrb.mxu3 %v1394_v62  ;;  %v1214_v14 = vld [vmem:[%s16274_s13 + $0xbd8] sm:$0xff]  ;;  %v1097_v62 = vld [vmem:[%s16274_s13 + $0x830] sm:$0xff]  ;;  %v1084_v0 = vld [vmem:[%s16274_s13 + $0x7c8] sm:$0xff] }
 0x5c4   :  { %1618 = vmatpush.msrb.mxu1 %v1070_v33  ;;  %1638 = vmatpush.msrb.mxu2 %v1278_v59  ;;  %v1006_v33 = vld [vmem:[%s16274_s13 + $0x558] sm:$0xff] }
 0x5c5   :  { %1594 = vmatpush.msra.mxu0 %v914_v18  ;;  %1550 = vmatpush.msrb.mxu3 %v1381_v35  ;;  %v1175_v18 = vld [vmem:[%s16274_s13 + $0xaa0] sm:$0xff]  ;;  %v1266_v59 = vld [vmem:[%s16274_s13 + $0xd78] sm:$0xff] }
 0x5c6   :  { %1619 = vmatpush.msrb.mxu1 %v1057_v42  ;;  %1639 = vmatpush.msrb.mxu2 %v1265_v2  ;;  %v1331_v35 = vld [vmem:[%s16274_s13 + $0xf80] sm:$0xff] }
 0x5c7   :  { %1595 = vmatpush.msra.mxu0 %v901_v21  ;;  %1551 = vmatpush.msrb.mxu3 %v1368_v36  ;;  %v1071_v36 = vld [vmem:[%s16274_s13 + $0x760] sm:$0xff] }
 0x5c8   :  { %1620 = vmatpush.msrb.mxu1 %v1044_v51  ;;  %1640 = vmatpush.msrb.mxu2 %v1252_v4  ;;  %v1007_v42 = vld [vmem:[%s16274_s13 + $0x560] sm:$0xff]  ;;  %v1305_v51 = vld [vmem:[%s16274_s13 + $0xeb0] sm:$0xff] }
 0x5c9   :  { %1596 = vmatpush.msra.mxu0 %v888_v24  ;;  %1552 = vmatpush.msrb.mxu3 %v1355_v45  ;;  %v993_v45 = vld [vmem:[%s16274_s13 + $0x4f0] sm:$0xff]  ;;  %v1423_v2 = vld [vmem:[%s16274_s13 + $0x1260] sm:$0xff] }
 0x5ca   :  { %v1253_v4 = vld [vmem:[%s16274_s13 + $0xd10] sm:$0xff] }
 0x5cb   :  { %1597 = vmatpush.msra.mxu0 %v875_v26  ;;  %1553 = vmatpush.msrb.mxu3 %v1342_v54  ;;  %v1396_v26 = vld [vmem:[%s16274_s13 + $0x1188] sm:$0xff]  ;;  %v994_v54 = vld [vmem:[%s16274_s13 + $0x4f8] sm:$0xff] }
 0x5cd   :  { %1598 = vmatpush.msra.mxu0 %v862_v40  ;;  %1554 = vmatpush.msrb.mxu3 %v1329_v49  ;;  %v980_v49 = vld [vmem:[%s16274_s13 + $0x488] sm:$0xff] }
 0x5cf   :  { %1599 = vmatpush.msra.mxu0 %v849_v55  ;;  %1555 = vmatpush.msrb.mxu3 %v1316_v32  ;;  %v981_v32 = vld [vmem:[%s16274_s13 + $0x490] sm:$0xff] }
 0x5d1   :  { %1600 = vmatpush.msra.mxu0 %v836_v63  ;;  %1556 = vmatpush.msrb.mxu3 %v1303_v47  ;;  %v1033_v63 = vld [vmem:[%s16274_s13 + $0x630] sm:$0xff]  ;;  %v967_v47 = vld [vmem:[%s16274_s13 + $0x420] sm:$0xff] }
 0x5d3   :  { %1557 = vmatpush.msrb.mxu3 %v1290_v53  ;;  %v968_v53 = vld [vmem:[%s16274_s13 + $0x428] sm:$0xff] }
 0x5d5   :  { %1558 = vmatpush.msrb.mxu3 %v1277_v57  ;;  %v954_v57 = vld [vmem:[%s16274_s13 + $0x3b8] sm:$0xff] }
 0x5d7   :  { %1559 = vmatpush.msrb.mxu3 %v1264_v1  ;;  %v955_v1 = vld [vmem:[%s16274_s13 + $0x3c0] sm:$0xff] }
 0x5d9   :  { %1560 = vmatpush.msrb.mxu3 %v1251_v3  ;;  %v941_v3 = vld [vmem:[%s16274_s13 + $0x350] sm:$0xff] }
 0x5db   :  { %1660 = vmatpush.msra.mxu3 %v1460_v6  ;;  %v942_v6 = vld [vmem:[%s16274_s13 + $0x358] sm:$0xff] }
 0x62f   :  { %v824_v7 = vpop.f32.mrf.mxu0 }
 0x630   :  { %v830_v8 = vperm.slane %v824_v7, 0  ;;  %v1410_v7 = vld [vmem:[%s16274_s13 + $0x11f8] sm:$0xff] }
 0x632   :  { %v8492_v9 = vmul.f32 %v830_v8, %v8176_v60  ;;  %v1462_v8 = vld [vmem:[%s16274_s13 + $0x1398] sm:$0xff] }
 0x634   :  { %7321 = vmatmul.msk.f32.vlgmr.msrb.gmra.mxu0 %vm72_vm0, %v8492_v9 }
 0x635   :  { %1685 = vmatpush.msrb.mxu0 %v1240_v10  ;;  %v764_v12 = vpop.f32.mrf.mxu3  ;;  %v928_v10 = vld [vmem:[%s16274_s13 + $0x2e8] sm:$0xff] }
 0x636   :  { %v827_v13 = vperm.slane %v764_v12, 0  ;;  %v1034_v12 = vld [vmem:[%s16274_s13 + $0x638] sm:$0xff] }
 0x637   :  { %1686 = vmatpush.msrb.mxu0 %v1227_v11  ;;  %v929_v11 = vld [vmem:[%s16274_s13 + $0x2f0] sm:$0xff] }
 0x638   :  { %v8506_v60 = vmul.f32 %v827_v13, %v8164_v41  ;;  %v1435_v41 = vld [vmem:[%s16274_s13 + $0x12c0] sm:$0xff]  ;;  %v1397_v13 = vld [vmem:[%s16274_s13 + $0x1190] sm:$0xff] }
 0x639   :  { %1687 = vmatpush.msrb.mxu0 %v1214_v14  ;;  %v915_v14 = vld [vmem:[%s16274_s13 + $0x280] sm:$0xff] }
 0x63a   :  { %1521 = vmatmul.f32.vlgmr.msra.gmra.mxu1 %v8506_v60 }
 0x63b   :  { %1688 = vmatpush.msrb.mxu0 %v1201_v15  ;;  %1705 = vmatpush.msra.mxu1 %v1448_v16  ;;  %v916_v15 = vld [vmem:[%s16274_s13 + $0x288] sm:$0xff]  ;;  %v1021_v16 = vld [vmem:[%s16274_s13 + $0x5d0] sm:$0xff] }
 0x63c   :  { %1601 = vmatmul.f32.vlgmr.msra.gmra.mxu0 %v8506_v60 }
 0x63d   :  { %1689 = vmatpush.msrb.mxu0 %v1188_v17  ;;  %1706 = vmatpush.msra.mxu1 %v1435_v41  ;;  %v784_v20 = vpop.f32.mrf.mxu3  ;;  %v1384_v17 = vld [vmem:[%s16274_s13 + $0x1128] sm:$0xff]  ;;  %v902_v41 = vld [vmem:[%s16274_s13 + $0x218] sm:$0xff] }
 0x63e   :  { %v828_v21 = vperm.slane %v784_v20, 0  ;;  %v1371_v20 = vld [vmem:[%s16274_s13 + $0x10c0] sm:$0xff] }
 0x63f   :  { %1690 = vmatpush.msrb.mxu0 %v1175_v18  ;;  %1707 = vmatpush.msra.mxu1 %v1422_v19  ;;  %v903_v18 = vld [vmem:[%s16274_s13 + $0x220] sm:$0xff]  ;;  %v1008_v19 = vld [vmem:[%s16274_s13 + $0x568] sm:$0xff] }
 0x640   :  { %v8535_v24 = vmul.f32 %v828_v21, %v8180_v61  ;;  %v1136_v61 = vld [vmem:[%s16274_s13 + $0x968] sm:$0xff]  ;;  %v889_v21 = vld [vmem:[%s16274_s13 + $0x1b0] sm:$0xff] }
 0x641   :  { %1691 = vmatpush.msrb.mxu0 %v1162_v22  ;;  %1708 = vmatpush.msra.mxu1 %v1409_v23  ;;  %v890_v22 = vld [vmem:[%s16274_s13 + $0x1b8] sm:$0xff]  ;;  %v995_v23 = vld [vmem:[%s16274_s13 + $0x500] sm:$0xff] }
 0x642   :  { %1541 = vmatmul.f32.vlgmr.msra.gmra.mxu2 %v8535_v24  ;;  %1621 = vmatmul.f32.vlgmr.msrb.gmra.mxu1 %v8535_v24 }
 0x643   :  { %1692 = vmatpush.msrb.mxu0 %v1149_v25  ;;  %1709 = vmatpush.msra.mxu1 %v1396_v26  ;;  %v1358_v25 = vld [vmem:[%s16274_s13 + $0x1058] sm:$0xff]  ;;  %v876_v26 = vld [vmem:[%s16274_s13 + $0x148] sm:$0xff] }
 0x644   :  { %1740 = vmatpush.msra.mxu2 %v1461_v27  ;;  %v877_v27 = vld [vmem:[%s16274_s13 + $0x150] sm:$0xff] }
 0x645   :  { %1693 = vmatpush.msrb.mxu0 %v1136_v61  ;;  %1710 = vmatpush.msra.mxu1 %v1383_v31  ;;  %v804_v40 = vpop.f32.mrf.mxu3  ;;  %v982_v61 = vld [vmem:[%s16274_s13 + $0x498] sm:$0xff]  ;;  %v1345_v31 = vld [vmem:[%s16274_s13 + $0xff0] sm:$0xff] }
 0x646   :  { %v829_v43 = vperm.slane %v804_v40, 0  ;;  %v969_v40 = vld [vmem:[%s16274_s13 + $0x430] sm:$0xff] }
 0x647   :  { %1694 = vmatpush.msrb.mxu0 %v1123_v34  ;;  %1711 = vmatpush.msra.mxu1 %v1370_v37  ;;  %v863_v34 = vld [vmem:[%s16274_s13 + $0xe0] sm:$0xff]  ;;  %v864_v37 = vld [vmem:[%s16274_s13 + $0xe8] sm:$0xff] }
 0x648   :  { %v8567_v55 = vmul.f32 %v829_v43, %v8168_v44  ;;  %v1019_v44 = vld [vmem:[%s16274_s13 + $0x5c0] sm:$0xff]  ;;  %v1332_v43 = vld [vmem:[%s16274_s13 + $0xf88] sm:$0xff] }
 0x649   :  { %1695 = vmatpush.msrb.mxu0 %v1110_v46  ;;  %1712 = vmatpush.msra.mxu1 %v1357_v52  ;;  %v850_v46 = vld [vmem:[%s16274_s13 + $0x78] sm:$0xff]  ;;  %v851_v52 = vld [vmem:[%s16274_s13 + $0x80] sm:$0xff] }
 0x64a   :  { %1561 = vmatmul.f32.vlgmr.msrb.gmra.mxu3 %v8567_v55  ;;  %1641 = vmatmul.f32.vlgmr.msrb.gmra.mxu2 %v8567_v55 }
 0x64b   :  { %1665 = vmatpush.msrb.mxu3 %v1032_v58  ;;  %1696 = vmatpush.msrb.mxu0 %v1097_v62  ;;  %v956_v58 = vld [vmem:[%s16274_s13 + $0x3c8] sm:$0xff]  ;;  %v1319_v62 = vld [vmem:[%s16274_s13 + $0xf20] sm:$0xff] }
 0x64c   :  { %1713 = vmatpush.msra.mxu1 %v1344_v30  ;;  %1745 = vmatpush.msrb.mxu2 %v1033_v63  ;;  %v837_v30 = vld [vmem:[%s16274_s13 + $0x10] sm:$0xff]  ;;  %v838_v63 = vld [vmem:[%s16274_s13 + $0x18] sm:$0xff] }
 0x64d   :  { %1666 = vmatpush.msrb.mxu3 %v1019_v44  ;;  %1697 = vmatpush.msrb.mxu0 %v1084_v0  ;;  %v943_v44 = vld [vmem:[%s16274_s13 + $0x360] sm:$0xff]  ;;  %v1241_v0 = vld [vmem:[%s16274_s13 + $0xcb0] sm:$0xff] }
 0x64e   :  { %1714 = vmatpush.msra.mxu1 %v1331_v35  ;;  %1746 = vmatpush.msrb.mxu2 %v1020_v5  ;;  %v1306_v35 = vld [vmem:[%s16274_s13 + $0xeb8] sm:$0xff] }
 0x64f   :  { %1667 = vmatpush.msrb.mxu3 %v1006_v33  ;;  %1698 = vmatpush.msrb.mxu0 %v1071_v36  ;;  %v1242_v5 = vld [vmem:[%s16274_s13 + $0xcb8] sm:$0xff]  ;;  %v1228_v36 = vld [vmem:[%s16274_s13 + $0xc48] sm:$0xff] }
 0x650   :  { %1715 = vmatpush.msra.mxu1 %v1318_v39  ;;  %1747 = vmatpush.msrb.mxu2 %v1007_v42  ;;  %v930_v33 = vld [vmem:[%s16274_s13 + $0x2f8] sm:$0xff]  ;;  %v1293_v39 = vld [vmem:[%s16274_s13 + $0xe50] sm:$0xff] }
 0x651   :  { %1668 = vmatpush.msrb.mxu3 %v993_v45  ;;  %1699 = vmatpush.msrb.mxu0 %v1058_v48  ;;  %v1229_v42 = vld [vmem:[%s16274_s13 + $0xc50] sm:$0xff]  ;;  %v1215_v48 = vld [vmem:[%s16274_s13 + $0xbe0] sm:$0xff] }
 0x652   :  { %1716 = vmatpush.msra.mxu1 %v1305_v51  ;;  %1748 = vmatpush.msrb.mxu2 %v994_v54  ;;  %v917_v45 = vld [vmem:[%s16274_s13 + $0x290] sm:$0xff]  ;;  %v1280_v51 = vld [vmem:[%s16274_s13 + $0xde8] sm:$0xff] }
 0x653   :  { %7322 = vmatmul.msk.f32.vlgmr.msra.gmra.mxu3 %vm72_vm0, %v8492_v9  ;;  %1700 = vmatpush.msrb.mxu0 %v1045_v28  ;;  %v1216_v54 = vld [vmem:[%s16274_s13 + $0xbe8] sm:$0xff] }
 0x654   :  { %1669 = vmatpush.msrb.mxu3 %v980_v49  ;;  %1717 = vmatpush.msra.mxu1 %v1292_v29  ;;  %v904_v28 = vld [vmem:[%s16274_s13 + $0x228] sm:$0xff]  ;;  %v1202_v49 = vld [vmem:[%s16274_s13 + $0xb78] sm:$0xff]  ;;  %v1267_v29 = vld [vmem:[%s16274_s13 + $0xd80] sm:$0xff] }
 0x655   :  { %7323 = vmatmul.msk.f32.vlgmr.msra.gmra.mxu2 %vm72_vm0, %v8492_v9  ;;  %1701 = vmatmul.f32.vlgmr.msrb.gmra.mxu0 %v8535_v24 }
 0x656   :  { %1749 = vmatpush.msrb.mxu2 %v981_v32  ;;  %1785 = vmatpush.msra.mxu0 %v1449_v38  ;;  %v1203_v32 = vld [vmem:[%s16274_s13 + $0xb80] sm:$0xff] }
 0x657   :  { %1670 = vmatpush.msrb.mxu3 %v967_v47  ;;  %1718 = vmatpush.msra.mxu1 %v1279_v50  ;;  %v891_v38 = vld [vmem:[%s16274_s13 + $0x1c0] sm:$0xff]  ;;  %v1189_v47 = vld [vmem:[%s16274_s13 + $0xb10] sm:$0xff]  ;;  %v1254_v50 = vld [vmem:[%s16274_s13 + $0xd18] sm:$0xff] }
 0x658   :  { %1750 = vmatpush.msrb.mxu2 %v968_v53  ;;  %1786 = vmatpush.msra.mxu0 %v1436_v56  ;;  %v1190_v53 = vld [vmem:[%s16274_s13 + $0xb18] sm:$0xff] }
 0x659   :  { %1671 = vmatpush.msrb.mxu3 %v954_v57  ;;  %1719 = vmatpush.msra.mxu1 %v1266_v59  ;;  %v878_v56 = vld [vmem:[%s16274_s13 + $0x158] sm:$0xff]  ;;  %v1463_v57 = vld [vmem:[%s16274_s13 + $0x13a0] sm:$0xff]  ;;  %v1176_v59 = vld [vmem:[%s16274_s13 + $0xaa8] sm:$0xff] }
 0x65a   :  { %1751 = vmatpush.msrb.mxu2 %v955_v1  ;;  %1787 = vmatpush.msra.mxu0 %v1423_v2  ;;  %v1177_v1 = vld [vmem:[%s16274_s13 + $0xab0] sm:$0xff]  ;;  %v1035_v2 = vld [vmem:[%s16274_s13 + $0x640] sm:$0xff] }
 0x65b   :  { %1672 = vmatpush.msrb.mxu3 %v941_v3  ;;  %1720 = vmatpush.msra.mxu1 %v1253_v4  ;;  %v865_v3 = vld [vmem:[%s16274_s13 + $0xf0] sm:$0xff]  ;;  %v1163_v4 = vld [vmem:[%s16274_s13 + $0xa40] sm:$0xff] }
 0x65c   :  { %1752 = vmatpush.msrb.mxu2 %v942_v6  ;;  %1721 = vmatmul.f32.vlgmr.msra.gmra.mxu1 %v8567_v55  ;;  %v1164_v6 = vld [vmem:[%s16274_s13 + $0xa48] sm:$0xff] }
 0x65d   :  { %1788 = vmatpush.msra.mxu0 %v1410_v7  ;;  %1820 = vmatpush.msrb.mxu1 %v1462_v8  ;;  %v1022_v7 = vld [vmem:[%s16274_s13 + $0x5d8] sm:$0xff]  ;;  %v852_v8 = vld [vmem:[%s16274_s13 + $0x88] sm:$0xff] }
 0x65e   :  { %1673 = vmatpush.msrb.mxu3 %v928_v10  ;;  %1753 = vmatpush.msrb.mxu2 %v929_v11  ;;  %v1150_v10 = vld [vmem:[%s16274_s13 + $0x9d8] sm:$0xff]  ;;  %v1151_v11 = vld [vmem:[%s16274_s13 + $0x9e0] sm:$0xff] }
 0x65f   :  { %1825 = vmatpush.msra.mxu1 %v1034_v12  ;;  %1789 = vmatpush.msra.mxu0 %v1397_v13  ;;  %v1009_v12 = vld [vmem:[%s16274_s13 + $0x570] sm:$0xff]  ;;  %v839_v13 = vld [vmem:[%s16274_s13 + $0x20] sm:$0xff] }
 0x660   :  { %1674 = vmatpush.msrb.mxu3 %v915_v14  ;;  %1754 = vmatpush.msrb.mxu2 %v916_v15  ;;  %v1137_v14 = vld [vmem:[%s16274_s13 + $0x970] sm:$0xff]  ;;  %v1138_v15 = vld [vmem:[%s16274_s13 + $0x978] sm:$0xff] }
 0x661   :  { %1826 = vmatpush.msra.mxu1 %v1021_v16  ;;  %1790 = vmatpush.msra.mxu0 %v1384_v17  ;;  %v996_v16 = vld [vmem:[%s16274_s13 + $0x508] sm:$0xff]  ;;  %v1243_v17 = vld [vmem:[%s16274_s13 + $0xcc0] sm:$0xff] }
 0x662   :  { %1675 = vmatpush.msrb.mxu3 %v902_v41  ;;  %1755 = vmatpush.msrb.mxu2 %v903_v18  ;;  %v1124_v41 = vld [vmem:[%s16274_s13 + $0x908] sm:$0xff]  ;;  %v1125_v18 = vld [vmem:[%s16274_s13 + $0x910] sm:$0xff] }
 0x663   :  { %1827 = vmatpush.msra.mxu1 %v1008_v19  ;;  %1791 = vmatpush.msra.mxu0 %v1371_v20  ;;  %v983_v19 = vld [vmem:[%s16274_s13 + $0x4a0] sm:$0xff]  ;;  %v1230_v20 = vld [vmem:[%s16274_s13 + $0xc58] sm:$0xff] }
 0x664   :  { %1676 = vmatpush.msrb.mxu3 %v889_v21  ;;  %1756 = vmatpush.msrb.mxu2 %v890_v22  ;;  %v1111_v21 = vld [vmem:[%s16274_s13 + $0x8a0] sm:$0xff]  ;;  %v1112_v22 = vld [vmem:[%s16274_s13 + $0x8a8] sm:$0xff] }
 0x665   :  { %1828 = vmatpush.msra.mxu1 %v995_v23  ;;  %1792 = vmatpush.msra.mxu0 %v1358_v25  ;;  %v970_v23 = vld [vmem:[%s16274_s13 + $0x438] sm:$0xff]  ;;  %v1217_v25 = vld [vmem:[%s16274_s13 + $0xbf0] sm:$0xff] }
 0x666   :  { %7324 = vmatmul.msk.f32.vlgmr.msrb.gmra.mxu1 %vm72_vm0, %v8492_v9  ;;  %1677 = vmatpush.msrb.mxu3 %v876_v26  ;;  %v1098_v26 = vld [vmem:[%s16274_s13 + $0x838] sm:$0xff] }
 0x667   :  { %1757 = vmatpush.msrb.mxu2 %v877_v27  ;;  %1829 = vmatpush.msra.mxu1 %v982_v61  ;;  %v1099_v27 = vld [vmem:[%s16274_s13 + $0x840] sm:$0xff]  ;;  %v957_v61 = vld [vmem:[%s16274_s13 + $0x3d0] sm:$0xff] }
 0x668   :  { %1793 = vmatpush.msra.mxu0 %v1345_v31  ;;  %1678 = vmatpush.msrb.mxu3 %v863_v34  ;;  %v1204_v31 = vld [vmem:[%s16274_s13 + $0xb88] sm:$0xff]  ;;  %v1085_v34 = vld [vmem:[%s16274_s13 + $0x7d0] sm:$0xff] }
 0x669   :  { %1758 = vmatpush.msrb.mxu2 %v864_v37  ;;  %1830 = vmatpush.msra.mxu1 %v969_v40  ;;  %v1086_v37 = vld [vmem:[%s16274_s13 + $0x7d8] sm:$0xff]  ;;  %v944_v40 = vld [vmem:[%s16274_s13 + $0x368] sm:$0xff] }
 0x66a   :  { %1794 = vmatpush.msra.mxu0 %v1332_v43  ;;  %1679 = vmatpush.msrb.mxu3 %v850_v46  ;;  %v1191_v43 = vld [vmem:[%s16274_s13 + $0xb20] sm:$0xff]  ;;  %v1072_v46 = vld [vmem:[%s16274_s13 + $0x768] sm:$0xff] }
 0x66b   :  { %1759 = vmatpush.msrb.mxu2 %v851_v52  ;;  %1831 = vmatpush.msra.mxu1 %v956_v58  ;;  %v1073_v52 = vld [vmem:[%s16274_s13 + $0x770] sm:$0xff]  ;;  %v931_v58 = vld [vmem:[%s16274_s13 + $0x300] sm:$0xff] }
 0x66c   :  { %1795 = vmatpush.msra.mxu0 %v1319_v62  ;;  %1680 = vmatpush.msrb.mxu3 %v837_v30  ;;  %v1178_v62 = vld [vmem:[%s16274_s13 + $0xab8] sm:$0xff]  ;;  %v1059_v30 = vld [vmem:[%s16274_s13 + $0x700] sm:$0xff] }
 0x66d   :  { %1760 = vmatpush.msrb.mxu2 %v838_v63  ;;  %1832 = vmatpush.msra.mxu1 %v943_v44  ;;  %v1060_v63 = vld [vmem:[%s16274_s13 + $0x708] sm:$0xff]  ;;  %v918_v44 = vld [vmem:[%s16274_s13 + $0x298] sm:$0xff] }
 0x66e   :  { %1681 = vmatmul.f32.vlgmr.msrb.gmra.mxu3 %v8506_v60  ;;  %1761 = vmatmul.f32.vlgmr.msrb.gmra.mxu2 %v8506_v60 }
 0x66f   :  { %1765 = vmatpush.msra.mxu3 %v1241_v0  ;;  %1796 = vmatpush.msra.mxu0 %v1306_v35  ;;  %v1165_v0 = vld [vmem:[%s16274_s13 + $0xa50] sm:$0xff]  ;;  %v1046_v35 = vld [vmem:[%s16274_s13 + $0x698] sm:$0xff] }
 0x670   :  { %1845 = vmatpush.msra.mxu2 %v1242_v5  ;;  %1833 = vmatpush.msra.mxu1 %v930_v33  ;;  %v1047_v5 = vld [vmem:[%s16274_s13 + $0x6a0] sm:$0xff]  ;;  %v905_v33 = vld [vmem:[%s16274_s13 + $0x230] sm:$0xff] }
 0x671   :  { %1766 = vmatpush.msra.mxu3 %v1228_v36  ;;  %1797 = vmatpush.msra.mxu0 %v1293_v39  ;;  %v1152_v36 = vld [vmem:[%s16274_s13 + $0x9e8] sm:$0xff]  ;;  %v1450_v39 = vld [vmem:[%s16274_s13 + $0x1338] sm:$0xff] }
 0x672   :  { %1846 = vmatpush.msra.mxu2 %v1229_v42  ;;  %1834 = vmatpush.msra.mxu1 %v917_v45  ;;  %v1451_v42 = vld [vmem:[%s16274_s13 + $0x1340] sm:$0xff]  ;;  %v892_v45 = vld [vmem:[%s16274_s13 + $0x1c8] sm:$0xff] }
 0x673   :  { %1767 = vmatpush.msra.mxu3 %v1215_v48  ;;  %1798 = vmatpush.msra.mxu0 %v1280_v51  ;;  %v1139_v48 = vld [vmem:[%s16274_s13 + $0x980] sm:$0xff]  ;;  %v1437_v51 = vld [vmem:[%s16274_s13 + $0x12d0] sm:$0xff] }
 0x674   :  { %1847 = vmatpush.msra.mxu2 %v1216_v54  ;;  %1835 = vmatpush.msra.mxu1 %v904_v28  ;;  %v1438_v54 = vld [vmem:[%s16274_s13 + $0x12d8] sm:$0xff]  ;;  %v879_v28 = vld [vmem:[%s16274_s13 + $0x160] sm:$0xff] }
 0x675   :  { %1768 = vmatpush.msra.mxu3 %v1202_v49  ;;  %1799 = vmatpush.msra.mxu0 %v1267_v29  ;;  %v1126_v49 = vld [vmem:[%s16274_s13 + $0x918] sm:$0xff]  ;;  %v1424_v29 = vld [vmem:[%s16274_s13 + $0x1268] sm:$0xff] }
 0x676   :  { %1848 = vmatpush.msra.mxu2 %v1203_v32  ;;  %1836 = vmatpush.msra.mxu1 %v891_v38  ;;  %v1425_v32 = vld [vmem:[%s16274_s13 + $0x1270] sm:$0xff]  ;;  %v866_v38 = vld [vmem:[%s16274_s13 + $0xf8] sm:$0xff] }
 0x677   :  { %1769 = vmatpush.msra.mxu3 %v1189_v47  ;;  %1800 = vmatpush.msra.mxu0 %v1254_v50  ;;  %v1113_v47 = vld [vmem:[%s16274_s13 + $0x8b0] sm:$0xff]  ;;  %v1411_v50 = vld [vmem:[%s16274_s13 + $0x1200] sm:$0xff] }
 0x678   :  { %1849 = vmatpush.msra.mxu2 %v1190_v53  ;;  %1801 = vmatmul.f32.vlgmr.msra.gmra.mxu0 %v8567_v55  ;;  %v1412_v53 = vld [vmem:[%s16274_s13 + $0x1208] sm:$0xff] }
 0x679   :  { %1837 = vmatpush.msra.mxu1 %v878_v56  ;;  %1900 = vmatpush.msrb.mxu0 %v1463_v57  ;;  %v853_v56 = vld [vmem:[%s16274_s13 + $0x90] sm:$0xff]  ;;  %v1100_v57 = vld [vmem:[%s16274_s13 + $0x848] sm:$0xff] }
 0x67a   :  { %1770 = vmatpush.msra.mxu3 %v1176_v59  ;;  %1850 = vmatpush.msra.mxu2 %v1177_v1  ;;  %v1398_v59 = vld [vmem:[%s16274_s13 + $0x1198] sm:$0xff]  ;;  %v1399_v1 = vld [vmem:[%s16274_s13 + $0x11a0] sm:$0xff] }
 0x67b   :  { %1905 = vmatpush.msra.mxu0 %v1035_v2  ;;  %1838 = vmatpush.msra.mxu1 %v865_v3  ;;  %v840_v2 = vld [vmem:[%s16274_s13 + $0x28] sm:$0xff]  ;;  %v1087_v3 = vld [vmem:[%s16274_s13 + $0x7e0] sm:$0xff] }
 0x67c   :  { %1771 = vmatpush.msra.mxu3 %v1163_v4  ;;  %1851 = vmatpush.msra.mxu2 %v1164_v6  ;;  %v1385_v4 = vld [vmem:[%s16274_s13 + $0x1130] sm:$0xff]  ;;  %v1386_v6 = vld [vmem:[%s16274_s13 + $0x1138] sm:$0xff] }
 0x67d   :  { %1906 = vmatpush.msra.mxu0 %v1022_v7  ;;  %1839 = vmatpush.msra.mxu1 %v852_v8  ;;  %v1244_v7 = vld [vmem:[%s16274_s13 + $0xcc8] sm:$0xff]  ;;  %v1074_v8 = vld [vmem:[%s16274_s13 + $0x778] sm:$0xff] }
 0x67e   :  { %1772 = vmatpush.msra.mxu3 %v1150_v10  ;;  %1852 = vmatpush.msra.mxu2 %v1151_v11  ;;  %v1372_v10 = vld [vmem:[%s16274_s13 + $0x10c8] sm:$0xff]  ;;  %v1373_v11 = vld [vmem:[%s16274_s13 + $0x10d0] sm:$0xff] }
 0x67f   :  { %1907 = vmatpush.msra.mxu0 %v1009_v12  ;;  %1840 = vmatpush.msra.mxu1 %v839_v13  ;;  %v1231_v12 = vld [vmem:[%s16274_s13 + $0xc60] sm:$0xff]  ;;  %v1061_v13 = vld [vmem:[%s16274_s13 + $0x710] sm:$0xff] }
 0x680   :  { %1773 = vmatpush.msra.mxu3 %v1137_v14  ;;  %1841 = vmatmul.f32.vlgmr.msra.gmra.mxu1 %v8506_v60  ;;  %v1359_v14 = vld [vmem:[%s16274_s13 + $0x1060] sm:$0xff] }
 0x681   :  { %1853 = vmatpush.msra.mxu2 %v1138_v15  ;;  %1908 = vmatpush.msra.mxu0 %v996_v16  ;;  %v1360_v15 = vld [vmem:[%s16274_s13 + $0x1068] sm:$0xff]  ;;  %v1218_v16 = vld [vmem:[%s16274_s13 + $0xbf8] sm:$0xff] }
 0x682   :  { %1925 = vmatpush.msrb.mxu1 %v1243_v17  ;;  %7325 = vmatmul.msk.f32.vlgmr.msrb.gmra.mxu0 %vm72_vm0, %v8492_v9  ;;  %v1048_v17 = vld [vmem:[%s16274_s13 + $0x6a8] sm:$0xff] }
 0x683   :  { %1774 = vmatpush.msra.mxu3 %v1124_v41  ;;  %1854 = vmatpush.msra.mxu2 %v1125_v18  ;;  %v1346_v41 = vld [vmem:[%s16274_s13 + $0xff8] sm:$0xff]  ;;  %v1347_v18 = vld [vmem:[%s16274_s13 + $0x1000] sm:$0xff] }
 0x684   :  { %1909 = vmatpush.msra.mxu0 %v983_v19  ;;  %1926 = vmatpush.msrb.mxu1 %v1230_v20  ;;  %v1205_v19 = vld [vmem:[%s16274_s13 + $0xb90] sm:$0xff]  ;;  %v1452_v20 = vld [vmem:[%s16274_s13 + $0x1348] sm:$0xff] }
 0x685   :  { %1775 = vmatpush.msra.mxu3 %v1111_v21  ;;  %1855 = vmatpush.msra.mxu2 %v1112_v22  ;;  %v1333_v21 = vld [vmem:[%s16274_s13 + $0xf90] sm:$0xff]  ;;  %v1334_v22 = vld [vmem:[%s16274_s13 + $0xf98] sm:$0xff] }
 0x686   :  { %1910 = vmatpush.msra.mxu0 %v970_v23  ;;  %1927 = vmatpush.msrb.mxu1 %v1217_v25  ;;  %v1192_v23 = vld [vmem:[%s16274_s13 + $0xb28] sm:$0xff]  ;;  %v1439_v25 = vld [vmem:[%s16274_s13 + $0x12e0] sm:$0xff] }
 0x687   :  { %1776 = vmatpush.msra.mxu3 %v1098_v26  ;;  %1856 = vmatpush.msra.mxu2 %v1099_v27  ;;  %v1320_v26 = vld [vmem:[%s16274_s13 + $0xf28] sm:$0xff]  ;;  %v1321_v27 = vld [vmem:[%s16274_s13 + $0xf30] sm:$0xff] }
 0x688   :  { %1911 = vmatpush.msra.mxu0 %v957_v61  ;;  %1928 = vmatpush.msrb.mxu1 %v1204_v31  ;;  %v1179_v61 = vld [vmem:[%s16274_s13 + $0xac0] sm:$0xff]  ;;  %v1426_v31 = vld [vmem:[%s16274_s13 + $0x1278] sm:$0xff] }
 0x689   :  { %1777 = vmatpush.msra.mxu3 %v1085_v34  ;;  %1857 = vmatpush.msra.mxu2 %v1086_v37  ;;  %v1307_v34 = vld [vmem:[%s16274_s13 + $0xec0] sm:$0xff]  ;;  %v1308_v37 = vld [vmem:[%s16274_s13 + $0xec8] sm:$0xff] }
 0x68a   :  { %1912 = vmatpush.msra.mxu0 %v944_v40  ;;  %1929 = vmatpush.msrb.mxu1 %v1191_v43  ;;  %v1166_v40 = vld [vmem:[%s16274_s13 + $0xa58] sm:$0xff]  ;;  %v1413_v43 = vld [vmem:[%s16274_s13 + $0x1210] sm:$0xff] }
 0x68b   :  { %1778 = vmatpush.msra.mxu3 %v1072_v46  ;;  %1858 = vmatpush.msra.mxu2 %v1073_v52  ;;  %v1294_v46 = vld [vmem:[%s16274_s13 + $0xe58] sm:$0xff]  ;;  %v1295_v52 = vld [vmem:[%s16274_s13 + $0xe60] sm:$0xff] }
 0x68c   :  { %1913 = vmatpush.msra.mxu0 %v931_v58  ;;  %1930 = vmatpush.msrb.mxu1 %v1178_v62  ;;  %v1153_v58 = vld [vmem:[%s16274_s13 + $0x9f0] sm:$0xff]  ;;  %v1400_v62 = vld [vmem:[%s16274_s13 + $0x11a8] sm:$0xff] }
 0x68d   :  { %1779 = vmatpush.msra.mxu3 %v1059_v30  ;;  %1859 = vmatpush.msra.mxu2 %v1060_v63  ;;  %v1281_v30 = vld [vmem:[%s16274_s13 + $0xdf0] sm:$0xff]  ;;  %v1282_v63 = vld [vmem:[%s16274_s13 + $0xdf8] sm:$0xff] }
 0x68e   :  { %1914 = vmatpush.msra.mxu0 %v918_v44  ;;  %1931 = vmatpush.msrb.mxu1 %v1165_v0  ;;  %v1140_v44 = vld [vmem:[%s16274_s13 + $0x988] sm:$0xff]  ;;  %v1387_v0 = vld [vmem:[%s16274_s13 + $0x1140] sm:$0xff] }
 0x68f   :  { %1780 = vmatpush.msra.mxu3 %v1046_v35  ;;  %1860 = vmatpush.msra.mxu2 %v1047_v5  ;;  %v1268_v35 = vld [vmem:[%s16274_s13 + $0xd88] sm:$0xff]  ;;  %v1269_v5 = vld [vmem:[%s16274_s13 + $0xd90] sm:$0xff] }
 0x690   :  { %1915 = vmatpush.msra.mxu0 %v905_v33  ;;  %1932 = vmatpush.msrb.mxu1 %v1152_v36  ;;  %v1127_v33 = vld [vmem:[%s16274_s13 + $0x920] sm:$0xff]  ;;  %v1374_v36 = vld [vmem:[%s16274_s13 + $0x10d8] sm:$0xff] }
 0x691   :  { %1781 = vmatmul.f32.vlgmr.msra.gmra.mxu3 %v8535_v24  ;;  %1861 = vmatmul.f32.vlgmr.msra.gmra.mxu2 %v8535_v24 }
 0x692   :  { %1865 = vmatpush.msrb.mxu3 %v1450_v39  ;;  %1945 = vmatpush.msrb.mxu2 %v1451_v42  ;;  %v1255_v39 = vld [vmem:[%s16274_s13 + $0xd20] sm:$0xff]  ;;  %v1256_v42 = vld [vmem:[%s16274_s13 + $0xd28] sm:$0xff] }
 0x693   :  { %1916 = vmatpush.msra.mxu0 %v892_v45  ;;  %1933 = vmatpush.msrb.mxu1 %v1139_v48  ;;  %v1114_v45 = vld [vmem:[%s16274_s13 + $0x8b8] sm:$0xff]  ;;  %v1361_v48 = vld [vmem:[%s16274_s13 + $0x1070] sm:$0xff] }
 0x694   :  { %1866 = vmatpush.msrb.mxu3 %v1437_v51  ;;  %1946 = vmatpush.msrb.mxu2 %v1438_v54  ;;  %v1464_v51 = vld [vmem:[%s16274_s13 + $0x13a8] sm:$0xff]  ;;  %v1465_v54 = vld [vmem:[%s16274_s13 + $0x13b0] sm:$0xff] }
 0x695   :  { %1917 = vmatpush.msra.mxu0 %v879_v28  ;;  %1934 = vmatpush.msrb.mxu1 %v1126_v49  ;;  %v1036_v28 = vld [vmem:[%s16274_s13 + $0x648] sm:$0xff]  ;;  %v1101_v49 = vld [vmem:[%s16274_s13 + $0x850] sm:$0xff] }
 0x696   :  { %1867 = vmatpush.msrb.mxu3 %v1424_v29  ;;  %1947 = vmatpush.msrb.mxu2 %v1425_v32  ;;  %v1348_v29 = vld [vmem:[%s16274_s13 + $0x1008] sm:$0xff]  ;;  %v1037_v32 = vld [vmem:[%s16274_s13 + $0x650] sm:$0xff] }
 0x697   :  { %1918 = vmatpush.msra.mxu0 %v866_v38  ;;  %1935 = vmatpush.msrb.mxu1 %v1113_v47  ;;  %v1023_v38 = vld [vmem:[%s16274_s13 + $0x5e0] sm:$0xff]  ;;  %v1088_v47 = vld [vmem:[%s16274_s13 + $0x7e8] sm:$0xff] }
 0x698   :  { %1868 = vmatpush.msrb.mxu3 %v1411_v50  ;;  %1948 = vmatpush.msrb.mxu2 %v1412_v53  ;;  %v1335_v50 = vld [vmem:[%s16274_s13 + $0xfa0] sm:$0xff]  ;;  %v1024_v53 = vld [vmem:[%s16274_s13 + $0x5e8] sm:$0xff] }
 0x699   :  { %1919 = vmatpush.msra.mxu0 %v853_v56  ;;  %1936 = vmatpush.msrb.mxu1 %v1100_v57  ;;  %v1010_v56 = vld [vmem:[%s16274_s13 + $0x578] sm:$0xff]  ;;  %v1075_v57 = vld [vmem:[%s16274_s13 + $0x780] sm:$0xff] }
 0x69a   :  { %1869 = vmatpush.msrb.mxu3 %v1398_v59  ;;  %1949 = vmatpush.msrb.mxu2 %v1399_v1  ;;  %v1322_v59 = vld [vmem:[%s16274_s13 + $0xf38] sm:$0xff]  ;;  %v1011_v1 = vld [vmem:[%s16274_s13 + $0x580] sm:$0xff] }
 0x69b   :  { %1920 = vmatpush.msra.mxu0 %v840_v2  ;;  %1937 = vmatpush.msrb.mxu1 %v1087_v3  ;;  %v997_v2 = vld [vmem:[%s16274_s13 + $0x510] sm:$0xff]  ;;  %v1062_v3 = vld [vmem:[%s16274_s13 + $0x718] sm:$0xff] }
 0x69c   :  { %1870 = vmatpush.msrb.mxu3 %v1385_v4  ;;  %1921 = vmatmul.f32.vlgmr.msra.gmra.mxu0 %v8506_v60  ;;  %v1309_v4 = vld [vmem:[%s16274_s13 + $0xed0] sm:$0xff] }
 0x69d   :  { %1950 = vmatpush.msrb.mxu2 %v1386_v6  ;;  %2005 = vmatpush.msrb.mxu0 %v1244_v7  ;;  %v998_v6 = vld [vmem:[%s16274_s13 + $0x518] sm:$0xff]  ;;  %v984_v7 = vld [vmem:[%s16274_s13 + $0x4a8] sm:$0xff] }
 0x69e   :  { %1938 = vmatpush.msrb.mxu1 %v1074_v8  ;;  %1871 = vmatpush.msrb.mxu3 %v1372_v10  ;;  %v1049_v8 = vld [vmem:[%s16274_s13 + $0x6b0] sm:$0xff]  ;;  %v1296_v10 = vld [vmem:[%s16274_s13 + $0xe68] sm:$0xff] }
 0x69f   :  { %1951 = vmatpush.msrb.mxu2 %v1373_v11  ;;  %2006 = vmatpush.msrb.mxu0 %v1231_v12  ;;  %v985_v11 = vld [vmem:[%s16274_s13 + $0x4b0] sm:$0xff]  ;;  %v971_v12 = vld [vmem:[%s16274_s13 + $0x440] sm:$0xff] }
 0x6a0   :  { %1939 = vmatpush.msrb.mxu1 %v1061_v13  ;;  %1872 = vmatpush.msrb.mxu3 %v1359_v14  ;;  %v1453_v13 = vld [vmem:[%s16274_s13 + $0x1350] sm:$0xff]  ;;  %v1283_v14 = vld [vmem:[%s16274_s13 + $0xe00] sm:$0xff] }
 0x6a1   :  { %1952 = vmatpush.msrb.mxu2 %v1360_v15  ;;  %2007 = vmatpush.msrb.mxu0 %v1218_v16  ;;  %v972_v15 = vld [vmem:[%s16274_s13 + $0x448] sm:$0xff]  ;;  %v958_v16 = vld [vmem:[%s16274_s13 + $0x3d8] sm:$0xff] }
 0x6a2   :  { %1940 = vmatpush.msrb.mxu1 %v1048_v17  ;;  %1873 = vmatpush.msrb.mxu3 %v1346_v41  ;;  %v1440_v17 = vld [vmem:[%s16274_s13 + $0x12e8] sm:$0xff]  ;;  %v1270_v41 = vld [vmem:[%s16274_s13 + $0xd98] sm:$0xff] }
 0x6a3   :  { %1941 = vmatmul.f32.vlgmr.msrb.gmra.mxu1 %v8535_v24  ;;  %1953 = vmatpush.msrb.mxu2 %v1347_v18  ;;  %v959_v18 = vld [vmem:[%s16274_s13 + $0x3e0] sm:$0xff] }
 0x6a4   :  { %2008 = vmatpush.msrb.mxu0 %v1205_v19  ;;  %2025 = vmatpush.msra.mxu1 %v1452_v20  ;;  %v945_v19 = vld [vmem:[%s16274_s13 + $0x370] sm:$0xff]  ;;  %v1427_v20 = vld [vmem:[%s16274_s13 + $0x1280] sm:$0xff] }
 0x6a5   :  { %1874 = vmatpush.msrb.mxu3 %v1333_v21  ;;  %1954 = vmatpush.msrb.mxu2 %v1334_v22  ;;  %v1257_v21 = vld [vmem:[%s16274_s13 + $0xd30] sm:$0xff]  ;;  %v946_v22 = vld [vmem:[%s16274_s13 + $0x378] sm:$0xff] }
 0x6a6   :  { %2009 = vmatpush.msrb.mxu0 %v1192_v23  ;;  %2026 = vmatpush.msra.mxu1 %v1439_v25  ;;  %v1414_v23 = vld [vmem:[%s16274_s13 + $0x1218] sm:$0xff] }
 0x6a7   :  { %1875 = vmatpush.msrb.mxu3 %v1320_v26  ;;  %1955 = vmatpush.msrb.mxu2 %v1321_v27  ;;  %v1466_v25 = vld [vmem:[%s16274_s13 + $0x13b8] sm:$0xff]  ;;  %v932_v26 = vld [vmem:[%s16274_s13 + $0x308] sm:$0xff]  ;;  %v933_v27 = vld [vmem:[%s16274_s13 + $0x310] sm:$0xff] }
 0x6a8   :  { %2010 = vmatpush.msrb.mxu0 %v1179_v61  ;;  %2027 = vmatpush.msra.mxu1 %v1426_v31  ;;  %v1038_v61 = vld [vmem:[%s16274_s13 + $0x658] sm:$0xff]  ;;  %v1401_v31 = vld [vmem:[%s16274_s13 + $0x11b0] sm:$0xff] }
 0x6a9   :  { %1876 = vmatpush.msrb.mxu3 %v1307_v34  ;;  %1956 = vmatpush.msrb.mxu2 %v1308_v37  ;;  %v919_v34 = vld [vmem:[%s16274_s13 + $0x2a0] sm:$0xff]  ;;  %v920_v37 = vld [vmem:[%s16274_s13 + $0x2a8] sm:$0xff] }
 0x6aa   :  { %2011 = vmatpush.msrb.mxu0 %v1166_v40  ;;  %2028 = vmatpush.msra.mxu1 %v1413_v43  ;;  %v1025_v40 = vld [vmem:[%s16274_s13 + $0x5f0] sm:$0xff]  ;;  %v1388_v43 = vld [vmem:[%s16274_s13 + $0x1148] sm:$0xff] }
 0x6ab   :  { %1877 = vmatpush.msrb.mxu3 %v1294_v46  ;;  %1957 = vmatpush.msrb.mxu2 %v1295_v52  ;;  %v906_v46 = vld [vmem:[%s16274_s13 + $0x238] sm:$0xff]  ;;  %v907_v52 = vld [vmem:[%s16274_s13 + $0x240] sm:$0xff] }
 0x6ac   :  { %2012 = vmatpush.msrb.mxu0 %v1153_v58  ;;  %2029 = vmatpush.msra.mxu1 %v1400_v62  ;;  %v1012_v58 = vld [vmem:[%s16274_s13 + $0x588] sm:$0xff]  ;;  %v1375_v62 = vld [vmem:[%s16274_s13 + $0x10e0] sm:$0xff] }
 0x6ad   :  { %1878 = vmatpush.msrb.mxu3 %v1281_v30  ;;  %1958 = vmatpush.msrb.mxu2 %v1282_v63  ;;  %v893_v30 = vld [vmem:[%s16274_s13 + $0x1d0] sm:$0xff]  ;;  %v894_v63 = vld [vmem:[%s16274_s13 + $0x1d8] sm:$0xff] }
 0x6ae   :  { %2013 = vmatpush.msrb.mxu0 %v1140_v44  ;;  %2030 = vmatpush.msra.mxu1 %v1387_v0  ;;  %v999_v44 = vld [vmem:[%s16274_s13 + $0x520] sm:$0xff]  ;;  %v1362_v0 = vld [vmem:[%s16274_s13 + $0x1078] sm:$0xff] }
 0x6af   :  { %1879 = vmatpush.msrb.mxu3 %v1268_v35  ;;  %1959 = vmatpush.msrb.mxu2 %v1269_v5  ;;  %v880_v35 = vld [vmem:[%s16274_s13 + $0x168] sm:$0xff]  ;;  %v881_v5 = vld [vmem:[%s16274_s13 + $0x170] sm:$0xff] }
 0x6b0   :  { %2014 = vmatpush.msrb.mxu0 %v1127_v33  ;;  %2031 = vmatpush.msra.mxu1 %v1374_v36  ;;  %v986_v33 = vld [vmem:[%s16274_s13 + $0x4b8] sm:$0xff]  ;;  %v1349_v36 = vld [vmem:[%s16274_s13 + $0x1010] sm:$0xff] }
 0x6b1   :  { %1880 = vmatpush.msrb.mxu3 %v1255_v39  ;;  %1960 = vmatpush.msrb.mxu2 %v1256_v42  ;;  %v867_v39 = vld [vmem:[%s16274_s13 + $0x100] sm:$0xff]  ;;  %v868_v42 = vld [vmem:[%s16274_s13 + $0x108] sm:$0xff] }
 0x6b2   :  { %2015 = vmatpush.msrb.mxu0 %v1114_v45  ;;  %2032 = vmatpush.msra.mxu1 %v1361_v48  ;;  %v973_v45 = vld [vmem:[%s16274_s13 + $0x450] sm:$0xff]  ;;  %v1336_v48 = vld [vmem:[%s16274_s13 + $0xfa8] sm:$0xff] }
 0x6b3   :  { %1881 = vmatmul.f32.vlgmr.msrb.gmra.mxu3 %v8567_v55  ;;  %1961 = vmatmul.f32.vlgmr.msrb.gmra.mxu2 %v8567_v55 }
 0x6b4   :  { %1980 = vmatpush.msra.mxu3 %v1464_v51  ;;  %2060 = vmatpush.msra.mxu2 %v1465_v54  ;;  %v854_v51 = vld [vmem:[%s16274_s13 + $0x98] sm:$0xff]  ;;  %v855_v54 = vld [vmem:[%s16274_s13 + $0xa0] sm:$0xff] }
 0x6b5   :  { %2016 = vmatpush.msrb.mxu0 %v1101_v49  ;;  %2033 = vmatpush.msra.mxu1 %v1348_v29  ;;  %v1323_v49 = vld [vmem:[%s16274_s13 + $0xf40] sm:$0xff]  ;;  %v841_v29 = vld [vmem:[%s16274_s13 + $0x30] sm:$0xff] }
 0x6b6   :  { %1985 = vmatpush.msrb.mxu3 %v1036_v28  ;;  %2065 = vmatpush.msrb.mxu2 %v1037_v32  ;;  %v960_v28 = vld [vmem:[%s16274_s13 + $0x3e8] sm:$0xff]  ;;  %v842_v32 = vld [vmem:[%s16274_s13 + $0x38] sm:$0xff] }
 0x6b7   :  { %2017 = vmatpush.msrb.mxu0 %v1088_v47  ;;  %2034 = vmatpush.msra.mxu1 %v1335_v50  ;;  %v1245_v47 = vld [vmem:[%s16274_s13 + $0xcd0] sm:$0xff]  ;;  %v1310_v50 = vld [vmem:[%s16274_s13 + $0xed8] sm:$0xff] }
 0x6b8   :  { %1986 = vmatpush.msrb.mxu3 %v1023_v38  ;;  %2066 = vmatpush.msrb.mxu2 %v1024_v53  ;;  %v947_v38 = vld [vmem:[%s16274_s13 + $0x380] sm:$0xff]  ;;  %v1246_v53 = vld [vmem:[%s16274_s13 + $0xcd8] sm:$0xff] }
 0x6b9   :  { %2018 = vmatpush.msrb.mxu0 %v1075_v57  ;;  %2035 = vmatpush.msra.mxu1 %v1322_v59  ;;  %v1232_v57 = vld [vmem:[%s16274_s13 + $0xc68] sm:$0xff]  ;;  %v1297_v59 = vld [vmem:[%s16274_s13 + $0xe70] sm:$0xff] }
 0x6ba   :  { %1987 = vmatpush.msrb.mxu3 %v1010_v56  ;;  %2067 = vmatpush.msrb.mxu2 %v1011_v1  ;;  %v934_v56 = vld [vmem:[%s16274_s13 + $0x318] sm:$0xff]  ;;  %v1233_v1 = vld [vmem:[%s16274_s13 + $0xc70] sm:$0xff] }
 0x6bb   :  { %2019 = vmatpush.msrb.mxu0 %v1062_v3  ;;  %2036 = vmatpush.msra.mxu1 %v1309_v4  ;;  %v1219_v3 = vld [vmem:[%s16274_s13 + $0xc00] sm:$0xff]  ;;  %v1284_v4 = vld [vmem:[%s16274_s13 + $0xe08] sm:$0xff] }
 0x6bc   :  { %1988 = vmatpush.msrb.mxu3 %v997_v2  ;;  %2068 = vmatpush.msrb.mxu2 %v998_v6  ;;  %v921_v2 = vld [vmem:[%s16274_s13 + $0x2b0] sm:$0xff]  ;;  %v1220_v6 = vld [vmem:[%s16274_s13 + $0xc08] sm:$0xff] }
 0x6bd   :  { %7326 = vmatmul.msk.f32.vlgmr.msra.gmra.mxu3 %vm72_vm0, %v8492_v9  ;;  %7327 = vmatmul.msk.f32.vlgmr.msra.gmra.mxu2 %vm72_vm0, %v8492_v9 }
 0x6be   :  { %1989 = vmatpush.msrb.mxu3 %v984_v7  ;;  %2020 = vmatpush.msrb.mxu0 %v1049_v8  ;;  %v908_v7 = vld [vmem:[%s16274_s13 + $0x248] sm:$0xff]  ;;  %v1206_v8 = vld [vmem:[%s16274_s13 + $0xb98] sm:$0xff] }
 0x6bf   :  { %2037 = vmatpush.msra.mxu1 %v1296_v10  ;;  %2069 = vmatpush.msrb.mxu2 %v985_v11  ;;  %v1271_v10 = vld [vmem:[%s16274_s13 + $0xda0] sm:$0xff] }
 0x6c0   :  { %2021 = vmatmul.f32.vlgmr.msrb.gmra.mxu0 %v8535_v24  ;;  %1990 = vmatpush.msrb.mxu3 %v971_v12  ;;  %v1207_v11 = vld [vmem:[%s16274_s13 + $0xba0] sm:$0xff] }
 0x6c1   :  { %2105 = vmatpush.msra.mxu0 %v1453_v13  ;;  %2038 = vmatpush.msra.mxu1 %v1283_v14  ;;  %v895_v12 = vld [vmem:[%s16274_s13 + $0x1e0] sm:$0xff]  ;;  %v1193_v13 = vld [vmem:[%s16274_s13 + $0xb30] sm:$0xff]  ;;  %v1258_v14 = vld [vmem:[%s16274_s13 + $0xd38] sm:$0xff] }
 0x6c2   :  { %2070 = vmatpush.msrb.mxu2 %v972_v15  ;;  %1991 = vmatpush.msrb.mxu3 %v958_v16  ;;  %v1194_v15 = vld [vmem:[%s16274_s13 + $0xb38] sm:$0xff] }
 0x6c3   :  { %2106 = vmatpush.msra.mxu0 %v1440_v17  ;;  %2039 = vmatpush.msra.mxu1 %v1270_v41  ;;  %v882_v16 = vld [vmem:[%s16274_s13 + $0x178] sm:$0xff]  ;;  %v1467_v17 = vld [vmem:[%s16274_s13 + $0x13c0] sm:$0xff]  ;;  %v1180_v41 = vld [vmem:[%s16274_s13 + $0xac8] sm:$0xff] }
 0x6c4   :  { %2071 = vmatpush.msrb.mxu2 %v959_v18  ;;  %1992 = vmatpush.msrb.mxu3 %v945_v19  ;;  %v1181_v18 = vld [vmem:[%s16274_s13 + $0xad0] sm:$0xff]  ;;  %v1039_v19 = vld [vmem:[%s16274_s13 + $0x660] sm:$0xff] }
 0x6c5   :  { %2107 = vmatpush.msra.mxu0 %v1427_v20  ;;  %2040 = vmatpush.msra.mxu1 %v1257_v21  ;;  %v869_v20 = vld [vmem:[%s16274_s13 + $0x110] sm:$0xff]  ;;  %v1167_v21 = vld [vmem:[%s16274_s13 + $0xa60] sm:$0xff] }
 0x6c6   :  { %2072 = vmatpush.msrb.mxu2 %v946_v22  ;;  %2041 = vmatmul.f32.vlgmr.msra.gmra.mxu1 %v8567_v55  ;;  %v1168_v22 = vld [vmem:[%s16274_s13 + $0xa68] sm:$0xff] }
 0x6c7   :  { %2108 = vmatpush.msra.mxu0 %v1414_v23  ;;  %2140 = vmatpush.msrb.mxu1 %v1466_v25  ;;  %v1026_v23 = vld [vmem:[%s16274_s13 + $0x5f8] sm:$0xff]  ;;  %v856_v25 = vld [vmem:[%s16274_s13 + $0xa8] sm:$0xff] }
 0x6c8   :  { %1993 = vmatpush.msrb.mxu3 %v932_v26  ;;  %2073 = vmatpush.msrb.mxu2 %v933_v27  ;;  %v1154_v26 = vld [vmem:[%s16274_s13 + $0x9f8] sm:$0xff]  ;;  %v1155_v27 = vld [vmem:[%s16274_s13 + $0xa00] sm:$0xff] }
 0x6c9   :  { %2145 = vmatpush.msra.mxu1 %v1038_v61  ;;  %2109 = vmatpush.msra.mxu0 %v1401_v31  ;;  %v1013_v61 = vld [vmem:[%s16274_s13 + $0x590] sm:$0xff]  ;;  %v843_v31 = vld [vmem:[%s16274_s13 + $0x40] sm:$0xff] }
 0x6ca   :  { %1994 = vmatpush.msrb.mxu3 %v919_v34  ;;  %2074 = vmatpush.msrb.mxu2 %v920_v37  ;;  %v1141_v34 = vld [vmem:[%s16274_s13 + $0x990] sm:$0xff]  ;;  %v1142_v37 = vld [vmem:[%s16274_s13 + $0x998] sm:$0xff] }
 0x6cb   :  { %2146 = vmatpush.msra.mxu1 %v1025_v40  ;;  %2110 = vmatpush.msra.mxu0 %v1388_v43  ;;  %v1000_v40 = vld [vmem:[%s16274_s13 + $0x528] sm:$0xff]  ;;  %v1247_v43 = vld [vmem:[%s16274_s13 + $0xce0] sm:$0xff] }
 0x6cc   :  { %1995 = vmatpush.msrb.mxu3 %v906_v46  ;;  %2075 = vmatpush.msrb.mxu2 %v907_v52  ;;  %v1128_v46 = vld [vmem:[%s16274_s13 + $0x928] sm:$0xff]  ;;  %v1129_v52 = vld [vmem:[%s16274_s13 + $0x930] sm:$0xff] }
 0x6cd   :  { %2147 = vmatpush.msra.mxu1 %v1012_v58  ;;  %2111 = vmatpush.msra.mxu0 %v1375_v62  ;;  %v987_v58 = vld [vmem:[%s16274_s13 + $0x4c0] sm:$0xff]  ;;  %v1234_v62 = vld [vmem:[%s16274_s13 + $0xc78] sm:$0xff] }
 0x6ce   :  { %1996 = vmatpush.msrb.mxu3 %v893_v30  ;;  %2076 = vmatpush.msrb.mxu2 %v894_v63  ;;  %v1115_v30 = vld [vmem:[%s16274_s13 + $0x8c0] sm:$0xff]  ;;  %v1116_v63 = vld [vmem:[%s16274_s13 + $0x8c8] sm:$0xff] }
 0x6cf   :  { %2148 = vmatpush.msra.mxu1 %v999_v44  ;;  %2112 = vmatpush.msra.mxu0 %v1362_v0  ;;  %v974_v44 = vld [vmem:[%s16274_s13 + $0x458] sm:$0xff]  ;;  %v1221_v0 = vld [vmem:[%s16274_s13 + $0xc10] sm:$0xff] }
 0x6d0   :  { %7328 = vmatmul.msk.f32.vlgmr.msrb.gmra.mxu1 %vm72_vm0, %v8492_v9  ;;  %1997 = vmatpush.msrb.mxu3 %v880_v35  ;;  %v1102_v35 = vld [vmem:[%s16274_s13 + $0x858] sm:$0xff] }
 0x6d1   :  { %2077 = vmatpush.msrb.mxu2 %v881_v5  ;;  %2149 = vmatpush.msra.mxu1 %v986_v33  ;;  %v1103_v5 = vld [vmem:[%s16274_s13 + $0x860] sm:$0xff]  ;;  %v961_v33 = vld [vmem:[%s16274_s13 + $0x3f0] sm:$0xff] }
 0x6d2   :  { %2113 = vmatpush.msra.mxu0 %v1349_v36  ;;  %1998 = vmatpush.msrb.mxu3 %v867_v39  ;;  %v1208_v36 = vld [vmem:[%s16274_s13 + $0xba8] sm:$0xff]  ;;  %v1089_v39 = vld [vmem:[%s16274_s13 + $0x7f0] sm:$0xff] }
 0x6d3   :  { %2078 = vmatpush.msrb.mxu2 %v868_v42  ;;  %2150 = vmatpush.msra.mxu1 %v973_v45  ;;  %v1090_v42 = vld [vmem:[%s16274_s13 + $0x7f8] sm:$0xff]  ;;  %v948_v45 = vld [vmem:[%s16274_s13 + $0x388] sm:$0xff] }
 0x6d4   :  { %2114 = vmatpush.msra.mxu0 %v1336_v48  ;;  %1999 = vmatpush.msrb.mxu3 %v854_v51  ;;  %v1195_v48 = vld [vmem:[%s16274_s13 + $0xb40] sm:$0xff]  ;;  %v1076_v51 = vld [vmem:[%s16274_s13 + $0x788] sm:$0xff] }
 0x6d5   :  { %2079 = vmatpush.msrb.mxu2 %v855_v54  ;;  %2151 = vmatpush.msra.mxu1 %v960_v28  ;;  %v1077_v54 = vld [vmem:[%s16274_s13 + $0x790] sm:$0xff]  ;;  %v935_v28 = vld [vmem:[%s16274_s13 + $0x320] sm:$0xff] }
 0x6d6   :  { %2115 = vmatpush.msra.mxu0 %v1323_v49  ;;  %2000 = vmatpush.msrb.mxu3 %v841_v29  ;;  %v1182_v49 = vld [vmem:[%s16274_s13 + $0xad8] sm:$0xff]  ;;  %v1063_v29 = vld [vmem:[%s16274_s13 + $0x720] sm:$0xff] }
 0x6d7   :  { %2080 = vmatpush.msrb.mxu2 %v842_v32  ;;  %2152 = vmatpush.msra.mxu1 %v947_v38  ;;  %v1064_v32 = vld [vmem:[%s16274_s13 + $0x728] sm:$0xff]  ;;  %v922_v38 = vld [vmem:[%s16274_s13 + $0x2b8] sm:$0xff] }
 0x6d8   :  { %2001 = vmatmul.f32.vlgmr.msrb.gmra.mxu3 %v8506_v60  ;;  %2081 = vmatmul.f32.vlgmr.msrb.gmra.mxu2 %v8506_v60 }
 0x6d9   :  { %2085 = vmatpush.msra.mxu3 %v1245_v47  ;;  %2116 = vmatpush.msra.mxu0 %v1310_v50  ;;  %v1169_v47 = vld [vmem:[%s16274_s13 + $0xa70] sm:$0xff]  ;;  %v1050_v50 = vld [vmem:[%s16274_s13 + $0x6b8] sm:$0xff] }
 0x6da   :  { %2165 = vmatpush.msra.mxu2 %v1246_v53  ;;  %2153 = vmatpush.msra.mxu1 %v934_v56  ;;  %v1051_v53 = vld [vmem:[%s16274_s13 + $0x6c0] sm:$0xff]  ;;  %v909_v56 = vld [vmem:[%s16274_s13 + $0x250] sm:$0xff] }
 0x6db   :  { %2086 = vmatpush.msra.mxu3 %v1232_v57  ;;  %2117 = vmatpush.msra.mxu0 %v1297_v59  ;;  %v1156_v57 = vld [vmem:[%s16274_s13 + $0xa08] sm:$0xff]  ;;  %v1454_v59 = vld [vmem:[%s16274_s13 + $0x1358] sm:$0xff] }
 0x6dc   :  { %2166 = vmatpush.msra.mxu2 %v1233_v1  ;;  %2154 = vmatpush.msra.mxu1 %v921_v2  ;;  %v1455_v1 = vld [vmem:[%s16274_s13 + $0x1360] sm:$0xff]  ;;  %v896_v2 = vld [vmem:[%s16274_s13 + $0x1e8] sm:$0xff] }
 0x6dd   :  { %2087 = vmatpush.msra.mxu3 %v1219_v3  ;;  %2118 = vmatpush.msra.mxu0 %v1284_v4  ;;  %v1143_v3 = vld [vmem:[%s16274_s13 + $0x9a0] sm:$0xff]  ;;  %v1441_v4 = vld [vmem:[%s16274_s13 + $0x12f0] sm:$0xff] }
 0x6de   :  { %2167 = vmatpush.msra.mxu2 %v1220_v6  ;;  %2155 = vmatpush.msra.mxu1 %v908_v7  ;;  %v1442_v6 = vld [vmem:[%s16274_s13 + $0x12f8] sm:$0xff]  ;;  %v883_v7 = vld [vmem:[%s16274_s13 + $0x180] sm:$0xff] }
 0x6df   :  { %2088 = vmatpush.msra.mxu3 %v1206_v8  ;;  %2119 = vmatpush.msra.mxu0 %v1271_v10  ;;  %v1130_v8 = vld [vmem:[%s16274_s13 + $0x938] sm:$0xff]  ;;  %v1428_v10 = vld [vmem:[%s16274_s13 + $0x1288] sm:$0xff] }
 0x6e0   :  { %2168 = vmatpush.msra.mxu2 %v1207_v11  ;;  %2156 = vmatpush.msra.mxu1 %v895_v12  ;;  %v1429_v11 = vld [vmem:[%s16274_s13 + $0x1290] sm:$0xff]  ;;  %v870_v12 = vld [vmem:[%s16274_s13 + $0x118] sm:$0xff] }
 0x6e1   :  { %2089 = vmatpush.msra.mxu3 %v1193_v13  ;;  %2120 = vmatpush.msra.mxu0 %v1258_v14  ;;  %v1117_v13 = vld [vmem:[%s16274_s13 + $0x8d0] sm:$0xff]  ;;  %v1415_v14 = vld [vmem:[%s16274_s13 + $0x1220] sm:$0xff] }
 0x6e2   :  { %2169 = vmatpush.msra.mxu2 %v1194_v15  ;;  %2121 = vmatmul.f32.vlgmr.msra.gmra.mxu0 %v8567_v55  ;;  %v1416_v15 = vld [vmem:[%s16274_s13 + $0x1228] sm:$0xff] }
 0x6e3   :  { %2157 = vmatpush.msra.mxu1 %v882_v16  ;;  %2220 = vmatpush.msrb.mxu0 %v1467_v17  ;;  %v857_v16 = vld [vmem:[%s16274_s13 + $0xb0] sm:$0xff]  ;;  %v1104_v17 = vld [vmem:[%s16274_s13 + $0x868] sm:$0xff] }
 0x6e4   :  { %2090 = vmatpush.msra.mxu3 %v1180_v41  ;;  %2170 = vmatpush.msra.mxu2 %v1181_v18  ;;  %v1402_v41 = vld [vmem:[%s16274_s13 + $0x11b8] sm:$0xff]  ;;  %v1403_v18 = vld [vmem:[%s16274_s13 + $0x11c0] sm:$0xff] }
 0x6e5   :  { %2225 = vmatpush.msra.mxu0 %v1039_v19  ;;  %2158 = vmatpush.msra.mxu1 %v869_v20  ;;  %v844_v19 = vld [vmem:[%s16274_s13 + $0x48] sm:$0xff]  ;;  %v1091_v20 = vld [vmem:[%s16274_s13 + $0x800] sm:$0xff] }
 0x6e6   :  { %2091 = vmatpush.msra.mxu3 %v1167_v21  ;;  %2171 = vmatpush.msra.mxu2 %v1168_v22  ;;  %v1389_v21 = vld [vmem:[%s16274_s13 + $0x1150] sm:$0xff]  ;;  %v1390_v22 = vld [vmem:[%s16274_s13 + $0x1158] sm:$0xff] }
 0x6e7   :  { %2226 = vmatpush.msra.mxu0 %v1026_v23  ;;  %2159 = vmatpush.msra.mxu1 %v856_v25  ;;  %v1248_v23 = vld [vmem:[%s16274_s13 + $0xce8] sm:$0xff]  ;;  %v1078_v25 = vld [vmem:[%s16274_s13 + $0x798] sm:$0xff] }
 0x6e8   :  { %2092 = vmatpush.msra.mxu3 %v1154_v26  ;;  %2172 = vmatpush.msra.mxu2 %v1155_v27  ;;  %v1376_v26 = vld [vmem:[%s16274_s13 + $0x10e8] sm:$0xff]  ;;  %v1377_v27 = vld [vmem:[%s16274_s13 + $0x10f0] sm:$0xff] }
 0x6e9   :  { %2227 = vmatpush.msra.mxu0 %v1013_v61  ;;  %2160 = vmatpush.msra.mxu1 %v843_v31  ;;  %v1235_v61 = vld [vmem:[%s16274_s13 + $0xc80] sm:$0xff]  ;;  %v1065_v31 = vld [vmem:[%s16274_s13 + $0x730] sm:$0xff] }
 0x6ea   :  { %2093 = vmatpush.msra.mxu3 %v1141_v34  ;;  %2161 = vmatmul.f32.vlgmr.msra.gmra.mxu1 %v8506_v60  ;;  %v1363_v34 = vld [vmem:[%s16274_s13 + $0x1080] sm:$0xff] }
 0x6eb   :  { %2173 = vmatpush.msra.mxu2 %v1142_v37  ;;  %2228 = vmatpush.msra.mxu0 %v1000_v40  ;;  %v1364_v37 = vld [vmem:[%s16274_s13 + $0x1088] sm:$0xff]  ;;  %v1222_v40 = vld [vmem:[%s16274_s13 + $0xc18] sm:$0xff] }
 0x6ec   :  { %2245 = vmatpush.msrb.mxu1 %v1247_v43  ;;  %7329 = vmatmul.msk.f32.vlgmr.msrb.gmra.mxu0 %vm72_vm0, %v8492_v9  ;;  %v1052_v43 = vld [vmem:[%s16274_s13 + $0x6c8] sm:$0xff] }
 0x6ed   :  { %2094 = vmatpush.msra.mxu3 %v1128_v46  ;;  %2174 = vmatpush.msra.mxu2 %v1129_v52  ;;  %v1350_v46 = vld [vmem:[%s16274_s13 + $0x1018] sm:$0xff]  ;;  %v1351_v52 = vld [vmem:[%s16274_s13 + $0x1020] sm:$0xff] }
 0x6ee   :  { %2229 = vmatpush.msra.mxu0 %v987_v58  ;;  %2246 = vmatpush.msrb.mxu1 %v1234_v62  ;;  %v1209_v58 = vld [vmem:[%s16274_s13 + $0xbb0] sm:$0xff]  ;;  %v1456_v62 = vld [vmem:[%s16274_s13 + $0x1368] sm:$0xff] }
 0x6ef   :  { %2095 = vmatpush.msra.mxu3 %v1115_v30  ;;  %2175 = vmatpush.msra.mxu2 %v1116_v63  ;;  %v1337_v30 = vld [vmem:[%s16274_s13 + $0xfb0] sm:$0xff]  ;;  %v1338_v63 = vld [vmem:[%s16274_s13 + $0xfb8] sm:$0xff] }
 0x6f0   :  { %2230 = vmatpush.msra.mxu0 %v974_v44  ;;  %2247 = vmatpush.msrb.mxu1 %v1221_v0  ;;  %v1196_v44 = vld [vmem:[%s16274_s13 + $0xb48] sm:$0xff]  ;;  %v1443_v0 = vld [vmem:[%s16274_s13 + $0x1300] sm:$0xff] }
 0x6f1   :  { %2096 = vmatpush.msra.mxu3 %v1102_v35  ;;  %2176 = vmatpush.msra.mxu2 %v1103_v5  ;;  %v1324_v35 = vld [vmem:[%s16274_s13 + $0xf48] sm:$0xff]  ;;  %v1325_v5 = vld [vmem:[%s16274_s13 + $0xf50] sm:$0xff] }
 0x6f2   :  { %2231 = vmatpush.msra.mxu0 %v961_v33  ;;  %2248 = vmatpush.msrb.mxu1 %v1208_v36  ;;  %v1183_v33 = vld [vmem:[%s16274_s13 + $0xae0] sm:$0xff]  ;;  %v1430_v36 = vld [vmem:[%s16274_s13 + $0x1298] sm:$0xff] }
 0x6f3   :  { %2097 = vmatpush.msra.mxu3 %v1089_v39  ;;  %2177 = vmatpush.msra.mxu2 %v1090_v42  ;;  %v1311_v39 = vld [vmem:[%s16274_s13 + $0xee0] sm:$0xff]  ;;  %v1312_v42 = vld [vmem:[%s16274_s13 + $0xee8] sm:$0xff] }
 0x6f4   :  { %2232 = vmatpush.msra.mxu0 %v948_v45  ;;  %2249 = vmatpush.msrb.mxu1 %v1195_v48  ;;  %v1170_v45 = vld [vmem:[%s16274_s13 + $0xa78] sm:$0xff]  ;;  %v1417_v48 = vld [vmem:[%s16274_s13 + $0x1230] sm:$0xff] }
 0x6f5   :  { %2098 = vmatpush.msra.mxu3 %v1076_v51  ;;  %2178 = vmatpush.msra.mxu2 %v1077_v54  ;;  %v1298_v51 = vld [vmem:[%s16274_s13 + $0xe78] sm:$0xff]  ;;  %v1299_v54 = vld [vmem:[%s16274_s13 + $0xe80] sm:$0xff] }
 0x6f6   :  { %2233 = vmatpush.msra.mxu0 %v935_v28  ;;  %2250 = vmatpush.msrb.mxu1 %v1182_v49  ;;  %v1157_v28 = vld [vmem:[%s16274_s13 + $0xa10] sm:$0xff]  ;;  %v1404_v49 = vld [vmem:[%s16274_s13 + $0x11c8] sm:$0xff] }
 0x6f7   :  { %2099 = vmatpush.msra.mxu3 %v1063_v29  ;;  %2179 = vmatpush.msra.mxu2 %v1064_v32  ;;  %v1285_v29 = vld [vmem:[%s16274_s13 + $0xe10] sm:$0xff]  ;;  %v1286_v32 = vld [vmem:[%s16274_s13 + $0xe18] sm:$0xff] }
 0x6f8   :  { %2234 = vmatpush.msra.mxu0 %v922_v38  ;;  %2251 = vmatpush.msrb.mxu1 %v1169_v47  ;;  %v1144_v38 = vld [vmem:[%s16274_s13 + $0x9a8] sm:$0xff]  ;;  %v1391_v47 = vld [vmem:[%s16274_s13 + $0x1160] sm:$0xff] }
 0x6f9   :  { %2100 = vmatpush.msra.mxu3 %v1050_v50  ;;  %2180 = vmatpush.msra.mxu2 %v1051_v53  ;;  %v1272_v50 = vld [vmem:[%s16274_s13 + $0xda8] sm:$0xff]  ;;  %v1273_v53 = vld [vmem:[%s16274_s13 + $0xdb0] sm:$0xff] }
 0x6fa   :  { %2235 = vmatpush.msra.mxu0 %v909_v56  ;;  %2252 = vmatpush.msrb.mxu1 %v1156_v57  ;;  %v1131_v56 = vld [vmem:[%s16274_s13 + $0x940] sm:$0xff]  ;;  %v1378_v57 = vld [vmem:[%s16274_s13 + $0x10f8] sm:$0xff] }
 0x6fb   :  { %2101 = vmatmul.f32.vlgmr.msra.gmra.mxu3 %v8535_v24  ;;  %2181 = vmatmul.f32.vlgmr.msra.gmra.mxu2 %v8535_v24 }
 0x6fc   :  { %2185 = vmatpush.msrb.mxu3 %v1454_v59  ;;  %2265 = vmatpush.msrb.mxu2 %v1455_v1  ;;  %v1259_v59 = vld [vmem:[%s16274_s13 + $0xd40] sm:$0xff]  ;;  %v1260_v1 = vld [vmem:[%s16274_s13 + $0xd48] sm:$0xff] }
 0x6fd   :  { %2236 = vmatpush.msra.mxu0 %v896_v2  ;;  %2253 = vmatpush.msrb.mxu1 %v1143_v3  ;;  %v1118_v2 = vld [vmem:[%s16274_s13 + $0x8d8] sm:$0xff]  ;;  %v1365_v3 = vld [vmem:[%s16274_s13 + $0x1090] sm:$0xff] }
 0x6fe   :  { %2186 = vmatpush.msrb.mxu3 %v1441_v4  ;;  %2266 = vmatpush.msrb.mxu2 %v1442_v6  ;;  %v1468_v4 = vld [vmem:[%s16274_s13 + $0x13c8] sm:$0xff]  ;;  %v1469_v6 = vld [vmem:[%s16274_s13 + $0x13d0] sm:$0xff] }
 0x6ff   :  { %2237 = vmatpush.msra.mxu0 %v883_v7  ;;  %2254 = vmatpush.msrb.mxu1 %v1130_v8  ;;  %v1040_v7 = vld [vmem:[%s16274_s13 + $0x668] sm:$0xff]  ;;  %v1105_v8 = vld [vmem:[%s16274_s13 + $0x870] sm:$0xff] }
 0x700   :  { %2187 = vmatpush.msrb.mxu3 %v1428_v10  ;;  %2267 = vmatpush.msrb.mxu2 %v1429_v11  ;;  %v1352_v10 = vld [vmem:[%s16274_s13 + $0x1028] sm:$0xff]  ;;  %v1041_v11 = vld [vmem:[%s16274_s13 + $0x670] sm:$0xff] }
 0x701   :  { %2238 = vmatpush.msra.mxu0 %v870_v12  ;;  %2255 = vmatpush.msrb.mxu1 %v1117_v13  ;;  %v1027_v12 = vld [vmem:[%s16274_s13 + $0x600] sm:$0xff]  ;;  %v1092_v13 = vld [vmem:[%s16274_s13 + $0x808] sm:$0xff] }
 0x702   :  { %2188 = vmatpush.msrb.mxu3 %v1415_v14  ;;  %2268 = vmatpush.msrb.mxu2 %v1416_v15  ;;  %v1339_v14 = vld [vmem:[%s16274_s13 + $0xfc0] sm:$0xff]  ;;  %v1028_v15 = vld [vmem:[%s16274_s13 + $0x608] sm:$0xff] }
 0x703   :  { %2239 = vmatpush.msra.mxu0 %v857_v16  ;;  %2256 = vmatpush.msrb.mxu1 %v1104_v17  ;;  %v1014_v16 = vld [vmem:[%s16274_s13 + $0x598] sm:$0xff]  ;;  %v1079_v17 = vld [vmem:[%s16274_s13 + $0x7a0] sm:$0xff] }
 0x704   :  { %2189 = vmatpush.msrb.mxu3 %v1402_v41  ;;  %2269 = vmatpush.msrb.mxu2 %v1403_v18  ;;  %v1326_v41 = vld [vmem:[%s16274_s13 + $0xf58] sm:$0xff]  ;;  %v1015_v18 = vld [vmem:[%s16274_s13 + $0x5a0] sm:$0xff] }
 0x705   :  { %2240 = vmatpush.msra.mxu0 %v844_v19  ;;  %2257 = vmatpush.msrb.mxu1 %v1091_v20  ;;  %v1001_v19 = vld [vmem:[%s16274_s13 + $0x530] sm:$0xff]  ;;  %v1066_v20 = vld [vmem:[%s16274_s13 + $0x738] sm:$0xff] }
 0x706   :  { %2190 = vmatpush.msrb.mxu3 %v1389_v21  ;;  %2241 = vmatmul.f32.vlgmr.msra.gmra.mxu0 %v8506_v60  ;;  %v1313_v21 = vld [vmem:[%s16274_s13 + $0xef0] sm:$0xff] }
 0x707   :  { %2270 = vmatpush.msrb.mxu2 %v1390_v22  ;;  %2325 = vmatpush.msrb.mxu0 %v1248_v23  ;;  %v1002_v22 = vld [vmem:[%s16274_s13 + $0x538] sm:$0xff]  ;;  %v988_v23 = vld [vmem:[%s16274_s13 + $0x4c8] sm:$0xff] }
 0x708   :  { %2258 = vmatpush.msrb.mxu1 %v1078_v25  ;;  %2191 = vmatpush.msrb.mxu3 %v1376_v26  ;;  %v1053_v25 = vld [vmem:[%s16274_s13 + $0x6d0] sm:$0xff]  ;;  %v1300_v26 = vld [vmem:[%s16274_s13 + $0xe88] sm:$0xff] }
 0x709   :  { %2271 = vmatpush.msrb.mxu2 %v1377_v27  ;;  %2326 = vmatpush.msrb.mxu0 %v1235_v61  ;;  %v989_v27 = vld [vmem:[%s16274_s13 + $0x4d0] sm:$0xff]  ;;  %v975_v61 = vld [vmem:[%s16274_s13 + $0x460] sm:$0xff] }
 0x70a   :  { %2259 = vmatpush.msrb.mxu1 %v1065_v31  ;;  %2192 = vmatpush.msrb.mxu3 %v1363_v34  ;;  %v1457_v31 = vld [vmem:[%s16274_s13 + $0x1370] sm:$0xff]  ;;  %v1287_v34 = vld [vmem:[%s16274_s13 + $0xe20] sm:$0xff] }
 0x70b   :  { %2272 = vmatpush.msrb.mxu2 %v1364_v37  ;;  %2327 = vmatpush.msrb.mxu0 %v1222_v40  ;;  %v976_v37 = vld [vmem:[%s16274_s13 + $0x468] sm:$0xff]  ;;  %v962_v40 = vld [vmem:[%s16274_s13 + $0x3f8] sm:$0xff] }
 0x70c   :  { %2260 = vmatpush.msrb.mxu1 %v1052_v43  ;;  %2193 = vmatpush.msrb.mxu3 %v1350_v46  ;;  %v1444_v43 = vld [vmem:[%s16274_s13 + $0x1308] sm:$0xff]  ;;  %v1274_v46 = vld [vmem:[%s16274_s13 + $0xdb8] sm:$0xff] }
 0x70d   :  { %2261 = vmatmul.f32.vlgmr.msrb.gmra.mxu1 %v8535_v24  ;;  %2273 = vmatpush.msrb.mxu2 %v1351_v52  ;;  %v963_v52 = vld [vmem:[%s16274_s13 + $0x400] sm:$0xff] }
 0x70e   :  { %2328 = vmatpush.msrb.mxu0 %v1209_v58  ;;  %2345 = vmatpush.msra.mxu1 %v1456_v62  ;;  %v949_v58 = vld [vmem:[%s16274_s13 + $0x390] sm:$0xff]  ;;  %v1431_v62 = vld [vmem:[%s16274_s13 + $0x12a0] sm:$0xff] }
 0x70f   :  { %2194 = vmatpush.msrb.mxu3 %v1337_v30  ;;  %2274 = vmatpush.msrb.mxu2 %v1338_v63  ;;  %v1261_v30 = vld [vmem:[%s16274_s13 + $0xd50] sm:$0xff]  ;;  %v950_v63 = vld [vmem:[%s16274_s13 + $0x398] sm:$0xff] }
 0x710   :  { %2329 = vmatpush.msrb.mxu0 %v1196_v44  ;;  %2346 = vmatpush.msra.mxu1 %v1443_v0  ;;  %v1418_v44 = vld [vmem:[%s16274_s13 + $0x1238] sm:$0xff] }
 0x711   :  { %2195 = vmatpush.msrb.mxu3 %v1324_v35  ;;  %2275 = vmatpush.msrb.mxu2 %v1325_v5  ;;  %v1470_v0 = vld [vmem:[%s16274_s13 + $0x13d8] sm:$0xff]  ;;  %v936_v35 = vld [vmem:[%s16274_s13 + $0x328] sm:$0xff]  ;;  %v937_v5 = vld [vmem:[%s16274_s13 + $0x330] sm:$0xff] }
 0x712   :  { %2330 = vmatpush.msrb.mxu0 %v1183_v33  ;;  %2347 = vmatpush.msra.mxu1 %v1430_v36  ;;  %v1042_v33 = vld [vmem:[%s16274_s13 + $0x678] sm:$0xff]  ;;  %v1405_v36 = vld [vmem:[%s16274_s13 + $0x11d0] sm:$0xff] }
 0x713   :  { %2196 = vmatpush.msrb.mxu3 %v1311_v39  ;;  %2276 = vmatpush.msrb.mxu2 %v1312_v42  ;;  %v923_v39 = vld [vmem:[%s16274_s13 + $0x2c0] sm:$0xff]  ;;  %v924_v42 = vld [vmem:[%s16274_s13 + $0x2c8] sm:$0xff] }
 0x714   :  { %2331 = vmatpush.msrb.mxu0 %v1170_v45  ;;  %2348 = vmatpush.msra.mxu1 %v1417_v48  ;;  %v1029_v45 = vld [vmem:[%s16274_s13 + $0x610] sm:$0xff]  ;;  %v1392_v48 = vld [vmem:[%s16274_s13 + $0x1168] sm:$0xff] }
 0x715   :  { %2197 = vmatpush.msrb.mxu3 %v1298_v51  ;;  %2277 = vmatpush.msrb.mxu2 %v1299_v54  ;;  %v910_v51 = vld [vmem:[%s16274_s13 + $0x258] sm:$0xff]  ;;  %v911_v54 = vld [vmem:[%s16274_s13 + $0x260] sm:$0xff] }
 0x716   :  { %2332 = vmatpush.msrb.mxu0 %v1157_v28  ;;  %2349 = vmatpush.msra.mxu1 %v1404_v49  ;;  %v1016_v28 = vld [vmem:[%s16274_s13 + $0x5a8] sm:$0xff]  ;;  %v1379_v49 = vld [vmem:[%s16274_s13 + $0x1100] sm:$0xff] }
 0x717   :  { %2198 = vmatpush.msrb.mxu3 %v1285_v29  ;;  %2278 = vmatpush.msrb.mxu2 %v1286_v32  ;;  %v897_v29 = vld [vmem:[%s16274_s13 + $0x1f0] sm:$0xff]  ;;  %v898_v32 = vld [vmem:[%s16274_s13 + $0x1f8] sm:$0xff] }
 0x718   :  { %2333 = vmatpush.msrb.mxu0 %v1144_v38  ;;  %2350 = vmatpush.msra.mxu1 %v1391_v47  ;;  %v1003_v38 = vld [vmem:[%s16274_s13 + $0x540] sm:$0xff]  ;;  %v1366_v47 = vld [vmem:[%s16274_s13 + $0x1098] sm:$0xff] }
 0x719   :  { %2199 = vmatpush.msrb.mxu3 %v1272_v50  ;;  %2279 = vmatpush.msrb.mxu2 %v1273_v53  ;;  %v884_v50 = vld [vmem:[%s16274_s13 + $0x188] sm:$0xff]  ;;  %v885_v53 = vld [vmem:[%s16274_s13 + $0x190] sm:$0xff] }
 0x71a   :  { %2334 = vmatpush.msrb.mxu0 %v1131_v56  ;;  %2351 = vmatpush.msra.mxu1 %v1378_v57  ;;  %v990_v56 = vld [vmem:[%s16274_s13 + $0x4d8] sm:$0xff]  ;;  %v1353_v57 = vld [vmem:[%s16274_s13 + $0x1030] sm:$0xff] }
 0x71b   :  { %2200 = vmatpush.msrb.mxu3 %v1259_v59  ;;  %2280 = vmatpush.msrb.mxu2 %v1260_v1  ;;  %v871_v59 = vld [vmem:[%s16274_s13 + $0x120] sm:$0xff]  ;;  %v872_v1 = vld [vmem:[%s16274_s13 + $0x128] sm:$0xff] }
 0x71c   :  { %2335 = vmatpush.msrb.mxu0 %v1118_v2  ;;  %2352 = vmatpush.msra.mxu1 %v1365_v3  ;;  %v977_v2 = vld [vmem:[%s16274_s13 + $0x470] sm:$0xff]  ;;  %v1340_v3 = vld [vmem:[%s16274_s13 + $0xfc8] sm:$0xff] }
 0x71d   :  { %2201 = vmatmul.f32.vlgmr.msrb.gmra.mxu3 %v8567_v55  ;;  %2281 = vmatmul.f32.vlgmr.msrb.gmra.mxu2 %v8567_v55 }
 0x71e   :  { %2300 = vmatpush.msra.mxu3 %v1468_v4  ;;  %2380 = vmatpush.msra.mxu2 %v1469_v6  ;;  %v858_v4 = vld [vmem:[%s16274_s13 + $0xb8] sm:$0xff]  ;;  %v859_v6 = vld [vmem:[%s16274_s13 + $0xc0] sm:$0xff] }
 0x71f   :  { %2336 = vmatpush.msrb.mxu0 %v1105_v8  ;;  %2353 = vmatpush.msra.mxu1 %v1352_v10  ;;  %v1327_v8 = vld [vmem:[%s16274_s13 + $0xf60] sm:$0xff]  ;;  %v845_v10 = vld [vmem:[%s16274_s13 + $0x50] sm:$0xff] }
 0x720   :  { %2305 = vmatpush.msrb.mxu3 %v1040_v7  ;;  %2385 = vmatpush.msrb.mxu2 %v1041_v11  ;;  %v964_v7 = vld [vmem:[%s16274_s13 + $0x408] sm:$0xff]  ;;  %v846_v11 = vld [vmem:[%s16274_s13 + $0x58] sm:$0xff] }
 0x721   :  { %2337 = vmatpush.msrb.mxu0 %v1092_v13  ;;  %2354 = vmatpush.msra.mxu1 %v1339_v14  ;;  %v1249_v13 = vld [vmem:[%s16274_s13 + $0xcf0] sm:$0xff]  ;;  %v1314_v14 = vld [vmem:[%s16274_s13 + $0xef8] sm:$0xff] }
 0x722   :  { %2306 = vmatpush.msrb.mxu3 %v1027_v12  ;;  %2386 = vmatpush.msrb.mxu2 %v1028_v15  ;;  %v951_v12 = vld [vmem:[%s16274_s13 + $0x3a0] sm:$0xff]  ;;  %v1250_v15 = vld [vmem:[%s16274_s13 + $0xcf8] sm:$0xff] }
 0x723   :  { %2338 = vmatpush.msrb.mxu0 %v1079_v17  ;;  %2355 = vmatpush.msra.mxu1 %v1326_v41  ;;  %v1236_v17 = vld [vmem:[%s16274_s13 + $0xc88] sm:$0xff]  ;;  %v1301_v41 = vld [vmem:[%s16274_s13 + $0xe90] sm:$0xff] }
 0x724   :  { %2307 = vmatpush.msrb.mxu3 %v1014_v16  ;;  %2387 = vmatpush.msrb.mxu2 %v1015_v18  ;;  %v938_v16 = vld [vmem:[%s16274_s13 + $0x338] sm:$0xff]  ;;  %v1237_v18 = vld [vmem:[%s16274_s13 + $0xc90] sm:$0xff] }
 0x725   :  { %2339 = vmatpush.msrb.mxu0 %v1066_v20  ;;  %2356 = vmatpush.msra.mxu1 %v1313_v21  ;;  %v1223_v20 = vld [vmem:[%s16274_s13 + $0xc20] sm:$0xff]  ;;  %v1288_v21 = vld [vmem:[%s16274_s13 + $0xe28] sm:$0xff] }
 0x726   :  { %2308 = vmatpush.msrb.mxu3 %v1001_v19  ;;  %2388 = vmatpush.msrb.mxu2 %v1002_v22  ;;  %v925_v19 = vld [vmem:[%s16274_s13 + $0x2d0] sm:$0xff]  ;;  %v1224_v22 = vld [vmem:[%s16274_s13 + $0xc28] sm:$0xff] }
 0x727   :  { %7330 = vmatmul.msk.f32.vlgmr.msra.gmra.mxu3 %vm72_vm0, %v8492_v9  ;;  %7331 = vmatmul.msk.f32.vlgmr.msra.gmra.mxu2 %vm72_vm0, %v8492_v9 }
 0x728   :  { %2309 = vmatpush.msrb.mxu3 %v988_v23  ;;  %2340 = vmatpush.msrb.mxu0 %v1053_v25  ;;  %v912_v23 = vld [vmem:[%s16274_s13 + $0x268] sm:$0xff]  ;;  %v1210_v25 = vld [vmem:[%s16274_s13 + $0xbb8] sm:$0xff] }
 0x729   :  { %2357 = vmatpush.msra.mxu1 %v1300_v26  ;;  %2389 = vmatpush.msrb.mxu2 %v989_v27  ;;  %v1275_v26 = vld [vmem:[%s16274_s13 + $0xdc0] sm:$0xff] }
 0x72a   :  { %2341 = vmatmul.f32.vlgmr.msrb.gmra.mxu0 %v8535_v24  ;;  %2310 = vmatpush.msrb.mxu3 %v975_v61  ;;  %v1211_v27 = vld [vmem:[%s16274_s13 + $0xbc0] sm:$0xff] }
 0x72b   :  { %2425 = vmatpush.msra.mxu0 %v1457_v31  ;;  %2358 = vmatpush.msra.mxu1 %v1287_v34  ;;  %v899_v61 = vld [vmem:[%s16274_s13 + $0x200] sm:$0xff]  ;;  %v1197_v31 = vld [vmem:[%s16274_s13 + $0xb50] sm:$0xff]  ;;  %v1262_v34 = vld [vmem:[%s16274_s13 + $0xd58] sm:$0xff] }
 0x72c   :  { %2390 = vmatpush.msrb.mxu2 %v976_v37  ;;  %2311 = vmatpush.msrb.mxu3 %v962_v40  ;;  %v1198_v37 = vld [vmem:[%s16274_s13 + $0xb58] sm:$0xff] }
 0x72d   :  { %2426 = vmatpush.msra.mxu0 %v1444_v43  ;;  %2359 = vmatpush.msra.mxu1 %v1274_v46  ;;  %v886_v40 = vld [vmem:[%s16274_s13 + $0x198] sm:$0xff]  ;;  %v1471_v43 = vld [vmem:[%s16274_s13 + $0x13e0] sm:$0xff]  ;;  %v1184_v46 = vld [vmem:[%s16274_s13 + $0xae8] sm:$0xff] }
 0x72e   :  { %2391 = vmatpush.msrb.mxu2 %v963_v52  ;;  %2312 = vmatpush.msrb.mxu3 %v949_v58  ;;  %v1185_v52 = vld [vmem:[%s16274_s13 + $0xaf0] sm:$0xff]  ;;  %v2573_v58 = vld [vmem:[%s16277_s16 + $0x78] sm:$0xff] }
 0x72f   :  { %2427 = vmatpush.msra.mxu0 %v1431_v62  ;;  %2360 = vmatpush.msra.mxu1 %v1261_v30  ;;  %v873_v62 = vld [vmem:[%s16274_s13 + $0x130] sm:$0xff]  ;;  %v1171_v30 = vld [vmem:[%s16274_s13 + $0xa80] sm:$0xff] }
 0x730   :  { %2392 = vmatpush.msrb.mxu2 %v950_v63  ;;  %2361 = vmatmul.f32.vlgmr.msra.gmra.mxu1 %v8567_v55  ;;  %v1172_v63 = vld [vmem:[%s16274_s13 + $0xa88] sm:$0xff] }
 0x731   :  { %2428 = vmatpush.msra.mxu0 %v1418_v44  ;;  %2460 = vmatpush.msrb.mxu1 %v1470_v0  ;;  %v2572_v44 = vld [vmem:[%s16277_s16 + $0x70] sm:$0xff]  ;;  %v860_v0 = vld [vmem:[%s16274_s13 + $0xc8] sm:$0xff] }
 0x732   :  { %2313 = vmatpush.msrb.mxu3 %v936_v35  ;;  %2393 = vmatpush.msrb.mxu2 %v937_v5  ;;  %v1158_v35 = vld [vmem:[%s16274_s13 + $0xa18] sm:$0xff]  ;;  %v1159_v5 = vld [vmem:[%s16274_s13 + $0xa20] sm:$0xff] }
 0x733   :  { %2465 = vmatpush.msra.mxu1 %v1042_v33  ;;  %2429 = vmatpush.msra.mxu0 %v1405_v36  ;;  %v2571_v33 = vld [vmem:[%s16277_s16 + $0x68] sm:$0xff]  ;;  %v847_v36 = vld [vmem:[%s16274_s13 + $0x60] sm:$0xff] }
 0x734   :  { %2314 = vmatpush.msrb.mxu3 %v923_v39  ;;  %2394 = vmatpush.msrb.mxu2 %v924_v42  ;;  %v1145_v39 = vld [vmem:[%s16274_s13 + $0x9b0] sm:$0xff]  ;;  %v1146_v42 = vld [vmem:[%s16274_s13 + $0x9b8] sm:$0xff] }
 0x735   :  { %2466 = vmatpush.msra.mxu1 %v1029_v45  ;;  %2430 = vmatpush.msra.mxu0 %v1392_v48  ;;  %v2570_v45 = vld [vmem:[%s16277_s16 + $0x60] sm:$0xff]  ;;  %v2589_v48 = vld [vmem:[%s16277_s16 + $0xf8] sm:$0xff] }
 0x736   :  { %2315 = vmatpush.msrb.mxu3 %v910_v51  ;;  %2395 = vmatpush.msrb.mxu2 %v911_v54  ;;  %v1132_v51 = vld [vmem:[%s16274_s13 + $0x948] sm:$0xff]  ;;  %v1133_v54 = vld [vmem:[%s16274_s13 + $0x950] sm:$0xff] }
 0x737   :  { %2467 = vmatpush.msra.mxu1 %v1016_v28  ;;  %2431 = vmatpush.msra.mxu0 %v1379_v49  ;;  %v2569_v28 = vld [vmem:[%s16277_s16 + $0x58] sm:$0xff]  ;;  %v2588_v49 = vld [vmem:[%s16277_s16 + $0xf0] sm:$0xff] }
 0x738   :  { %2316 = vmatpush.msrb.mxu3 %v897_v29  ;;  %2396 = vmatpush.msrb.mxu2 %v898_v32  ;;  %v1120_v29 = vld [vmem:[%s16274_s13 + $0x8e8] sm:$0xff]  ;;  %v2568_v32 = vld [vmem:[%s16277_s16 + $0x50] sm:$0xff] }
 0x739   :  { %2468 = vmatpush.msra.mxu1 %v1003_v38  ;;  %2432 = vmatpush.msra.mxu0 %v1366_v47  ;;  %v2587_v38 = vld [vmem:[%s16277_s16 + $0xe8] sm:$0xff]  ;;  %v1107_v47 = vld [vmem:[%s16274_s13 + $0x880] sm:$0xff] }
 0x73a   :  { %7332 = vmatmul.msk.f32.vlgmr.msrb.gmra.mxu1 %vm72_vm0, %v8492_v9  ;;  %2317 = vmatpush.msrb.mxu3 %v884_v50  ;;  %v2567_v50 = vld [vmem:[%s16277_s16 + $0x48] sm:$0xff] }
 0x73b   :  { %2397 = vmatpush.msrb.mxu2 %v885_v53  ;;  %2469 = vmatpush.msra.mxu1 %v990_v56  ;;  %v2586_v53 = vld [vmem:[%s16277_s16 + $0xe0] sm:$0xff]  ;;  %v1093_v56 = vld [vmem:[%s16274_s13 + $0x810] sm:$0xff] }
 0x73c   :  { %2433 = vmatpush.msra.mxu0 %v1353_v57  ;;  %2318 = vmatpush.msrb.mxu3 %v871_v59  ;;  %v1094_v57 = vld [vmem:[%s16274_s13 + $0x818] sm:$0xff]  ;;  %v10149_v59 = vpop.f32.mrf.mxu0 }
 0x73d   :  { %2398 = vmatpush.msrb.mxu2 %v872_v1  ;;  %2470 = vmatpush.msra.mxu1 %v977_v2  ;;  %v10154_v1 = vld [vmem:[%s16275_s14] sm:$0xff] }
 0x73e   :  { %2434 = vmatpush.msra.mxu0 %v1340_v3  ;;  %2319 = vmatpush.msrb.mxu3 %v858_v4  ;;  %v2566_v2 = vld [vmem:[%s16277_s16 + $0x40] sm:$0xff]  ;;  %v2585_v3 = vld [vmem:[%s16277_s16 + $0xd8] sm:$0xff]  ;;  %v1080_v4 = vld [vmem:[%s16274_s13 + $0x7a8] sm:$0xff] }
 0x73f   :  { %2399 = vmatpush.msrb.mxu2 %v859_v6  ;;  %2471 = vmatpush.msra.mxu1 %v964_v7  ;;  %v1081_v6 = vld [vmem:[%s16274_s13 + $0x7b0] sm:$0xff]  ;;  %v1522_v7 = vpop.f32.mrf.mxu1 }
 0x740   :  { %2435 = vmatpush.msra.mxu0 %v1327_v8  ;;  %2320 = vmatpush.msrb.mxu3 %v845_v10  ;;  %v2565_v8 = vld [vmem:[%s16277_s16 + $0x38] sm:$0xff]  ;;  %v2584_v10 = vld [vmem:[%s16277_s16 + $0xd0] sm:$0xff] }
 0x741   :  { %2400 = vmatpush.msrb.mxu2 %v846_v11  ;;  %2472 = vmatpush.msra.mxu1 %v951_v12  ;;  %v1476_v11 = vperm.slane %v10154_v1, 0  ;;  %v1067_v12 = vld [vmem:[%s16274_s13 + $0x740] sm:$0xff] }
 0x742   :  { %2321 = vmatmul.f32.vlgmr.msrb.gmra.mxu3 %v8506_v60  ;;  %2401 = vmatmul.f32.vlgmr.msrb.gmra.mxu2 %v8506_v60 }
 0x743   :  { %2405 = vmatpush.msra.mxu3 %v1249_v13  ;;  %2436 = vmatpush.msra.mxu0 %v1314_v14  ;;  %v1068_v13 = vld [vmem:[%s16274_s13 + $0x748] sm:$0xff]  ;;  %v1542_v14 = vpop.f32.mrf.mxu2 }
 0x744   :  { %2485 = vmatpush.msra.mxu2 %v1250_v15  ;;  %2473 = vmatpush.msra.mxu1 %v938_v16  ;;  %v1562_v15 = vpop.f32.mrf.mxu3  ;;  %v2564_v16 = vld [vmem:[%s16277_s16 + $0x30] sm:$0xff] }
 0x745   :  { %2406 = vmatpush.msra.mxu3 %v1236_v17  ;;  %2437 = vmatpush.msra.mxu0 %v1301_v41  ;;  %v2583_v17 = vld [vmem:[%s16277_s16 + $0xc8] sm:$0xff]  ;;  %v1054_v41 = vld [vmem:[%s16274_s13 + $0x6d8] sm:$0xff] }
 0x746   :  { %2486 = vmatpush.msra.mxu2 %v1237_v18  ;;  %2474 = vmatpush.msra.mxu1 %v925_v19  ;;  %v1055_v18 = vld [vmem:[%s16274_s13 + $0x6e0] sm:$0xff]  ;;  %v2563_v19 = vld [vmem:[%s16277_s16 + $0x28] sm:$0xff] }
 0x747   :  { %2407 = vmatpush.msra.mxu3 %v1223_v20  ;;  %2438 = vmatpush.msra.mxu0 %v1288_v21  ;;  %v2582_v20 = vld [vmem:[%s16277_s16 + $0xc0] sm:$0xff]  ;;  %v1523_v21 = vadd.f32 %v1522_v7, %v1476_v11  ;;  %v2635_v7 = vld [vmem:[%s16277_s16 + $0x268] sm:$0xff]  ;;  %v1354_v11 = vld [vmem:[%s16274_s13 + $0x1038] sm:$0xff] }
 0x748   :  { %2487 = vmatpush.msra.mxu2 %v1224_v22  ;;  %2475 = vmatpush.msra.mxu1 %v912_v23  ;;  %v1458_v22 = vld [vmem:[%s16274_s13 + $0x1378] sm:$0xff] }
 0x749   :  { %2408 = vmatpush.msra.mxu3 %v1210_v25  ;;  %2439 = vmatpush.msra.mxu0 %v1275_v26  ;;  %v2605_v23 = vld [vmem:[%s16277_s16 + $0x178] sm:$0xff]  ;;  %v1543_v25 = vadd.f32 %v1542_v14, %v1523_v21  ;;  %v2562_v26 = vld [vmem:[%s16277_s16 + $0x20] sm:$0xff]  ;;  %v1328_v21 = vld [vmem:[%s16274_s13 + $0xf68] sm:$0xff] }
 0x74a   :  { %2488 = vmatpush.msra.mxu2 %v1211_v27  ;;  %2476 = vmatpush.msra.mxu1 %v899_v61  ;;  %v2581_v27 = vld [vmem:[%s16277_s16 + $0xb8] sm:$0xff]  ;;  %v1602_v61 = vpop.f32.mrf.mxu0 }
 0x74b   :  { %2409 = vmatpush.msra.mxu3 %v1197_v31  ;;  %2440 = vmatpush.msra.mxu0 %v1262_v34  ;;  %v1445_v31 = vld [vmem:[%s16274_s13 + $0x1310] sm:$0xff] }
 0x74c   :  { %2489 = vmatpush.msra.mxu2 %v1198_v37  ;;  %2441 = vmatmul.f32.vlgmr.msra.gmra.mxu0 %v8567_v55  ;;  %v2604_v34 = vld [vmem:[%s16277_s16 + $0x170] sm:$0xff]  ;;  %v1563_v37 = vadd.f32 %v1562_v15, %v1543_v25 }
 0x74d   :  { %2477 = vmatpush.msra.mxu1 %v886_v40  ;;  %2540 = vmatpush.msrb.mxu0 %v1471_v43  ;;  %v2561_v40 = vld [vmem:[%s16277_s16 + $0x18] sm:$0xff]  ;;  %v2580_v43 = vld [vmem:[%s16277_s16 + $0xb0] sm:$0xff] }
 0x74e   :  { %2410 = vmatpush.msra.mxu3 %v1184_v46  ;;  %2490 = vmatpush.msra.mxu2 %v1185_v52  ;;  %v1622_v46 = vpop.f32.mrf.mxu1  ;;  %v1432_v52 = vld [vmem:[%s16274_s13 + $0x12a8] sm:$0xff] }
 0x74f   :  { %2770 = vmatpush.msra.mxu0 %v2573_v58  ;;  %2478 = vmatpush.msra.mxu1 %v873_v62  ;;  %v2603_v58 = vld [vmem:[%s16277_s16 + $0x168] sm:$0xff]  ;;  %v2560_v62 = vld [vmem:[%s16277_s16 + $0x10] sm:$0xff] }
 0x750   :  { %2411 = vmatpush.msra.mxu3 %v1171_v30  ;;  %2491 = vmatpush.msra.mxu2 %v1172_v63  ;;  %v2579_v30 = vld [vmem:[%s16277_s16 + $0xa8] sm:$0xff]  ;;  %v1642_v63 = vpop.f32.mrf.mxu2 }
 0x751   :  { %2771 = vmatpush.msra.mxu0 %v2572_v44  ;;  %2479 = vmatpush.msra.mxu1 %v860_v0  ;;  %v1662_v44 = vpop.f32.mrf.mxu3  ;;  %v1419_v0 = vld [vmem:[%s16274_s13 + $0x1240] sm:$0xff] }
 0x752   :  { %2412 = vmatpush.msra.mxu3 %v1158_v35  ;;  %2492 = vmatpush.msra.mxu2 %v1159_v5  ;;  %v2602_v35 = vld [vmem:[%s16277_s16 + $0x160] sm:$0xff]  ;;  %v10245_v5 = vadd.f32 %v10149_v59, %v1563_v37  ;;  %v1478_v59 = vperm.slane %v10154_v1, 2 }
 0x753   :  { %2772 = vmatpush.msra.mxu0 %v2571_v33  ;;  %2480 = vmatpush.msra.mxu1 %v847_v36  ;;  %v2559_v33 = vld [vmem:[%s16277_s16 + $0x8] sm:$0xff]  ;;  %v2578_v36 = vld [vmem:[%s16277_s16 + $0xa0] sm:$0xff] }
 0x754   :  { %2413 = vmatpush.msra.mxu3 %v1145_v39  ;;  %2481 = vmatmul.f32.vlgmr.msra.gmra.mxu1 %v8506_v60  ;;  %v1119_v60 = vld [vmem:[%s16274_s13 + $0x8e0] sm:$0xff]  ;;  %16400 = vst [vmem:[#allocation5_spill] sm:$0xff] %v10245_v5 }
 0x755   :  { %2493 = vmatpush.msra.mxu2 %v1146_v42  ;;  %2773 = vmatpush.msra.mxu0 %v2570_v45  ;;  %v1406_v42 = vld [vmem:[%s16274_s13 + $0x11d8] sm:$0xff] }
 0x756   :  { %2790 = vmatpush.msrb.mxu1 %v2589_v48  ;;  %7333 = vmatmul.msk.f32.vlgmr.msrb.gmra.mxu0 %vm72_vm0, %v8492_v9  ;;  %v1106_v9 = vld [vmem:[%s16274_s13 + $0x878] sm:$0xff]  ;;  %v2558_v48 = vld [vmem:[%s16277_s16] sm:$0xff] }
 0x757   :  { %2414 = vmatpush.msra.mxu3 %v1132_v51  ;;  %2494 = vmatpush.msra.mxu2 %v1133_v54  ;;  %v2601_v45 = vld [vmem:[%s16277_s16 + $0x158] sm:$0xff] }
 0x758   :  { %2774 = vmatpush.msra.mxu0 %v2569_v28  ;;  %2791 = vmatpush.msrb.mxu1 %v2588_v49  ;;  %v2577_v51 = vld [vmem:[%s16277_s16 + $0x98] sm:$0xff]  ;;  %v1702_v28 = vpop.f32.mrf.mxu0  ;;  %v1393_v49 = vld [vmem:[%s16274_s13 + $0x1170] sm:$0xff] }
 0x759   :  { %2415 = vmatpush.msra.mxu3 %v1119_v60  ;;  %2495 = vmatpush.msra.mxu2 %v1120_v29  ;;  %v16287_v60 = vmax.f32 %v10245_v5, 0.0  ;;  %v2600_v29 = vld [vmem:[%s16277_s16 + $0x150] sm:$0xff] }
 0x75a   :  { %2775 = vmatpush.msra.mxu0 %v2568_v32  ;;  %2792 = vmatpush.msrb.mxu1 %v2587_v38  ;;  %v2637_v32 = vld [vmem:[%s16277_s16 + $0x278] sm:$0xff] }
 0x75b   :  { %2416 = vmatpush.msra.mxu3 %v1106_v9  ;;  %2496 = vmatpush.msra.mxu2 %v1107_v47  ;;  %v10275_v9 = vpop.f32.mrf.mxu1  ;;  %v2576_v47 = vld [vmem:[%s16277_s16 + $0x90] sm:$0xff] }
 0x75c   :  { %2776 = vmatpush.msra.mxu0 %v2567_v50  ;;  %2793 = vmatpush.msrb.mxu1 %v2586_v53  ;;  %v1380_v50 = vld [vmem:[%s16274_s13 + $0x1108] sm:$0xff] }
 0x75d   :  { %2417 = vmatpush.msra.mxu3 %v1093_v56  ;;  %2497 = vmatpush.msra.mxu2 %v1094_v57  ;;  %v2599_v53 = vld [vmem:[%s16277_s16 + $0x148] sm:$0xff]  ;;  %v2636_v56 = vld [vmem:[%s16277_s16 + $0x270] sm:$0xff] }
 0x75e   :  { %2777 = vmatpush.msra.mxu0 %v2566_v2  ;;  %2794 = vmatpush.msrb.mxu1 %v2585_v3  ;;  %v1682_v2 = vpop.f32.mrf.mxu3  ;;  %v2575_v3 = vld [vmem:[%s16277_s16 + $0x88] sm:$0xff] }
 0x75f   :  { %2418 = vmatpush.msra.mxu3 %v1080_v4  ;;  %2498 = vmatpush.msra.mxu2 %v1081_v6  ;;  %v1367_v4 = vld [vmem:[%s16274_s13 + $0x10a0] sm:$0xff]  ;;  %v1683_v14 = vadd.f32 %v1682_v2, %v1478_v59  ;;  %v2645_v2 = vld [vmem:[%s16277_s16 + $0x2b8] sm:$0xff] }
 0x760   :  { %2778 = vmatpush.msra.mxu0 %v2565_v8  ;;  %2795 = vmatpush.msrb.mxu1 %v2584_v10  ;;  %v2598_v6 = vld [vmem:[%s16277_s16 + $0x140] sm:$0xff]  ;;  %v10306_v8 = vpop.f32.mrf.mxu2  ;;  %v10318_v15 = vpop.f32.mrf.mxu0 }
 0x761   :  { %2419 = vmatpush.msra.mxu3 %v1067_v12  ;;  %2499 = vmatpush.msra.mxu2 %v1068_v13  ;;  %v2574_v10 = vld [vmem:[%s16277_s16 + $0x80] sm:$0xff]  ;;  %v2597_v12 = vld [vmem:[%s16277_s16 + $0x138] sm:$0xff]  ;;  %v1703_v25 = vadd.f32 %v1702_v28, %v1683_v14  ;;  %v10478_v14 = vld [vmem:[%s16277_s16 + $0x368] sm:$0xff] }
 0x762   :  { %2779 = vmatpush.msra.mxu0 %v2564_v16  ;;  %2796 = vmatpush.msrb.mxu1 %v2583_v17  ;;  %v2634_v16 = vld [vmem:[%s16277_s16 + $0x260] sm:$0xff]  ;;  %v2653_v17 = vld [vmem:[%s16277_s16 + $0x2f8] sm:$0xff] }
 0x763   :  { %2420 = vmatpush.msra.mxu3 %v1054_v41  ;;  %2500 = vmatpush.msra.mxu2 %v1055_v18  ;;  %v1341_v41 = vld [vmem:[%s16274_s13 + $0xfd0] sm:$0xff]  ;;  %v1263_v28 = vld [vmem:[%s16274_s13 + $0xd60] sm:$0xff] }
 0x764   :  { %2780 = vmatpush.msra.mxu0 %v2563_v19  ;;  %2797 = vmatpush.msrb.mxu1 %v2582_v20  ;;  %v2596_v18 = vld [vmem:[%s16277_s16 + $0x130] sm:$0xff]  ;;  %v2633_v19 = vld [vmem:[%s16277_s16 + $0x258] sm:$0xff]  ;;  %v2626_v59 = vld [vmem:[%s16277_s16 + $0x220] sm:$0xff] }
 0x765   :  { %2421 = vmatmul.f32.vlgmr.msra.gmra.mxu3 %v8535_v24  ;;  %2501 = vmatmul.f32.vlgmr.msra.gmra.mxu2 %v8535_v24  ;;  %v1477_v24 = vperm.slane %v10154_v1, 1  ;;  %v2652_v20 = vld [vmem:[%s16277_s16 + $0x2f0] sm:$0xff] }
 0x766   :  { %2505 = vmatpush.msrb.mxu3 %v1458_v22  ;;  %2810 = vmatpush.msrb.mxu2 %v2605_v23  ;;  %v2595_v22 = vld [vmem:[%s16277_s16 + $0x128] sm:$0xff]  ;;  %v10346_v23 = vpop.f32.mrf.mxu1 }
 0x767   :  { %2781 = vmatpush.msra.mxu0 %v2562_v26  ;;  %2798 = vmatpush.msrb.mxu1 %v2581_v27  ;;  %v1603_v39 = vadd.f32 %v1602_v61, %v1477_v24  ;;  %v10348_v26 = vpop.f32.mrf.mxu3  ;;  %v2632_v27 = vld [vmem:[%s16277_s16 + $0x250] sm:$0xff]  ;;  %v2651_v61 = vld [vmem:[%s16277_s16 + $0x2e8] sm:$0xff]  ;;  %v1302_v24 = vld [vmem:[%s16274_s13 + $0xe98] sm:$0xff] }
 0x768   :  { %2506 = vmatpush.msrb.mxu3 %v1445_v31  ;;  %2811 = vmatpush.msrb.mxu2 %v2604_v34  ;;  %v1315_v31 = vld [vmem:[%s16274_s13 + $0xf00] sm:$0xff]  ;;  %v10362_v37 = vpop.f32.mrf.mxu2 }
 0x769   :  { %2782 = vmatpush.msra.mxu0 %v2561_v40  ;;  %2799 = vmatpush.msrb.mxu1 %v2580_v43  ;;  %v1623_v54 = vadd.f32 %v1622_v46, %v1603_v39  ;;  %v2594_v34 = vld [vmem:[%s16277_s16 + $0x120] sm:$0xff]  ;;  %v2631_v40 = vld [vmem:[%s16277_s16 + $0x248] sm:$0xff]  ;;  %v2593_v46 = vld [vmem:[%s16277_s16 + $0x118] sm:$0xff] }
 0x76a   :  { %2507 = vmatpush.msrb.mxu3 %v1432_v52  ;;  %2812 = vmatpush.msrb.mxu2 %v2603_v58  ;;  %v2650_v43 = vld [vmem:[%s16277_s16 + $0x2e0] sm:$0xff]  ;;  %v1723_v52 = vadd.f32 %v10275_v9, %v1703_v25  ;;  %v10404_v39 = vld [vmem:[%s16277_s16 + $0x108] sm:$0xff] }
 0x76b   :  { %2783 = vmatpush.msra.mxu0 %v2560_v62  ;;  %2800 = vmatpush.msrb.mxu1 %v2579_v30  ;;  %v1643_v38 = vadd.f32 %v1642_v63, %v1623_v54  ;;  %v2630_v58 = vld [vmem:[%s16277_s16 + $0x240] sm:$0xff]  ;;  %v2649_v62 = vld [vmem:[%s16277_s16 + $0x2d8] sm:$0xff]  ;;  %v1289_v30 = vld [vmem:[%s16274_s13 + $0xe30] sm:$0xff] }
 0x76c   :  { %2508 = vmatpush.msrb.mxu3 %v1419_v0  ;;  %2813 = vmatpush.msrb.mxu2 %v2602_v35  ;;  %v2592_v63 = vld [vmem:[%s16277_s16 + $0x110] sm:$0xff]  ;;  %v2629_v0 = vld [vmem:[%s16277_s16 + $0x238] sm:$0xff]  ;;  %v2647_v54 = vld [vmem:[%s16277_s16 + $0x2c8] sm:$0xff] }
 0x76d   :  { %2784 = vmatpush.msra.mxu0 %v2559_v33  ;;  %2801 = vmatpush.msrb.mxu1 %v2578_v36  ;;  %v10291_v57 = vadd.f32 %v1662_v44, %v1643_v38  ;;  %v10389_v44 = vpop.f32.mrf.mxu0  ;;  %v2648_v35 = vld [vmem:[%s16277_s16 + $0x2d0] sm:$0xff]  ;;  %v1480_v33 = vperm.slane %v10154_v1, 4  ;;  %v1276_v36 = vld [vmem:[%s16274_s13 + $0xdc8] sm:$0xff]  ;;  %v2646_v38 = vld [vmem:[%s16277_s16 + $0x2c0] sm:$0xff] }
 0x76e   :  { %2509 = vmatpush.msrb.mxu3 %v1406_v42  ;;  %2814 = vmatpush.msrb.mxu2 %v2601_v45  ;;  %v10407_v42 = vadd.f32 %v10306_v8, %v1723_v52  ;;  %v1842_v45 = vpop.f32.mrf.mxu1  ;;  %v2623_v25 = vld [vmem:[%s16277_s16 + $0x208] sm:$0xff] }
 0x76f   :  { %2785 = vmatpush.msra.mxu0 %v2558_v48  ;;  %2802 = vmatpush.msrb.mxu1 %v2577_v51  ;;  %16401 = vst [vmem:[#allocation6_spill] sm:$0xff] %v10291_v57  ;;  %v16284_v13 = vmax.f32 %v10291_v57, 0.0  ;;  %v1882_v48 = vpop.f32.mrf.mxu3  ;;  %v2628_v51 = vld [vmem:[%s16277_s16 + $0x230] sm:$0xff]  ;;  %v1843_v9 = vadd.f32 %v1842_v45, %v1480_v33  ;;  %v1482_v33 = vperm.slane %v10154_v1, 6  ;;  %v10575_v45 = vld [vmem:[%s16277_s16 + $0x288] sm:$0xff] }
 0x770   :  { %2510 = vmatpush.msrb.mxu3 %v1393_v49  ;;  %2786 = vmatmul.f32.vlgmr.msra.gmra.mxu0 %v16287_v60  ;;  %16402 = vst [vmem:[#allocation7_spill] sm:$0xff] %v10407_v42  ;;  %v10421_v49 = vld [vmem:[%s16277_s16 + $0x100] sm:$0xff]  ;;  %v10768_v60 = vld [vmem:[%s16277_s16 + $0x188] sm:$0xff] }
 0x771   :  { %2815 = vmatpush.msrb.mxu2 %v2600_v29  ;;  %2850 = vmatpush.msrb.mxu0 %v2637_v32  ;;  %v1862_v29 = vpop.f32.mrf.mxu2  ;;  %v2627_v32 = vld [vmem:[%s16277_s16 + $0x228] sm:$0xff]  ;;  %16408 = vst [vmem:[#allocation13_spill] sm:$0xff] %v10575_v45 }
 0x772   :  { %2803 = vmatpush.msrb.mxu1 %v2576_v47  ;;  %2511 = vmatpush.msrb.mxu3 %v1380_v50  ;;  %v16286_v47 = vmax.f32 %v10407_v42, 0.0  ;;  %v10435_v50 = vld [vmem:[%s16277_s16 + $0x1f8] sm:$0xff] }
 0x773   :  { %2816 = vmatpush.msrb.mxu2 %v2599_v53  ;;  %2851 = vmatpush.msrb.mxu0 %v2636_v56  ;;  %v10440_v53 = vld [vmem:[%s16277_s16 + $0x378] sm:$0xff]  ;;  %v1863_v56 = vadd.f32 %v1862_v29, %v1843_v9  ;;  %v10594_v29 = vld [vmem:[%s16277_s16 + $0x340] sm:$0xff] }
 0x774   :  { %2804 = vmatpush.msrb.mxu1 %v2575_v3  ;;  %2512 = vmatpush.msrb.mxu3 %v1367_v4  ;;  %v10454_v4 = vld [vmem:[%s16277_s16 + $0x1f0] sm:$0xff]  ;;  %v10608_v9 = vld [vmem:[%s16277_s16 + $0x1b8] sm:$0xff] }
 0x775   :  { %2817 = vmatpush.msrb.mxu2 %v2598_v6  ;;  %2852 = vmatpush.msrb.mxu0 %v2635_v7  ;;  %v1922_v3 = vpop.f32.mrf.mxu0  ;;  %v10459_v6 = vld [vmem:[%s16277_s16 + $0x370] sm:$0xff]  ;;  %v1481_v7 = vperm.slane %v10154_v1, 5  ;;  %v1883_v8 = vadd.f32 %v1882_v48, %v1863_v56  ;;  %v1479_v48 = vperm.slane %v10154_v1, 3 }
 0x776   :  { %2805 = vmatpush.msrb.mxu1 %v2574_v10  ;;  %2513 = vmatpush.msrb.mxu3 %v1354_v11  ;;  %v2644_v10 = vld [vmem:[%s16277_s16 + $0x2b0] sm:$0xff]  ;;  %v1942_v11 = vpop.f32.mrf.mxu1 }
 0x777   :  { %2806 = vmatmul.f32.vlgmr.msrb.gmra.mxu1 %v16284_v13  ;;  %2818 = vmatpush.msrb.mxu2 %v2597_v12  ;;  %v10473_v12 = vld [vmem:[%s16277_s16 + $0x1e8] sm:$0xff]  ;;  %v10756_v13 = vld [vmem:[%s16277_s16 + $0x440] sm:$0xff] }
 0x778   :  { %2853 = vmatpush.msrb.mxu0 %v2634_v16  ;;  %2870 = vmatpush.msra.mxu1 %v2653_v17  ;;  %v2624_v16 = vld [vmem:[%s16277_s16 + $0x210] sm:$0xff]  ;;  %v2643_v17 = vld [vmem:[%s16277_s16 + $0x2a8] sm:$0xff]  ;;  %16420 = vst [vmem:[#allocation25_spill] sm:$0xff] %v10756_v13 }
 0x779   :  { %2514 = vmatpush.msrb.mxu3 %v1341_v41  ;;  %2819 = vmatpush.msrb.mxu2 %v2596_v18  ;;  %v1962_v41 = vpop.f32.mrf.mxu2  ;;  %v1982_v18 = vpop.f32.mrf.mxu3 }
 0x77a   :  { %2854 = vmatpush.msrb.mxu0 %v2633_v19  ;;  %2871 = vmatpush.msra.mxu1 %v2652_v20  ;;  %v10491_v19 = vld [vmem:[%s16277_s16 + $0x1e0] sm:$0xff] }
 0x77b   :  { %2515 = vmatpush.msrb.mxu3 %v1328_v21  ;;  %2820 = vmatpush.msrb.mxu2 %v2595_v22  ;;  %v10496_v20 = vld [vmem:[%s16277_s16 + $0x360] sm:$0xff]  ;;  %v1923_v21 = vadd.f32 %v1922_v3, %v1481_v7  ;;  %v10499_v22 = vadd.f32 %v10389_v44, %v1883_v8  ;;  %v10556_v44 = vld [vmem:[%s16277_s16 + $0x1c8] sm:$0xff]  ;;  %v1763_v7 = vadd.f32 %v10362_v37, %v1479_v48  ;;  %v10642_v37 = vld [vmem:[%s16277_s16 + $0x330] sm:$0xff] }
 0x77c   :  { %2855 = vmatpush.msrb.mxu0 %v2632_v27  ;;  %2872 = vmatpush.msra.mxu1 %v2651_v61  ;;  %v10509_v27 = vld [vmem:[%s16277_s16 + $0x2a0] sm:$0xff]  ;;  %v10514_v61 = vld [vmem:[%s16277_s16 + $0x1d8] sm:$0xff]  ;;  %v10621_v3 = vld [vmem:[%s16277_s16 + $0x468] sm:$0xff] }
 0x77d   :  { %2516 = vmatpush.msrb.mxu3 %v1315_v31  ;;  %2821 = vmatpush.msrb.mxu2 %v2594_v34  ;;  %16403 = vst [vmem:[#allocation8_spill] sm:$0xff] %v10499_v22  ;;  %v10519_v31 = vld [vmem:[%s16277_s16 + $0x358] sm:$0xff]  ;;  %v1943_v34 = vadd.f32 %v1942_v11, %v1923_v21  ;;  %v16285_v52 = vmax.f32 %v10499_v22, 0.0  ;;  %v10647_v11 = vld [vmem:[%s16277_s16 + $0x460] sm:$0xff] }
 0x77e   :  { %2856 = vmatpush.msrb.mxu0 %v2631_v40  ;;  %2873 = vmatpush.msra.mxu1 %v2650_v43  ;;  %16404 = vst [vmem:[#allocation9_spill] sm:$0xff] %v10509_v27  ;;  %v2622_v40 = vld [vmem:[%s16277_s16 + $0x200] sm:$0xff]  ;;  %v10529_v43 = vld [vmem:[%s16277_s16 + $0x298] sm:$0xff] }
 0x77f   :  { %2517 = vmatpush.msrb.mxu3 %v1302_v24  ;;  %2822 = vmatpush.msrb.mxu2 %v2593_v46  ;;  %16405 = vst [vmem:[#allocation10_spill] sm:$0xff] %v10529_v43  ;;  %v2022_v24 = vpop.f32.mrf.mxu0  ;;  %v10535_v46 = vld [vmem:[%s16277_s16 + $0x1d0] sm:$0xff]  ;;  %v10671_v21 = vld [vmem:[%s16277_s16 + $0x458] sm:$0xff] }
 0x780   :  { %2857 = vmatpush.msrb.mxu0 %v2630_v58  ;;  %2874 = vmatpush.msra.mxu1 %v2649_v62  ;;  %v1963_v58 = vadd.f32 %v1962_v41, %v1943_v34  ;;  %v10543_v62 = vld [vmem:[%s16277_s16 + $0x350] sm:$0xff]  ;;  %16411 = vst [vmem:[#allocation16_spill] sm:$0xff] %v10621_v3  ;;  %v10680_v34 = vld [vmem:[%s16277_s16 + $0x1a0] sm:$0xff] }
 0x781   :  { %2518 = vmatpush.msrb.mxu3 %v1289_v30  ;;  %2823 = vmatpush.msrb.mxu2 %v2592_v63  ;;  %v10548_v30 = vld [vmem:[%s16277_s16 + $0x290] sm:$0xff]  ;;  %v10550_v63 = vpop.f32.mrf.mxu1  ;;  %16412 = vst [vmem:[#allocation17_spill] sm:$0xff] %v10647_v11 }
 0x782   :  { %2858 = vmatpush.msrb.mxu0 %v2629_v0  ;;  %2875 = vmatpush.msra.mxu1 %v2648_v35  ;;  %16406 = vst [vmem:[#allocation11_spill] sm:$0xff] %v10548_v30  ;;  %v2701_v0 = vld [vmem:[%s16277_s16 + $0x478] sm:$0xff]  ;;  %v10561_v35 = vadd.f32 %v1982_v18, %v1963_v58  ;;  %v10660_v41 = vld [vmem:[%s16277_s16 + $0x4f0] sm:$0xff] }
 0x783   :  { %2519 = vmatpush.msrb.mxu3 %v1276_v36  ;;  %2824 = vmatpush.msrb.mxu2 %v10404_v39  ;;  %v10570_v36 = vld [vmem:[%s16277_s16 + $0x348] sm:$0xff]  ;;  %16413 = vst [vmem:[#allocation18_spill] sm:$0xff] %v10660_v41  ;;  %v10697_v58 = vld [vmem:[%s16277_s16 + $0x450] sm:$0xff] }
 0x784   :  { %2859 = vmatpush.msrb.mxu0 %v2628_v51  ;;  %2876 = vmatpush.msra.mxu1 %v2647_v54  ;;  %16407 = vst [vmem:[#allocation12_spill] sm:$0xff] %v10561_v35  ;;  %v2002_v51 = vpop.f32.mrf.mxu3  ;;  %v10583_v54 = vld [vmem:[%s16277_s16 + $0x1c0] sm:$0xff]  ;;  %v16283_v56 = vmax.f32 %v10561_v35, 0.0  ;;  %v10816_v35 = vld [vmem:[%s16277_s16 + $0x3f8] sm:$0xff] }
 0x785   :  { %2520 = vmatpush.msrb.mxu3 %v1263_v28  ;;  %2825 = vmatpush.msrb.mxu2 %v10421_v49  ;;  %v10588_v28 = vld [vmem:[%s16277_s16 + $0x470] sm:$0xff]  ;;  %16414 = vst [vmem:[#allocation19_spill] sm:$0xff] %v10671_v21 }
 0x786   :  { %2860 = vmatpush.msrb.mxu0 %v2627_v32  ;;  %2877 = vmatpush.msra.mxu1 %v2646_v38  ;;  %16409 = vst [vmem:[#allocation14_spill] sm:$0xff] %v10588_v28  ;;  %v10599_v32 = vld [vmem:[%s16277_s16 + $0x280] sm:$0xff]  ;;  %v10601_v38 = vpop.f32.mrf.mxu2 }
 0x787   :  { %2521 = vmatmul.f32.vlgmr.msrb.gmra.mxu3 %v8567_v55  ;;  %2826 = vmatmul.f32.vlgmr.msrb.gmra.mxu2 %v16286_v47  ;;  %v2625_v55 = vld [vmem:[%s16277_s16 + $0x218] sm:$0xff]  ;;  %16410 = vst [vmem:[#allocation15_spill] sm:$0xff] %v10599_v32  ;;  %v10624_v8 = vpop.f32.mrf.mxu0 }
 0x788   :  { %2830 = vmatpush.msra.mxu3 %v10435_v50  ;;  %2890 = vmatpush.msra.mxu2 %v10440_v53  ;;  %16416 = vst [vmem:[#allocation21_spill] sm:$0xff] %v10697_v58 }
 0x789   :  { %2861 = vmatpush.msrb.mxu0 %v2626_v59  ;;  %2878 = vmatpush.msra.mxu1 %v2645_v2  ;;  %v2003_v59 = vadd.f32 %v2002_v51, %v1482_v33  ;;  %v10616_v2 = vld [vmem:[%s16277_s16 + $0x338] sm:$0xff] }
 0x78a   :  { %2831 = vmatpush.msra.mxu3 %v10454_v4  ;;  %2891 = vmatpush.msra.mxu2 %v10459_v6  ;;  %v10709_v51 = vld [vmem:[%s16277_s16 + $0x198] sm:$0xff] }
 0x78b   :  { %2862 = vmatpush.msrb.mxu0 %v2625_v55  ;;  %2879 = vmatpush.msra.mxu1 %v2644_v10  ;;  %v10631_v55 = vld [vmem:[%s16277_s16 + $0x1b0] sm:$0xff]  ;;  %v2717_v10 = vld [vmem:[%s16277_s16 + $0x4f8] sm:$0xff]  ;;  %v2023_v18 = vadd.f32 %v2022_v24, %v2003_v59  ;;  %v10692_v24 = vld [vmem:[%s16277_s16 + $0x320] sm:$0xff] }
 0x78c   :  { %2832 = vmatpush.msra.mxu3 %v10473_v12  ;;  %2892 = vmatpush.msra.mxu2 %v10478_v14  ;;  %v10702_v48 = vpop.f32.mrf.mxu3  ;;  %v10714_v59 = vld [vmem:[%s16277_s16 + $0x4e0] sm:$0xff] }
 0x78d   :  { %2863 = vmatpush.msrb.mxu0 %v2624_v16  ;;  %2880 = vmatpush.msra.mxu1 %v2643_v17  ;;  %v1783_v16 = vadd.f32 %v10348_v26, %v1763_v7  ;;  %v10655_v17 = vld [vmem:[%s16277_s16 + $0x1a8] sm:$0xff]  ;;  %16417 = vst [vmem:[#allocation22_spill] sm:$0xff] %v10714_v59  ;;  %v10722_v7 = vld [vmem:[%s16277_s16 + $0x318] sm:$0xff] }
 0x78e   :  { %2833 = vmatpush.msra.mxu3 %v10491_v19  ;;  %2893 = vmatpush.msra.mxu2 %v10496_v20  ;;  %v10666_v26 = vld [vmem:[%s16277_s16 + $0x328] sm:$0xff]  ;;  %v10700_v33 = vpop.f32.mrf.mxu2 }
 0x78f   :  { %2864 = vmatpush.msrb.mxu0 %v2623_v25  ;;  %2881 = vmatpush.msra.mxu1 %v10509_v27  ;;  %v10673_v25 = vpop.f32.mrf.mxu1  ;;  %v10761_v47 = vpop.f32.mrf.mxu0 }
 0x790   :  { %2834 = vmatpush.msra.mxu3 %v10514_v61  ;;  %2894 = vmatpush.msra.mxu2 %v10519_v31 }
 0x791   :  { %2865 = vmatpush.msrb.mxu0 %v2622_v40  ;;  %2882 = vmatpush.msra.mxu1 %v10529_v43  ;;  %v10685_v40 = vld [vmem:[%s16277_s16 + $0x4e8] sm:$0xff] }
 0x792   :  { %2835 = vmatpush.msra.mxu3 %v10535_v46  ;;  %2866 = vmatmul.f32.vlgmr.msrb.gmra.mxu0 %v16285_v52  ;;  %16415 = vst [vmem:[#allocation20_spill] sm:$0xff] %v10685_v40 }
 0x793   :  { %2895 = vmatpush.msra.mxu2 %v10543_v62  ;;  %2883 = vmatpush.msra.mxu1 %v10548_v30 }
 0x794   :  { %2836 = vmatpush.msra.mxu3 %v10556_v44  ;;  %2930 = vmatpush.msra.mxu0 %v2701_v0  ;;  %v1803_v0 = vadd.f32 %v10318_v15, %v1783_v16  ;;  %v2043_v15 = vadd.f32 %v10550_v63, %v2023_v18  ;;  %v10732_v16 = vld [vmem:[%s16275_s14 + $0x8] sm:$0x1f]  ;;  %v10739_v63 = vld [vmem:[%s16277_s16 + $0x190] sm:$0xff]  ;;  %v10744_v18 = vld [vmem:[%s16277_s16 + $0x4d8] sm:$0xff] }
 0x795   :  { %2896 = vmatpush.msra.mxu2 %v10570_v36  ;;  %2884 = vmatpush.msra.mxu1 %v10575_v45  ;;  %16419 = vst [vmem:[#allocation24_spill] sm:$0xff] %v10744_v18 }
 0x796   :  { %2837 = vmatpush.msra.mxu3 %v10583_v54  ;;  %2931 = vmatpush.msra.mxu0 %v10588_v28  ;;  %v10759_v52 = vadd.f32 %v10346_v23, %v1803_v0  ;;  %v1484_v23 = vperm.slane %v10732_v16, 0  ;;  %v10784_v0 = vld [vmem:[%s16277_s16 + $0x308] sm:$0xff]  ;;  %v10856_v28 = vld [vmem:[%s16277_s16 + $0x4b8] sm:$0xff] }
 0x797   :  { %2897 = vmatpush.msra.mxu2 %v10594_v29  ;;  %2885 = vmatpush.msra.mxu1 %v10599_v32  ;;  %16424 = vst [vmem:[#allocation29_spill] sm:$0xff] %v10784_v0  ;;  %v2242_v22 = vpop.f32.mrf.mxu0  ;;  %v11131_v32 = vld [vmem:[%s16277_s16 + $0x500] sm:$0xff] }
 0x798   :  { %2838 = vmatpush.msra.mxu3 %v10608_v9  ;;  %2886 = vmatmul.f32.vlgmr.msra.gmra.mxu1 %v16283_v56  ;;  %v10751_v56 = vld [vmem:[%s16277_s16 + $0x310] sm:$0xff]  ;;  %16421 = vst [vmem:[#allocation26_spill] sm:$0xff] %v10759_v52 }
 0x799   :  { %2898 = vmatpush.msra.mxu2 %v10616_v2  ;;  %2932 = vmatpush.msra.mxu0 %v10621_v3  ;;  %v1485_v3 = vperm.slane %v10732_v16, 1  ;;  %16434 = vst [vmem:[#allocation37_spill] sm:$0xff] %v10856_v28 }
 0x79a   :  { %2839 = vmatpush.msra.mxu3 %v10631_v55  ;;  %2950 = vmatpush.msrb.mxu1 %v2717_v10  ;;  %v10727_v10 = vld [vmem:[%s16277_s16 + $0x448] sm:$0xff]  ;;  %16471 = vst [vmem:[#allocation72_spill] sm:$0xff] %v11131_v32 }
 0x79b   :  { %2899 = vmatpush.msra.mxu2 %v10642_v37  ;;  %2933 = vmatpush.msra.mxu0 %v10647_v11  ;;  %16418 = vst [vmem:[#allocation23_spill] sm:$0xff] %v10727_v10 }
 0x79c   :  { %2840 = vmatpush.msra.mxu3 %v10655_v17  ;;  %2951 = vmatpush.msrb.mxu1 %v10660_v41  ;;  %v2162_v41 = vpop.f32.mrf.mxu1 }
 0x79d   :  { %2900 = vmatpush.msra.mxu2 %v10666_v26  ;;  %2934 = vmatpush.msra.mxu0 %v10671_v21  ;;  %v2163_v11 = vadd.f32 %v2162_v41, %v1484_v23  ;;  %v16430_v41 = vmax.f32 %v10759_v52, 0.0  ;;  %v10837_v23 = vld [vmem:[%s16277_s16 + $0x3f0] sm:$0xff]  ;;  %v10887_v52 = vld [vmem:[%s16277_s16 + $0x3e0] sm:$0xff] }
 0x79e   :  { %2841 = vmatpush.msra.mxu3 %v10680_v34  ;;  %2952 = vmatpush.msrb.mxu1 %v10685_v40  ;;  %v10776_v40 = vadd.f32 %v10601_v38, %v2043_v15  ;;  %v10796_v38 = vld [vmem:[%s16277_s16 + $0x180] sm:$0xff]  ;;  %v10801_v15 = vld [vmem:[%s16277_s16 + $0x4c8] sm:$0xff] }
 0x79f   :  { %2901 = vmatpush.msra.mxu2 %v10692_v24  ;;  %2935 = vmatpush.msra.mxu0 %v10697_v58  ;;  %16426 = vst [vmem:[#allocation31_spill] sm:$0xff] %v10801_v15  ;;  %v2182_v58 = vpop.f32.mrf.mxu2 }
 0x7a0   :  { %2842 = vmatpush.msra.mxu3 %v10709_v51  ;;  %2953 = vmatpush.msrb.mxu1 %v10714_v59  ;;  %v10773_v59 = vld [vmem:[%s16277_s16 + $0x4d0] sm:$0xff]  ;;  %16423 = vst [vmem:[#allocation28_spill] sm:$0xff] %v10776_v40  ;;  %v2202_v21 = vpop.f32.mrf.mxu3  ;;  %v16432_v57 = vmax.f32 %v10776_v40, 0.0 }
 0x7a1   :  { %2902 = vmatpush.msra.mxu2 %v10722_v7  ;;  %2936 = vmatpush.msra.mxu0 %v10727_v10  ;;  %16422 = vst [vmem:[#allocation27_spill] sm:$0xff] %v10773_v59  ;;  %v10789_v10 = vld [vmem:[%s16277_s16 + $0x438] sm:$0xff] }
 0x7a2   :  { %2843 = vmatpush.msra.mxu3 %v10739_v63  ;;  %2954 = vmatpush.msrb.mxu1 %v10744_v18  ;;  %16425 = vst [vmem:[#allocation30_spill] sm:$0xff] %v10789_v10  ;;  %v10808_v18 = vld [vmem:[%s16277_s16 + $0x300] sm:$0xff] }
 0x7a3   :  { %2903 = vmatpush.msra.mxu2 %v10751_v56  ;;  %2937 = vmatpush.msra.mxu0 %v10756_v13  ;;  %16427 = vst [vmem:[#allocation32_spill] sm:$0xff] %v10808_v18  ;;  %v10823_v13 = vld [vmem:[%s16277_s16 + $0x430] sm:$0xff] }
 0x7a4   :  { %2844 = vmatpush.msra.mxu3 %v10768_v60  ;;  %2955 = vmatpush.msrb.mxu1 %v10773_v59  ;;  %16428 = vst [vmem:[#allocation33_spill] sm:$0xff] %v10823_v13  ;;  %v10842_v59 = vld [vmem:[%s16277_s16 + $0x578] sm:$0xff]  ;;  %v2262_v40 = vpop.f32.mrf.mxu1 }
 0x7a5   :  { %2904 = vmatpush.msra.mxu2 %v10784_v0  ;;  %2938 = vmatpush.msra.mxu0 %v10789_v10  ;;  %v10829_v10 = vld [vmem:[%s16277_s16 + $0x4c0] sm:$0xff]  ;;  %16431 = vst [vmem:[#allocation35_spill] sm:$0xff] %v10842_v59 }
 0x7a6   :  { %2845 = vmatpush.msra.mxu3 %v10796_v38  ;;  %2956 = vmatpush.msrb.mxu1 %v10801_v15  ;;  %16429 = vst [vmem:[#allocation34_spill] sm:$0xff] %v10829_v10  ;;  %v2183_v15 = vadd.f32 %v2182_v58, %v2163_v11  ;;  %v10868_v11 = vld [vmem:[%s16277_s16 + $0x570] sm:$0xff]  ;;  %v10874_v58 = vld [vmem:[%s16277_s16 + $0x420] sm:$0xff] }
 0x7a7   :  { %2905 = vmatpush.msra.mxu2 %v10808_v18  ;;  %2846 = vmatmul.f32.vlgmr.msra.gmra.mxu3 %v16430_v41  ;;  %v10851_v41 = vld [vmem:[%s16277_s16 + $0x428] sm:$0xff]  ;;  %16435 = vst [vmem:[#allocation38_spill] sm:$0xff] %v10868_v11  ;;  %v2342_v45 = vpop.f32.mrf.mxu0 }
 0x7a8   :  { %2906 = vmatmul.f32.vlgmr.msra.gmra.mxu2 %v16432_v57  ;;  %2910 = vmatpush.msrb.mxu3 %v10816_v35  ;;  %16433 = vst [vmem:[#allocation36_spill] sm:$0xff] %v10851_v41  ;;  %v10863_v57 = vld [vmem:[%s16277_s16 + $0x3e8] sm:$0xff] }
 0x7a9   :  { %2939 = vmatpush.msra.mxu0 %v10823_v13  ;;  %2957 = vmatpush.msrb.mxu1 %v10829_v10  ;;  %16436 = vst [vmem:[#allocation39_spill] sm:$0xff] %v10874_v58  ;;  %v2203_v13 = vadd.f32 %v2202_v21, %v2183_v15  ;;  %v10879_v10 = vld [vmem:[%s16277_s16 + $0x4b0] sm:$0xff]  ;;  %v10892_v21 = vld [vmem:[%s16277_s16 + $0x568] sm:$0xff]  ;;  %v2243_v15 = vadd.f32 %v2242_v22, %v1485_v3  ;;  %v10911_v22 = vld [vmem:[%s16277_s16 + $0x3d8] sm:$0xff] }
 0x7aa   :  { %2911 = vmatpush.msrb.mxu3 %v10837_v23  ;;  %16437 = vst [vmem:[#allocation40_spill] sm:$0xff] %v10879_v10  ;;  %2970 = vmatpush.msrb.mxu2 %v10842_v59  ;;  %v10898_v59 = vld [vmem:[%s16277_s16 + $0x418] sm:$0xff]  ;;  %v10916_v3 = vld [vmem:[%s16277_s16 + $0x560] sm:$0xff] }
 0x7ab   :  { %2940 = vmatpush.msra.mxu0 %v10851_v41  ;;  %2958 = vmatpush.msrb.mxu1 %v10856_v28  ;;  %16438 = vst [vmem:[#allocation41_spill] sm:$0xff] %v10892_v21  ;;  %v10903_v28 = vld [vmem:[%s16277_s16 + $0x4a8] sm:$0xff]  ;;  %v2282_v41 = vpop.f32.mrf.mxu2  ;;  %v2263_v42 = vadd.f32 %v2262_v40, %v2243_v15  ;;  %v10919_v5 = vadd.f32 %v10761_v47, %v2203_v13  ;;  %v10938_v13 = vld [vmem:[%s16277_s16 + $0x3d0] sm:$0xff]  ;;  %v2302_v47 = vpop.f32.mrf.mxu3  ;;  %v10943_v40 = vld [vmem:[%s16277_s16 + $0x558] sm:$0xff] }
 0x7ac   :  { %2912 = vmatpush.msrb.mxu3 %v10863_v57  ;;  %16439 = vst [vmem:[#allocation42_spill] sm:$0xff] %v10898_v59  ;;  %2971 = vmatpush.msrb.mxu2 %v10868_v11  ;;  %v1483_v11 = vperm.slane %v10154_v1, 7  ;;  %v11002_v1 = vld [vmem:[%s16277_s16 + $0x548] sm:$0xff] }
 0x7ad   :  { %16440 = vst [vmem:[#allocation43_spill] sm:$0xff] %v10903_v28  ;;  %2941 = vmatpush.msra.mxu0 %v10874_v58  ;;  %2959 = vmatpush.msrb.mxu1 %v10879_v10  ;;  %v10925_v10 = vld [vmem:[%s16277_s16 + $0x410] sm:$0xff]  ;;  %v10930_v58 = vld [vmem:[%s16277_s16 + $0x4a0] sm:$0xff]  ;;  %v2283_v15 = vadd.f32 %v2282_v41, %v2263_v42  ;;  %v10962_v42 = vld [vmem:[%s16277_s16 + $0x3c8] sm:$0xff] }
 0x7ae   :  { %16441 = vst [vmem:[#allocation44_spill] sm:$0xff] %v10916_v3  ;;  %2913 = vmatpush.msrb.mxu3 %v10887_v52  ;;  %2972 = vmatpush.msrb.mxu2 %v10892_v21  ;;  %v10967_v41 = vld [vmem:[%s16277_s16 + $0x550] sm:$0xff]  ;;  %v10990_v21 = vld [vmem:[%s16277_s16 + $0x3c0] sm:$0xff] }
 0x7af   :  { %16442 = vst [vmem:[#allocation45_spill] sm:$0xff] %v10919_v5  ;;  %2942 = vmatpush.msra.mxu0 %v10898_v59  ;;  %2960 = vmatpush.msrb.mxu1 %v10903_v28  ;;  %v10949_v59 = vld [vmem:[%s16277_s16 + $0x408] sm:$0xff]  ;;  %v10954_v28 = vld [vmem:[%s16277_s16 + $0x498] sm:$0xff] }
 0x7b0   :  { %16443 = vst [vmem:[#allocation46_spill] sm:$0xff] %v10925_v10  ;;  %2914 = vmatpush.msrb.mxu3 %v10911_v22  ;;  %2973 = vmatpush.msrb.mxu2 %v10916_v3  ;;  %v10981_v3 = vld [vmem:[%s16277_s16 + $0x490] sm:$0xff] }
 0x7b1   :  { %16444 = vst [vmem:[#allocation47_spill] sm:$0xff] %v10930_v58  ;;  %2943 = vmatpush.msra.mxu0 %v10925_v10  ;;  %2961 = vmatpush.msrb.mxu1 %v10930_v58  ;;  %v10974_v10 = vld [vmem:[%s16277_s16 + $0x400] sm:$0xff]  ;;  %v10976_v58 = vadd.f32 %v2302_v47, %v2283_v15  ;;  %v10996_v47 = vld [vmem:[%s16277_s16 + $0x488] sm:$0xff]  ;;  %v11009_v15 = vld [vmem:[%s16277_s16 + $0x3b8] sm:$0xff] }
 0x7b2   :  { %16445 = vst [vmem:[#allocation48_spill] sm:$0xff] %v10943_v40  ;;  %2915 = vmatpush.msrb.mxu3 %v10938_v13  ;;  %2974 = vmatpush.msrb.mxu2 %v10943_v40  ;;  %v11125_v40 = vld [vmem:[%s16277_s16 + $0x5f8] sm:$0xff] }
 0x7b3   :  { %16446 = vst [vmem:[#allocation49_spill] sm:$0xff] %v10949_v59  ;;  %2944 = vmatpush.msra.mxu0 %v10949_v59  ;;  %2962 = vmatpush.msrb.mxu1 %v10954_v28  ;;  %v11037_v59 = vld [vmem:[%s16277_s16 + $0x538] sm:$0xff] }
 0x7b4   :  { %16447 = vst [vmem:[#allocation50_spill] sm:$0xff] %v10954_v28  ;;  %2916 = vmatpush.msrb.mxu3 %v10962_v42  ;;  %2975 = vmatpush.msrb.mxu2 %v10967_v41  ;;  %v16454_v28 = vmax.f32 %v10919_v5, 0.0 }
 0x7b5   :  { %16448 = vst [vmem:[#allocation51_spill] sm:$0xff] %v10967_v41  ;;  %2945 = vmatpush.msra.mxu0 %v10974_v10  ;;  %2963 = vmatpush.msrb.mxu1 %v10981_v3  ;;  %v11018_v41 = vld [vmem:[%s16277_s16 + $0x480] sm:$0xff] }
 0x7b6   :  { %16449 = vst [vmem:[#allocation52_spill] sm:$0xff] %v10974_v10  ;;  %2946 = vmatmul.f32.vlgmr.msra.gmra.mxu0 %v16454_v28  ;;  %2917 = vmatpush.msrb.mxu3 %v10990_v21  ;;  %v2083_v10 = vadd.f32 %v10700_v33, %v1483_v11  ;;  %v11030_v28 = vld [vmem:[%s16277_s16 + $0x3b0] sm:$0xff]  ;;  %v11044_v33 = vld [vmem:[%s16277_s16 + $0x3a8] sm:$0xff]  ;;  %v16458_v11 = vmax.f32 %v10976_v58, 0.0 }
 0x7b7   :  { %16450 = vst [vmem:[#allocation53_spill] sm:$0xff] %v10976_v58  ;;  %2964 = vmatpush.msrb.mxu1 %v10996_v47  ;;  %2976 = vmatpush.msrb.mxu2 %v11002_v1  ;;  %v11078_v58 = vld [vmem:[%s16277_s16 + $0x520] sm:$0xff] }
 0x7b8   :  { %16451 = vst [vmem:[#allocation54_spill] sm:$0xff] %v10981_v3  ;;  %v11023_v3 = vld [vmem:[%s16277_s16 + $0x540] sm:$0xff]  ;;  %2918 = vmatpush.msrb.mxu3 %v11009_v15  ;;  %v2103_v5 = vadd.f32 %v10702_v48, %v2083_v10  ;;  %v11065_v10 = vld [vmem:[%s16277_s16 + $0x528] sm:$0xff] }
 0x7b9   :  { %16452 = vst [vmem:[#allocation55_spill] sm:$0xff] %v10996_v47  ;;  %2965 = vmatpush.msrb.mxu1 %v11018_v41  ;;  %2977 = vmatpush.msrb.mxu2 %v11023_v3  ;;  %v11053_v47 = vld [vmem:[%s16277_s16 + $0x530] sm:$0xff]  ;;  %v11058_v48 = vld [vmem:[%s16277_s16 + $0x3a0] sm:$0xff] }
 0x7ba   :  { %16453 = vst [vmem:[#allocation56_spill] sm:$0xff] %v11002_v1  ;;  %2919 = vmatpush.msrb.mxu3 %v11030_v28  ;;  %2966 = vmatmul.f32.vlgmr.msrb.gmra.mxu1 %v16458_v11  ;;  %v2123_v11 = vadd.f32 %v10624_v8, %v2103_v5  ;;  %v11090_v5 = vld [vmem:[%s16277_s16 + $0x518] sm:$0xff] }
 0x7bb   :  { %16455 = vst [vmem:[#allocation57_spill] sm:$0xff] %v11018_v41  ;;  %2978 = vmatpush.msrb.mxu2 %v11037_v59  ;;  %v11071_v41 = vld [vmem:[%s16277_s16 + $0x398] sm:$0xff] }
 0x7bc   :  { %16456 = vst [vmem:[#allocation58_spill] sm:$0xff] %v11023_v3  ;;  %2920 = vmatpush.msrb.mxu3 %v11044_v33  ;;  %v11093_v8 = vadd.f32 %v10673_v25, %v2123_v11  ;;  %v11106_v3 = vld [vmem:[%s16277_s16 + $0x510] sm:$0xff]  ;;  %v11111_v25 = vld [vmem:[%s16277_s16 + $0x380] sm:$0xff]  ;;  %v11118_v11 = vld [vmem:[%s16277_s16 + $0x508] sm:$0xff] }
 0x7bd   :  { %16457 = vst [vmem:[#allocation59_spill] sm:$0xff] %v11037_v59  ;;  %2979 = vmatpush.msrb.mxu2 %v11053_v47  ;;  %v11083_v59 = vld [vmem:[%s16277_s16 + $0x390] sm:$0xff] }
 0x7be   :  { %16459 = vst [vmem:[#allocation60_spill] sm:$0xff] %v11053_v47  ;;  %2921 = vmatpush.msrb.mxu3 %v11058_v48  ;;  %v11098_v47 = vld [vmem:[%s16277_s16 + $0x388] sm:$0xff] }
 0x7bf   :  { %16460 = vst [vmem:[#allocation61_spill] sm:$0xff] %v11065_v10  ;;  %2980 = vmatpush.msrb.mxu2 %v11065_v10  ;;  %v1486_v10 = vperm.slane %v10732_v16, 2 }
 0x7c0   :  { %16461 = vst [vmem:[#allocation62_spill] sm:$0xff] %v11071_v41  ;;  %2922 = vmatpush.msrb.mxu3 %v11071_v41 }
 0x7c1   :  { %16462 = vst [vmem:[#allocation63_spill] sm:$0xff] %v11078_v58  ;;  %2981 = vmatpush.msrb.mxu2 %v11078_v58  ;;  %v16345_v58 = vmax.f32 %v11093_v8, 0.0 }
 0x7c2   :  { %16463 = vst [vmem:[#allocation64_spill] sm:$0xff] %v11083_v59  ;;  %2923 = vmatpush.msrb.mxu3 %v11083_v59 }
 0x7c3   :  { %16464 = vst [vmem:[#allocation65_spill] sm:$0xff] %v11090_v5  ;;  %2982 = vmatpush.msrb.mxu2 %v11090_v5 }
 0x7c4   :  { %16465 = vst [vmem:[#allocation66_spill] sm:$0xff] %v11093_v8  ;;  %2924 = vmatpush.msrb.mxu3 %v11098_v47 }
 0x7c5   :  { %16466 = vst [vmem:[#allocation67_spill] sm:$0xff] %v11098_v47  ;;  %v2322_v1 = vpop.f32.mrf.mxu3  ;;  %2983 = vmatpush.msrb.mxu2 %v11106_v3 }
 0x7c6   :  { %16467 = vst [vmem:[#allocation68_spill] sm:$0xff] %v11106_v3  ;;  %2925 = vmatpush.msrb.mxu3 %v11111_v25  ;;  %v2323_v5 = vadd.f32 %v2322_v1, %v1486_v10  ;;  %v11139_v3 = vld [vmem:[%s16277_s16 + $0x5f0] sm:$0xff]  ;;  %v2362_v1 = vpop.f32.mrf.mxu1  ;;  %v11146_v10 = vld [vmem:[%s16277_s16 + $0x5e8] sm:$0xff] }
 0x7c7   :  { %16468 = vst [vmem:[#allocation69_spill] sm:$0xff] %v11111_v25  ;;  %2926 = vmatmul.f32.vlgmr.msrb.gmra.mxu3 %v16345_v58  ;;  %2984 = vmatpush.msrb.mxu2 %v11118_v11  ;;  %v2382_v58 = vpop.f32.mrf.mxu2 }
 0x7c8   :  { %16469 = vst [vmem:[#allocation70_spill] sm:$0xff] %v11118_v11  ;;  %v2343_v47 = vadd.f32 %v2342_v45, %v2323_v5  ;;  %2990 = vmatpush.msra.mxu3 %v11125_v40  ;;  %v11152_v11 = vld [vmem:[%s16277_s16 + $0x5e0] sm:$0xff]  ;;  %v11160_v5 = vld [vmem:[%s16277_s16 + $0x5d8] sm:$0xff] }
 0x7c9   :  { %16470 = vst [vmem:[#allocation71_spill] sm:$0xff] %v11125_v40  ;;  %2985 = vmatpush.msrb.mxu2 %v11131_v32 }
 0x7ca   :  { %16472 = vst [vmem:[#allocation73_spill] sm:$0xff] %v11139_v3  ;;  %v2363_v8 = vadd.f32 %v2362_v1, %v2343_v47  ;;  %2991 = vmatpush.msra.mxu3 %v11139_v3  ;;  %v11167_v47 = vld [vmem:[%s16277_s16 + $0x5d0] sm:$0xff]  ;;  %v11187_v1 = vld [vmem:[%s16277_s16 + $0x5b8] sm:$0xff] }
 0x7cb   :  { %16473 = vst [vmem:[#allocation74_spill] sm:$0xff] %v11146_v10 }
 0x7cc   :  { %16474 = vst [vmem:[#allocation75_spill] sm:$0xff] %v11152_v11  ;;  %v11154_v45 = vadd.f32 %v2382_v58, %v2363_v8  ;;  %2992 = vmatpush.msra.mxu3 %v11146_v10  ;;  %v11175_v58 = vld [vmem:[%s16277_s16 + $0x5c8] sm:$0xff]  ;;  %v11181_v8 = vld [vmem:[%s16277_s16 + $0x5c0] sm:$0xff]  ;;  %v2442_v10 = vpop.f32.mrf.mxu0 }
 0x7cd   :  { %16476 = vst [vmem:[#allocation77_spill] sm:$0xff] %v11160_v5 }
 0x7ce   :  { %16475 = vst [vmem:[#allocation76_spill] sm:$0xff] %v11154_v45  ;;  %v16348_v32 = vmax.f32 %v11154_v45, 0.0  ;;  %2993 = vmatpush.msra.mxu3 %v11152_v11  ;;  %v11199_v45 = vld [vmem:[%s16277_s16 + $0x5a8] sm:$0xff]  ;;  %v2462_v40 = vpop.f32.mrf.mxu1 }
 0x7cf   :  { %16477 = vst [vmem:[#allocation78_spill] sm:$0xff] %v11167_v47 }
 0x7d0   :  { %2986 = vmatmul.f32.vlgmr.msrb.gmra.mxu2 %v16348_v32  ;;  %2994 = vmatpush.msra.mxu3 %v11160_v5  ;;  %16478 = vst [vmem:[#allocation79_spill] sm:$0xff] %v11175_v58  ;;  %v11193_v32 = vld [vmem:[%s16277_s16 + $0x5b0] sm:$0xff] }
 0x7d1   :  { %16479 = vst [vmem:[#allocation80_spill] sm:$0xff] %v11181_v8 }
 0x7d2   :  { %2995 = vmatpush.msra.mxu3 %v11167_v47  ;;  %16480 = vst [vmem:[#allocation81_spill] sm:$0xff] %v11187_v1  ;;  %v2402_v47 = vpop.f32.mrf.mxu2 }
 0x7d3   :  { %16481 = vst [vmem:[#allocation82_spill] sm:$0xff] %v11193_v32 }
 0x7d4   :  { %2996 = vmatpush.msra.mxu3 %v11175_v58  ;;  %16482 = vst [vmem:[#allocation83_spill] sm:$0xff] %v11199_v45  ;;  %v11205_v58 = vld [vmem:[%s16277_s16 + $0x5a0] sm:$0xff] }
 0x7d5   :  { %16483 = vst [vmem:[#allocation84_spill] sm:$0xff] %v11205_v58 }
 0x7d6   :  { %2997 = vmatpush.msra.mxu3 %v11181_v8  ;;  %v11211_v8 = vld [vmem:[%s16277_s16 + $0x598] sm:$0xff] }
 0x7d7   :  { %16484 = vst [vmem:[#allocation85_spill] sm:$0xff] %v11211_v8 }
 0x7d8   :  { %2998 = vmatpush.msra.mxu3 %v11187_v1  ;;  %v11217_v1 = vld [vmem:[%s16277_s16 + $0x590] sm:$0xff] }
 0x7d9   :  { %16485 = vst [vmem:[#allocation86_spill] sm:$0xff] %v11217_v1 }
 0x7da   :  { %2999 = vmatpush.msra.mxu3 %v11193_v32  ;;  %v11223_v32 = vld [vmem:[%s16277_s16 + $0x588] sm:$0xff] }
 0x7db   :  { %16486 = vst [vmem:[#allocation87_spill] sm:$0xff] %v11223_v32 }
 0x7dc   :  { %3000 = vmatpush.msra.mxu3 %v11199_v45  ;;  %v1487_v45 = vperm.slane %v10732_v16, 3 }
 0x7de   :  { %3001 = vmatpush.msra.mxu3 %v11205_v58  ;;  %v11230_v58 = vld [vmem:[%s16277_s16 + $0x580] sm:$0xff] }
 0x7df   :  { %16487 = vst [vmem:[#allocation88_spill] sm:$0xff] %v11230_v58 }
 0x7e0   :  { %3002 = vmatpush.msra.mxu3 %v11211_v8  ;;  %v2403_v8 = vadd.f32 %v2402_v47, %v1487_v45 }
 0x7e2   :  { %3003 = vmatpush.msra.mxu3 %v11217_v1  ;;  %v11237_v1 = vld [vmem:[%s16277_s16 + $0x618] sm:$0xff] }
 0x7e3   :  { %16488 = vst [vmem:[#allocation89_spill] sm:$0xff] %v11237_v1  ;;  %3022 = vmatpush.msrb.mxu0 %v11237_v1  ;;  %v2542_v1 = vpop.f32.mrf.mxu0 }
 0x7e4   :  { %3004 = vmatpush.msra.mxu3 %v11223_v32  ;;  %v11245_v32 = vld [vmem:[%s16277_s16 + $0x610] sm:$0xff] }
 0x7e5   :  { %16490 = vst [vmem:[#allocation91_spill] sm:$0xff] %v11245_v32  ;;  %3023 = vmatpush.msrb.mxu0 %v11245_v32 }
 0x7e6   :  { %3005 = vmatpush.msra.mxu3 %v11230_v58 }
 0x7e8   :  { %v2422_v5 = vpop.f32.mrf.mxu3 }
 0x7e9   :  { %v2423_v11 = vadd.f32 %v2422_v5, %v2403_v8  ;;  %v2502_v5 = vpop.f32.mrf.mxu2 }
 0x7eb   :  { %v2443_v3 = vadd.f32 %v2442_v10, %v2423_v11  ;;  %v11252_v11 = vld [vmem:[%s16277_s16 + $0x608] sm:$0xff]  ;;  %v2482_v10 = vpop.f32.mrf.mxu1 }
 0x7ec   :  { %16491 = vst [vmem:[#allocation92_spill] sm:$0xff] %v11252_v11  ;;  %3024 = vmatpush.msrb.mxu0 %v11252_v11 }
 0x7ed   :  { %v11239_v25 = vadd.f32 %v2462_v40, %v2443_v3  ;;  %v11257_v3 = vld [vmem:[%s16277_s16 + $0x600] sm:$0xff]  ;;  %v1488_v40 = vperm.slane %v10732_v16, 4  ;;  %v2787_v11 = vpop.f32.mrf.mxu0 }
 0x7ee   :  { %16492 = vst [vmem:[#allocation93_spill] sm:$0xff] %v11257_v3  ;;  %3025 = vmatpush.msrb.mxu0 %v11257_v3 }
 0x7ef   :  { %16489 = vst [vmem:[#allocation90_spill] sm:$0xff] %v11239_v25  ;;  %v16371_v45 = vmax.f32 %v11239_v25, 0.0  ;;  %v2483_v47 = vadd.f32 %v2482_v10, %v1488_v40 }
 0x7f1   :  { %3006 = vmatmul.f32.vlgmr.msra.gmra.mxu3 %v16371_v45  ;;  %v2503_v8 = vadd.f32 %v2502_v5, %v2483_v47 }
 0x7f4   :  { %v2807_v45 = vpop.f32.mrf.mxu1 }
 0x7f5   :  { %v2808_v25 = vadd.f32 %v2807_v45, %v2787_v11  ;;  %v11297_v11 = vld [vmem:[%s16278_s17 + $0x8] sm:$0xff] }
 0x7f6   :  { %16498 = vst [vmem:[#allocation99_spill] sm:$0xff] %v11297_v11 }
 0x80a   :  { %v2522_v58 = vpop.f32.mrf.mxu3  ;;  %v2827_v3 = vpop.f32.mrf.mxu2 }
 0x80b   :  { %v2523_v32 = vadd.f32 %v2522_v58, %v2503_v8  ;;  %v2828_v59 = vadd.f32 %v2827_v3, %v2808_v25  ;;  %v11278_v8 = vld [vmem:[%s16278_s17 + $0x10] sm:$0xff]  ;;  %v11290_v25 = vld [vmem:[%s16278_s17 + $0x20] sm:$0xff] }
 0x80c   :  { %16495 = vst [vmem:[#allocation96_spill] sm:$0xff] %v11278_v8  ;;  %3096 = vmatpush.msra.mxu1 %v11278_v8  ;;  %3136 = vmatpush.msrb.mxu3 %v11290_v25  ;;  %v11302_v3 = vld [vmem:[%s16278_s17 + $0x30] sm:$0xff] }
 0x80d   :  { %v11264_v30 = vadd.f32 %v2542_v1, %v2523_v32  ;;  %v11273_v1 = vld [vmem:[%s16278_s17] sm:$0xff]  ;;  %16497 = vst [vmem:[#allocation98_spill] sm:$0xff] %v11290_v25 }
 0x80e   :  { %16494 = vst [vmem:[#allocation95_spill] sm:$0xff] %v11273_v1  ;;  %3056 = vmatpush.msra.mxu0 %v11273_v1  ;;  %3176 = vmatpush.msrb.mxu1 %v11302_v3 }
 0x80f   :  { %16493 = vst [vmem:[#allocation94_spill] sm:$0xff] %v11264_v30  ;;  %v16377_v18 = vmax.f32 %v11264_v30, 0.0  ;;  %v2867_v40 = vpop.f32.mrf.mxu0 }
 0x810   :  { %16499 = vst [vmem:[#allocation100_spill] sm:$0xff] %v11302_v3 }
 0x811   :  { %7334 = vmatmul.msk.f32.vlgmr.msrb.gmra.mxu0 %vm105_vm1, %v16377_v18 }
 0x812   :  { %3076 = vmatpush.msrb.mxu0 %v11297_v11 }
 0x815   :  { %v2887_v5 = vpop.f32.mrf.mxu1 }
 0x82a   :  { %v2847_v16 = vpop.f32.mrf.mxu3 }
 0x82b   :  { %v2848_v43 = vadd.f32 %v2847_v16, %v2828_v59  ;;  %v2907_v47 = vpop.f32.mrf.mxu2  ;;  %v11283_v59 = vld [vmem:[%s16278_s17 + $0x18] sm:$0xff] }
 0x82c   :  { %16496 = vst [vmem:[#allocation97_spill] sm:$0xff] %v11283_v59  ;;  %3116 = vmatpush.msra.mxu2 %v11283_v59  ;;  %v11307_v16 = vld [vmem:[%s16278_s17 + $0x38] sm:$0xff] }
 0x82d   :  { %v2868_v10 = vadd.f32 %v2867_v40, %v2848_v43  ;;  %16500 = vst [vmem:[#allocation101_spill] sm:$0xff] %v11307_v16  ;;  %v11314_v40 = vld [vmem:[%s16278_s17 + $0x40] sm:$0xff] }
 0x82e   :  { %3196 = vmatpush.msrb.mxu2 %v11307_v16  ;;  %3216 = vmatpush.msra.mxu3 %v11314_v40 }
 0x82f   :  { %v2888_v58 = vadd.f32 %v2887_v5, %v2868_v10 }
 0x831   :  { %v2908_v43 = vadd.f32 %v2907_v47, %v2888_v58 }
 0x833   :  { %v2947_v10 = vpop.f32.mrf.mxu0 }
 0x837   :  { %v2967_v58 = vpop.f32.mrf.mxu1 }
 0x84a   :  { %v2927_v32 = vpop.f32.mrf.mxu3 }
 0x84b   :  { %v2928_v45 = vadd.f32 %v2927_v32, %v2908_v43 }
 0x84d   :  { %v2948_v5 = vadd.f32 %v2947_v10, %v2928_v45  ;;  %v11322_v45 = vld [vmem:[%s16278_s17 + $0x28] sm:$0xff]  ;;  %v7423_v10 = vld [vmem:[%s16277_s16 + $0x158] sm:$0xff] }
 0x84f   :  { %v2968_v32 = vadd.f32 %v2967_v58, %v2948_v5  ;;  %v7425_v5 = vld [vmem:[%s16277_s16 + $0x68] sm:$0xff]  ;;  %v7426_v58 = vld [vmem:[%s16277_s16 + $0x150] sm:$0xff] }
 0x853   :  { %v2987_v47 = vpop.f32.mrf.mxu2 }
 0x854   :  { %v2988_v18 = vadd.f32 %v2987_v47, %v2968_v32  ;;  %v7428_v47 = vld [vmem:[%s16277_s16 + $0x148] sm:$0xff]  ;;  %v7429_v32 = vld [vmem:[%s16277_s16 + $0x60] sm:$0xff] }
 0x874   :  { %v3007_v43 = vpop.f32.mrf.mxu3 }
 0x875   :  { %v3008_v25 = vadd.f32 %v3007_v43, %v2988_v18  ;;  %v11327_v18 = vld [vmem:[%s16278_s17 + $0x50] sm:$0xff]  ;;  %v7432_v43 = vld [vmem:[%s16277_s16 + $0x58] sm:$0xff] }
 0x88e   :  { %v3027_v59 = vpop.f32.mrf.mxu0 }
 0x88f   :  { %v3028_v8 = vadd.f32 %v3027_v59, %v3008_v25  ;;  %v7415_v59 = vld [vmem:[%s16277_s16 + $0x170] sm:$0xff] }
 0x890   :  { %v7416_v25 = vld [vmem:[%s16277_s16 + $0xf0] sm:$0xff] }
 0x891   :  { %v3030_v3 = vsel %vm164_vm3, %v3028_v8, 0.0  ;;  %v7414_v8 = vld [vmem:[%s16277_s16 + $0xf8] sm:$0xff] }
 0x892   :  { %v3031_v1 = vrot.slane %v3030_v3, 4 }
 0x894   :  { %v3032_v11 = vadd.f32 %v3031_v1, %v3030_v3  ;;  %v7413_v1 = vld [vmem:[%s16277_s16 + $0x178] sm:$0xff]  ;;  %v7421_v3 = vld [vmem:[%s16277_s16 + $0xe0] sm:$0xff] }
 0x896   :  { %v3033_v30 = vrot.slane %v3032_v11, 2 }
 0x898   :  { %v3034_v0 = vadd.f32 %v3033_v30, %v3032_v11  ;;  %v11334_v30 = vld [vmem:[%s16278_s17 + $0x58] sm:$0xff]  ;;  %v7418_v11 = vld [vmem:[%s16277_s16 + $0xe8] sm:$0xff] }
 0x89a   :  { %v3035_v41 = vrot.slane %v3034_v0, 1 }
 0x89c   :  { %v3036_v16 = vadd.f32 %v3035_v41, %v3034_v0  ;;  %v11339_v0 = vld [vmem:[%s16278_s17 + $0x60] sm:$0xff]  ;;  %v11350_v41 = vld [vmem:[%s16278_s17 + $0x48] sm:$0xff] }
 0x89e   :  { %v3037_v27 = vmul.f32 0.0025510204, %v3036_v16  ;;  %v7422_v16 = vld [vmem:[%s16277_s16 + $0x70] sm:$0xff] }
 0x8a0   :  { %7335 = vmatmul.msk.f32.vlgmr.msra.gmra.mxu0 %vm72_vm0, %v3037_v27  ;;  %7337 = vmatmul.msk.f32.vlgmr.msra.gmra.mxu1 %vm72_vm0, %v3037_v27 }
 0x8a1   :  { %7338 = vmatmul.msk.f32.vlgmr.msra.gmra.mxu2 %vm72_vm0, %v3037_v27  ;;  %7339 = vmatmul.msk.f32.vlgmr.msrb.gmra.mxu3 %vm72_vm0, %v3037_v27 }
 0x8a2   :  { %3156 = vmatpush.msra.mxu0 %v11322_v45  ;;  %3256 = vmatpush.msra.mxu1 %v11327_v18 }
 0x8a3   :  { %3276 = vmatpush.msra.mxu2 %v11334_v30  ;;  %3296 = vmatpush.msrb.mxu3 %v11339_v0 }
 0x8a8   :  { %7336 = vmatmul.msk.f32.vlgmr.msrb.gmra.mxu0 %vm72_vm0, %v3037_v27  ;;  %7341 = vmatmul.msk.f32.vlgmr.msrb.gmra.mxu1 %vm72_vm0, %v3037_v27 }
 0x8a9   :  { %7342 = vmatmul.msk.f32.vlgmr.msrb.gmra.mxu2 %vm72_vm0, %v3037_v27  ;;  %7343 = vmatmul.msk.f32.vlgmr.msra.gmra.mxu3 %vm72_vm0, %v3037_v27 }
 0x8aa   :  { %3236 = vmatpush.msrb.mxu0 %v11350_v41  ;;  %3383 = vmatpush.msrb.mxu2 %v7413_v1  ;;  %v7434_v1 = vld [vmem:[%s16277_s16 + $0xc0] sm:$0xff] }
 0x8ab   :  { %3403 = vmatpush.msra.mxu3 %v10435_v50  ;;  %3363 = vmatpush.msrb.mxu1 %v7414_v8  ;;  %v7417_v50 = vld [vmem:[%s16277_s16 + $0x168] sm:$0xff]  ;;  %v7435_v8 = vld [vmem:[%s16277_s16 + $0x50] sm:$0xff] }
 0x8ac   :  { %3384 = vmatpush.msrb.mxu2 %v7415_v59  ;;  %v7437_v59 = vld [vmem:[%s16277_s16 + $0xb8] sm:$0xff] }
 0x8ad   :  { %3404 = vmatpush.msra.mxu3 %v10454_v4  ;;  %3364 = vmatpush.msrb.mxu1 %v7416_v25  ;;  %v7419_v4 = vld [vmem:[%s16277_s16 + $0x78] sm:$0xff]  ;;  %v7438_v25 = vld [vmem:[%s16277_s16 + $0x48] sm:$0xff] }
 0x8ae   :  { %3385 = vmatpush.msrb.mxu2 %v7417_v50  ;;  %v7440_v50 = vld [vmem:[%s16277_s16 + $0xb0] sm:$0xff] }
 0x8af   :  { %3405 = vmatpush.msra.mxu3 %v10473_v12  ;;  %3365 = vmatpush.msrb.mxu1 %v7418_v11  ;;  %v7420_v12 = vld [vmem:[%s16277_s16 + $0x160] sm:$0xff] }
 0x8b0   :  { %7340 = vmatmul.msk.f32.vlgmr.msra.gmra.mxu0 %vm72_vm0, %v3037_v27  ;;  %7345 = vmatmul.msk.f32.vlgmr.msra.gmra.mxu1 %vm72_vm0, %v3037_v27  ;;  %v7441_v11 = vld [vmem:[%s16277_s16 + $0x40] sm:$0xff] }
 0x8b1   :  { %7346 = vmatmul.msk.f32.vlgmr.msra.gmra.mxu2 %vm72_vm0, %v3037_v27  ;;  %7347 = vmatmul.msk.f32.vlgmr.msrb.gmra.mxu3 %vm72_vm0, %v3037_v27 }
 0x8b2   :  { %3343 = vmatpush.msra.mxu0 %v7419_v4  ;;  %3386 = vmatpush.msrb.mxu2 %v7420_v12  ;;  %v7443_v4 = vld [vmem:[%s16277_s16 + $0xa8] sm:$0xff]  ;;  %v7444_v12 = vld [vmem:[%s16277_s16 + $0x38] sm:$0xff] }
 0x8b3   :  { %3406 = vmatpush.msra.mxu3 %v10491_v19  ;;  %3366 = vmatpush.msrb.mxu1 %v7421_v3  ;;  %v7424_v19 = vld [vmem:[%s16277_s16 + $0xd8] sm:$0xff]  ;;  %v7446_v3 = vld [vmem:[%s16277_s16 + $0xa0] sm:$0xff] }
 0x8b4   :  { %3344 = vmatpush.msra.mxu0 %v7422_v16  ;;  %3387 = vmatpush.msrb.mxu2 %v7423_v10  ;;  %v7447_v16 = vld [vmem:[%s16277_s16 + $0x30] sm:$0xff]  ;;  %v7449_v10 = vld [vmem:[%s16277_s16 + $0x98] sm:$0xff] }
 0x8b5   :  { %3407 = vmatpush.msra.mxu3 %v10514_v61  ;;  %3367 = vmatpush.msrb.mxu1 %v7424_v19  ;;  %v7427_v61 = vld [vmem:[%s16277_s16 + $0xd0] sm:$0xff]  ;;  %v7450_v19 = vld [vmem:[%s16277_s16 + $0x28] sm:$0xff] }
 0x8b6   :  { %3345 = vmatpush.msra.mxu0 %v7425_v5  ;;  %3388 = vmatpush.msrb.mxu2 %v7426_v58  ;;  %v7452_v5 = vld [vmem:[%s16277_s16 + $0x20] sm:$0xff]  ;;  %v7461_v58 = vld [vmem:[%s16277_s16 + $0x278] sm:$0xff] }
 0x8b7   :  { %3408 = vmatpush.msra.mxu3 %v10535_v46  ;;  %3368 = vmatpush.msrb.mxu1 %v7427_v61  ;;  %v7430_v46 = vld [vmem:[%s16277_s16 + $0x140] sm:$0xff]  ;;  %v16503_v61 = vld [vmem:[#allocation29_spill] sm:$0xff] }
 0x8b8   :  { %7344 = vmatmul.msk.f32.vlgmr.msrb.gmra.mxu0 %vm72_vm0, %v3037_v27  ;;  %3389 = vmatpush.msrb.mxu2 %v7428_v47  ;;  %v7431_v27 = vld [vmem:[%s16277_s16 + $0xc8] sm:$0xff]  ;;  %v16504_v47 = vld [vmem:[#allocation10_spill] sm:$0xff] }
 0x8b9   :  { %3346 = vmatpush.msra.mxu0 %v7429_v32  ;;  %3409 = vmatpush.msra.mxu3 %v10556_v44  ;;  %v7433_v44 = vld [vmem:[%s16277_s16 + $0x138] sm:$0xff]  ;;  %v7481_v32 = vld [vmem:[%s16277_s16 + $0x220] sm:$0xff] }
 0x8ba   :  { %3390 = vmatpush.msrb.mxu2 %v7430_v46  ;;  %3369 = vmatpush.msrb.mxu1 %v7431_v27  ;;  %v16507_v46 = vld [vmem:[#allocation11_spill] sm:$0xff] }
 0x8bb   :  { %3347 = vmatpush.msra.mxu0 %v7432_v43  ;;  %3410 = vmatpush.msra.mxu3 %v10583_v54  ;;  %v7436_v54 = vld [vmem:[%s16277_s16 + $0x130] sm:$0xff]  ;;  %v7482_v27 = vld [vmem:[%s16277_s16 + $0x218] sm:$0xff] }
 0x8bc   :  { %3391 = vmatpush.msrb.mxu2 %v7433_v44  ;;  %3370 = vmatpush.msrb.mxu1 %v7434_v1  ;;  %v16508_v43 = vld [vmem:[#allocation67_spill] sm:$0xff]  ;;  %v16509_v44 = vld [vmem:[#allocation13_spill] sm:$0xff] }
 0x8bd   :  { %3348 = vmatpush.msra.mxu0 %v7435_v8  ;;  %3411 = vmatpush.msra.mxu3 %v10608_v9  ;;  %v7439_v9 = vld [vmem:[%s16277_s16 + $0x128] sm:$0xff]  ;;  %v7483_v1 = vld [vmem:[%s16277_s16 + $0x210] sm:$0xff] }
 0x8be   :  { %3392 = vmatpush.msrb.mxu2 %v7436_v54  ;;  %3371 = vmatpush.msrb.mxu1 %v7437_v59  ;;  %v16510_v8 = vld [vmem:[#allocation69_spill] sm:$0xff]  ;;  %v16511_v54 = vld [vmem:[#allocation15_spill] sm:$0xff] }
 0x8bf   :  { %3349 = vmatpush.msra.mxu0 %v7438_v25  ;;  %3412 = vmatpush.msra.mxu3 %v10631_v55  ;;  %v7442_v55 = vld [vmem:[%s16277_s16 + $0x120] sm:$0xff]  ;;  %v7484_v59 = vld [vmem:[%s16277_s16 + $0x208] sm:$0xff] }
 0x8c0   :  { %3393 = vmatpush.msrb.mxu2 %v7439_v9  ;;  %3372 = vmatpush.msrb.mxu1 %v7440_v50  ;;  %v7485_v25 = vld [vmem:[%s16277_s16 + $0x200] sm:$0xff] }
 0x8c1   :  { %3350 = vmatpush.msra.mxu0 %v7441_v11  ;;  %3413 = vmatpush.msra.mxu3 %v10655_v17  ;;  %v7445_v17 = vld [vmem:[%s16277_s16 + $0x118] sm:$0xff] }
 0x8c2   :  { %3394 = vmatpush.msrb.mxu2 %v7442_v55  ;;  %3373 = vmatpush.msrb.mxu1 %v7443_v4  ;;  %v16512_v4 = vld [vmem:[#allocation5_spill] sm:$0xff] }
 0x8c3   :  { %3351 = vmatpush.msra.mxu0 %v7444_v12  ;;  %3414 = vmatpush.msra.mxu3 %v10680_v34  ;;  %v7448_v34 = vld [vmem:[%s16277_s16 + $0x110] sm:$0xff]  ;;  %v16513_v12 = vmax.f32 %v16512_v4, 0.0  ;;  %v16541_v4 = vld [vmem:[#allocation51_spill] sm:$0xff] }
 0x8c4   :  { %3395 = vmatpush.msrb.mxu2 %v7445_v17  ;;  %3374 = vmatpush.msrb.mxu1 %v7446_v3  ;;  %v16514_v3 = vld [vmem:[#allocation7_spill] sm:$0xff] }
 0x8c5   :  { %3352 = vmatpush.msra.mxu0 %v7447_v16  ;;  %3415 = vmatpush.msra.mxu3 %v10709_v51  ;;  %v7451_v51 = vld [vmem:[%s16277_s16 + $0x90] sm:$0xff]  ;;  %v16515_v16 = vmax.f32 %v16514_v3, 0.0  ;;  %v16543_v3 = vld [vmem:[#allocation23_spill] sm:$0xff] }
 0x8c6   :  { %3396 = vmatpush.msrb.mxu2 %v7448_v34  ;;  %3375 = vmatpush.msrb.mxu1 %v7449_v10 }
 0x8c7   :  { %3353 = vmatpush.msra.mxu0 %v7450_v19  ;;  %3416 = vmatpush.msra.mxu3 %v10739_v63  ;;  %v7453_v63 = vld [vmem:[%s16277_s16 + $0x88] sm:$0xff] }
 0x8c8   :  { %3397 = vmatpush.msrb.mxu2 %v10404_v39  ;;  %3376 = vmatpush.msrb.mxu1 %v7451_v51  ;;  %v7454_v39 = vld [vmem:[%s16277_s16 + $0x18] sm:$0xff] }
 0x8c9   :  { %3354 = vmatpush.msra.mxu0 %v7452_v5  ;;  %3417 = vmatpush.msra.mxu3 %v10768_v60  ;;  %v7455_v60 = vld [vmem:[%s16277_s16 + $0x80] sm:$0xff] }
 0x8ca   :  { %3398 = vmatpush.msrb.mxu2 %v10421_v49  ;;  %3377 = vmatpush.msrb.mxu1 %v7453_v63  ;;  %v7456_v49 = vld [vmem:[%s16277_s16 + $0x10] sm:$0xff] }
 0x8cb   :  { %3355 = vmatpush.msra.mxu0 %v7454_v39  ;;  %3418 = vmatpush.msra.mxu3 %v10796_v38  ;;  %v7458_v38 = vld [vmem:[%s16277_s16 + $0x8] sm:$0xff] }
 0x8cc   :  { %3463 = vmatpush.msra.mxu2 %v10440_v53  ;;  %3378 = vmatpush.msrb.mxu1 %v7455_v60  ;;  %v7457_v53 = vld [vmem:[%s16277_s16 + $0x2f8] sm:$0xff] }
 0x8cd   :  { %3356 = vmatpush.msra.mxu0 %v7456_v49  ;;  %3483 = vmatpush.msrb.mxu3 %v10816_v35  ;;  %v7460_v35 = vld [vmem:[%s16277_s16] sm:$0xff]  ;;  %v7486_v60 = vld [vmem:[%s16277_s16 + $0x478] sm:$0xff] }
 0x8ce   :  { %3464 = vmatpush.msra.mxu2 %v10459_v6  ;;  %3443 = vmatpush.msra.mxu1 %v7457_v53  ;;  %v7459_v6 = vld [vmem:[%s16277_s16 + $0x2f0] sm:$0xff]  ;;  %v16516_v49 = vld [vmem:[#allocation35_spill] sm:$0xff] }
 0x8cf   :  { %3357 = vmatpush.msra.mxu0 %v7458_v38  ;;  %3484 = vmatpush.msrb.mxu3 %v10837_v23  ;;  %v7463_v23 = vld [vmem:[%s16277_s16 + $0x270] sm:$0xff] }
 0x8d0   :  { %3465 = vmatpush.msra.mxu2 %v10478_v14  ;;  %3444 = vmatpush.msra.mxu1 %v7459_v6  ;;  %v7462_v14 = vld [vmem:[%s16277_s16 + $0x2e8] sm:$0xff] }
 0x8d1   :  { %3358 = vmatpush.msra.mxu0 %v7460_v35  ;;  %3485 = vmatpush.msrb.mxu3 %v10863_v57  ;;  %v7468_v57 = vld [vmem:[%s16277_s16 + $0x2d0] sm:$0xff] }
 0x8d2   :  { %3466 = vmatpush.msra.mxu2 %v10496_v20  ;;  %3445 = vmatpush.msra.mxu1 %v7462_v14  ;;  %v7464_v20 = vld [vmem:[%s16277_s16 + $0x2e0] sm:$0xff] }
 0x8d3   :  { %3423 = vmatpush.msrb.mxu0 %v7461_v58  ;;  %3486 = vmatpush.msrb.mxu3 %v10887_v52  ;;  %v7466_v52 = vld [vmem:[%s16277_s16 + $0x2d8] sm:$0xff] }
 0x8d4   :  { %3467 = vmatpush.msra.mxu2 %v10519_v31  ;;  %3446 = vmatpush.msra.mxu1 %v7464_v20  ;;  %v7465_v31 = vld [vmem:[%s16277_s16 + $0x268] sm:$0xff]  ;;  %v16517_v58 = vld [vmem:[#allocation26_spill] sm:$0xff] }
 0x8d5   :  { %3424 = vmatpush.msrb.mxu0 %v7463_v23  ;;  %3487 = vmatpush.msrb.mxu3 %v10911_v22  ;;  %v7470_v22 = vld [vmem:[%s16277_s16 + $0x2c8] sm:$0xff]  ;;  %v16518_v14 = vmax.f32 %v16517_v58, 0.0 }
 0x8d6   :  { %3468 = vmatpush.msra.mxu2 %v10543_v62  ;;  %3447 = vmatpush.msra.mxu1 %v7466_v52  ;;  %v7467_v62 = vld [vmem:[%s16277_s16 + $0x260] sm:$0xff]  ;;  %v16555_v58 = vld [vmem:[#allocation33_spill] sm:$0xff] }
 0x8d7   :  { %3425 = vmatpush.msrb.mxu0 %v7465_v31  ;;  %3488 = vmatpush.msrb.mxu3 %v10938_v13  ;;  %v7472_v13 = vld [vmem:[%s16277_s16 + $0x2c0] sm:$0xff] }
 0x8d8   :  { %3469 = vmatpush.msra.mxu2 %v10570_v36  ;;  %3448 = vmatpush.msra.mxu1 %v7468_v57  ;;  %v7469_v36 = vld [vmem:[%s16277_s16 + $0x258] sm:$0xff]  ;;  %v16519_v20 = vld [vmem:[#allocation8_spill] sm:$0xff] }
 0x8d9   :  { %3426 = vmatpush.msrb.mxu0 %v7467_v62  ;;  %3489 = vmatpush.msrb.mxu3 %v10962_v42  ;;  %v7476_v42 = vld [vmem:[%s16277_s16 + $0x2b0] sm:$0xff]  ;;  %v16520_v31 = vmax.f32 %v16519_v20, 0.0  ;;  %v16557_v20 = vld [vmem:[#allocation60_spill] sm:$0xff] }
 0x8da   :  { %3470 = vmatpush.msra.mxu2 %v10594_v29  ;;  %3449 = vmatpush.msra.mxu1 %v7470_v22  ;;  %v7471_v29 = vld [vmem:[%s16277_s16 + $0x250] sm:$0xff] }
 0x8db   :  { %3427 = vmatpush.msrb.mxu0 %v7469_v36  ;;  %3490 = vmatpush.msrb.mxu3 %v10990_v21  ;;  %v7474_v21 = vld [vmem:[%s16277_s16 + $0x2b8] sm:$0xff] }
 0x8dc   :  { %3471 = vmatpush.msra.mxu2 %v10616_v2  ;;  %3450 = vmatpush.msra.mxu1 %v7472_v13  ;;  %v7473_v2 = vld [vmem:[%s16277_s16 + $0x248] sm:$0xff]  ;;  %v16521_v62 = vld [vmem:[#allocation14_spill] sm:$0xff] }
 0x8dd   :  { %3428 = vmatpush.msrb.mxu0 %v7471_v29  ;;  %3491 = vmatpush.msrb.mxu3 %v11009_v15  ;;  %v7478_v15 = vld [vmem:[%s16277_s16 + $0x2a8] sm:$0xff]  ;;  %v16522_v57 = vld [vmem:[#allocation38_spill] sm:$0xff] }
 0x8de   :  { %3472 = vmatpush.msra.mxu2 %v10642_v37  ;;  %3451 = vmatpush.msra.mxu1 %v7474_v21  ;;  %v7475_v37 = vld [vmem:[%s16277_s16 + $0x240] sm:$0xff]  ;;  %v16523_v36 = vld [vmem:[#allocation6_spill] sm:$0xff] }
 0x8df   :  { %3429 = vmatpush.msrb.mxu0 %v7473_v2  ;;  %3492 = vmatpush.msrb.mxu3 %v11030_v28  ;;  %v16501_v28 = vld [vmem:[#allocation9_spill] sm:$0xff]  ;;  %v16524_v22 = vmax.f32 %v16523_v36, 0.0  ;;  %v16525_v13 = vld [vmem:[#allocation28_spill] sm:$0xff]  ;;  %v16560_v36 = vld [vmem:[#allocation31_spill] sm:$0xff] }
 0x8e0   :  { %3473 = vmatpush.msra.mxu2 %v10666_v26  ;;  %3452 = vmatpush.msra.mxu1 %v7476_v42  ;;  %v7477_v26 = vld [vmem:[%s16277_s16 + $0x238] sm:$0xff]  ;;  %v16526_v2 = vmax.f32 %v16525_v13, 0.0  ;;  %v16527_v42 = vld [vmem:[#allocation16_spill] sm:$0xff] }
 0x8e1   :  { %3430 = vmatpush.msrb.mxu0 %v7475_v37  ;;  %3493 = vmatpush.msrb.mxu3 %v11044_v33  ;;  %v16502_v33 = vld [vmem:[#allocation62_spill] sm:$0xff] }
 0x8e2   :  { %3474 = vmatpush.msra.mxu2 %v10692_v24  ;;  %3453 = vmatpush.msra.mxu1 %v7478_v15  ;;  %v7479_v24 = vld [vmem:[%s16277_s16 + $0x230] sm:$0xff] }
 0x8e3   :  { %3431 = vmatpush.msrb.mxu0 %v7477_v26  ;;  %3494 = vmatpush.msrb.mxu3 %v11058_v48  ;;  %v16505_v48 = vld [vmem:[#allocation64_spill] sm:$0xff]  ;;  %v16528_v26 = vld [vmem:[#allocation41_spill] sm:$0xff] }
 0x8e4   :  { %3475 = vmatpush.msra.mxu2 %v10722_v7  ;;  %3454 = vmatpush.msra.mxu1 %v16501_v28  ;;  %v7480_v7 = vld [vmem:[%s16277_s16 + $0x228] sm:$0xff] }
 0x8e5   :  { %3432 = vmatpush.msrb.mxu0 %v7479_v24  ;;  %3495 = vmatpush.msrb.mxu3 %v16502_v33  ;;  %v16530_v33 = vld [vmem:[#allocation44_spill] sm:$0xff] }
 0x8e6   :  { %3476 = vmatpush.msra.mxu2 %v10751_v56  ;;  %3455 = vmatpush.msra.mxu1 %v16504_v47  ;;  %v16506_v56 = vld [vmem:[#allocation32_spill] sm:$0xff] }
 0x8e7   :  { %3433 = vmatpush.msrb.mxu0 %v7480_v7  ;;  %3496 = vmatpush.msrb.mxu3 %v16505_v48  ;;  %v16529_v7 = vld [vmem:[#allocation17_spill] sm:$0xff] }
 0x8e8   :  { %3477 = vmatpush.msra.mxu2 %v16503_v61  ;;  %3456 = vmatpush.msra.mxu1 %v16507_v46  ;;  %v16531_v61 = vld [vmem:[#allocation71_spill] sm:$0xff] }
 0x8e9   :  { %3434 = vmatpush.msrb.mxu0 %v7481_v32  ;;  %3497 = vmatpush.msrb.mxu3 %v16508_v43 }
 0x8ea   :  { %3478 = vmatpush.msra.mxu2 %v16506_v56  ;;  %3457 = vmatpush.msra.mxu1 %v16509_v44  ;;  %v16532_v56 = vld [vmem:[#allocation19_spill] sm:$0xff] }
 0x8eb   :  { %3435 = vmatpush.msrb.mxu0 %v7482_v27  ;;  %3498 = vmatpush.msrb.mxu3 %v16510_v8  ;;  %v16533_v27 = vld [vmem:[#allocation66_spill] sm:$0xff]  ;;  %v16535_v8 = vld [vmem:[#allocation48_spill] sm:$0xff] }
 0x8ec   :  { %3458 = vmatpush.msra.mxu1 %v16511_v54  ;;  %v16534_v43 = vmax.f32 %v16533_v27, 0.0  ;;  %v16536_v54 = vld [vmem:[#allocation73_spill] sm:$0xff]  ;;  %v16574_v27 = vld [vmem:[#allocation76_spill] sm:$0xff] }
 0x8ed   :  { %3436 = vmatpush.msrb.mxu0 %v7483_v1  ;;  %v7487_v1 = vld [vmem:[%s16277_s16 + $0x4f8] sm:$0xff] }
 0x8ef   :  { %3437 = vmatpush.msrb.mxu0 %v7484_v59  ;;  %v16537_v59 = vld [vmem:[#allocation12_spill] sm:$0xff] }
 0x8f1   :  { %3438 = vmatpush.msrb.mxu0 %v7485_v25  ;;  %v16538_v25 = vmax.f32 %v16537_v59, 0.0  ;;  %v16577_v59 = vld [vmem:[#allocation68_spill] sm:$0xff] }
 0x91d   :  { %v3058_v9 = vpop.f32.mrf.mxu0  ;;  %v3098_v50 = vpop.f32.mrf.mxu1 }
 0x91e   :  { %v3301_v11 = vperm.slane %v3058_v9, 0  ;;  %v3303_v55 = vperm.slane %v3098_v50, 0  ;;  %v16539_v50 = vld [vmem:[#allocation21_spill] sm:$0xff] }
 0x920   :  { %v11638_v17 = vsub.f32 %v16513_v12, %v3301_v11  ;;  %v11642_v34 = vsub.f32 %v16515_v16, %v3303_v55  ;;  %v16540_v55 = vld [vmem:[#allocation18_spill] sm:$0xff] }
 0x921   :  { %v16542_v12 = vld [vmem:[#allocation74_spill] sm:$0xff] }
 0x922   :  { %v3327_v10 = vmul.f32 %v11638_v17, %v11638_v17  ;;  %v3329_v19 = vmul.f32 %v11642_v34, %v11642_v34 }
 0x924   :  { %v3118_v51 = vpop.f32.mrf.mxu2  ;;  %v3138_v5 = vpop.f32.mrf.mxu3  ;;  %3359 = vmatmul.f32.vlgmr.msra.gmra.mxu0 %v3327_v10  ;;  %3399 = vmatmul.f32.vlgmr.msrb.gmra.mxu2 %v3329_v19  ;;  %v16544_v10 = vld [vmem:[#allocation20_spill] sm:$0xff] }
 0x925   :  { %v3304_v63 = vperm.slane %v3118_v51, 0  ;;  %v3305_v39 = vperm.slane %v3138_v5, 0  ;;  %3503 = vmatpush.msra.mxu0 %v7486_v60  ;;  %3543 = vmatpush.msrb.mxu2 %v16516_v49  ;;  %v3078_v53 = vpop.f32.mrf.mxu0  ;;  %v3178_v38 = vpop.f32.mrf.mxu1  ;;  %v16545_v19 = vld [vmem:[#allocation56_spill] sm:$0xff]  ;;  %v16546_v51 = vld [vmem:[#allocation75_spill] sm:$0xff]  ;;  %v16547_v5 = vld [vmem:[#allocation25_spill] sm:$0xff] }
 0x926   :  { %v3302_v6 = vperm.slane %v3078_v53, 0  ;;  %v3307_v35 = vperm.slane %v3178_v38, 0  ;;  %v16550_v60 = vld [vmem:[#allocation77_spill] sm:$0xff]  ;;  %v16551_v49 = vld [vmem:[#allocation30_spill] sm:$0xff]  ;;  %v16552_v53 = vld [vmem:[#allocation24_spill] sm:$0xff] }
 0x927   :  { %v11654_v23 = vsub.f32 %v16518_v14, %v3304_v63  ;;  %v11658_v52 = vsub.f32 %v16520_v31, %v3305_v39  ;;  %3504 = vmatpush.msra.mxu0 %v16521_v62  ;;  %3544 = vmatpush.msrb.mxu2 %v16522_v57  ;;  %v16548_v63 = vld [vmem:[#allocation22_spill] sm:$0xff]  ;;  %v16553_v38 = vld [vmem:[#allocation59_spill] sm:$0xff]  ;;  %v16559_v57 = vld [vmem:[#allocation36_spill] sm:$0xff] }
 0x928   :  { %v11664_v29 = vsub.f32 %v16524_v22, %v3302_v6  ;;  %v11668_v21 = vsub.f32 %v16526_v2, %v3307_v35  ;;  %v16549_v39 = vld [vmem:[#allocation58_spill] sm:$0xff]  ;;  %v16556_v14 = vld [vmem:[#allocation27_spill] sm:$0xff]  ;;  %v16561_v22 = vld [vmem:[#allocation61_spill] sm:$0xff] }
 0x929   :  { %v3330_v37 = vmul.f32 %v11654_v23, %v11654_v23  ;;  %3505 = vmatpush.msra.mxu0 %v16527_v42  ;;  %3545 = vmatpush.msrb.mxu2 %v16528_v26  ;;  %v3331_v28 = vmul.f32 %v11658_v52, %v11658_v52  ;;  %v16554_v35 = vld [vmem:[#allocation78_spill] sm:$0xff]  ;;  %v16558_v62 = vld [vmem:[#allocation79_spill] sm:$0xff]  ;;  %v16562_v2 = vld [vmem:[#allocation80_spill] sm:$0xff] }
 0x92a   :  { %v3328_v15 = vmul.f32 %v11664_v29, %v11664_v29  ;;  %v3333_v24 = vmul.f32 %v11668_v21, %v11668_v21  ;;  %v16564_v26 = vld [vmem:[#allocation34_spill] sm:$0xff] }
 0x92b   :  { %3419 = vmatmul.f32.vlgmr.msra.gmra.mxu3 %v3330_v37  ;;  %3506 = vmatpush.msra.mxu0 %v16529_v7  ;;  %v16563_v37 = vld [vmem:[#allocation39_spill] sm:$0xff]  ;;  %v16568_v7 = vld [vmem:[#allocation37_spill] sm:$0xff] }
 0x92c   :  { %3546 = vmatpush.msrb.mxu2 %v16530_v33  ;;  %3563 = vmatpush.msra.mxu3 %v16531_v61  ;;  %v3198_v47 = vpop.f32.mrf.mxu2  ;;  %v3218_v6 = vpop.f32.mrf.mxu3  ;;  %v16569_v33 = vld [vmem:[#allocation65_spill] sm:$0xff] }
 0x92d   :  { %v3308_v32 = vperm.slane %v3198_v47, 0  ;;  %3379 = vmatmul.f32.vlgmr.msrb.gmra.mxu1 %v3328_v15  ;;  %3439 = vmatmul.f32.vlgmr.msrb.gmra.mxu0 %v3331_v28  ;;  %v3158_v48 = vpop.f32.mrf.mxu0  ;;  %v3258_v31 = vpop.f32.mrf.mxu1  ;;  %v3309_v13 = vperm.slane %v3218_v6, 0  ;;  %v16565_v15 = vld [vmem:[#allocation63_spill] sm:$0xff]  ;;  %v16567_v28 = vld [vmem:[#allocation42_spill] sm:$0xff]  ;;  %v16570_v61 = vld [vmem:[#allocation45_spill] sm:$0xff] }
 0x92e   :  { %3479 = vmatmul.f32.vlgmr.msra.gmra.mxu2 %v3333_v24  ;;  %3507 = vmatpush.msra.mxu0 %v16532_v56  ;;  %v3306_v46 = vperm.slane %v3158_v48, 0  ;;  %v3311_v42 = vperm.slane %v3258_v31, 0  ;;  %v16566_v24 = vld [vmem:[#allocation81_spill] sm:$0xff]  ;;  %v16571_v47 = vmax.f32 %v16570_v61, 0.0  ;;  %v16572_v56 = vld [vmem:[#allocation82_spill] sm:$0xff] }
 0x92f   :  { %v11686_v44 = vsub.f32 %v16534_v43, %v3308_v32  ;;  %3523 = vmatpush.msrb.mxu1 %v7487_v1  ;;  %3547 = vmatpush.msrb.mxu2 %v16535_v8  ;;  %v16575_v43 = vmax.f32 %v16574_v27, 0.0  ;;  %v16589_v6 = vld [vmem:[#allocation50_spill] sm:$0xff]  ;;  %v16593_v31 = vld [vmem:[#allocation89_spill] sm:$0xff] }
 0x930   :  { %3564 = vmatpush.msra.mxu3 %v16536_v54  ;;  %v11695_v9 = vsub.f32 %v16538_v25, %v3306_v46  ;;  %3508 = vmatpush.msra.mxu0 %v16539_v50  ;;  %v11734_v32 = vsub.f32 %v16571_v47, %v3309_v13  ;;  %v16573_v46 = vld [vmem:[#allocation46_spill] sm:$0xff]  ;;  %v16576_v54 = vld [vmem:[#allocation40_spill] sm:$0xff]  ;;  %v16578_v50 = vld [vmem:[#allocation83_spill] sm:$0xff] }
 0x931   :  { %v3334_v11 = vmul.f32 %v11686_v44, %v11686_v44  ;;  %3524 = vmatpush.msrb.mxu1 %v16540_v55  ;;  %3548 = vmatpush.msrb.mxu2 %v16541_v4  ;;  %v11740_v1 = vsub.f32 %v16575_v43, %v3311_v42  ;;  %v16580_v4 = vld [vmem:[#allocation43_spill] sm:$0xff]  ;;  %v16604_v61 = vld [vmem:[#allocation93_spill] sm:$0xff] }
 0x932   :  { %3565 = vmatpush.msra.mxu3 %v16542_v12  ;;  %3509 = vmatpush.msra.mxu0 %v16543_v3  ;;  %v3332_v16 = vmul.f32 %v11695_v9, %v11695_v9  ;;  %v16581_v12 = vld [vmem:[#allocation70_spill] sm:$0xff]  ;;  %v3335_v3 = vmul.f32 %v11734_v32, %v11734_v32  ;;  %v16597_v13 = vld [vmem:[#allocation99_spill] sm:$0xff]  ;;  %v16610_v27 = vld [vmem:[#allocation101_spill] sm:$0xff] }
 0x933   :  { %3525 = vmatpush.msrb.mxu1 %v16544_v10  ;;  %3549 = vmatpush.msrb.mxu2 %v16545_v19  ;;  %v16582_v10 = vld [vmem:[#allocation84_spill] sm:$0xff]  ;;  %v16605_v47 = vld [vmem:[#allocation95_spill] sm:$0xff] }
 0x934   :  { %3566 = vmatpush.msra.mxu3 %v16546_v51  ;;  %3510 = vmatpush.msra.mxu0 %v16547_v5  ;;  %v3278_v48 = vpop.f32.mrf.mxu2  ;;  %v3298_v25 = vpop.f32.mrf.mxu3  ;;  %v16583_v19 = vld [vmem:[#allocation52_spill] sm:$0xff]  ;;  %v3337_v51 = vmul.f32 %v11740_v1, %v11740_v1 }
 0x935   :  { %3499 = vmatmul.f32.vlgmr.msrb.gmra.mxu3 %v3334_v11  ;;  %3526 = vmatpush.msrb.mxu1 %v16548_v63  ;;  %v3238_v8 = vpop.f32.mrf.mxu0  ;;  %v16579_v11 = vld [vmem:[#allocation49_spill] sm:$0xff]  ;;  %v3312_v55 = vperm.slane %v3278_v48, 0  ;;  %v3313_v5 = vperm.slane %v3298_v25, 0  ;;  %v16584_v63 = vld [vmem:[#allocation47_spill] sm:$0xff] }
 0x936   :  { %3550 = vmatpush.msrb.mxu2 %v16549_v39  ;;  %3567 = vmatpush.msra.mxu3 %v16550_v60  ;;  %v16585_v39 = vld [vmem:[#allocation72_spill] sm:$0xff]  ;;  %v16586_v60 = vld [vmem:[#allocation85_spill] sm:$0xff] }
 0x937   :  { %3459 = vmatmul.f32.vlgmr.msra.gmra.mxu1 %v3332_v16  ;;  %3511 = vmatpush.msra.mxu0 %v16551_v49  ;;  %v3310_v16 = vperm.slane %v3238_v8, 0  ;;  %v16587_v49 = vld [vmem:[#allocation90_spill] sm:$0xff]  ;;  %v16607_v48 = vld [vmem:[#allocation97_spill] sm:$0xff] }
 0x938   :  { %3527 = vmatpush.msrb.mxu1 %v16552_v53  ;;  %3551 = vmatpush.msrb.mxu2 %v16553_v38  ;;  %v16588_v53 = vmax.f32 %v16587_v49, 0.0 }
 0x939   :  { %3568 = vmatpush.msra.mxu3 %v16554_v35  ;;  %3512 = vmatpush.msra.mxu0 %v16555_v58  ;;  %v16590_v35 = vld [vmem:[#allocation53_spill] sm:$0xff] }
 0x93a   :  { %3528 = vmatpush.msrb.mxu1 %v16556_v14  ;;  %3552 = vmatpush.msrb.mxu2 %v16557_v20  ;;  %v11759_v38 = vsub.f32 %v16588_v53, %v3312_v55  ;;  %v16591_v58 = vmax.f32 %v16590_v35, 0.0  ;;  %v16592_v20 = vld [vmem:[#allocation86_spill] sm:$0xff] }
 0x93b   :  { %3569 = vmatpush.msra.mxu3 %v16558_v62  ;;  %3513 = vmatpush.msra.mxu0 %v16559_v57  ;;  %v16594_v62 = vld [vmem:[#allocation94_spill] sm:$0xff] }
 0x93c   :  { %3529 = vmatpush.msrb.mxu1 %v16560_v36  ;;  %3553 = vmatpush.msrb.mxu2 %v16561_v22  ;;  %v11764_v14 = vsub.f32 %v16591_v58, %v3310_v16  ;;  %v16595_v57 = vmax.f32 %v16594_v62, 0.0  ;;  %v16596_v22 = vld [vmem:[#allocation54_spill] sm:$0xff]  ;;  %v3338_v42 = vmul.f32 %v11759_v38, %v11759_v38 }
 0x93d   :  { %3570 = vmatpush.msra.mxu3 %v16562_v2  ;;  %3514 = vmatpush.msra.mxu0 %v16563_v37  ;;  %v16598_v2 = vld [vmem:[#allocation87_spill] sm:$0xff] }
 0x93e   :  { %3530 = vmatpush.msrb.mxu1 %v16564_v26  ;;  %3554 = vmatpush.msrb.mxu2 %v16565_v15  ;;  %v11770_v36 = vsub.f32 %v16595_v57, %v3313_v5  ;;  %v16599_v37 = vld [vmem:[#allocation91_spill] sm:$0xff]  ;;  %v3336_v15 = vmul.f32 %v11764_v14, %v11764_v14 }
 0x93f   :  { %3571 = vmatpush.msra.mxu3 %v16566_v24  ;;  %3515 = vmatpush.msra.mxu0 %v16567_v28  ;;  %v16600_v26 = vld [vmem:[#allocation55_spill] sm:$0xff]  ;;  %v16601_v24 = vld [vmem:[#allocation88_spill] sm:$0xff] }
 0x940   :  { %3531 = vmatpush.msrb.mxu1 %v16568_v7  ;;  %3555 = vmatpush.msrb.mxu2 %v16569_v33  ;;  %v16602_v28 = vld [vmem:[#allocation92_spill] sm:$0xff]  ;;  %v3339_v7 = vmul.f32 %v11770_v36, %v11770_v36  ;;  %v16603_v33 = vld [vmem:[#allocation57_spill] sm:$0xff] }
 0x941   :  { %3572 = vmatpush.msra.mxu3 %v16572_v56  ;;  %3516 = vmatpush.msra.mxu0 %v16573_v46  ;;  %v16608_v56 = vld [vmem:[#allocation98_spill] sm:$0xff]  ;;  %v16609_v46 = vld [vmem:[#allocation100_spill] sm:$0xff] }
 0x942   :  { %3532 = vmatpush.msrb.mxu1 %v16576_v54  ;;  %3556 = vmatpush.msrb.mxu2 %v16577_v59 }
 0x943   :  { %3573 = vmatpush.msra.mxu3 %v16578_v50  ;;  %3517 = vmatpush.msra.mxu0 %v16579_v11 }
 0x944   :  { %3533 = vmatpush.msrb.mxu1 %v16580_v4  ;;  %3557 = vmatpush.msrb.mxu2 %v16581_v12 }
 0x945   :  { %3574 = vmatpush.msra.mxu3 %v16582_v10  ;;  %3518 = vmatpush.msra.mxu0 %v16583_v19 }
 0x946   :  { %3534 = vmatpush.msrb.mxu1 %v16584_v63  ;;  %3558 = vmatpush.msrb.mxu2 %v16585_v39 }
 0x947   :  { %3575 = vmatpush.msra.mxu3 %v16586_v60  ;;  %3519 = vmatmul.f32.vlgmr.msra.gmra.mxu0 %v3335_v3 }
 0x948   :  { %3559 = vmatmul.f32.vlgmr.msrb.gmra.mxu2 %v3337_v51  ;;  %3535 = vmatpush.msrb.mxu1 %v16589_v6 }
 0x949   :  { %3576 = vmatpush.msra.mxu3 %v16592_v20  ;;  %3595 = vmatpush.msrb.mxu0 %v16593_v31 }
 0x94a   :  { %3536 = vmatpush.msrb.mxu1 %v16596_v22  ;;  %3662 = vmatpush.msra.mxu2 %v16597_v13 }
 0x94b   :  { %3577 = vmatpush.msra.mxu3 %v16598_v2  ;;  %3596 = vmatpush.msrb.mxu0 %v16599_v37 }
 0x94c   :  { %3537 = vmatpush.msrb.mxu1 %v16600_v26  ;;  %3742 = vmatpush.msrb.mxu2 %v11322_v45  ;;  %v16606_v45 = vld [vmem:[#allocation96_spill] sm:$0xff] }
 0x94d   :  { %3578 = vmatpush.msra.mxu3 %v16601_v24  ;;  %3597 = vmatpush.msrb.mxu0 %v16602_v28 }
 0x94e   :  { %3579 = vmatmul.f32.vlgmr.msra.gmra.mxu3 %v3338_v42  ;;  %3538 = vmatpush.msrb.mxu1 %v16603_v33 }
 0x94f   :  { %3598 = vmatpush.msrb.mxu0 %v16604_v61  ;;  %3539 = vmatmul.f32.vlgmr.msrb.gmra.mxu1 %v3336_v15  ;;  %v3611_v61 = vld [vmem:[%s16611_s26] sm:$0x1] }
 0x950   :  { %7348 = vmatmul.msk.f32.vlgmr.msrb.gmra.mxu0 %vm105_vm1, %v3339_v7  ;;  %3642 = vmatpush.msra.mxu1 %v16605_v47 }
 0x951   :  { %3682 = vmatpush.msrb.mxu3 %v16606_v45  ;;  %3702 = vmatpush.msra.mxu0 %v16607_v48 }
 0x952   :  { %3722 = vmatpush.msrb.mxu1 %v16608_v56  ;;  %v4018_v56 = vld [vmem:[%s16279_s18 + $0x348] sm:$0xff] }
 0x953   :  { %3762 = vmatpush.msra.mxu3 %v16609_v46  ;;  %3782 = vmatpush.msrb.mxu0 %v16610_v27  ;;  %v4235_v46 = vld [vmem:[%s16279_s18 + $0xa10] sm:$0xff]  ;;  %v4004_v27 = vld [vmem:[%s16279_s18 + $0x2d8] sm:$0xff] }
 0x9a1   :  { %v3360_v8 = vpop.f32.mrf.mxu0 }
 0x9a7   :  { %v3400_v59 = vpop.f32.mrf.mxu2 }
 0x9aa   :  { %v3380_v43 = vpop.f32.mrf.mxu1  ;;  %v3440_v55 = vpop.f32.mrf.mxu0 }
 0x9ab   :  { %v3381_v54 = vadd.f32 %v3380_v43, %v3360_v8  ;;  %v4228_v43 = vld [vmem:[%s16279_s18 + $0x9d8] sm:$0xff]  ;;  %v4354_v8 = vld [vmem:[%s16279_s18 + $0xdc8] sm:$0xff] }
 0x9ad   :  { %v3401_v25 = vadd.f32 %v3400_v59, %v3381_v54  ;;  %v3997_v54 = vld [vmem:[%s16279_s18 + $0x2a0] sm:$0xff] }
 0x9ae   :  { %v3420_v50 = vpop.f32.mrf.mxu3  ;;  %v4109_v59 = vld [vmem:[%s16279_s18 + $0x620] sm:$0xff] }
 0x9af   :  { %v3421_v11 = vadd.f32 %v3420_v50, %v3401_v25  ;;  %v4221_v25 = vld [vmem:[%s16279_s18 + $0x9a0] sm:$0xff]  ;;  %v4347_v50 = vld [vmem:[%s16279_s18 + $0xd90] sm:$0xff] }
 0x9b1   :  { %v3441_v4 = vadd.f32 %v3440_v55, %v3421_v11  ;;  %v3480_v16 = vpop.f32.mrf.mxu2  ;;  %v3990_v11 = vld [vmem:[%s16279_s18 + $0x268] sm:$0xff] }
 0x9b2   :  { %v4102_v55 = vld [vmem:[%s16279_s18 + $0x5e8] sm:$0xff] }
 0x9b4   :  { %v3460_v12 = vpop.f32.mrf.mxu1 }
 0x9b5   :  { %v3461_v3 = vadd.f32 %v3460_v12, %v3441_v4  ;;  %v4214_v4 = vld [vmem:[%s16279_s18 + $0x968] sm:$0xff]  ;;  %v4340_v12 = vld [vmem:[%s16279_s18 + $0xd58] sm:$0xff] }
 0x9b7   :  { %v3481_v10 = vadd.f32 %v3480_v16, %v3461_v3  ;;  %v3983_v3 = vld [vmem:[%s16279_s18 + $0x230] sm:$0xff] }
 0x9b8   :  { %v3500_v19 = vpop.f32.mrf.mxu3  ;;  %v4095_v16 = vld [vmem:[%s16279_s18 + $0x5b0] sm:$0xff] }
 0x9b9   :  { %v3501_v5 = vadd.f32 %v3500_v19, %v3481_v10  ;;  %v4207_v10 = vld [vmem:[%s16279_s18 + $0x930] sm:$0xff]  ;;  %v3976_v19 = vld [vmem:[%s16279_s18 + $0x1f8] sm:$0xff] }
 0x9c4   :  { %v3520_v51 = vpop.f32.mrf.mxu0 }
 0x9c5   :  { %v3521_v63 = vadd.f32 %v3520_v51, %v3501_v5  ;;  %v4333_v51 = vld [vmem:[%s16279_s18 + $0xd20] sm:$0xff]  ;;  %v4088_v5 = vld [vmem:[%s16279_s18 + $0x578] sm:$0xff] }
 0x9cb   :  { %v3560_v49 = vpop.f32.mrf.mxu2 }
 0x9cc   :  { %v3540_v39 = vpop.f32.mrf.mxu1 }
 0x9cd   :  { %v3541_v60 = vadd.f32 %v3540_v39, %v3521_v63  ;;  %v3600_v58 = vpop.f32.mrf.mxu0  ;;  %v3969_v63 = vld [vmem:[%s16279_s18 + $0x1c0] sm:$0xff]  ;;  %v4200_v39 = vld [vmem:[%s16279_s18 + $0x8f8] sm:$0xff] }
 0x9cf   :  { %v3561_v53 = vadd.f32 %v3560_v49, %v3541_v60  ;;  %v4326_v60 = vld [vmem:[%s16279_s18 + $0xce8] sm:$0xff]  ;;  %v4081_v49 = vld [vmem:[%s16279_s18 + $0x540] sm:$0xff] }
 0x9d1   :  { %v3580_v6 = vpop.f32.mrf.mxu3 }
 0x9d2   :  { %v3581_v35 = vadd.f32 %v3580_v6, %v3561_v53  ;;  %v3962_v53 = vld [vmem:[%s16279_s18 + $0x188] sm:$0xff]  ;;  %v4193_v6 = vld [vmem:[%s16279_s18 + $0x8c0] sm:$0xff] }
 0x9d4   :  { %v3601_v20 = vadd.f32 %v3600_v58, %v3581_v35  ;;  %v4319_v35 = vld [vmem:[%s16279_s18 + $0xcb0] sm:$0xff]  ;;  %v4074_v58 = vld [vmem:[%s16279_s18 + $0x508] sm:$0xff] }
 0x9d6   :  { %v3603_v31 = vsel %vm164_vm3, %v3601_v20, 0.0  ;;  %v3955_v20 = vld [vmem:[%s16279_s18 + $0x150] sm:$0xff] }
 0x9d7   :  { %v3604_v62 = vrot.slane %v3603_v31, 4 }
 0x9d9   :  { %v3605_v57 = vadd.f32 %v3604_v62, %v3603_v31  ;;  %v4186_v31 = vld [vmem:[%s16279_s18 + $0x888] sm:$0xff]  ;;  %v4312_v62 = vld [vmem:[%s16279_s18 + $0xc78] sm:$0xff] }
 0x9db   :  { %v3606_v22 = vrot.slane %v3605_v57, 2 }
 0x9dd   :  { %v3607_v13 = vadd.f32 %v3606_v22, %v3605_v57  ;;  %v4067_v57 = vld [vmem:[%s16279_s18 + $0x4d0] sm:$0xff]  ;;  %v3948_v22 = vld [vmem:[%s16279_s18 + $0x118] sm:$0xff] }
 0x9df   :  { %v3608_v2 = vrot.slane %v3607_v13, 1 }
 0x9e1   :  { %v3609_v37 = vadd.f32 %v3608_v2, %v3607_v13  ;;  %v4179_v13 = vld [vmem:[%s16279_s18 + $0x850] sm:$0xff]  ;;  %v4305_v2 = vld [vmem:[%s16279_s18 + $0xc40] sm:$0xff] }
 0x9e3   :  { %v3610_v42 = vmul.f32 0.0025510204, %v3609_v37  ;;  %v4060_v37 = vld [vmem:[%s16279_s18 + $0x498] sm:$0xff] }
 0x9e5   :  { %v3612_v26 = vadd.f32 1e-05, %v3610_v42  ;;  %v3941_v42 = vld [vmem:[%s16279_s18 + $0xe0] sm:$0xff] }
 0x9e7   :  { %7383 = vrsqrt.f32 %v3612_v26  ;;  %vm3619_vm11 = vweird.f32 %v3612_v26 }
 0x9ed   :  { %v7384_v15 = vpop.eup %7383 }
 0x9ee   :  { %v3614_v24 = vmul.f32 %v7384_v15, %v3612_v26  ;;  %vm3620_vm10 = vweird.f32 %v7384_v15  ;;  %v4172_v26 = vld [vmem:[%s16279_s18 + $0x818] sm:$0xff] }
 0x9ef   :  { %vm3621_vm12 = vmor %vm3619_vm11, %vm3620_vm10 }
 0x9f0   :  { %v3615_v28 = vmul.f32 %v7384_v15, %v3614_v24  ;;  %v4053_v24 = vld [vmem:[%s16279_s18 + $0x460] sm:$0xff] }
 0x9f2   :  { %v3616_v7 = vmul.f32 0.5, %v3615_v28  ;;  %v3934_v28 = vld [vmem:[%s16279_s18 + $0xa8] sm:$0xff] }
 0x9f4   :  { %v3617_v33 = vsub.f32 1.5, %v3616_v7  ;;  %v4165_v7 = vld [vmem:[%s16279_s18 + $0x7e0] sm:$0xff] }
 0x9f6   :  { %v3618_v47 = vmul.f32 %v7384_v15, %v3617_v33  ;;  %v4291_v33 = vld [vmem:[%s16279_s18 + $0xbd0] sm:$0xff] }
 0x9f8   :  { %v3622_v45 = vsel %vm3621_vm12, %v7384_v15, %v3618_v47  ;;  %v4298_v15 = vld [vmem:[%s16279_s18 + $0xc08] sm:$0xff]  ;;  %v3927_v47 = vld [vmem:[%s16279_s18 + $0x70] sm:$0xff] }
 0x9f9   :  { %v11799_v48 = vmul.f32 %v3622_v45, %v3611_v61  ;;  %v4046_v61 = vld [vmem:[%s16279_s18 + $0x428] sm:$0xff] }
 0x9fa   :  { %v4158_v45 = vld [vmem:[%s16279_s18 + $0x7a8] sm:$0xff] }
 0x9fb   :  { %7349 = vmatmul.msk.f32.vlgmr.msra.gmra.mxu1 %vm72_vm0, %v11799_v48  ;;  %7350 = vmatmul.msk.f32.vlgmr.msra.gmra.mxu2 %vm72_vm0, %v11799_v48 }
 0x9fc   :  { %7351 = vmatmul.msk.f32.vlgmr.msrb.gmra.mxu3 %vm72_vm0, %v11799_v48  ;;  %7352 = vmatmul.msk.f32.vlgmr.msra.gmra.mxu0 %vm72_vm0, %v11799_v48 }
 0x9fd   :  { %3802 = vmatpush.msra.mxu1 %v11314_v40  ;;  %3822 = vmatpush.msra.mxu2 %v11350_v41  ;;  %v4130_v40 = vld [vmem:[%s16279_s18 + $0x6c8] sm:$0xff]  ;;  %v4123_v41 = vld [vmem:[%s16279_s18 + $0x690] sm:$0xff] }
 0x9fe   :  { %3842 = vmatpush.msrb.mxu3 %v11327_v18  ;;  %3862 = vmatpush.msra.mxu0 %v11334_v30  ;;  %v4242_v18 = vld [vmem:[%s16279_s18 + $0xa48] sm:$0xff]  ;;  %v4011_v30 = vld [vmem:[%s16279_s18 + $0x310] sm:$0xff] }
 0xa03   :  { %7353 = vmatmul.msk.f32.vlgmr.msrb.gmra.mxu1 %vm72_vm0, %v11799_v48  ;;  %7354 = vmatmul.msk.f32.vlgmr.msrb.gmra.mxu2 %vm72_vm0, %v11799_v48 }
 0xa04   :  { %7355 = vmatmul.msk.f32.vlgmr.msra.gmra.mxu3 %vm72_vm0, %v11799_v48  ;;  %7356 = vmatmul.msk.f32.vlgmr.msrb.gmra.mxu0 %vm72_vm0, %v11799_v48 }
 0xa05   :  { %3882 = vmatpush.msrb.mxu1 %v11339_v0  ;;  %5304 = vmatpush.msrb.mxu2 %v4018_v56  ;;  %v4116_v0 = vld [vmem:[%s16279_s18 + $0x658] sm:$0xff]  ;;  %v4039_v56 = vld [vmem:[%s16279_s18 + $0x3f0] sm:$0xff] }
 0xa06   :  { %5324 = vmatpush.msra.mxu3 %v4130_v40  ;;  %5344 = vmatpush.msrb.mxu0 %v4242_v18  ;;  %v3920_v40 = vld [vmem:[%s16279_s18 + $0x38] sm:$0xff]  ;;  %v4151_v18 = vld [vmem:[%s16279_s18 + $0x770] sm:$0xff] }
 0xa07   :  { %5305 = vmatpush.msrb.mxu2 %v4011_v30  ;;  %v4277_v30 = vld [vmem:[%s16279_s18 + $0xb60] sm:$0xff] }
 0xa08   :  { %5325 = vmatpush.msra.mxu3 %v4123_v41  ;;  %5345 = vmatpush.msrb.mxu0 %v4235_v46  ;;  %v4032_v41 = vld [vmem:[%s16279_s18 + $0x3b8] sm:$0xff]  ;;  %v3913_v46 = vld [vmem:[%s16279_s18] sm:$0xff] }
 0xa09   :  { %5306 = vmatpush.msrb.mxu2 %v4004_v27  ;;  %v4144_v27 = vld [vmem:[%s16279_s18 + $0x738] sm:$0xff] }
 0xa0a   :  { %5326 = vmatpush.msra.mxu3 %v4116_v0  ;;  %5346 = vmatpush.msrb.mxu0 %v4228_v43  ;;  %v4270_v0 = vld [vmem:[%s16279_s18 + $0xb28] sm:$0xff] }
 0xa0b   :  { %7357 = vmatmul.msk.f32.vlgmr.msra.gmra.mxu1 %vm72_vm0, %v11799_v48  ;;  %7358 = vmatmul.msk.f32.vlgmr.msra.gmra.mxu2 %vm72_vm0, %v11799_v48  ;;  %v4466_v43 = vld [vmem:[%s16279_s18 + $0x1148] sm:$0xff] }
 0xa0c   :  { %7359 = vmatmul.msk.f32.vlgmr.msrb.gmra.mxu3 %vm72_vm0, %v11799_v48  ;;  %7360 = vmatmul.msk.f32.vlgmr.msra.gmra.mxu0 %vm72_vm0, %v11799_v48 }
 0xa0d   :  { %5364 = vmatpush.msra.mxu1 %v4354_v8  ;;  %5307 = vmatpush.msrb.mxu2 %v3997_v54  ;;  %v4025_v8 = vld [vmem:[%s16279_s18 + $0x380] sm:$0xff] }
 0xa0e   :  { %5327 = vmatpush.msra.mxu3 %v4109_v59  ;;  %5347 = vmatpush.msrb.mxu0 %v4221_v25  ;;  %v4137_v54 = vld [vmem:[%s16279_s18 + $0x700] sm:$0xff]  ;;  %v4263_v59 = vld [vmem:[%s16279_s18 + $0xaf0] sm:$0xff] }
 0xa0f   :  { %5365 = vmatpush.msra.mxu1 %v4347_v50  ;;  %5308 = vmatpush.msrb.mxu2 %v3990_v11  ;;  %v4459_v25 = vld [vmem:[%s16279_s18 + $0x1110] sm:$0xff]  ;;  %v4578_v50 = vld [vmem:[%s16279_s18 + $0x14c8] sm:$0xff] }
 0xa10   :  { %5328 = vmatpush.msra.mxu3 %v4102_v55  ;;  %5348 = vmatpush.msrb.mxu0 %v4214_v4  ;;  %v4690_v11 = vld [vmem:[%s16279_s18 + $0x1848] sm:$0xff]  ;;  %v4256_v55 = vld [vmem:[%s16279_s18 + $0xab8] sm:$0xff] }
 0xa11   :  { %5366 = vmatpush.msra.mxu1 %v4340_v12  ;;  %5309 = vmatpush.msrb.mxu2 %v3983_v3  ;;  %v4452_v4 = vld [vmem:[%s16279_s18 + $0x10d8] sm:$0xff]  ;;  %v4571_v12 = vld [vmem:[%s16279_s18 + $0x1490] sm:$0xff] }
 0xa12   :  { %5329 = vmatpush.msra.mxu3 %v4095_v16  ;;  %5349 = vmatpush.msrb.mxu0 %v4207_v10  ;;  %v4683_v3 = vld [vmem:[%s16279_s18 + $0x1810] sm:$0xff]  ;;  %v4249_v16 = vld [vmem:[%s16279_s18 + $0xa80] sm:$0xff] }
 0xa13   :  { %7361 = vmatmul.msk.f32.vlgmr.msrb.gmra.mxu1 %vm72_vm0, %v11799_v48  ;;  %5310 = vmatpush.msrb.mxu2 %v3976_v19  ;;  %v4284_v48 = vld [vmem:[%s16279_s18 + $0xb98] sm:$0xff]  ;;  %v4445_v10 = vld [vmem:[%s16279_s18 + $0x10a0] sm:$0xff]  ;;  %v4802_v19 = vld [vmem:[%s16279_s18 + $0x1bc8] sm:$0xff] }
 0xa14   :  { %5367 = vmatpush.msra.mxu1 %v4333_v51  ;;  %5330 = vmatpush.msra.mxu3 %v4088_v5  ;;  %v4564_v51 = vld [vmem:[%s16279_s18 + $0x1458] sm:$0xff]  ;;  %v4438_v5 = vld [vmem:[%s16279_s18 + $0x1068] sm:$0xff] }
 0xa15   :  { %5311 = vmatpush.msrb.mxu2 %v3969_v63  ;;  %5350 = vmatpush.msrb.mxu0 %v4200_v39  ;;  %v4676_v63 = vld [vmem:[%s16279_s18 + $0x17d8] sm:$0xff]  ;;  %v4795_v39 = vld [vmem:[%s16279_s18 + $0x1b90] sm:$0xff] }
 0xa16   :  { %5368 = vmatpush.msra.mxu1 %v4326_v60  ;;  %5331 = vmatpush.msra.mxu3 %v4081_v49  ;;  %v4557_v60 = vld [vmem:[%s16279_s18 + $0x1420] sm:$0xff]  ;;  %v4431_v49 = vld [vmem:[%s16279_s18 + $0x1030] sm:$0xff] }
 0xa17   :  { %5312 = vmatpush.msrb.mxu2 %v3962_v53  ;;  %5351 = vmatpush.msrb.mxu0 %v4193_v6  ;;  %v4669_v53 = vld [vmem:[%s16279_s18 + $0x17a0] sm:$0xff]  ;;  %v4788_v6 = vld [vmem:[%s16279_s18 + $0x1b58] sm:$0xff] }
 0xa18   :  { %5369 = vmatpush.msra.mxu1 %v4319_v35  ;;  %5332 = vmatpush.msra.mxu3 %v4074_v58  ;;  %v4550_v35 = vld [vmem:[%s16279_s18 + $0x13e8] sm:$0xff]  ;;  %v4424_v58 = vld [vmem:[%s16279_s18 + $0xff8] sm:$0xff] }
 0xa19   :  { %5313 = vmatpush.msrb.mxu2 %v3955_v20  ;;  %5352 = vmatpush.msrb.mxu0 %v4186_v31  ;;  %v4662_v20 = vld [vmem:[%s16279_s18 + $0x1768] sm:$0xff]  ;;  %v4781_v31 = vld [vmem:[%s16279_s18 + $0x1b20] sm:$0xff] }
 0xa1a   :  { %5370 = vmatpush.msra.mxu1 %v4312_v62  ;;  %5333 = vmatpush.msra.mxu3 %v4067_v57  ;;  %v4543_v62 = vld [vmem:[%s16279_s18 + $0x13b0] sm:$0xff]  ;;  %v4417_v57 = vld [vmem:[%s16279_s18 + $0xfc0] sm:$0xff] }
 0xa1b   :  { %5314 = vmatpush.msrb.mxu2 %v3948_v22  ;;  %5353 = vmatpush.msrb.mxu0 %v4179_v13  ;;  %v4655_v22 = vld [vmem:[%s16279_s18 + $0x1730] sm:$0xff]  ;;  %v4774_v13 = vld [vmem:[%s16279_s18 + $0x1ae8] sm:$0xff] }
 0xa1c   :  { %5371 = vmatpush.msra.mxu1 %v4305_v2  ;;  %5334 = vmatpush.msra.mxu3 %v4060_v37  ;;  %v4536_v2 = vld [vmem:[%s16279_s18 + $0x1378] sm:$0xff]  ;;  %v4410_v37 = vld [vmem:[%s16279_s18 + $0xf88] sm:$0xff] }
 0xa1d   :  { %5315 = vmatpush.msrb.mxu2 %v3941_v42  ;;  %5354 = vmatpush.msrb.mxu0 %v4172_v26  ;;  %v4648_v42 = vld [vmem:[%s16279_s18 + $0x16f8] sm:$0xff]  ;;  %v4767_v26 = vld [vmem:[%s16279_s18 + $0x1ab0] sm:$0xff] }
 0xa1e   :  { %5372 = vmatpush.msra.mxu1 %v4298_v15  ;;  %5335 = vmatpush.msra.mxu3 %v4053_v24  ;;  %v4529_v15 = vld [vmem:[%s16279_s18 + $0x1340] sm:$0xff]  ;;  %v4403_v24 = vld [vmem:[%s16279_s18 + $0xf50] sm:$0xff] }
 0xa1f   :  { %5316 = vmatpush.msrb.mxu2 %v3934_v28  ;;  %5355 = vmatpush.msrb.mxu0 %v4165_v7  ;;  %v4641_v28 = vld [vmem:[%s16279_s18 + $0x16c0] sm:$0xff]  ;;  %v4760_v7 = vld [vmem:[%s16279_s18 + $0x1a78] sm:$0xff] }
 0xa20   :  { %5373 = vmatpush.msra.mxu1 %v4291_v33  ;;  %5336 = vmatpush.msra.mxu3 %v4046_v61  ;;  %v4522_v33 = vld [vmem:[%s16279_s18 + $0x1308] sm:$0xff]  ;;  %v4396_v61 = vld [vmem:[%s16279_s18 + $0xf18] sm:$0xff] }
 0xa21   :  { %5317 = vmatpush.msrb.mxu2 %v3927_v47  ;;  %5356 = vmatpush.msrb.mxu0 %v4158_v45  ;;  %v4634_v47 = vld [vmem:[%s16279_s18 + $0x1688] sm:$0xff]  ;;  %v4753_v45 = vld [vmem:[%s16279_s18 + $0x1a40] sm:$0xff] }
 0xa22   :  { %5374 = vmatpush.msra.mxu1 %v4284_v48  ;;  %5337 = vmatpush.msra.mxu3 %v4039_v56  ;;  %v4515_v48 = vld [vmem:[%s16279_s18 + $0x12d0] sm:$0xff]  ;;  %v4389_v56 = vld [vmem:[%s16279_s18 + $0xee0] sm:$0xff] }
 0xa23   :  { %5318 = vmatpush.msrb.mxu2 %v3920_v40  ;;  %5357 = vmatpush.msrb.mxu0 %v4151_v18  ;;  %v4627_v40 = vld [vmem:[%s16279_s18 + $0x1650] sm:$0xff]  ;;  %v4746_v18 = vld [vmem:[%s16279_s18 + $0x1a08] sm:$0xff] }
 0xa24   :  { %5375 = vmatpush.msra.mxu1 %v4277_v30  ;;  %5338 = vmatpush.msra.mxu3 %v4032_v41  ;;  %v4382_v30 = vld [vmem:[%s16279_s18 + $0xea8] sm:$0xff]  ;;  %v4739_v41 = vld [vmem:[%s16279_s18 + $0x19d0] sm:$0xff] }
 0xa25   :  { %5319 = vmatpush.msrb.mxu2 %v3913_v46  ;;  %5358 = vmatpush.msrb.mxu0 %v4144_v27  ;;  %v4732_v46 = vld [vmem:[%s16279_s18 + $0x1998] sm:$0xff]  ;;  %v4725_v27 = vld [vmem:[%s16279_s18 + $0x1960] sm:$0xff] }
 0xa26   :  { %5376 = vmatpush.msra.mxu1 %v4270_v0  ;;  %5339 = vmatpush.msra.mxu3 %v4025_v8  ;;  %v4718_v0 = vld [vmem:[%s16279_s18 + $0x1928] sm:$0xff]  ;;  %v4508_v8 = vld [vmem:[%s16279_s18 + $0x1298] sm:$0xff] }
 0xa27   :  { %5384 = vmatpush.msra.mxu2 %v4466_v43  ;;  %5359 = vmatpush.msrb.mxu0 %v4137_v54  ;;  %v4375_v43 = vld [vmem:[%s16279_s18 + $0xe70] sm:$0xff]  ;;  %v4620_v54 = vld [vmem:[%s16279_s18 + $0x1618] sm:$0xff] }
 0xa28   :  { %5377 = vmatpush.msra.mxu1 %v4263_v59  ;;  %5404 = vmatpush.msrb.mxu3 %v4578_v50  ;;  %v4711_v59 = vld [vmem:[%s16279_s18 + $0x18f0] sm:$0xff]  ;;  %v4501_v50 = vld [vmem:[%s16279_s18 + $0x1260] sm:$0xff] }
 0xa29   :  { %5385 = vmatpush.msra.mxu2 %v4459_v25  ;;  %5424 = vmatpush.msra.mxu0 %v4690_v11  ;;  %v4368_v25 = vld [vmem:[%s16279_s18 + $0xe38] sm:$0xff]  ;;  %v4613_v11 = vld [vmem:[%s16279_s18 + $0x15e0] sm:$0xff] }
 0xa2a   :  { %5378 = vmatpush.msra.mxu1 %v4256_v55  ;;  %5405 = vmatpush.msrb.mxu3 %v4571_v12  ;;  %v4704_v55 = vld [vmem:[%s16279_s18 + $0x18b8] sm:$0xff]  ;;  %v4494_v12 = vld [vmem:[%s16279_s18 + $0x1228] sm:$0xff] }
 0xa2b   :  { %5386 = vmatpush.msra.mxu2 %v4452_v4  ;;  %5425 = vmatpush.msra.mxu0 %v4683_v3  ;;  %v4361_v4 = vld [vmem:[%s16279_s18 + $0xe00] sm:$0xff]  ;;  %v4606_v3 = vld [vmem:[%s16279_s18 + $0x15a8] sm:$0xff] }
 0xa2c   :  { %5379 = vmatpush.msra.mxu1 %v4249_v16  ;;  %5406 = vmatpush.msrb.mxu3 %v4564_v51  ;;  %v4697_v16 = vld [vmem:[%s16279_s18 + $0x1880] sm:$0xff]  ;;  %v4480_v51 = vld [vmem:[%s16279_s18 + $0x11b8] sm:$0xff] }
 0xa2d   :  { %5387 = vmatpush.msra.mxu2 %v4445_v10  ;;  %5426 = vmatpush.msra.mxu0 %v4676_v63  ;;  %v4487_v10 = vld [vmem:[%s16279_s18 + $0x11f0] sm:$0xff]  ;;  %v4473_v63 = vld [vmem:[%s16279_s18 + $0x1180] sm:$0xff] }
 0xa2e   :  { %5444 = vmatpush.msrb.mxu1 %v4802_v19  ;;  %5407 = vmatpush.msrb.mxu3 %v4557_v60  ;;  %v4599_v19 = vld [vmem:[%s16279_s18 + $0x1570] sm:$0xff] }
 0xa2f   :  { %5388 = vmatpush.msra.mxu2 %v4438_v5  ;;  %5427 = vmatpush.msra.mxu0 %v4669_v53  ;;  %v4592_v5 = vld [vmem:[%s16279_s18 + $0x1538] sm:$0xff] }
 0xa30   :  { %5445 = vmatpush.msrb.mxu1 %v4795_v39  ;;  %5408 = vmatpush.msrb.mxu3 %v4550_v35  ;;  %v4585_v39 = vld [vmem:[%s16279_s18 + $0x1500] sm:$0xff] }
 0xa31   :  { %5389 = vmatpush.msra.mxu2 %v4431_v49  ;;  %5428 = vmatpush.msra.mxu0 %v4662_v20 }
 0xa32   :  { %5446 = vmatpush.msrb.mxu1 %v4788_v6  ;;  %5409 = vmatpush.msrb.mxu3 %v4543_v62  ;;  %v4907_v62 = vld [vmem:[%s16279_s18 + $0x1f10] sm:$0xff] }
 0xa33   :  { %5390 = vmatpush.msra.mxu2 %v4424_v58  ;;  %5429 = vmatpush.msra.mxu0 %v4655_v22  ;;  %v4914_v58 = vld [vmem:[%s16279_s18 + $0x1f48] sm:$0xff] }
 0xa34   :  { %5447 = vmatpush.msrb.mxu1 %v4781_v31  ;;  %5410 = vmatpush.msrb.mxu3 %v4536_v2  ;;  %v5250_v31 = vld [vmem:[%s16279_s18 + $0x29c8] sm:$0xff] }
 0xa35   :  { %5391 = vmatpush.msra.mxu2 %v4417_v57  ;;  %5430 = vmatpush.msra.mxu0 %v4648_v42  ;;  %v5243_v57 = vld [vmem:[%s16279_s18 + $0x2990] sm:$0xff]  ;;  %v5236_v42 = vld [vmem:[%s16279_s18 + $0x2958] sm:$0xff] }
 0xa36   :  { %5448 = vmatpush.msrb.mxu1 %v4774_v13  ;;  %5411 = vmatpush.msrb.mxu3 %v4529_v15  ;;  %v4900_v13 = vld [vmem:[%s16279_s18 + $0x1ed8] sm:$0xff] }
 0xa37   :  { %5392 = vmatpush.msra.mxu2 %v4410_v37  ;;  %5431 = vmatpush.msra.mxu0 %v4641_v28  ;;  %v4893_v28 = vld [vmem:[%s16279_s18 + $0x1ea0] sm:$0xff] }
 0xa38   :  { %5449 = vmatpush.msrb.mxu1 %v4767_v26  ;;  %5412 = vmatpush.msrb.mxu3 %v4522_v33 }
 0xa39   :  { %5393 = vmatpush.msra.mxu2 %v4403_v24  ;;  %5432 = vmatpush.msra.mxu0 %v4634_v47 }
 0xa3a   :  { %5450 = vmatpush.msrb.mxu1 %v4760_v7  ;;  %5413 = vmatpush.msrb.mxu3 %v4515_v48  ;;  %v4886_v48 = vld [vmem:[%s16279_s18 + $0x1e68] sm:$0xff] }
 0xa3b   :  { %5394 = vmatpush.msra.mxu2 %v4396_v61  ;;  %5433 = vmatpush.msra.mxu0 %v4627_v40  ;;  %v5026_v61 = vld [vmem:[%s16279_s18 + $0x22c8] sm:$0xff] }
 0xa3c   :  { %5451 = vmatpush.msrb.mxu1 %v4753_v45  ;;  %5414 = vmatpush.msrb.mxu3 %v4508_v8  ;;  %v4872_v8 = vld [vmem:[%s16279_s18 + $0x1df8] sm:$0xff] }
 0xa3d   :  { %5395 = vmatpush.msra.mxu2 %v4389_v56  ;;  %5434 = vmatpush.msra.mxu0 %v4620_v54  ;;  %v5131_v56 = vld [vmem:[%s16279_s18 + $0x2610] sm:$0xff] }
 0xa3e   :  { %5452 = vmatpush.msrb.mxu1 %v4746_v18  ;;  %5415 = vmatpush.msrb.mxu3 %v4501_v50  ;;  %v4879_v18 = vld [vmem:[%s16279_s18 + $0x1e30] sm:$0xff] }
 0xa3f   :  { %5396 = vmatpush.msra.mxu2 %v4382_v30  ;;  %5435 = vmatpush.msra.mxu0 %v4613_v11  ;;  %v5208_v11 = vld [vmem:[%s16279_s18 + $0x2878] sm:$0xff] }
 0xa40   :  { %5453 = vmatpush.msrb.mxu1 %v4739_v41  ;;  %5416 = vmatpush.msrb.mxu3 %v4494_v12  ;;  %v4858_v12 = vld [vmem:[%s16279_s18 + $0x1d88] sm:$0xff] }
 0xa41   :  { %5397 = vmatpush.msra.mxu2 %v4375_v43  ;;  %5436 = vmatpush.msra.mxu0 %v4606_v3  ;;  %v5215_v43 = vld [vmem:[%s16279_s18 + $0x28b0] sm:$0xff] }
 0xa42   :  { %5454 = vmatpush.msrb.mxu1 %v4732_v46  ;;  %5417 = vmatpush.msrb.mxu3 %v4487_v10  ;;  %v5012_v46 = vld [vmem:[%s16279_s18 + $0x2258] sm:$0xff]  ;;  %v4991_v3 = vld [vmem:[%s16279_s18 + $0x21b0] sm:$0xff]  ;;  %v5194_v10 = vld [vmem:[%s16279_s18 + $0x2808] sm:$0xff] }
 0xa43   :  { %5398 = vmatpush.msra.mxu2 %v4368_v25  ;;  %5437 = vmatpush.msra.mxu0 %v4599_v19  ;;  %v5117_v25 = vld [vmem:[%s16279_s18 + $0x25a0] sm:$0xff]  ;;  %v4851_v19 = vld [vmem:[%s16279_s18 + $0x1d50] sm:$0xff] }
 0xa44   :  { %5455 = vmatpush.msrb.mxu1 %v4725_v27  ;;  %5418 = vmatpush.msrb.mxu3 %v4480_v51  ;;  %v5124_v27 = vld [vmem:[%s16279_s18 + $0x25d8] sm:$0xff] }
 0xa45   :  { %5399 = vmatpush.msra.mxu2 %v4361_v4  ;;  %5438 = vmatpush.msra.mxu0 %v4592_v5  ;;  %v5201_v4 = vld [vmem:[%s16279_s18 + $0x2840] sm:$0xff]  ;;  %v4984_v51 = vld [vmem:[%s16279_s18 + $0x2178] sm:$0xff] }
 0xa46   :  { %5456 = vmatpush.msrb.mxu1 %v4718_v0  ;;  %5419 = vmatpush.msrb.mxu3 %v4473_v63  ;;  %v5096_v5 = vld [vmem:[%s16279_s18 + $0x24f8] sm:$0xff]  ;;  %v5187_v63 = vld [vmem:[%s16279_s18 + $0x27d0] sm:$0xff] }
 0xa47   :  { %5439 = vmatpush.msra.mxu0 %v4585_v39  ;;  %v4844_v39 = vld [vmem:[%s16279_s18 + $0x1d18] sm:$0xff] }
 0xa48   :  { %5457 = vmatpush.msrb.mxu1 %v4711_v59  ;;  %v5005_v59 = vld [vmem:[%s16279_s18 + $0x2220] sm:$0xff] }
 0xa4a   :  { %5458 = vmatpush.msrb.mxu1 %v4704_v55  ;;  %v4998_v55 = vld [vmem:[%s16279_s18 + $0x21e8] sm:$0xff] }
 0xa4c   :  { %5459 = vmatpush.msrb.mxu1 %v4697_v16  ;;  %v5103_v16 = vld [vmem:[%s16279_s18 + $0x2530] sm:$0xff] }
 0xa78   :  { %v3644_v60 = vpop.f32.mrf.mxu1 }
 0xa79   :  { %v3887_v49 = vperm.slane %v3644_v60, 0  ;;  %v3704_v53 = vpop.f32.mrf.mxu0  ;;  %v4977_v60 = vld [vmem:[%s16279_s18 + $0x2140] sm:$0xff] }
 0xa7a   :  { %v3890_v6 = vperm.slane %v3704_v53, 0  ;;  %v5180_v53 = vld [vmem:[%s16279_s18 + $0x2798] sm:$0xff] }
 0xa7b   :  { %v12217_v35 = vmul.f32 %v3887_v49, %v11638_v17  ;;  %v5089_v49 = vld [vmem:[%s16279_s18 + $0x24c0] sm:$0xff] }
 0xa7c   :  { %v12223_v20 = vmul.f32 %v3890_v6, %v11654_v23  ;;  %v4837_v6 = vld [vmem:[%s16279_s18 + $0x1ce0] sm:$0xff] }
 0xa7d   :  { %5320 = vmatmul.f32.vlgmr.msrb.gmra.mxu2 %v12217_v35 }
 0xa7e   :  { %5380 = vmatmul.f32.vlgmr.msra.gmra.mxu1 %v12223_v20  ;;  %5464 = vmatpush.msrb.mxu2 %v4914_v58  ;;  %v3664_v17 = vpop.f32.mrf.mxu2  ;;  %v4970_v58 = vld [vmem:[%s16279_s18 + $0x2108] sm:$0xff] }
 0xa7f   :  { %5524 = vmatpush.msra.mxu1 %v5250_v31  ;;  %v3888_v23 = vperm.slane %v3664_v17, 0  ;;  %v3684_v22 = vpop.f32.mrf.mxu3  ;;  %v5082_v31 = vld [vmem:[%s16279_s18 + $0x2488] sm:$0xff] }
 0xa80   :  { %v3889_v2 = vperm.slane %v3684_v22, 0  ;;  %5465 = vmatpush.msrb.mxu2 %v4907_v62  ;;  %v3724_v37 = vpop.f32.mrf.mxu1  ;;  %v5173_v62 = vld [vmem:[%s16279_s18 + $0x2760] sm:$0xff]  ;;  %v4830_v17 = vld [vmem:[%s16279_s18 + $0x1ca8] sm:$0xff] }
 0xa81   :  { %v12243_v26 = vmul.f32 %v3888_v23, %v11664_v29  ;;  %5525 = vmatpush.msra.mxu1 %v5243_v57  ;;  %v3891_v15 = vperm.slane %v3724_v37, 0  ;;  %v3784_v24 = vpop.f32.mrf.mxu0  ;;  %v5138_v29 = vld [vmem:[%s16279_s18 + $0x2648] sm:$0xff]  ;;  %v4963_v57 = vld [vmem:[%s16279_s18 + $0x20d0] sm:$0xff] }
 0xa82   :  { %v12249_v7 = vmul.f32 %v3889_v2, %v11642_v34  ;;  %v3894_v33 = vperm.slane %v3784_v24, 0  ;;  %5466 = vmatpush.msrb.mxu2 %v4900_v13  ;;  %v5229_v34 = vld [vmem:[%s16279_s18 + $0x2920] sm:$0xff]  ;;  %v5075_v23 = vld [vmem:[%s16279_s18 + $0x2450] sm:$0xff]  ;;  %v5166_v13 = vld [vmem:[%s16279_s18 + $0x2728] sm:$0xff] }
 0xa83   :  { %v12258_v47 = vmul.f32 %v3891_v15, %v11658_v52  ;;  %5526 = vmatpush.msra.mxu1 %v5236_v42  ;;  %5340 = vmatmul.f32.vlgmr.msra.gmra.mxu3 %v12243_v26  ;;  %v5019_v52 = vld [vmem:[%s16279_s18 + $0x2290] sm:$0xff]  ;;  %v4956_v42 = vld [vmem:[%s16279_s18 + $0x2098] sm:$0xff] }
 0xa84   :  { %v12265_v45 = vmul.f32 %v3894_v33, %v11686_v44  ;;  %5360 = vmatmul.f32.vlgmr.msrb.gmra.mxu0 %v12249_v7  ;;  %5467 = vmatpush.msrb.mxu2 %v4893_v28  ;;  %v5222_v44 = vld [vmem:[%s16279_s18 + $0x28e8] sm:$0xff]  ;;  %v4823_v2 = vld [vmem:[%s16279_s18 + $0x1c70] sm:$0xff]  ;;  %v5068_v15 = vld [vmem:[%s16279_s18 + $0x2418] sm:$0xff] }
 0xa85   :  { %5484 = vmatpush.msra.mxu3 %v5026_v61  ;;  %5504 = vmatpush.msrb.mxu0 %v5138_v29  ;;  %v5159_v24 = vld [vmem:[%s16279_s18 + $0x26f0] sm:$0xff]  ;;  %v4816_v28 = vld [vmem:[%s16279_s18 + $0x1c38] sm:$0xff]  ;;  %v4949_v61 = vld [vmem:[%s16279_s18 + $0x2060] sm:$0xff] }
 0xa86   :  { %5527 = vmatpush.msra.mxu1 %v5229_v34  ;;  %5400 = vmatmul.f32.vlgmr.msra.gmra.mxu2 %v12258_v47  ;;  %v3744_v40 = vpop.f32.mrf.mxu2  ;;  %v5061_v29 = vld [vmem:[%s16279_s18 + $0x23e0] sm:$0xff] }
 0xa87   :  { %5460 = vmatmul.f32.vlgmr.msrb.gmra.mxu1 %v12265_v45  ;;  %5468 = vmatpush.msrb.mxu2 %v4886_v48  ;;  %v3892_v30 = vperm.slane %v3744_v40, 0  ;;  %v3764_v41 = vpop.f32.mrf.mxu3  ;;  %v5152_v48 = vld [vmem:[%s16279_s18 + $0x26b8] sm:$0xff]  ;;  %v5145_v40 = vld [vmem:[%s16279_s18 + $0x2680] sm:$0xff] }
 0xa88   :  { %5485 = vmatpush.msra.mxu3 %v5019_v52  ;;  %5505 = vmatpush.msrb.mxu0 %v5131_v56  ;;  %v3893_v0 = vperm.slane %v3764_v41, 0  ;;  %v3804_v22 = vpop.f32.mrf.mxu1  ;;  %v4809_v52 = vld [vmem:[%s16279_s18 + $0x1c00] sm:$0xff]  ;;  %v4942_v56 = vld [vmem:[%s16279_s18 + $0x2028] sm:$0xff] }
 0xa89   :  { %5528 = vmatpush.msra.mxu1 %v5222_v44  ;;  %v12298_v54 = vmul.f32 %v3892_v30, %v11695_v9  ;;  %5469 = vmatpush.msrb.mxu2 %v4879_v18  ;;  %v4865_v9 = vld [vmem:[%s16279_s18 + $0x1dc0] sm:$0xff]  ;;  %v3864_v37 = vpop.f32.mrf.mxu0  ;;  %v3895_v33 = vperm.slane %v3804_v22, 0  ;;  %v5054_v44 = vld [vmem:[%s16279_s18 + $0x23a8] sm:$0xff] }
 0xa8a   :  { %v12307_v50 = vmul.f32 %v3893_v0, %v11668_v21  ;;  %5486 = vmatpush.msra.mxu3 %v5012_v46  ;;  %5506 = vmatpush.msrb.mxu0 %v5124_v27  ;;  %v5110_v21 = vld [vmem:[%s16279_s18 + $0x2568] sm:$0xff]  ;;  %v3898_v34 = vperm.slane %v3864_v37, 0  ;;  %v4243_v0 = vld [vmem:[%s16279_s18 + $0xa50] sm:$0xff] }
 0xa8b   :  { %5529 = vmatpush.msra.mxu1 %v5215_v43  ;;  %5470 = vmatpush.msrb.mxu2 %v4872_v8  ;;  %v12423_v18 = vmul.f32 %v3895_v33, %v11734_v32  ;;  %v5278_v41 = vld [vmem:[%s16279_s18 + $0x2aa8] sm:$0xff]  ;;  %v4935_v32 = vld [vmem:[%s16279_s18 + $0x1ff0] sm:$0xff]  ;;  %v4320_v33 = vld [vmem:[%s16279_s18 + $0xcb8] sm:$0xff] }
 0xa8c   :  { %5487 = vmatpush.msra.mxu3 %v5005_v59  ;;  %5507 = vmatpush.msrb.mxu0 %v5117_v25  ;;  %v12429_v46 = vmul.f32 %v3898_v34, %v11759_v38  ;;  %v5047_v43 = vld [vmem:[%s16279_s18 + $0x2370] sm:$0xff]  ;;  %v4236_v59 = vld [vmem:[%s16279_s18 + $0xa18] sm:$0xff]  ;;  %v4334_v22 = vld [vmem:[%s16279_s18 + $0xd28] sm:$0xff] }
 0xa8d   :  { %5530 = vmatpush.msra.mxu1 %v5208_v11  ;;  %5420 = vmatmul.f32.vlgmr.msrb.gmra.mxu3 %v12298_v54  ;;  %v5271_v38 = vld [vmem:[%s16279_s18 + $0x2a70] sm:$0xff]  ;;  %v4928_v25 = vld [vmem:[%s16279_s18 + $0x1fb8] sm:$0xff]  ;;  %v4194_v37 = vld [vmem:[%s16279_s18 + $0x8c8] sm:$0xff] }
 0xa8e   :  { %5440 = vmatmul.f32.vlgmr.msra.gmra.mxu0 %v12307_v50  ;;  %5471 = vmatpush.msrb.mxu2 %v4865_v9  ;;  %v3824_v30 = vpop.f32.mrf.mxu2  ;;  %v4180_v34 = vld [vmem:[%s16279_s18 + $0x858] sm:$0xff] }
 0xa8f   :  { %5488 = vmatpush.msra.mxu3 %v4998_v55  ;;  %5508 = vmatpush.msrb.mxu0 %v5110_v21  ;;  %v3844_v27 = vpop.f32.mrf.mxu3  ;;  %v3896_v8 = vperm.slane %v3824_v30, 0  ;;  %v5040_v55 = vld [vmem:[%s16279_s18 + $0x2338] sm:$0xff]  ;;  %v3963_v30 = vld [vmem:[%s16279_s18 + $0x190] sm:$0xff] }
 0xa90   :  { %5531 = vmatpush.msra.mxu1 %v5201_v4  ;;  %5472 = vmatpush.msrb.mxu2 %v4858_v12  ;;  %v3897_v11 = vperm.slane %v3844_v27, 0  ;;  %v3884_v9 = vpop.f32.mrf.mxu1  ;;  %v5264_v21 = vld [vmem:[%s16279_s18 + $0x2a38] sm:$0xff]  ;;  %v4229_v4 = vld [vmem:[%s16279_s18 + $0x9e0] sm:$0xff]  ;;  %v4166_v27 = vld [vmem:[%s16279_s18 + $0x7e8] sm:$0xff] }
 0xa91   :  { %5489 = vmatpush.msra.mxu3 %v4991_v3  ;;  %5509 = vmatpush.msrb.mxu0 %v5103_v16  ;;  %v4921_v12 = vld [vmem:[%s16279_s18 + $0x1f80] sm:$0xff]  ;;  %v12467_v16 = vmul.f32 %v3896_v8, %v11764_v14  ;;  %v4131_v14 = vld [vmem:[%s16279_s18 + $0x6d0] sm:$0xff]  ;;  %v4292_v8 = vld [vmem:[%s16279_s18 + $0xbd8] sm:$0xff] }
 0xa92   :  { %5532 = vmatpush.msra.mxu1 %v5194_v10  ;;  %5473 = vmatpush.msrb.mxu2 %v4851_v19  ;;  %v5033_v3 = vld [vmem:[%s16279_s18 + $0x2300] sm:$0xff]  ;;  %v3899_v10 = vperm.slane %v3884_v9, 0 }
 0xa93   :  { %5490 = vmatpush.msra.mxu3 %v4984_v51  ;;  %5510 = vmatpush.msrb.mxu0 %v5096_v5  ;;  %v5257_v19 = vld [vmem:[%s16279_s18 + $0x2a00] sm:$0xff]  ;;  %v12473_v51 = vmul.f32 %v3897_v11, %v11740_v1  ;;  %v4019_v5 = vld [vmem:[%s16279_s18 + $0x350] sm:$0xff]  ;;  %v4152_v11 = vld [vmem:[%s16279_s18 + $0x778] sm:$0xff] }
 0xa94   :  { %5533 = vmatpush.msra.mxu1 %v5187_v63  ;;  %5474 = vmatpush.msrb.mxu2 %v4844_v39  ;;  %v4222_v63 = vld [vmem:[%s16279_s18 + $0x9a8] sm:$0xff]  ;;  %v4355_v1 = vld [vmem:[%s16279_s18 + $0xdd0] sm:$0xff]  ;;  %v4012_v39 = vld [vmem:[%s16279_s18 + $0x318] sm:$0xff] }
 0xa95   :  { %5491 = vmatpush.msra.mxu3 %v4977_v60  ;;  %5511 = vmatpush.msrb.mxu0 %v5089_v49  ;;  %v12493_v60 = vmul.f32 %v3899_v10, %v11770_v36  ;;  %v4124_v49 = vld [vmem:[%s16279_s18 + $0x698] sm:$0xff]  ;;  %v4005_v36 = vld [vmem:[%s16279_s18 + $0x2e0] sm:$0xff]  ;;  %v4047_v10 = vld [vmem:[%s16279_s18 + $0x430] sm:$0xff] }
 0xa96   :  { %5534 = vmatpush.msra.mxu1 %v5180_v53  ;;  %5475 = vmatpush.msrb.mxu2 %v4837_v6  ;;  %v4215_v53 = vld [vmem:[%s16279_s18 + $0x970] sm:$0xff]  ;;  %v4348_v6 = vld [vmem:[%s16279_s18 + $0xd98] sm:$0xff]  ;;  %v4285_v9 = vld [vmem:[%s16279_s18 + $0xba0] sm:$0xff] }
 0xa97   :  { %5492 = vmatpush.msra.mxu3 %v4970_v58  ;;  %5512 = vmatpush.msrb.mxu0 %v5082_v31  ;;  %v4117_v58 = vld [vmem:[%s16279_s18 + $0x660] sm:$0xff]  ;;  %v4208_v31 = vld [vmem:[%s16279_s18 + $0x938] sm:$0xff] }
 0xa98   :  { %5535 = vmatpush.msra.mxu1 %v5173_v62  ;;  %5476 = vmatpush.msrb.mxu2 %v4830_v17  ;;  %v4341_v62 = vld [vmem:[%s16279_s18 + $0xd60] sm:$0xff]  ;;  %v3998_v17 = vld [vmem:[%s16279_s18 + $0x2a8] sm:$0xff] }
 0xa99   :  { %5493 = vmatpush.msra.mxu3 %v4963_v57  ;;  %5513 = vmatpush.msrb.mxu0 %v5075_v23  ;;  %v4110_v57 = vld [vmem:[%s16279_s18 + $0x628] sm:$0xff]  ;;  %v4201_v23 = vld [vmem:[%s16279_s18 + $0x900] sm:$0xff] }
 0xa9a   :  { %5536 = vmatpush.msra.mxu1 %v5166_v13  ;;  %5477 = vmatpush.msrb.mxu2 %v4823_v2  ;;  %v3991_v13 = vld [vmem:[%s16279_s18 + $0x270] sm:$0xff] }
 0xa9b   :  { %5494 = vmatpush.msra.mxu3 %v4956_v42  ;;  %5514 = vmatpush.msrb.mxu0 %v5068_v15  ;;  %v4103_v2 = vld [vmem:[%s16279_s18 + $0x5f0] sm:$0xff]  ;;  %v3984_v15 = vld [vmem:[%s16279_s18 + $0x238] sm:$0xff] }
 0xa9c   :  { %5537 = vmatpush.msra.mxu1 %v5159_v24  ;;  %5478 = vmatpush.msrb.mxu2 %v4816_v28  ;;  %v4327_v42 = vld [vmem:[%s16279_s18 + $0xcf0] sm:$0xff]  ;;  %v4096_v24 = vld [vmem:[%s16279_s18 + $0x5b8] sm:$0xff] }
 0xa9d   :  { %5495 = vmatpush.msra.mxu3 %v4949_v61  ;;  %5515 = vmatpush.msrb.mxu0 %v5061_v29  ;;  %v4187_v28 = vld [vmem:[%s16279_s18 + $0x890] sm:$0xff]  ;;  %v3977_v61 = vld [vmem:[%s16279_s18 + $0x200] sm:$0xff] }
 0xa9e   :  { %5538 = vmatpush.msra.mxu1 %v5152_v48  ;;  %5479 = vmatpush.msrb.mxu2 %v4809_v52  ;;  %v4089_v29 = vld [vmem:[%s16279_s18 + $0x580] sm:$0xff]  ;;  %v3970_v52 = vld [vmem:[%s16279_s18 + $0x1c8] sm:$0xff] }
 0xa9f   :  { %5496 = vmatpush.msra.mxu3 %v4942_v56  ;;  %5516 = vmatpush.msrb.mxu0 %v5054_v44  ;;  %v4313_v48 = vld [vmem:[%s16279_s18 + $0xc80] sm:$0xff]  ;;  %v4082_v56 = vld [vmem:[%s16279_s18 + $0x548] sm:$0xff] }
 0xaa0   :  { %5539 = vmatpush.msra.mxu1 %v5145_v40  ;;  %5480 = vmatmul.f32.vlgmr.msrb.gmra.mxu2 %v12423_v18  ;;  %v4173_v44 = vld [vmem:[%s16279_s18 + $0x820] sm:$0xff]  ;;  %v4306_v40 = vld [vmem:[%s16279_s18 + $0xc48] sm:$0xff] }
 0xaa1   :  { %5540 = vmatmul.f32.vlgmr.msra.gmra.mxu1 %v12429_v46  ;;  %5556 = vmatpush.msra.mxu2 %v5278_v41  ;;  %v4075_v41 = vld [vmem:[%s16279_s18 + $0x510] sm:$0xff] }
 0xaa2   :  { %5604 = vmatpush.msrb.mxu1 %v4243_v0  ;;  %5497 = vmatpush.msra.mxu3 %v4935_v32  ;;  %v4299_v0 = vld [vmem:[%s16279_s18 + $0xc10] sm:$0xff]  ;;  %v3956_v32 = vld [vmem:[%s16279_s18 + $0x158] sm:$0xff] }
 0xaa3   :  { %5517 = vmatpush.msrb.mxu0 %v5047_v43  ;;  %5557 = vmatpush.msra.mxu2 %v5271_v38  ;;  %v4068_v43 = vld [vmem:[%s16279_s18 + $0x4d8] sm:$0xff]  ;;  %v4159_v38 = vld [vmem:[%s16279_s18 + $0x7b0] sm:$0xff] }
 0xaa4   :  { %5605 = vmatpush.msrb.mxu1 %v4236_v59  ;;  %5498 = vmatpush.msra.mxu3 %v4928_v25  ;;  %v3949_v59 = vld [vmem:[%s16279_s18 + $0x120] sm:$0xff] }
 0xaa5   :  { %5518 = vmatpush.msrb.mxu0 %v5040_v55  ;;  %5558 = vmatpush.msra.mxu2 %v5264_v21  ;;  %v4061_v25 = vld [vmem:[%s16279_s18 + $0x4a0] sm:$0xff]  ;;  %v3942_v55 = vld [vmem:[%s16279_s18 + $0xe8] sm:$0xff] }
 0xaa6   :  { %5606 = vmatpush.msrb.mxu1 %v4229_v4  ;;  %5499 = vmatpush.msra.mxu3 %v4921_v12  ;;  %v4054_v21 = vld [vmem:[%s16279_s18 + $0x468] sm:$0xff]  ;;  %v4145_v4 = vld [vmem:[%s16279_s18 + $0x740] sm:$0xff] }
 0xaa7   :  { %5519 = vmatpush.msrb.mxu0 %v5033_v3  ;;  %5500 = vmatmul.f32.vlgmr.msra.gmra.mxu3 %v12467_v16  ;;  %v4278_v12 = vld [vmem:[%s16279_s18 + $0xb68] sm:$0xff]  ;;  %v3935_v3 = vld [vmem:[%s16279_s18 + $0xb0] sm:$0xff] }
 0xaa8   :  { %5520 = vmatmul.f32.vlgmr.msrb.gmra.mxu0 %v12473_v51  ;;  %5559 = vmatpush.msra.mxu2 %v5257_v19  ;;  %v4138_v19 = vld [vmem:[%s16279_s18 + $0x708] sm:$0xff] }
 0xaa9   :  { %5564 = vmatpush.msrb.mxu3 %v4019_v5  ;;  %5584 = vmatpush.msra.mxu0 %v4131_v14  ;;  %v4271_v5 = vld [vmem:[%s16279_s18 + $0xb30] sm:$0xff] }
 0xaaa   :  { %5607 = vmatpush.msrb.mxu1 %v4222_v63  ;;  %5624 = vmatpush.msrb.mxu2 %v4355_v1  ;;  %v4691_v14 = vld [vmem:[%s16279_s18 + $0x1850] sm:$0xff]  ;;  %v3928_v63 = vld [vmem:[%s16279_s18 + $0x78] sm:$0xff] }
 0xaab   :  { %7362 = vmatmul.msk.f32.vlgmr.msra.gmra.mxu2 %vm105_vm1, %v12493_v60  ;;  %5565 = vmatpush.msrb.mxu3 %v4012_v39  ;;  %v4040_v1 = vld [vmem:[%s16279_s18 + $0x3f8] sm:$0xff] }
 0xaac   :  { %5585 = vmatpush.msra.mxu0 %v4124_v49  ;;  %5608 = vmatpush.msrb.mxu1 %v4215_v53  ;;  %v4264_v39 = vld [vmem:[%s16279_s18 + $0xaf8] sm:$0xff]  ;;  %v3921_v53 = vld [vmem:[%s16279_s18 + $0x40] sm:$0xff] }
 0xaad   :  { %5625 = vmatpush.msrb.mxu2 %v4348_v6  ;;  %5566 = vmatpush.msrb.mxu3 %v4005_v36  ;;  %v4684_v49 = vld [vmem:[%s16279_s18 + $0x1818] sm:$0xff]  ;;  %v4033_v6 = vld [vmem:[%s16279_s18 + $0x3c0] sm:$0xff] }
 0xaae   :  { %5586 = vmatpush.msra.mxu0 %v4117_v58  ;;  %5609 = vmatpush.msrb.mxu1 %v4208_v31  ;;  %v4257_v36 = vld [vmem:[%s16279_s18 + $0xac0] sm:$0xff]  ;;  %v3914_v31 = vld [vmem:[%s16279_s18 + $0x8] sm:$0xff] }
 0xaaf   :  { %5626 = vmatpush.msrb.mxu2 %v4341_v62  ;;  %5567 = vmatpush.msrb.mxu3 %v3998_v17  ;;  %v4677_v58 = vld [vmem:[%s16279_s18 + $0x17e0] sm:$0xff]  ;;  %v4026_v62 = vld [vmem:[%s16279_s18 + $0x388] sm:$0xff] }
 0xab0   :  { %5587 = vmatpush.msra.mxu0 %v4110_v57  ;;  %5610 = vmatpush.msrb.mxu1 %v4201_v23  ;;  %v4250_v17 = vld [vmem:[%s16279_s18 + $0xa88] sm:$0xff]  ;;  %v4467_v57 = vld [vmem:[%s16279_s18 + $0x1150] sm:$0xff] }
 0xab1   :  { %5627 = vmatpush.msrb.mxu2 %v4334_v22  ;;  %5568 = vmatpush.msrb.mxu3 %v3991_v13  ;;  %v4579_v23 = vld [vmem:[%s16279_s18 + $0x14d0] sm:$0xff]  ;;  %v4670_v22 = vld [vmem:[%s16279_s18 + $0x17a8] sm:$0xff] }
 0xab2   :  { %5588 = vmatpush.msra.mxu0 %v4103_v2  ;;  %5611 = vmatpush.msrb.mxu1 %v4194_v37  ;;  %v4803_v13 = vld [vmem:[%s16279_s18 + $0x1bd0] sm:$0xff]  ;;  %v4460_v2 = vld [vmem:[%s16279_s18 + $0x1118] sm:$0xff] }
 0xab3   :  { %5628 = vmatpush.msrb.mxu2 %v4327_v42  ;;  %5569 = vmatpush.msrb.mxu3 %v3984_v15  ;;  %v4572_v37 = vld [vmem:[%s16279_s18 + $0x1498] sm:$0xff]  ;;  %v4663_v42 = vld [vmem:[%s16279_s18 + $0x1770] sm:$0xff] }
 0xab4   :  { %5589 = vmatpush.msra.mxu0 %v4096_v24  ;;  %5612 = vmatpush.msrb.mxu1 %v4187_v28  ;;  %v4796_v15 = vld [vmem:[%s16279_s18 + $0x1b98] sm:$0xff]  ;;  %v4453_v24 = vld [vmem:[%s16279_s18 + $0x10e0] sm:$0xff] }
 0xab5   :  { %5629 = vmatpush.msrb.mxu2 %v4320_v33  ;;  %5570 = vmatpush.msrb.mxu3 %v3977_v61  ;;  %v4565_v28 = vld [vmem:[%s16279_s18 + $0x1460] sm:$0xff]  ;;  %v4656_v33 = vld [vmem:[%s16279_s18 + $0x1738] sm:$0xff] }
 0xab6   :  { %5590 = vmatpush.msra.mxu0 %v4089_v29  ;;  %5613 = vmatpush.msrb.mxu1 %v4180_v34  ;;  %v4789_v61 = vld [vmem:[%s16279_s18 + $0x1b60] sm:$0xff]  ;;  %v4446_v29 = vld [vmem:[%s16279_s18 + $0x10a8] sm:$0xff] }
 0xab7   :  { %5630 = vmatpush.msrb.mxu2 %v4313_v48  ;;  %5571 = vmatpush.msrb.mxu3 %v3970_v52  ;;  %v4558_v34 = vld [vmem:[%s16279_s18 + $0x1428] sm:$0xff]  ;;  %v4649_v48 = vld [vmem:[%s16279_s18 + $0x1700] sm:$0xff] }
 0xab8   :  { %5591 = vmatpush.msra.mxu0 %v4082_v56  ;;  %5614 = vmatpush.msrb.mxu1 %v4173_v44  ;;  %v4782_v52 = vld [vmem:[%s16279_s18 + $0x1b28] sm:$0xff]  ;;  %v4439_v56 = vld [vmem:[%s16279_s18 + $0x1070] sm:$0xff] }
 0xab9   :  { %5631 = vmatpush.msrb.mxu2 %v4306_v40  ;;  %5572 = vmatpush.msrb.mxu3 %v3963_v30  ;;  %v4551_v44 = vld [vmem:[%s16279_s18 + $0x13f0] sm:$0xff]  ;;  %v4642_v40 = vld [vmem:[%s16279_s18 + $0x16c8] sm:$0xff] }
 0xaba   :  { %5592 = vmatpush.msra.mxu0 %v4075_v41  ;;  %5615 = vmatpush.msrb.mxu1 %v4166_v27  ;;  %v4775_v30 = vld [vmem:[%s16279_s18 + $0x1af0] sm:$0xff]  ;;  %v4432_v41 = vld [vmem:[%s16279_s18 + $0x1038] sm:$0xff] }
 0xabb   :  { %5632 = vmatpush.msrb.mxu2 %v4299_v0  ;;  %5573 = vmatpush.msrb.mxu3 %v3956_v32  ;;  %v4544_v27 = vld [vmem:[%s16279_s18 + $0x13b8] sm:$0xff]  ;;  %v4635_v0 = vld [vmem:[%s16279_s18 + $0x1690] sm:$0xff] }
 0xabc   :  { %5593 = vmatpush.msra.mxu0 %v4068_v43  ;;  %5616 = vmatpush.msrb.mxu1 %v4159_v38  ;;  %v4768_v32 = vld [vmem:[%s16279_s18 + $0x1ab8] sm:$0xff]  ;;  %v4425_v43 = vld [vmem:[%s16279_s18 + $0x1000] sm:$0xff] }
 0xabd   :  { %5633 = vmatpush.msrb.mxu2 %v4292_v8  ;;  %5574 = vmatpush.msrb.mxu3 %v3949_v59  ;;  %v4537_v38 = vld [vmem:[%s16279_s18 + $0x1380] sm:$0xff]  ;;  %v4628_v8 = vld [vmem:[%s16279_s18 + $0x1658] sm:$0xff] }
 0xabe   :  { %5594 = vmatpush.msra.mxu0 %v4061_v25  ;;  %5617 = vmatpush.msrb.mxu1 %v4152_v11  ;;  %v4761_v59 = vld [vmem:[%s16279_s18 + $0x1a80] sm:$0xff]  ;;  %v4418_v25 = vld [vmem:[%s16279_s18 + $0xfc8] sm:$0xff] }
 0xabf   :  { %5634 = vmatpush.msrb.mxu2 %v4285_v9  ;;  %5575 = vmatpush.msrb.mxu3 %v3942_v55  ;;  %v4530_v11 = vld [vmem:[%s16279_s18 + $0x1348] sm:$0xff]  ;;  %v4621_v9 = vld [vmem:[%s16279_s18 + $0x1620] sm:$0xff] }
 0xac0   :  { %5595 = vmatpush.msra.mxu0 %v4054_v21  ;;  %5618 = vmatpush.msrb.mxu1 %v4145_v4  ;;  %v4754_v55 = vld [vmem:[%s16279_s18 + $0x1a48] sm:$0xff]  ;;  %v4411_v21 = vld [vmem:[%s16279_s18 + $0xf90] sm:$0xff] }
 0xac1   :  { %5635 = vmatpush.msrb.mxu2 %v4278_v12  ;;  %5576 = vmatpush.msrb.mxu3 %v3935_v3  ;;  %v4523_v4 = vld [vmem:[%s16279_s18 + $0x1310] sm:$0xff]  ;;  %v4614_v12 = vld [vmem:[%s16279_s18 + $0x15e8] sm:$0xff] }
 0xac2   :  { %5596 = vmatpush.msra.mxu0 %v4047_v10  ;;  %5619 = vmatpush.msrb.mxu1 %v4138_v19  ;;  %v4747_v3 = vld [vmem:[%s16279_s18 + $0x1a10] sm:$0xff]  ;;  %v4404_v10 = vld [vmem:[%s16279_s18 + $0xf58] sm:$0xff] }
 0xac3   :  { %5620 = vmatmul.f32.vlgmr.msrb.gmra.mxu1 %v12249_v7  ;;  %5636 = vmatpush.msrb.mxu2 %v4271_v5  ;;  %v4516_v19 = vld [vmem:[%s16279_s18 + $0x12d8] sm:$0xff]  ;;  %v4607_v5 = vld [vmem:[%s16279_s18 + $0x15b0] sm:$0xff] }
 0xac4   :  { %5684 = vmatpush.msra.mxu1 %v4691_v14  ;;  %5577 = vmatpush.msrb.mxu3 %v3928_v63  ;;  %v4740_v14 = vld [vmem:[%s16279_s18 + $0x19d8] sm:$0xff]  ;;  %v4397_v63 = vld [vmem:[%s16279_s18 + $0xf20] sm:$0xff] }
 0xac5   :  { %5597 = vmatpush.msra.mxu0 %v4040_v1  ;;  %5637 = vmatpush.msrb.mxu2 %v4264_v39  ;;  %v4509_v1 = vld [vmem:[%s16279_s18 + $0x12a0] sm:$0xff]  ;;  %v4600_v39 = vld [vmem:[%s16279_s18 + $0x1578] sm:$0xff] }
 0xac6   :  { %5685 = vmatpush.msra.mxu1 %v4684_v49  ;;  %5578 = vmatpush.msrb.mxu3 %v3921_v53  ;;  %v4733_v49 = vld [vmem:[%s16279_s18 + $0x19a0] sm:$0xff]  ;;  %v4390_v53 = vld [vmem:[%s16279_s18 + $0xee8] sm:$0xff] }
 0xac7   :  { %5598 = vmatpush.msra.mxu0 %v4033_v6  ;;  %5638 = vmatpush.msrb.mxu2 %v4257_v36  ;;  %v4502_v6 = vld [vmem:[%s16279_s18 + $0x1268] sm:$0xff]  ;;  %v4593_v36 = vld [vmem:[%s16279_s18 + $0x1540] sm:$0xff] }
 0xac8   :  { %5686 = vmatpush.msra.mxu1 %v4677_v58  ;;  %5579 = vmatpush.msrb.mxu3 %v3914_v31  ;;  %v4726_v58 = vld [vmem:[%s16279_s18 + $0x1968] sm:$0xff]  ;;  %v4383_v31 = vld [vmem:[%s16279_s18 + $0xeb0] sm:$0xff] }
 0xac9   :  { %5599 = vmatpush.msra.mxu0 %v4026_v62  ;;  %5580 = vmatmul.f32.vlgmr.msrb.gmra.mxu3 %v12217_v35  ;;  %v4495_v62 = vld [vmem:[%s16279_s18 + $0x1230] sm:$0xff] }
 0xaca   :  { %5600 = vmatmul.f32.vlgmr.msra.gmra.mxu0 %v12243_v26  ;;  %5639 = vmatpush.msrb.mxu2 %v4250_v17  ;;  %v4586_v17 = vld [vmem:[%s16279_s18 + $0x1508] sm:$0xff] }
 0xacb   :  { %5644 = vmatpush.msra.mxu3 %v4467_v57  ;;  %5664 = vmatpush.msrb.mxu0 %v4579_v23  ;;  %v4719_v57 = vld [vmem:[%s16279_s18 + $0x1930] sm:$0xff] }
 0xacc   :  { %5687 = vmatpush.msra.mxu1 %v4670_v22  ;;  %5640 = vmatmul.f32.vlgmr.msrb.gmra.mxu2 %v12223_v20  ;;  %v5139_v23 = vld [vmem:[%s16279_s18 + $0x2650] sm:$0xff]  ;;  %v4376_v22 = vld [vmem:[%s16279_s18 + $0xe78] sm:$0xff] }
 0xacd   :  { %5704 = vmatpush.msra.mxu2 %v4803_v13  ;;  %5645 = vmatpush.msra.mxu3 %v4460_v2  ;;  %v4488_v13 = vld [vmem:[%s16279_s18 + $0x11f8] sm:$0xff] }
 0xace   :  { %5665 = vmatpush.msrb.mxu0 %v4572_v37  ;;  %5688 = vmatpush.msra.mxu1 %v4663_v42  ;;  %v4712_v2 = vld [vmem:[%s16279_s18 + $0x18f8] sm:$0xff]  ;;  %v4369_v42 = vld [vmem:[%s16279_s18 + $0xe40] sm:$0xff] }
 0xacf   :  { %5705 = vmatpush.msra.mxu2 %v4796_v15  ;;  %5646 = vmatpush.msra.mxu3 %v4453_v24  ;;  %v5132_v37 = vld [vmem:[%s16279_s18 + $0x2618] sm:$0xff]  ;;  %v4481_v15 = vld [vmem:[%s16279_s18 + $0x11c0] sm:$0xff] }
 0xad0   :  { %5666 = vmatpush.msrb.mxu0 %v4565_v28  ;;  %5689 = vmatpush.msra.mxu1 %v4656_v33  ;;  %v4705_v24 = vld [vmem:[%s16279_s18 + $0x18c0] sm:$0xff]  ;;  %v4362_v33 = vld [vmem:[%s16279_s18 + $0xe08] sm:$0xff] }
 0xad1   :  { %5706 = vmatpush.msra.mxu2 %v4789_v61  ;;  %5647 = vmatpush.msra.mxu3 %v4446_v29  ;;  %v5125_v28 = vld [vmem:[%s16279_s18 + $0x25e0] sm:$0xff]  ;;  %v4474_v61 = vld [vmem:[%s16279_s18 + $0x1188] sm:$0xff] }
 0xad2   :  { %5667 = vmatpush.msrb.mxu0 %v4558_v34  ;;  %5690 = vmatpush.msra.mxu1 %v4649_v48  ;;  %v4698_v29 = vld [vmem:[%s16279_s18 + $0x1888] sm:$0xff]  ;;  %v4915_v34 = vld [vmem:[%s16279_s18 + $0x1f50] sm:$0xff] }
 0xad3   :  { %5707 = vmatpush.msra.mxu2 %v4782_v52  ;;  %5648 = vmatpush.msra.mxu3 %v4439_v56  ;;  %v5027_v48 = vld [vmem:[%s16279_s18 + $0x22d0] sm:$0xff]  ;;  %v5118_v52 = vld [vmem:[%s16279_s18 + $0x25a8] sm:$0xff] }
 0xad4   :  { %5668 = vmatpush.msrb.mxu0 %v4551_v44  ;;  %5691 = vmatpush.msra.mxu1 %v4642_v40  ;;  %v5251_v56 = vld [vmem:[%s16279_s18 + $0x29d0] sm:$0xff]  ;;  %v4908_v44 = vld [vmem:[%s16279_s18 + $0x1f18] sm:$0xff] }
 0xad5   :  { %5708 = vmatpush.msra.mxu2 %v4775_v30  ;;  %5649 = vmatpush.msra.mxu3 %v4432_v41  ;;  %v5020_v40 = vld [vmem:[%s16279_s18 + $0x2298] sm:$0xff]  ;;  %v5111_v30 = vld [vmem:[%s16279_s18 + $0x2570] sm:$0xff] }
 0xad6   :  { %5669 = vmatpush.msrb.mxu0 %v4544_v27  ;;  %5692 = vmatpush.msra.mxu1 %v4635_v0  ;;  %v5244_v41 = vld [vmem:[%s16279_s18 + $0x2998] sm:$0xff]  ;;  %v4901_v27 = vld [vmem:[%s16279_s18 + $0x1ee0] sm:$0xff] }
 0xad7   :  { %5709 = vmatpush.msra.mxu2 %v4768_v32  ;;  %5650 = vmatpush.msra.mxu3 %v4425_v43  ;;  %v5013_v0 = vld [vmem:[%s16279_s18 + $0x2260] sm:$0xff]  ;;  %v5104_v32 = vld [vmem:[%s16279_s18 + $0x2538] sm:$0xff] }
 0xad8   :  { %5670 = vmatpush.msrb.mxu0 %v4537_v38  ;;  %5693 = vmatpush.msra.mxu1 %v4628_v8  ;;  %v5237_v43 = vld [vmem:[%s16279_s18 + $0x2960] sm:$0xff]  ;;  %v4894_v38 = vld [vmem:[%s16279_s18 + $0x1ea8] sm:$0xff] }
 0xad9   :  { %5710 = vmatpush.msra.mxu2 %v4761_v59  ;;  %5651 = vmatpush.msra.mxu3 %v4418_v25  ;;  %v5006_v8 = vld [vmem:[%s16279_s18 + $0x2228] sm:$0xff]  ;;  %v5097_v59 = vld [vmem:[%s16279_s18 + $0x2500] sm:$0xff] }
 0xada   :  { %5671 = vmatpush.msrb.mxu0 %v4530_v11  ;;  %5694 = vmatpush.msra.mxu1 %v4621_v9  ;;  %v5230_v25 = vld [vmem:[%s16279_s18 + $0x2928] sm:$0xff]  ;;  %v4887_v11 = vld [vmem:[%s16279_s18 + $0x1e70] sm:$0xff] }
 0xadb   :  { %5711 = vmatpush.msra.mxu2 %v4754_v55  ;;  %5652 = vmatpush.msra.mxu3 %v4411_v21  ;;  %v4999_v9 = vld [vmem:[%s16279_s18 + $0x21f0] sm:$0xff]  ;;  %v5090_v55 = vld [vmem:[%s16279_s18 + $0x24c8] sm:$0xff] }
 0xadc   :  { %5672 = vmatpush.msrb.mxu0 %v4523_v4  ;;  %5695 = vmatpush.msra.mxu1 %v4614_v12  ;;  %v5223_v21 = vld [vmem:[%s16279_s18 + $0x28f0] sm:$0xff]  ;;  %v4880_v4 = vld [vmem:[%s16279_s18 + $0x1e38] sm:$0xff] }
 0xadd   :  { %5712 = vmatpush.msra.mxu2 %v4747_v3  ;;  %5653 = vmatpush.msra.mxu3 %v4404_v10  ;;  %v4992_v12 = vld [vmem:[%s16279_s18 + $0x21b8] sm:$0xff]  ;;  %v5083_v3 = vld [vmem:[%s16279_s18 + $0x2490] sm:$0xff] }
 0xade   :  { %5673 = vmatpush.msrb.mxu0 %v4516_v19  ;;  %5696 = vmatpush.msra.mxu1 %v4607_v5  ;;  %v5216_v10 = vld [vmem:[%s16279_s18 + $0x28b8] sm:$0xff]  ;;  %v4873_v19 = vld [vmem:[%s16279_s18 + $0x1e00] sm:$0xff] }
 0xadf   :  { %5713 = vmatpush.msra.mxu2 %v4740_v14  ;;  %5654 = vmatpush.msra.mxu3 %v4397_v63  ;;  %v4985_v5 = vld [vmem:[%s16279_s18 + $0x2180] sm:$0xff]  ;;  %v5076_v14 = vld [vmem:[%s16279_s18 + $0x2458] sm:$0xff] }
 0xae0   :  { %5674 = vmatpush.msrb.mxu0 %v4509_v1  ;;  %5697 = vmatpush.msra.mxu1 %v4600_v39  ;;  %v5209_v63 = vld [vmem:[%s16279_s18 + $0x2880] sm:$0xff]  ;;  %v4866_v1 = vld [vmem:[%s16279_s18 + $0x1dc8] sm:$0xff] }
 0xae1   :  { %5714 = vmatpush.msra.mxu2 %v4733_v49  ;;  %5655 = vmatpush.msra.mxu3 %v4390_v53  ;;  %v4978_v39 = vld [vmem:[%s16279_s18 + $0x2148] sm:$0xff]  ;;  %v5069_v49 = vld [vmem:[%s16279_s18 + $0x2420] sm:$0xff] }
 0xae2   :  { %5675 = vmatpush.msrb.mxu0 %v4502_v6  ;;  %5698 = vmatpush.msra.mxu1 %v4593_v36  ;;  %v5202_v53 = vld [vmem:[%s16279_s18 + $0x2848] sm:$0xff]  ;;  %v4859_v6 = vld [vmem:[%s16279_s18 + $0x1d90] sm:$0xff] }
 0xae3   :  { %5715 = vmatpush.msra.mxu2 %v4726_v58  ;;  %5656 = vmatpush.msra.mxu3 %v4383_v31  ;;  %v4971_v36 = vld [vmem:[%s16279_s18 + $0x2110] sm:$0xff]  ;;  %v5062_v58 = vld [vmem:[%s16279_s18 + $0x23e8] sm:$0xff] }
 0xae4   :  { %5676 = vmatpush.msrb.mxu0 %v4495_v62  ;;  %5699 = vmatpush.msra.mxu1 %v4586_v17  ;;  %v5195_v31 = vld [vmem:[%s16279_s18 + $0x2810] sm:$0xff]  ;;  %v4852_v62 = vld [vmem:[%s16279_s18 + $0x1d58] sm:$0xff] }
 0xae5   :  { %5700 = vmatmul.f32.vlgmr.msra.gmra.mxu1 %v12307_v50  ;;  %5716 = vmatpush.msra.mxu2 %v4719_v57  ;;  %v4964_v17 = vld [vmem:[%s16279_s18 + $0x20d8] sm:$0xff]  ;;  %v5055_v57 = vld [vmem:[%s16279_s18 + $0x23b0] sm:$0xff] }
 0xae6   :  { %5764 = vmatpush.msrb.mxu1 %v5139_v23  ;;  %5657 = vmatpush.msra.mxu3 %v4376_v22  ;;  %v5188_v23 = vld [vmem:[%s16279_s18 + $0x27d8] sm:$0xff]  ;;  %v4845_v22 = vld [vmem:[%s16279_s18 + $0x1d20] sm:$0xff] }
 0xae7   :  { %5677 = vmatpush.msrb.mxu0 %v4488_v13  ;;  %5717 = vmatpush.msra.mxu2 %v4712_v2  ;;  %v5285_v13 = vld [vmem:[%s16280_s19] sm:$0x7f] }
 0xae8   :  { %5765 = vmatpush.msrb.mxu1 %v5132_v37  ;;  %5658 = vmatpush.msra.mxu3 %v4369_v42  ;;  %v4957_v2 = vld [vmem:[%s16279_s18 + $0x20a0] sm:$0xff]  ;;  %v5048_v37 = vld [vmem:[%s16279_s18 + $0x2378] sm:$0xff] }
 0xae9   :  { %5678 = vmatpush.msrb.mxu0 %v4481_v15  ;;  %5718 = vmatpush.msra.mxu2 %v4705_v24  ;;  %v5181_v42 = vld [vmem:[%s16279_s18 + $0x27a0] sm:$0xff]  ;;  %v4838_v15 = vld [vmem:[%s16279_s18 + $0x1ce8] sm:$0xff] }
 0xaea   :  { %5766 = vmatpush.msrb.mxu1 %v5125_v28  ;;  %5659 = vmatpush.msra.mxu3 %v4362_v33  ;;  %v4950_v24 = vld [vmem:[%s16279_s18 + $0x2068] sm:$0xff]  ;;  %v5041_v28 = vld [vmem:[%s16279_s18 + $0x2340] sm:$0xff]  ;;  %v5287_v33 = vperm.slane %v5285_v13, 0  ;;  %v3999_v13 = vld [vmem:[%s16279_s18 + $0x2b0] sm:$0xff] }
 0xaeb   :  { %5679 = vmatpush.msrb.mxu0 %v4474_v61  ;;  %5660 = vmatmul.f32.vlgmr.msra.gmra.mxu3 %v12258_v47  ;;  %v5174_v61 = vld [vmem:[%s16279_s18 + $0x2768] sm:$0xff] }
 0xaec   :  { %5680 = vmatmul.f32.vlgmr.msrb.gmra.mxu0 %v12298_v54  ;;  %5719 = vmatpush.msra.mxu2 %v4698_v29  ;;  %v4831_v29 = vld [vmem:[%s16279_s18 + $0x1cb0] sm:$0xff] }
 0xaed   :  { %5724 = vmatpush.msrb.mxu3 %v4915_v34  ;;  %5744 = vmatpush.msra.mxu0 %v5027_v48  ;;  %v4943_v48 = vld [vmem:[%s16279_s18 + $0x2030] sm:$0xff] }
 0xaee   :  { %5767 = vmatpush.msrb.mxu1 %v5118_v52  ;;  %5720 = vmatmul.f32.vlgmr.msra.gmra.mxu2 %v12265_v45  ;;  %v5034_v52 = vld [vmem:[%s16279_s18 + $0x2308] sm:$0xff] }
 0xaef   :  { %5784 = vmatpush.msrb.mxu2 %v5251_v56  ;;  %5725 = vmatpush.msrb.mxu3 %v4908_v44  ;;  %v5167_v56 = vld [vmem:[%s16279_s18 + $0x2730] sm:$0xff]  ;;  %v4132_v44 = vld [vmem:[%s16279_s18 + $0x6d8] sm:$0xff] }
 0xaf0   :  { %5745 = vmatpush.msra.mxu0 %v5020_v40  ;;  %5768 = vmatpush.msrb.mxu1 %v5111_v30  ;;  %v4824_v40 = vld [vmem:[%s16279_s18 + $0x1c78] sm:$0xff] }
 0xaf1   :  { %5785 = vmatpush.msrb.mxu2 %v5244_v41  ;;  %5726 = vmatpush.msrb.mxu3 %v4901_v27  ;;  %v4936_v41 = vld [vmem:[%s16279_s18 + $0x1ff8] sm:$0xff] }
 0xaf2   :  { %5746 = vmatpush.msra.mxu0 %v5013_v0  ;;  %5769 = vmatpush.msrb.mxu1 %v5104_v32  ;;  %v5160_v27 = vld [vmem:[%s16279_s18 + $0x26f8] sm:$0xff]  ;;  %v4125_v32 = vld [vmem:[%s16279_s18 + $0x6a0] sm:$0xff] }
 0xaf3   :  { %5786 = vmatpush.msrb.mxu2 %v5237_v43  ;;  %5727 = vmatpush.msrb.mxu3 %v4894_v38  ;;  %v4817_v43 = vld [vmem:[%s16279_s18 + $0x1c40] sm:$0xff] }
 0xaf4   :  { %5747 = vmatpush.msra.mxu0 %v5006_v8  ;;  %5770 = vmatpush.msrb.mxu1 %v5097_v59  ;;  %v4929_v8 = vld [vmem:[%s16279_s18 + $0x1fc0] sm:$0xff] }
 0xaf5   :  { %5787 = vmatpush.msrb.mxu2 %v5230_v25  ;;  %5728 = vmatpush.msrb.mxu3 %v4887_v11  ;;  %v5153_v59 = vld [vmem:[%s16279_s18 + $0x26c0] sm:$0xff]  ;;  %v4118_v11 = vld [vmem:[%s16279_s18 + $0x668] sm:$0xff] }
 0xaf6   :  { %5748 = vmatpush.msra.mxu0 %v4999_v9  ;;  %5771 = vmatpush.msrb.mxu1 %v5090_v55  ;;  %v4810_v9 = vld [vmem:[%s16279_s18 + $0x1c08] sm:$0xff] }
 0xaf7   :  { %5788 = vmatpush.msrb.mxu2 %v5223_v21  ;;  %5729 = vmatpush.msrb.mxu3 %v4880_v4  ;;  %v4922_v4 = vld [vmem:[%s16279_s18 + $0x1f88] sm:$0xff] }
 0xaf8   :  { %5749 = vmatpush.msra.mxu0 %v4992_v12  ;;  %5772 = vmatpush.msrb.mxu1 %v5083_v3  ;;  %v5146_v12 = vld [vmem:[%s16279_s18 + $0x2688] sm:$0xff] }
 0xaf9   :  { %5789 = vmatpush.msrb.mxu2 %v5216_v10  ;;  %5730 = vmatpush.msrb.mxu3 %v4873_v19  ;;  %v5279_v10 = vld [vmem:[%s16279_s18 + $0x2ab0] sm:$0xff]  ;;  %v4020_v19 = vld [vmem:[%s16279_s18 + $0x358] sm:$0xff] }
 0xafa   :  { %5750 = vmatpush.msra.mxu0 %v4985_v5  ;;  %5773 = vmatpush.msrb.mxu1 %v5076_v14  ;;  %v4111_v14 = vld [vmem:[%s16279_s18 + $0x630] sm:$0xff] }
 0xafb   :  { %5790 = vmatpush.msrb.mxu2 %v5209_v63  ;;  %5731 = vmatpush.msrb.mxu3 %v4866_v1  ;;  %v5381_v21 = vpop.f32.mrf.mxu1  ;;  %v4244_v1 = vld [vmem:[%s16279_s18 + $0xa58] sm:$0xff] }
 0xafc   :  { %5751 = vmatpush.msra.mxu0 %v4978_v39  ;;  %5774 = vmatpush.msrb.mxu1 %v5069_v49  ;;  %v5272_v39 = vld [vmem:[%s16279_s18 + $0x2a78] sm:$0xff]  ;;  %v4013_v49 = vld [vmem:[%s16279_s18 + $0x320] sm:$0xff] }
 0xafd   :  { %5791 = vmatpush.msrb.mxu2 %v5202_v53  ;;  %5732 = vmatpush.msrb.mxu3 %v4859_v6  ;;  %v4104_v53 = vld [vmem:[%s16279_s18 + $0x5f8] sm:$0xff]  ;;  %v4237_v6 = vld [vmem:[%s16279_s18 + $0xa20] sm:$0xff] }
 0xafe   :  { %5752 = vmatpush.msra.mxu0 %v4971_v36  ;;  %5775 = vmatpush.msrb.mxu1 %v5062_v58  ;;  %v5265_v36 = vld [vmem:[%s16279_s18 + $0x2a40] sm:$0xff] }
 0xaff   :  { %5792 = vmatpush.msrb.mxu2 %v5195_v31  ;;  %5733 = vmatpush.msrb.mxu3 %v4852_v62  ;;  %v4006_v31 = vld [vmem:[%s16279_s18 + $0x2e8] sm:$0xff]  ;;  %v4097_v62 = vld [vmem:[%s16279_s18 + $0x5c0] sm:$0xff] }
 0xb00   :  { %5753 = vmatpush.msra.mxu0 %v4964_v17  ;;  %5776 = vmatpush.msrb.mxu1 %v5055_v57  ;;  %v5321_v34 = vpop.f32.mrf.mxu2  ;;  %v4230_v57 = vld [vmem:[%s16279_s18 + $0x9e8] sm:$0xff] }
 0xb01   :  { %5793 = vmatpush.msrb.mxu2 %v5188_v23  ;;  %5734 = vmatpush.msrb.mxu3 %v4845_v22  ;;  %v5322_v30 = vadd.f32 %v5321_v34, %v5287_v33  ;;  %v5361_v25 = vpop.f32.mrf.mxu0  ;;  %v5258_v23 = vld [vmem:[%s16279_s18 + $0x2a08] sm:$0xff]  ;;  %v4349_v34 = vld [vmem:[%s16279_s18 + $0xda0] sm:$0xff] }
 0xb02   :  { %5754 = vmatpush.msra.mxu0 %v4957_v2  ;;  %5777 = vmatpush.msrb.mxu1 %v5048_v37  ;;  %v4090_v2 = vld [vmem:[%s16279_s18 + $0x588] sm:$0xff] }
 0xb03   :  { %5794 = vmatpush.msrb.mxu2 %v5181_v42  ;;  %5735 = vmatpush.msrb.mxu3 %v4838_v15  ;;  %v4223_v15 = vld [vmem:[%s16279_s18 + $0x9b0] sm:$0xff] }
 0xb04   :  { %5755 = vmatpush.msra.mxu0 %v4950_v24  ;;  %5778 = vmatpush.msrb.mxu1 %v5041_v28  ;;  %v5461_v42 = vpop.f32.mrf.mxu1  ;;  %v4356_v24 = vld [vmem:[%s16279_s18 + $0xdd8] sm:$0xff] }
 0xb05   :  { %5795 = vmatpush.msrb.mxu2 %v5174_v61  ;;  %5736 = vmatpush.msrb.mxu3 %v4831_v29  ;;  %v3992_v28 = vld [vmem:[%s16279_s18 + $0x278] sm:$0xff]  ;;  %v4083_v61 = vld [vmem:[%s16279_s18 + $0x550] sm:$0xff] }
 0xb06   :  { %5756 = vmatpush.msra.mxu0 %v4943_v48  ;;  %5779 = vmatpush.msrb.mxu1 %v5034_v52  ;;  %v5341_v0 = vpop.f32.mrf.mxu3  ;;  %v4216_v29 = vld [vmem:[%s16279_s18 + $0x978] sm:$0xff]  ;;  %v3985_v48 = vld [vmem:[%s16279_s18 + $0x240] sm:$0xff] }
 0xb07   :  { %5780 = vmatmul.f32.vlgmr.msrb.gmra.mxu1 %v12473_v51  ;;  %5796 = vmatpush.msrb.mxu2 %v5167_v56  ;;  %v5342_v38 = vadd.f32 %v5341_v0, %v5322_v30  ;;  %v4076_v52 = vld [vmem:[%s16279_s18 + $0x518] sm:$0xff]  ;;  %v4209_v56 = vld [vmem:[%s16279_s18 + $0x940] sm:$0xff]  ;;  %v3971_v0 = vld [vmem:[%s16279_s18 + $0x1d0] sm:$0xff] }
 0xb08   :  { %5844 = vmatpush.msra.mxu1 %v4132_v44  ;;  %5737 = vmatpush.msrb.mxu3 %v4824_v40  ;;  %v4342_v44 = vld [vmem:[%s16279_s18 + $0xd68] sm:$0xff]  ;;  %v4069_v30 = vld [vmem:[%s16279_s18 + $0x4e0] sm:$0xff] }
 0xb09   :  { %5757 = vmatpush.msra.mxu0 %v4936_v41  ;;  %5797 = vmatpush.msrb.mxu2 %v5160_v27  ;;  %v5362_v55 = vadd.f32 %v5361_v25, %v5342_v38  ;;  %v5401_v5 = vpop.f32.mrf.mxu2  ;;  %v3978_v40 = vld [vmem:[%s16279_s18 + $0x208] sm:$0xff]  ;;  %v4335_v27 = vld [vmem:[%s16279_s18 + $0xd30] sm:$0xff]  ;;  %v4328_v38 = vld [vmem:[%s16279_s18 + $0xcf8] sm:$0xff] }
 0xb0a   :  { %5845 = vmatpush.msra.mxu1 %v4125_v32  ;;  %5738 = vmatpush.msrb.mxu3 %v4817_v43  ;;  %v4202_v41 = vld [vmem:[%s16279_s18 + $0x908] sm:$0xff]  ;;  %v4195_v43 = vld [vmem:[%s16279_s18 + $0x8d0] sm:$0xff]  ;;  %v4188_v25 = vld [vmem:[%s16279_s18 + $0x898] sm:$0xff] }
 0xb0b   :  { %5758 = vmatpush.msra.mxu0 %v4929_v8  ;;  %5798 = vmatpush.msrb.mxu2 %v5153_v59  ;;  %v5382_v3 = vadd.f32 %v5381_v21, %v5362_v55  ;;  %v5441_v22 = vpop.f32.mrf.mxu0  ;;  %v4062_v32 = vld [vmem:[%s16279_s18 + $0x4a8] sm:$0xff]  ;;  %v3964_v8 = vld [vmem:[%s16279_s18 + $0x198] sm:$0xff]  ;;  %v4055_v59 = vld [vmem:[%s16279_s18 + $0x470] sm:$0xff] }
 0xb0c   :  { %5846 = vmatpush.msra.mxu1 %v4118_v11  ;;  %5739 = vmatpush.msrb.mxu3 %v4810_v9  ;;  %v4321_v11 = vld [vmem:[%s16279_s18 + $0xcc0] sm:$0xff]  ;;  %v4048_v55 = vld [vmem:[%s16279_s18 + $0x438] sm:$0xff] }
 0xb0d   :  { %5759 = vmatpush.msra.mxu0 %v4922_v4  ;;  %5740 = vmatmul.f32.vlgmr.msrb.gmra.mxu3 %v12423_v18  ;;  %v5402_v63 = vadd.f32 %v5401_v5, %v5382_v3  ;;  %v3957_v9 = vld [vmem:[%s16279_s18 + $0x160] sm:$0xff]  ;;  %v4314_v4 = vld [vmem:[%s16279_s18 + $0xc88] sm:$0xff]  ;;  %v3943_v5 = vld [vmem:[%s16279_s18 + $0xf0] sm:$0xff] }
 0xb0e   :  { %5760 = vmatmul.f32.vlgmr.msra.gmra.mxu0 %v12467_v16  ;;  %5799 = vmatpush.msrb.mxu2 %v5146_v12  ;;  %v4181_v21 = vld [vmem:[%s16279_s18 + $0x860] sm:$0xff]  ;;  %v3950_v12 = vld [vmem:[%s16279_s18 + $0x128] sm:$0xff] }
 0xb0f   :  { %5816 = vmatpush.msra.mxu3 %v5279_v10  ;;  %5824 = vmatpush.msrb.mxu0 %v4020_v19  ;;  %v4041_v3 = vld [vmem:[%s16279_s18 + $0x400] sm:$0xff]  ;;  %v4174_v10 = vld [vmem:[%s16279_s18 + $0x828] sm:$0xff]  ;;  %v4307_v19 = vld [vmem:[%s16279_s18 + $0xc50] sm:$0xff] }
 0xb10   :  { %5847 = vmatpush.msra.mxu1 %v4111_v14  ;;  %5800 = vmatmul.f32.vlgmr.msrb.gmra.mxu2 %v12429_v46  ;;  %v5421_v58 = vpop.f32.mrf.mxu3 }
 0xb11   :  { %5864 = vmatpush.msra.mxu2 %v4244_v1  ;;  %5817 = vmatpush.msra.mxu3 %v5272_v39  ;;  %v5422_v17 = vadd.f32 %v5421_v58, %v5402_v63  ;;  %v4034_v63 = vld [vmem:[%s16279_s18 + $0x3c8] sm:$0xff]  ;;  %v4167_v1 = vld [vmem:[%s16279_s18 + $0x7f0] sm:$0xff]  ;;  %v4293_v58 = vld [vmem:[%s16279_s18 + $0xbe0] sm:$0xff] }
 0xb12   :  { %5825 = vmatpush.msrb.mxu0 %v4013_v49  ;;  %5848 = vmatpush.msra.mxu1 %v4104_v53  ;;  %v4300_v49 = vld [vmem:[%s16279_s18 + $0xc18] sm:$0xff] }
 0xb13   :  { %5865 = vmatpush.msra.mxu2 %v4237_v6  ;;  %5818 = vmatpush.msra.mxu3 %v5265_v36  ;;  %v5442_v37 = vadd.f32 %v5441_v22, %v5422_v17  ;;  %v3936_v53 = vld [vmem:[%s16279_s18 + $0xb8] sm:$0xff]  ;;  %v4027_v6 = vld [vmem:[%s16279_s18 + $0x390] sm:$0xff]  ;;  %v4153_v17 = vld [vmem:[%s16279_s18 + $0x780] sm:$0xff] }
 0xb14   :  { %5826 = vmatpush.msrb.mxu0 %v4006_v31  ;;  %5849 = vmatpush.msra.mxu1 %v4097_v62  ;;  %v4160_v36 = vld [vmem:[%s16279_s18 + $0x7b8] sm:$0xff]  ;;  %v3929_v62 = vld [vmem:[%s16279_s18 + $0x80] sm:$0xff]  ;;  %v3922_v22 = vld [vmem:[%s16279_s18 + $0x48] sm:$0xff] }
 0xb15   :  { %5866 = vmatpush.msra.mxu2 %v4230_v57  ;;  %5819 = vmatpush.msra.mxu3 %v5258_v23  ;;  %v5462_v33 = vadd.f32 %v5461_v42, %v5442_v37  ;;  %v4580_v31 = vld [vmem:[%s16279_s18 + $0x14d8] sm:$0xff]  ;;  %v4286_v57 = vld [vmem:[%s16279_s18 + $0xba8] sm:$0xff]  ;;  %v4573_v23 = vld [vmem:[%s16279_s18 + $0x14a0] sm:$0xff] }
 0xb16   :  { %5827 = vmatpush.msrb.mxu0 %v3999_v13  ;;  %5850 = vmatpush.msra.mxu1 %v4090_v2  ;;  %v4146_v2 = vld [vmem:[%s16279_s18 + $0x748] sm:$0xff]  ;;  %v4279_v37 = vld [vmem:[%s16279_s18 + $0xb70] sm:$0xff] }
 0xb17   :  { %5867 = vmatpush.msra.mxu2 %v4223_v15  ;;  %5884 = vmatpush.msrb.mxu3 %v4356_v24  ;;  %v4566_v15 = vld [vmem:[%s16279_s18 + $0x1468] sm:$0xff]  ;;  %v3915_v24 = vld [vmem:[%s16279_s18 + $0x10] sm:$0xff] }
 0xb18   :  { %7363 = vmatmul.msk.f32.vlgmr.msra.gmra.mxu3 %vm105_vm1, %v12493_v60  ;;  %5828 = vmatpush.msrb.mxu0 %v3992_v28 }
 0xb19   :  { %5851 = vmatpush.msra.mxu1 %v4083_v61  ;;  %5868 = vmatpush.msra.mxu2 %v4216_v29 }
 0xb1a   :  { %5885 = vmatpush.msrb.mxu3 %v4349_v34  ;;  %5829 = vmatpush.msrb.mxu0 %v3985_v48  ;;  %v4272_v34 = vld [vmem:[%s16279_s18 + $0xb38] sm:$0xff] }
 0xb1b   :  { %5852 = vmatpush.msra.mxu1 %v4076_v52  ;;  %5869 = vmatpush.msra.mxu2 %v4209_v56  ;;  %v4468_v48 = vld [vmem:[%s16279_s18 + $0x1158] sm:$0xff]  ;;  %v4559_v52 = vld [vmem:[%s16279_s18 + $0x1430] sm:$0xff] }
 0xb1c   :  { %5886 = vmatpush.msrb.mxu3 %v4342_v44  ;;  %5830 = vmatpush.msrb.mxu0 %v3978_v40  ;;  %v4692_v44 = vld [vmem:[%s16279_s18 + $0x1858] sm:$0xff]  ;;  %v4265_v40 = vld [vmem:[%s16279_s18 + $0xb00] sm:$0xff] }
 0xb1d   :  { %5853 = vmatpush.msra.mxu1 %v4069_v30  ;;  %5870 = vmatpush.msra.mxu2 %v4202_v41  ;;  %v4461_v41 = vld [vmem:[%s16279_s18 + $0x1120] sm:$0xff] }
 0xb1e   :  { %5887 = vmatpush.msrb.mxu3 %v4335_v27  ;;  %5831 = vmatpush.msrb.mxu0 %v3971_v0  ;;  %v5541_v29 = vpop.f32.mrf.mxu1  ;;  %v4552_v27 = vld [vmem:[%s16279_s18 + $0x13f8] sm:$0xff] }
 0xb1f   :  { %5854 = vmatpush.msra.mxu1 %v4062_v32  ;;  %5871 = vmatpush.msra.mxu2 %v4195_v43  ;;  %v4685_v32 = vld [vmem:[%s16279_s18 + $0x1820] sm:$0xff]  ;;  %v4258_v43 = vld [vmem:[%s16279_s18 + $0xac8] sm:$0xff] }
 0xb20   :  { %5888 = vmatpush.msrb.mxu3 %v4328_v38  ;;  %5832 = vmatpush.msrb.mxu0 %v3964_v8  ;;  %v4454_v38 = vld [vmem:[%s16279_s18 + $0x10e8] sm:$0xff]  ;;  %v4545_v8 = vld [vmem:[%s16279_s18 + $0x13c0] sm:$0xff] }
 0xb21   :  { %5855 = vmatpush.msra.mxu1 %v4055_v59  ;;  %5872 = vmatpush.msra.mxu2 %v4188_v25  ;;  %v4678_v59 = vld [vmem:[%s16279_s18 + $0x17e8] sm:$0xff]  ;;  %v4251_v25 = vld [vmem:[%s16279_s18 + $0xa90] sm:$0xff] }
 0xb22   :  { %5889 = vmatpush.msrb.mxu3 %v4321_v11  ;;  %5833 = vmatpush.msrb.mxu0 %v3957_v9  ;;  %v4447_v11 = vld [vmem:[%s16279_s18 + $0x10b0] sm:$0xff]  ;;  %v4538_v9 = vld [vmem:[%s16279_s18 + $0x1388] sm:$0xff] }
 0xb23   :  { %5856 = vmatpush.msra.mxu1 %v4048_v55  ;;  %5873 = vmatpush.msra.mxu2 %v4181_v21  ;;  %v5481_v14 = vpop.f32.mrf.mxu2  ;;  %v4671_v55 = vld [vmem:[%s16279_s18 + $0x17b0] sm:$0xff]  ;;  %v4804_v21 = vld [vmem:[%s16279_s18 + $0x1bd8] sm:$0xff] }
 0xb24   :  { %5890 = vmatpush.msrb.mxu3 %v4314_v4  ;;  %5834 = vmatpush.msrb.mxu0 %v3950_v12  ;;  %v5482_v39 = vadd.f32 %v5481_v14, %v5462_v33  ;;  %v4139_v33 = vld [vmem:[%s16279_s18 + $0x710] sm:$0xff]  ;;  %v4440_v4 = vld [vmem:[%s16279_s18 + $0x1078] sm:$0xff]  ;;  %v4657_v14 = vld [vmem:[%s16279_s18 + $0x1740] sm:$0xff] }
 0xb25   :  { %5857 = vmatpush.msra.mxu1 %v4041_v3  ;;  %5874 = vmatpush.msra.mxu2 %v4174_v10  ;;  %v5521_v28 = vpop.f32.mrf.mxu0  ;;  %v4531_v12 = vld [vmem:[%s16279_s18 + $0x1350] sm:$0xff]  ;;  %v4664_v3 = vld [vmem:[%s16279_s18 + $0x1778] sm:$0xff]  ;;  %v4797_v10 = vld [vmem:[%s16279_s18 + $0x1ba0] sm:$0xff] }
 0xb26   :  { %5891 = vmatpush.msrb.mxu3 %v4307_v19  ;;  %5835 = vmatpush.msrb.mxu0 %v3943_v5  ;;  %v4433_v19 = vld [vmem:[%s16279_s18 + $0x1040] sm:$0xff]  ;;  %v4524_v5 = vld [vmem:[%s16279_s18 + $0x1318] sm:$0xff] }
 0xb27   :  { %5858 = vmatpush.msra.mxu1 %v4034_v63  ;;  %5875 = vmatpush.msra.mxu2 %v4167_v1  ;;  %v4790_v63 = vld [vmem:[%s16279_s18 + $0x1b68] sm:$0xff] }
 0xb28   :  { %5892 = vmatpush.msrb.mxu3 %v4300_v49  ;;  %5836 = vmatpush.msrb.mxu0 %v3936_v53  ;;  %v4426_v1 = vld [vmem:[%s16279_s18 + $0x1008] sm:$0xff]  ;;  %v4783_v53 = vld [vmem:[%s16279_s18 + $0x1b30] sm:$0xff] }
 0xb29   :  { %5859 = vmatpush.msra.mxu1 %v4027_v6  ;;  %5876 = vmatpush.msra.mxu2 %v4160_v36  ;;  %v4650_v49 = vld [vmem:[%s16279_s18 + $0x1708] sm:$0xff]  ;;  %v4419_v6 = vld [vmem:[%s16279_s18 + $0xfd0] sm:$0xff] }
 0xb2a   :  { %5860 = vmatmul.f32.vlgmr.msra.gmra.mxu1 %v12243_v26  ;;  %5893 = vmatpush.msrb.mxu3 %v4293_v58  ;;  %v5501_v13 = vpop.f32.mrf.mxu3  ;;  %v4510_v36 = vld [vmem:[%s16279_s18 + $0x12a8] sm:$0xff]  ;;  %v4643_v58 = vld [vmem:[%s16279_s18 + $0x16d0] sm:$0xff] }
 0xb2b   :  { %5924 = vmatpush.msrb.mxu1 %v4580_v31  ;;  %5837 = vmatpush.msrb.mxu0 %v3929_v62  ;;  %v5502_v42 = vadd.f32 %v5501_v13, %v5482_v39  ;;  %v4517_v39 = vld [vmem:[%s16279_s18 + $0x12e0] sm:$0xff]  ;;  %v4776_v31 = vld [vmem:[%s16279_s18 + $0x1af8] sm:$0xff] }
 0xb2c   :  { %5877 = vmatpush.msra.mxu2 %v4153_v17  ;;  %5894 = vmatpush.msrb.mxu3 %v4286_v57  ;;  %v4412_v62 = vld [vmem:[%s16279_s18 + $0xf98] sm:$0xff]  ;;  %v4503_v17 = vld [vmem:[%s16279_s18 + $0x1270] sm:$0xff] }
 0xb2d   :  { %5925 = vmatpush.msrb.mxu1 %v4573_v23  ;;  %5838 = vmatpush.msrb.mxu0 %v3922_v22  ;;  %v5522_v61 = vadd.f32 %v5521_v28, %v5502_v42  ;;  %v4636_v57 = vld [vmem:[%s16279_s18 + $0x1698] sm:$0xff]  ;;  %v4769_v23 = vld [vmem:[%s16279_s18 + $0x1ac0] sm:$0xff]  ;;  %v4398_v42 = vld [vmem:[%s16279_s18 + $0xf28] sm:$0xff] }
 0xb2e   :  { %5878 = vmatpush.msra.mxu2 %v4146_v2  ;;  %5895 = vmatpush.msrb.mxu3 %v4279_v37  ;;  %v5561_v30 = vpop.f32.mrf.mxu2  ;;  %v4405_v22 = vld [vmem:[%s16279_s18 + $0xf60] sm:$0xff]  ;;  %v4496_v13 = vld [vmem:[%s16279_s18 + $0x1238] sm:$0xff]  ;;  %v4762_v37 = vld [vmem:[%s16279_s18 + $0x1a88] sm:$0xff] }
 0xb2f   :  { %5926 = vmatpush.msrb.mxu1 %v4566_v15  ;;  %5839 = vmatpush.msrb.mxu0 %v3915_v24  ;;  %v5542_v56 = vadd.f32 %v5541_v29, %v5522_v61  ;;  %v4629_v2 = vld [vmem:[%s16279_s18 + $0x1660] sm:$0xff]  ;;  %v4622_v24 = vld [vmem:[%s16279_s18 + $0x1628] sm:$0xff]  ;;  %v4755_v28 = vld [vmem:[%s16279_s18 + $0x1a50] sm:$0xff] }
 0xb30   :  { %5840 = vmatmul.f32.vlgmr.msrb.gmra.mxu0 %v12217_v35  ;;  %5879 = vmatpush.msra.mxu2 %v4139_v33  ;;  %v4489_v15 = vld [vmem:[%s16279_s18 + $0x1200] sm:$0xff]  ;;  %v4391_v33 = vld [vmem:[%s16279_s18 + $0xef0] sm:$0xff]  ;;  %v4482_v61 = vld [vmem:[%s16279_s18 + $0x11c8] sm:$0xff] }
 0xb31   :  { %5896 = vmatpush.msrb.mxu3 %v4272_v34  ;;  %5904 = vmatpush.msra.mxu0 %v4468_v48  ;;  %v13290_v0 = vadd.f32 %v5561_v30, %v5542_v56  ;;  %v4615_v29 = vld [vmem:[%s16279_s18 + $0x15f0] sm:$0xff]  ;;  %v4748_v34 = vld [vmem:[%s16279_s18 + $0x1a18] sm:$0xff]  ;;  %v4377_v30 = vld [vmem:[%s16279_s18 + $0xe80] sm:$0xff] }
 0xb32   :  { %5927 = vmatpush.msrb.mxu1 %v4559_v52  ;;  %5880 = vmatmul.f32.vlgmr.msra.gmra.mxu2 %v12249_v7  ;;  %v4384_v48 = vld [vmem:[%s16279_s18 + $0xeb8] sm:$0xff]  ;;  %v4475_v52 = vld [vmem:[%s16279_s18 + $0x1190] sm:$0xff] }
 0xb33   :  { %5944 = vmatpush.msrb.mxu2 %v4692_v44  ;;  %5897 = vmatpush.msrb.mxu3 %v4265_v40  ;;  %v4608_v56 = vld [vmem:[%s16279_s18 + $0x15b8] sm:$0xff]  ;;  %v4741_v44 = vld [vmem:[%s16279_s18 + $0x19e0] sm:$0xff] }
 0xb34   :  { %5905 = vmatpush.msra.mxu0 %v4461_v41  ;;  %5928 = vmatpush.msrb.mxu1 %v4552_v27  ;;  %v5028_v40 = vld [vmem:[%s16279_s18 + $0x22d8] sm:$0xff]  ;;  %v4601_v41 = vld [vmem:[%s16279_s18 + $0x1580] sm:$0xff]  ;;  %v4734_v27 = vld [vmem:[%s16279_s18 + $0x19a8] sm:$0xff] }
 0xb35   :  { %5945 = vmatpush.msrb.mxu2 %v4685_v32  ;;  %5898 = vmatpush.msrb.mxu3 %v4258_v43  ;;  %v5021_v32 = vld [vmem:[%s16279_s18 + $0x22a0] sm:$0xff]  ;;  %v4370_v43 = vld [vmem:[%s16279_s18 + $0xe48] sm:$0xff] }
 0xb36   :  { %5906 = vmatpush.msra.mxu0 %v4454_v38  ;;  %5929 = vmatpush.msrb.mxu1 %v4545_v8  ;;  %v4594_v38 = vld [vmem:[%s16279_s18 + $0x1548] sm:$0xff]  ;;  %v4727_v8 = vld [vmem:[%s16279_s18 + $0x1970] sm:$0xff] }
 0xb37   :  { %5946 = vmatpush.msrb.mxu2 %v4678_v59  ;;  %5899 = vmatpush.msrb.mxu3 %v4251_v25  ;;  %v5014_v59 = vld [vmem:[%s16279_s18 + $0x2268] sm:$0xff]  ;;  %v4363_v25 = vld [vmem:[%s16279_s18 + $0xe10] sm:$0xff] }
 0xb38   :  { %5907 = vmatpush.msra.mxu0 %v4447_v11  ;;  %5930 = vmatpush.msrb.mxu1 %v4538_v9  ;;  %v4587_v11 = vld [vmem:[%s16279_s18 + $0x1510] sm:$0xff]  ;;  %v4720_v9 = vld [vmem:[%s16279_s18 + $0x1938] sm:$0xff] }
 0xb39   :  { %5900 = vmatmul.f32.vlgmr.msrb.gmra.mxu3 %v12223_v20  ;;  %5947 = vmatpush.msrb.mxu2 %v4671_v55  ;;  %v4916_v55 = vld [vmem:[%s16279_s18 + $0x1f58] sm:$0xff] }
 0xb3a   :  { %5964 = vmatpush.msra.mxu3 %v4804_v21  ;;  %5908 = vmatpush.msra.mxu0 %v4440_v4  ;;  %v5007_v21 = vld [vmem:[%s16279_s18 + $0x2230] sm:$0xff]  ;;  %v5140_v4 = vld [vmem:[%s16279_s18 + $0x2658] sm:$0xff] }
 0xb3b   :  { %5931 = vmatpush.msrb.mxu1 %v4531_v12  ;;  %5948 = vmatpush.msrb.mxu2 %v4664_v3  ;;  %v4713_v12 = vld [vmem:[%s16279_s18 + $0x1900] sm:$0xff] }
 0xb3c   :  { %5965 = vmatpush.msra.mxu3 %v4797_v10  ;;  %5909 = vmatpush.msra.mxu0 %v4433_v19  ;;  %v4909_v3 = vld [vmem:[%s16279_s18 + $0x1f20] sm:$0xff]  ;;  %v5000_v10 = vld [vmem:[%s16279_s18 + $0x21f8] sm:$0xff] }
 0xb3d   :  { %5932 = vmatpush.msrb.mxu1 %v4524_v5  ;;  %5949 = vmatpush.msrb.mxu2 %v4657_v14  ;;  %v5133_v19 = vld [vmem:[%s16279_s18 + $0x2620] sm:$0xff]  ;;  %v4706_v5 = vld [vmem:[%s16279_s18 + $0x18c8] sm:$0xff] }
 0xb3e   :  { %5966 = vmatpush.msra.mxu3 %v4790_v63  ;;  %5910 = vmatpush.msra.mxu0 %v4426_v1  ;;  %v4902_v14 = vld [vmem:[%s16279_s18 + $0x1ee8] sm:$0xff]  ;;  %v4993_v63 = vld [vmem:[%s16279_s18 + $0x21c0] sm:$0xff] }
 0xb3f   :  { %5933 = vmatpush.msrb.mxu1 %v4517_v39  ;;  %5950 = vmatpush.msrb.mxu2 %v4650_v49  ;;  %v5126_v1 = vld [vmem:[%s16279_s18 + $0x25e8] sm:$0xff]  ;;  %v4699_v39 = vld [vmem:[%s16279_s18 + $0x1890] sm:$0xff] }
 0xb40   :  { %5967 = vmatpush.msra.mxu3 %v4783_v53  ;;  %5911 = vmatpush.msra.mxu0 %v4419_v6  ;;  %v4895_v49 = vld [vmem:[%s16279_s18 + $0x1eb0] sm:$0xff]  ;;  %v4986_v53 = vld [vmem:[%s16279_s18 + $0x2188] sm:$0xff] }
 0xb41   :  { %5934 = vmatpush.msrb.mxu1 %v4510_v36  ;;  %5951 = vmatpush.msrb.mxu2 %v4643_v58  ;;  %v5119_v6 = vld [vmem:[%s16279_s18 + $0x25b0] sm:$0xff]  ;;  %v5252_v36 = vld [vmem:[%s16279_s18 + $0x29d8] sm:$0xff] }
 0xb42   :  { %5968 = vmatpush.msra.mxu3 %v4776_v31  ;;  %5912 = vmatpush.msra.mxu0 %v4412_v62  ;;  %v4888_v58 = vld [vmem:[%s16279_s18 + $0x1e78] sm:$0xff]  ;;  %v4979_v31 = vld [vmem:[%s16279_s18 + $0x2150] sm:$0xff] }
 0xb43   :  { %5935 = vmatpush.msrb.mxu1 %v4503_v17  ;;  %5952 = vmatpush.msrb.mxu2 %v4636_v57  ;;  %v5112_v62 = vld [vmem:[%s16279_s18 + $0x2578] sm:$0xff]  ;;  %v5245_v17 = vld [vmem:[%s16279_s18 + $0x29a0] sm:$0xff] }
 0xb44   :  { %5969 = vmatpush.msra.mxu3 %v4769_v23  ;;  %5913 = vmatpush.msra.mxu0 %v4405_v22  ;;  %v4881_v57 = vld [vmem:[%s16279_s18 + $0x1e40] sm:$0xff]  ;;  %v4972_v23 = vld [vmem:[%s16279_s18 + $0x2118] sm:$0xff] }
 0xb45   :  { %5936 = vmatpush.msrb.mxu1 %v4496_v13  ;;  %5953 = vmatpush.msrb.mxu2 %v4629_v2  ;;  %v5105_v22 = vld [vmem:[%s16279_s18 + $0x2540] sm:$0xff]  ;;  %v5238_v13 = vld [vmem:[%s16279_s18 + $0x2968] sm:$0xff] }
 0xb46   :  { %5970 = vmatpush.msra.mxu3 %v4762_v37  ;;  %5914 = vmatpush.msra.mxu0 %v4398_v42  ;;  %v4874_v2 = vld [vmem:[%s16279_s18 + $0x1e08] sm:$0xff]  ;;  %v4965_v37 = vld [vmem:[%s16279_s18 + $0x20e0] sm:$0xff] }
 0xb47   :  { %5937 = vmatpush.msrb.mxu1 %v4489_v15  ;;  %5954 = vmatpush.msrb.mxu2 %v4622_v24  ;;  %v5098_v42 = vld [vmem:[%s16279_s18 + $0x2508] sm:$0xff]  ;;  %v5231_v15 = vld [vmem:[%s16279_s18 + $0x2930] sm:$0xff] }
 0xb48   :  { %5971 = vmatpush.msra.mxu3 %v4755_v28  ;;  %5915 = vmatpush.msra.mxu0 %v4391_v33  ;;  %v4867_v24 = vld [vmem:[%s16279_s18 + $0x1dd0] sm:$0xff]  ;;  %v4958_v28 = vld [vmem:[%s16279_s18 + $0x20a8] sm:$0xff] }
 0xb49   :  { %5938 = vmatpush.msrb.mxu1 %v4482_v61  ;;  %5955 = vmatpush.msrb.mxu2 %v4615_v29  ;;  %v5091_v33 = vld [vmem:[%s16279_s18 + $0x24d0] sm:$0xff]  ;;  %v5224_v61 = vld [vmem:[%s16279_s18 + $0x28f8] sm:$0xff] }
 0xb4a   :  { %5972 = vmatpush.msra.mxu3 %v4748_v34  ;;  %5916 = vmatpush.msra.mxu0 %v4384_v48  ;;  %v4860_v29 = vld [vmem:[%s16279_s18 + $0x1d98] sm:$0xff]  ;;  %v4951_v34 = vld [vmem:[%s16279_s18 + $0x2070] sm:$0xff] }
 0xb4b   :  { %5939 = vmatpush.msrb.mxu1 %v4475_v52  ;;  %5956 = vmatpush.msrb.mxu2 %v4608_v56  ;;  %v5084_v48 = vld [vmem:[%s16279_s18 + $0x2498] sm:$0xff]  ;;  %v5217_v52 = vld [vmem:[%s16279_s18 + $0x28c0] sm:$0xff] }
 0xb4c   :  { %5940 = vmatmul.f32.vlgmr.msrb.gmra.mxu1 %v12298_v54  ;;  %5973 = vmatpush.msra.mxu3 %v4741_v44  ;;  %v4853_v56 = vld [vmem:[%s16279_s18 + $0x1d60] sm:$0xff]  ;;  %v4944_v44 = vld [vmem:[%s16279_s18 + $0x2038] sm:$0xff] }
 0xb4d   :  { %6004 = vmatpush.msra.mxu1 %v5028_v40  ;;  %5917 = vmatpush.msra.mxu0 %v4377_v30  ;;  %v5077_v40 = vld [vmem:[%s16279_s18 + $0x2460] sm:$0xff]  ;;  %v5210_v30 = vld [vmem:[%s16279_s18 + $0x2888] sm:$0xff] }
 0xb4e   :  { %5957 = vmatpush.msrb.mxu2 %v4601_v41  ;;  %5974 = vmatpush.msra.mxu3 %v4734_v27  ;;  %v4846_v41 = vld [vmem:[%s16279_s18 + $0x1d28] sm:$0xff]  ;;  %v4937_v27 = vld [vmem:[%s16279_s18 + $0x2000] sm:$0xff] }
 0xb4f   :  { %6005 = vmatpush.msra.mxu1 %v5021_v32  ;;  %5918 = vmatpush.msra.mxu0 %v4370_v43  ;;  %v5070_v32 = vld [vmem:[%s16279_s18 + $0x2428] sm:$0xff]  ;;  %v5203_v43 = vld [vmem:[%s16279_s18 + $0x2850] sm:$0xff] }
 0xb50   :  { %5958 = vmatpush.msrb.mxu2 %v4594_v38  ;;  %5975 = vmatpush.msra.mxu3 %v4727_v8  ;;  %v4839_v38 = vld [vmem:[%s16279_s18 + $0x1cf0] sm:$0xff]  ;;  %v4930_v8 = vld [vmem:[%s16279_s18 + $0x1fc8] sm:$0xff] }
 0xb51   :  { %6006 = vmatpush.msra.mxu1 %v5014_v59  ;;  %5919 = vmatpush.msra.mxu0 %v4363_v25  ;;  %v5063_v59 = vld [vmem:[%s16279_s18 + $0x23f0] sm:$0xff]  ;;  %v5196_v25 = vld [vmem:[%s16279_s18 + $0x2818] sm:$0xff] }
 0xb52   :  { %5920 = vmatmul.f32.vlgmr.msra.gmra.mxu0 %v12258_v47  ;;  %5959 = vmatpush.msrb.mxu2 %v4587_v11  ;;  %v4832_v11 = vld [vmem:[%s16279_s18 + $0x1cb8] sm:$0xff] }
 0xb53   :  { %5976 = vmatpush.msra.mxu3 %v4720_v9  ;;  %5984 = vmatpush.msrb.mxu0 %v4916_v55  ;;  %v4923_v9 = vld [vmem:[%s16279_s18 + $0x1f90] sm:$0xff]  ;;  %v5056_v55 = vld [vmem:[%s16279_s18 + $0x23b8] sm:$0xff] }
 0xb54   :  { %6007 = vmatpush.msra.mxu1 %v5007_v21  ;;  %5960 = vmatmul.f32.vlgmr.msrb.gmra.mxu2 %v12307_v50  ;;  %v5189_v21 = vld [vmem:[%s16279_s18 + $0x27e0] sm:$0xff] }
 0xb55   :  { %6024 = vmatpush.msra.mxu2 %v5140_v4  ;;  %5977 = vmatpush.msra.mxu3 %v4713_v12  ;;  %v4021_v4 = vld [vmem:[%s16279_s18 + $0x360] sm:$0xff] }
 0xb56   :  { %5985 = vmatpush.msrb.mxu0 %v4909_v3  ;;  %6008 = vmatpush.msra.mxu1 %v5000_v10  ;;  %v4825_v12 = vld [vmem:[%s16279_s18 + $0x1c80] sm:$0xff]  ;;  %v5182_v10 = vld [vmem:[%s16279_s18 + $0x27a8] sm:$0xff] }
 0xb57   :  { %6025 = vmatpush.msra.mxu2 %v5133_v19  ;;  %5978 = vmatpush.msra.mxu3 %v4706_v5  ;;  %v5049_v3 = vld [vmem:[%s16279_s18 + $0x2380] sm:$0xff]  ;;  %v4014_v19 = vld [vmem:[%s16279_s18 + $0x328] sm:$0xff] }
 0xb58   :  { %5986 = vmatpush.msrb.mxu0 %v4902_v14  ;;  %6009 = vmatpush.msra.mxu1 %v4993_v63  ;;  %v4818_v5 = vld [vmem:[%s16279_s18 + $0x1c48] sm:$0xff]  ;;  %v5175_v63 = vld [vmem:[%s16279_s18 + $0x2770] sm:$0xff] }
 0xb59   :  { %6026 = vmatpush.msra.mxu2 %v5126_v1  ;;  %5979 = vmatpush.msra.mxu3 %v4699_v39  ;;  %v5042_v14 = vld [vmem:[%s16279_s18 + $0x2348] sm:$0xff]  ;;  %v4007_v1 = vld [vmem:[%s16279_s18 + $0x2f0] sm:$0xff] }
 0xb5a   :  { %5987 = vmatpush.msrb.mxu0 %v4895_v49  ;;  %6010 = vmatpush.msra.mxu1 %v4986_v53  ;;  %v4811_v39 = vld [vmem:[%s16279_s18 + $0x1c10] sm:$0xff]  ;;  %v5168_v53 = vld [vmem:[%s16279_s18 + $0x2738] sm:$0xff] }
 0xb5b   :  { %5980 = vmatmul.f32.vlgmr.msra.gmra.mxu3 %v12265_v45  ;;  %6027 = vmatpush.msra.mxu2 %v5119_v6  ;;  %v5035_v49 = vld [vmem:[%s16279_s18 + $0x2310] sm:$0xff]  ;;  %v5280_v6 = vld [vmem:[%s16279_s18 + $0x2ab8] sm:$0xff] }
 0xb5c   :  { %6044 = vmatpush.msrb.mxu3 %v5252_v36  ;;  %5988 = vmatpush.msrb.mxu0 %v4888_v58  ;;  %v4000_v36 = vld [vmem:[%s16279_s18 + $0x2b8] sm:$0xff]  ;;  %v4133_v58 = vld [vmem:[%s16279_s18 + $0x6e0] sm:$0xff] }
 0xb5d   :  { %6011 = vmatpush.msra.mxu1 %v4979_v31  ;;  %6028 = vmatpush.msra.mxu2 %v5112_v62  ;;  %v5161_v31 = vld [vmem:[%s16279_s18 + $0x2700] sm:$0xff] }
 0xb5e   :  { %6045 = vmatpush.msrb.mxu3 %v5245_v17  ;;  %5989 = vmatpush.msrb.mxu0 %v4881_v57  ;;  %v5273_v62 = vld [vmem:[%s16279_s18 + $0x2a80] sm:$0xff]  ;;  %v4126_v57 = vld [vmem:[%s16279_s18 + $0x6a8] sm:$0xff] }
 0xb5f   :  { %6012 = vmatpush.msra.mxu1 %v4972_v23  ;;  %6029 = vmatpush.msra.mxu2 %v5105_v22  ;;  %v3993_v17 = vld [vmem:[%s16279_s18 + $0x280] sm:$0xff]  ;;  %v5154_v23 = vld [vmem:[%s16279_s18 + $0x26c8] sm:$0xff] }
 0xb60   :  { %6046 = vmatpush.msrb.mxu3 %v5238_v13  ;;  %5990 = vmatpush.msrb.mxu0 %v4874_v2  ;;  %v5266_v22 = vld [vmem:[%s16279_s18 + $0x2a48] sm:$0xff]  ;;  %v4119_v2 = vld [vmem:[%s16279_s18 + $0x670] sm:$0xff] }
 0xb61   :  { %6013 = vmatpush.msra.mxu1 %v4965_v37  ;;  %6030 = vmatpush.msra.mxu2 %v5098_v42  ;;  %v3986_v13 = vld [vmem:[%s16279_s18 + $0x248] sm:$0xff]  ;;  %v5147_v37 = vld [vmem:[%s16279_s18 + $0x2690] sm:$0xff] }
 0xb62   :  { %6047 = vmatpush.msrb.mxu3 %v5231_v15  ;;  %5991 = vmatpush.msrb.mxu0 %v4867_v24  ;;  %v5259_v42 = vld [vmem:[%s16279_s18 + $0x2a10] sm:$0xff]  ;;  %v4112_v24 = vld [vmem:[%s16279_s18 + $0x638] sm:$0xff] }
 0xb63   :  { %6014 = vmatpush.msra.mxu1 %v4958_v28  ;;  %6031 = vmatpush.msra.mxu2 %v5091_v33  ;;  %v3979_v15 = vld [vmem:[%s16279_s18 + $0x210] sm:$0xff]  ;;  %v4245_v28 = vld [vmem:[%s16279_s18 + $0xa60] sm:$0xff] }
 0xb64   :  { %6048 = vmatpush.msrb.mxu3 %v5224_v61  ;;  %5992 = vmatpush.msrb.mxu0 %v4860_v29  ;;  %v4357_v33 = vld [vmem:[%s16279_s18 + $0xde0] sm:$0xff]  ;;  %v3972_v61 = vld [vmem:[%s16279_s18 + $0x1d8] sm:$0xff] }
 0xb65   :  { %6015 = vmatpush.msra.mxu1 %v4951_v34  ;;  %6032 = vmatpush.msra.mxu2 %v5084_v48  ;;  %v4105_v29 = vld [vmem:[%s16279_s18 + $0x600] sm:$0xff]  ;;  %v4238_v34 = vld [vmem:[%s16279_s18 + $0xa28] sm:$0xff] }
 0xb66   :  { %6049 = vmatpush.msrb.mxu3 %v5217_v52  ;;  %5993 = vmatpush.msrb.mxu0 %v4853_v56  ;;  %v4350_v48 = vld [vmem:[%s16279_s18 + $0xda8] sm:$0xff]  ;;  %v3965_v52 = vld [vmem:[%s16279_s18 + $0x1a0] sm:$0xff] }
 0xb67   :  { %6016 = vmatpush.msra.mxu1 %v4944_v44  ;;  %6033 = vmatpush.msra.mxu2 %v5077_v40  ;;  %v4098_v56 = vld [vmem:[%s16279_s18 + $0x5c8] sm:$0xff]  ;;  %v4231_v44 = vld [vmem:[%s16279_s18 + $0x9f0] sm:$0xff] }
 0xb68   :  { %6050 = vmatpush.msrb.mxu3 %v5210_v30  ;;  %5994 = vmatpush.msrb.mxu0 %v4846_v41  ;;  %v4343_v40 = vld [vmem:[%s16279_s18 + $0xd70] sm:$0xff]  ;;  %v3958_v30 = vld [vmem:[%s16279_s18 + $0x168] sm:$0xff] }
 0xb69   :  { %6017 = vmatpush.msra.mxu1 %v4937_v27  ;;  %6034 = vmatpush.msra.mxu2 %v5070_v32  ;;  %v4091_v41 = vld [vmem:[%s16279_s18 + $0x590] sm:$0xff]  ;;  %v4224_v27 = vld [vmem:[%s16279_s18 + $0x9b8] sm:$0xff] }
 0xb6a   :  { %6051 = vmatpush.msrb.mxu3 %v5203_v43  ;;  %5995 = vmatpush.msrb.mxu0 %v4839_v38  ;;  %v4336_v32 = vld [vmem:[%s16279_s18 + $0xd38] sm:$0xff]  ;;  %v3951_v43 = vld [vmem:[%s16279_s18 + $0x130] sm:$0xff] }
 0xb6b   :  { %6018 = vmatpush.msra.mxu1 %v4930_v8  ;;  %6035 = vmatpush.msra.mxu2 %v5063_v59  ;;  %v4084_v38 = vld [vmem:[%s16279_s18 + $0x558] sm:$0xff]  ;;  %v4217_v8 = vld [vmem:[%s16279_s18 + $0x980] sm:$0xff] }
 0xb6c   :  { %6052 = vmatpush.msrb.mxu3 %v5196_v25  ;;  %5996 = vmatpush.msrb.mxu0 %v4832_v11  ;;  %v4329_v59 = vld [vmem:[%s16279_s18 + $0xd00] sm:$0xff]  ;;  %v3944_v25 = vld [vmem:[%s16279_s18 + $0xf8] sm:$0xff] }
 0xb6d   :  { %6019 = vmatpush.msra.mxu1 %v4923_v9  ;;  %6036 = vmatpush.msra.mxu2 %v5056_v55  ;;  %v4077_v11 = vld [vmem:[%s16279_s18 + $0x520] sm:$0xff]  ;;  %v4210_v9 = vld [vmem:[%s16279_s18 + $0x948] sm:$0xff] }
 0xb6e   :  { %6020 = vmatmul.f32.vlgmr.msra.gmra.mxu1 %v12467_v16  ;;  %6053 = vmatpush.msrb.mxu3 %v5189_v21  ;;  %v4322_v55 = vld [vmem:[%s16279_s18 + $0xcc8] sm:$0xff]  ;;  %v3937_v21 = vld [vmem:[%s16279_s18 + $0xc0] sm:$0xff] }
 0xb6f   :  { %6084 = vmatpush.msrb.mxu1 %v4021_v4  ;;  %5997 = vmatpush.msrb.mxu0 %v4825_v12  ;;  %v4070_v4 = vld [vmem:[%s16279_s18 + $0x4e8] sm:$0xff]  ;;  %v4203_v12 = vld [vmem:[%s16279_s18 + $0x910] sm:$0xff] }
 0xb70   :  { %6037 = vmatpush.msra.mxu2 %v5049_v3  ;;  %6054 = vmatpush.msrb.mxu3 %v5182_v10  ;;  %v4315_v3 = vld [vmem:[%s16279_s18 + $0xc90] sm:$0xff]  ;;  %v3930_v10 = vld [vmem:[%s16279_s18 + $0x88] sm:$0xff] }
 0xb71   :  { %6085 = vmatpush.msrb.mxu1 %v4014_v19  ;;  %5998 = vmatpush.msrb.mxu0 %v4818_v5  ;;  %v4063_v19 = vld [vmem:[%s16279_s18 + $0x4b0] sm:$0xff]  ;;  %v4196_v5 = vld [vmem:[%s16279_s18 + $0x8d8] sm:$0xff] }
 0xb72   :  { %6038 = vmatpush.msra.mxu2 %v5042_v14  ;;  %6055 = vmatpush.msrb.mxu3 %v5175_v63  ;;  %v4308_v14 = vld [vmem:[%s16279_s18 + $0xc58] sm:$0xff]  ;;  %v3923_v63 = vld [vmem:[%s16279_s18 + $0x50] sm:$0xff] }
 0xb73   :  { %6086 = vmatpush.msrb.mxu1 %v4007_v1  ;;  %5999 = vmatpush.msrb.mxu0 %v4811_v39  ;;  %v4056_v1 = vld [vmem:[%s16279_s18 + $0x478] sm:$0xff]  ;;  %v4189_v39 = vld [vmem:[%s16279_s18 + $0x8a0] sm:$0xff] }
 0xb74   :  { %6000 = vmatmul.f32.vlgmr.msrb.gmra.mxu0 %v12423_v18  ;;  %6039 = vmatpush.msra.mxu2 %v5035_v49  ;;  %v4301_v49 = vld [vmem:[%s16279_s18 + $0xc20] sm:$0xff] }
 0xb75   :  { %6056 = vmatpush.msrb.mxu3 %v5168_v53  ;;  %6076 = vmatpush.msra.mxu0 %v5280_v6  ;;  %v3916_v53 = vld [vmem:[%s16279_s18 + $0x18] sm:$0xff]  ;;  %v4049_v6 = vld [vmem:[%s16279_s18 + $0x440] sm:$0xff] }
 0xb76   :  { %6087 = vmatpush.msrb.mxu1 %v4000_v36  ;;  %6040 = vmatmul.f32.vlgmr.msra.gmra.mxu2 %v12473_v51  ;;  %v4182_v36 = vld [vmem:[%s16279_s18 + $0x868] sm:$0xff] }
 0xb77   :  { %6104 = vmatpush.msrb.mxu2 %v4133_v58  ;;  %6057 = vmatpush.msrb.mxu3 %v5161_v31  ;;  %v4294_v58 = vld [vmem:[%s16279_s18 + $0xbe8] sm:$0xff]  ;;  %v4469_v31 = vld [vmem:[%s16279_s18 + $0x1160] sm:$0xff] }
 0xb78   :  { %6077 = vmatpush.msra.mxu0 %v5273_v62  ;;  %6088 = vmatpush.msrb.mxu1 %v3993_v17  ;;  %v4042_v62 = vld [vmem:[%s16279_s18 + $0x408] sm:$0xff]  ;;  %v4175_v17 = vld [vmem:[%s16279_s18 + $0x830] sm:$0xff] }
 0xb79   :  { %6105 = vmatpush.msrb.mxu2 %v4126_v57  ;;  %6058 = vmatpush.msrb.mxu3 %v5154_v23  ;;  %v4287_v57 = vld [vmem:[%s16279_s18 + $0xbb0] sm:$0xff]  ;;  %v4462_v23 = vld [vmem:[%s16279_s18 + $0x1128] sm:$0xff] }
 0xb7a   :  { %6078 = vmatpush.msra.mxu0 %v5266_v22  ;;  %6089 = vmatpush.msrb.mxu1 %v3986_v13  ;;  %v4035_v22 = vld [vmem:[%s16279_s18 + $0x3d0] sm:$0xff]  ;;  %v4168_v13 = vld [vmem:[%s16279_s18 + $0x7f8] sm:$0xff] }
 0xb7b   :  { %6106 = vmatpush.msrb.mxu2 %v4119_v2  ;;  %6059 = vmatpush.msrb.mxu3 %v5147_v37  ;;  %v4280_v2 = vld [vmem:[%s16279_s18 + $0xb78] sm:$0xff]  ;;  %v4455_v37 = vld [vmem:[%s16279_s18 + $0x10f0] sm:$0xff] }
 0xb7c   :  { %6079 = vmatpush.msra.mxu0 %v5259_v42  ;;  %6090 = vmatpush.msrb.mxu1 %v3979_v15  ;;  %v4028_v42 = vld [vmem:[%s16279_s18 + $0x398] sm:$0xff]  ;;  %v4161_v15 = vld [vmem:[%s16279_s18 + $0x7c0] sm:$0xff] }
 0xb7d   :  { %6060 = vmatmul.f32.vlgmr.msrb.gmra.mxu3 %v12429_v46  ;;  %6107 = vmatpush.msrb.mxu2 %v4112_v24  ;;  %v4273_v24 = vld [vmem:[%s16279_s18 + $0xb40] sm:$0xff] }
 0xb7e   :  { %6124 = vmatpush.msra.mxu3 %v4245_v28  ;;  %6144 = vmatpush.msrb.mxu0 %v4357_v33  ;;  %v4448_v28 = vld [vmem:[%s16279_s18 + $0x10b8] sm:$0xff]  ;;  %v4581_v33 = vld [vmem:[%s16279_s18 + $0x14e0] sm:$0xff] }
 0xb7f   :  { %7364 = vmatmul.msk.f32.vlgmr.msra.gmra.mxu0 %vm105_vm1, %v12493_v60  ;;  %6091 = vmatpush.msrb.mxu1 %v3972_v61  ;;  %v4154_v61 = vld [vmem:[%s16279_s18 + $0x788] sm:$0xff] }
 0xb80   :  { %6108 = vmatpush.msrb.mxu2 %v4105_v29  ;;  %6125 = vmatpush.msra.mxu3 %v4238_v34  ;;  %v4266_v29 = vld [vmem:[%s16279_s18 + $0xb08] sm:$0xff]  ;;  %v4441_v34 = vld [vmem:[%s16279_s18 + $0x1080] sm:$0xff] }
 0xb81   :  { %6145 = vmatpush.msrb.mxu0 %v4350_v48  ;;  %6092 = vmatpush.msrb.mxu1 %v3965_v52  ;;  %v4574_v48 = vld [vmem:[%s16279_s18 + $0x14a8] sm:$0xff]  ;;  %v4147_v52 = vld [vmem:[%s16279_s18 + $0x750] sm:$0xff] }
 0xb82   :  { %6109 = vmatpush.msrb.mxu2 %v4098_v56  ;;  %6126 = vmatpush.msra.mxu3 %v4231_v44  ;;  %v4259_v56 = vld [vmem:[%s16279_s18 + $0xad0] sm:$0xff]  ;;  %v4434_v44 = vld [vmem:[%s16279_s18 + $0x1048] sm:$0xff] }
 0xb83   :  { %6146 = vmatpush.msrb.mxu0 %v4343_v40  ;;  %6093 = vmatpush.msrb.mxu1 %v3958_v30  ;;  %v4567_v40 = vld [vmem:[%s16279_s18 + $0x1470] sm:$0xff]  ;;  %v4140_v30 = vld [vmem:[%s16279_s18 + $0x718] sm:$0xff] }
 0xb84   :  { %6110 = vmatpush.msrb.mxu2 %v4091_v41  ;;  %6127 = vmatpush.msra.mxu3 %v4224_v27  ;;  %v4252_v41 = vld [vmem:[%s16279_s18 + $0xa98] sm:$0xff]  ;;  %v4427_v27 = vld [vmem:[%s16279_s18 + $0x1010] sm:$0xff] }
 0xb85   :  { %6147 = vmatpush.msrb.mxu0 %v4336_v32  ;;  %6094 = vmatpush.msrb.mxu1 %v3951_v43  ;;  %v4560_v32 = vld [vmem:[%s16279_s18 + $0x1438] sm:$0xff]  ;;  %v4693_v43 = vld [vmem:[%s16279_s18 + $0x1860] sm:$0xff] }
 0xb86   :  { %6111 = vmatpush.msrb.mxu2 %v4084_v38  ;;  %6128 = vmatpush.msra.mxu3 %v4217_v8  ;;  %v4805_v38 = vld [vmem:[%s16279_s18 + $0x1be0] sm:$0xff]  ;;  %v4420_v8 = vld [vmem:[%s16279_s18 + $0xfd8] sm:$0xff] }
 0xb87   :  { %6148 = vmatpush.msrb.mxu0 %v4329_v59  ;;  %6095 = vmatpush.msrb.mxu1 %v3944_v25  ;;  %v4553_v59 = vld [vmem:[%s16279_s18 + $0x1400] sm:$0xff]  ;;  %v4686_v25 = vld [vmem:[%s16279_s18 + $0x1828] sm:$0xff] }
 0xb88   :  { %6112 = vmatpush.msrb.mxu2 %v4077_v11  ;;  %6129 = vmatpush.msra.mxu3 %v4210_v9  ;;  %v4798_v11 = vld [vmem:[%s16279_s18 + $0x1ba8] sm:$0xff]  ;;  %v4413_v9 = vld [vmem:[%s16279_s18 + $0xfa0] sm:$0xff] }
 0xb89   :  { %6149 = vmatpush.msrb.mxu0 %v4322_v55  ;;  %6096 = vmatpush.msrb.mxu1 %v3937_v21  ;;  %v4546_v55 = vld [vmem:[%s16279_s18 + $0x13c8] sm:$0xff]  ;;  %v4679_v21 = vld [vmem:[%s16279_s18 + $0x17f0] sm:$0xff] }
 0xb8a   :  { %6113 = vmatpush.msrb.mxu2 %v4070_v4  ;;  %6130 = vmatpush.msra.mxu3 %v4203_v12  ;;  %v4791_v4 = vld [vmem:[%s16279_s18 + $0x1b70] sm:$0xff]  ;;  %v4406_v12 = vld [vmem:[%s16279_s18 + $0xf68] sm:$0xff] }
 0xb8b   :  { %6150 = vmatpush.msrb.mxu0 %v4315_v3  ;;  %6097 = vmatpush.msrb.mxu1 %v3930_v10  ;;  %v4539_v3 = vld [vmem:[%s16279_s18 + $0x1390] sm:$0xff]  ;;  %v4672_v10 = vld [vmem:[%s16279_s18 + $0x17b8] sm:$0xff] }
 0xb8c   :  { %6114 = vmatpush.msrb.mxu2 %v4063_v19  ;;  %6131 = vmatpush.msra.mxu3 %v4196_v5  ;;  %v4784_v19 = vld [vmem:[%s16279_s18 + $0x1b38] sm:$0xff]  ;;  %v4399_v5 = vld [vmem:[%s16279_s18 + $0xf30] sm:$0xff] }
 0xb8d   :  { %6151 = vmatpush.msrb.mxu0 %v4308_v14  ;;  %6098 = vmatpush.msrb.mxu1 %v3923_v63  ;;  %v4532_v14 = vld [vmem:[%s16279_s18 + $0x1358] sm:$0xff]  ;;  %v4665_v63 = vld [vmem:[%s16279_s18 + $0x1780] sm:$0xff] }
 0xb8e   :  { %6115 = vmatpush.msrb.mxu2 %v4056_v1  ;;  %6132 = vmatpush.msra.mxu3 %v4189_v39  ;;  %v4777_v1 = vld [vmem:[%s16279_s18 + $0x1b00] sm:$0xff]  ;;  %v4392_v39 = vld [vmem:[%s16279_s18 + $0xef8] sm:$0xff] }
 0xb8f   :  { %6152 = vmatpush.msrb.mxu0 %v4301_v49  ;;  %6099 = vmatpush.msrb.mxu1 %v3916_v53  ;;  %v4525_v49 = vld [vmem:[%s16279_s18 + $0x1320] sm:$0xff]  ;;  %v4658_v53 = vld [vmem:[%s16279_s18 + $0x1748] sm:$0xff] }
 0xb90   :  { %6100 = vmatmul.f32.vlgmr.msrb.gmra.mxu1 %v12217_v35  ;;  %6116 = vmatpush.msrb.mxu2 %v4049_v6  ;;  %v4770_v6 = vld [vmem:[%s16279_s18 + $0x1ac8] sm:$0xff] }
 0xb91   :  { %6133 = vmatpush.msra.mxu3 %v4182_v36  ;;  %6153 = vmatpush.msrb.mxu0 %v4294_v58  ;;  %v4385_v36 = vld [vmem:[%s16279_s18 + $0xec0] sm:$0xff]  ;;  %v4518_v58 = vld [vmem:[%s16279_s18 + $0x12e8] sm:$0xff] }
 0xb92   :  { %6164 = vmatpush.msra.mxu1 %v4469_v31  ;;  %6117 = vmatpush.msrb.mxu2 %v4042_v62  ;;  %v4651_v31 = vld [vmem:[%s16279_s18 + $0x1710] sm:$0xff] }
 0xb93   :  { %6134 = vmatpush.msra.mxu3 %v4175_v17  ;;  %6154 = vmatpush.msrb.mxu0 %v4287_v57  ;;  %v4763_v62 = vld [vmem:[%s16279_s18 + $0x1a90] sm:$0xff]  ;;  %v4378_v17 = vld [vmem:[%s16279_s18 + $0xe88] sm:$0xff] }
 0xb94   :  { %6165 = vmatpush.msra.mxu1 %v4462_v23  ;;  %6118 = vmatpush.msrb.mxu2 %v4035_v22  ;;  %v4511_v57 = vld [vmem:[%s16279_s18 + $0x12b0] sm:$0xff]  ;;  %v4644_v23 = vld [vmem:[%s16279_s18 + $0x16d8] sm:$0xff] }
 0xb95   :  { %6135 = vmatpush.msra.mxu3 %v4168_v13  ;;  %6155 = vmatpush.msrb.mxu0 %v4280_v2  ;;  %v4756_v22 = vld [vmem:[%s16279_s18 + $0x1a58] sm:$0xff]  ;;  %v4371_v13 = vld [vmem:[%s16279_s18 + $0xe50] sm:$0xff] }
 0xb96   :  { %6166 = vmatpush.msra.mxu1 %v4455_v37  ;;  %6119 = vmatpush.msrb.mxu2 %v4028_v42  ;;  %v4504_v2 = vld [vmem:[%s16279_s18 + $0x1278] sm:$0xff]  ;;  %v4637_v37 = vld [vmem:[%s16279_s18 + $0x16a0] sm:$0xff] }
 0xb97   :  { %6136 = vmatpush.msra.mxu3 %v4161_v15  ;;  %6156 = vmatpush.msrb.mxu0 %v4273_v24  ;;  %v4749_v42 = vld [vmem:[%s16279_s18 + $0x1a20] sm:$0xff]  ;;  %v4364_v15 = vld [vmem:[%s16279_s18 + $0xe18] sm:$0xff] }
 0xb98   :  { %6167 = vmatpush.msra.mxu1 %v4448_v28  ;;  %6120 = vmatmul.f32.vlgmr.msrb.gmra.mxu2 %v12243_v26  ;;  %v4497_v24 = vld [vmem:[%s16279_s18 + $0x1240] sm:$0xff]  ;;  %v4630_v28 = vld [vmem:[%s16279_s18 + $0x1668] sm:$0xff] }
 0xb99   :  { %6184 = vmatpush.msra.mxu2 %v4581_v33  ;;  %6137 = vmatpush.msra.mxu3 %v4154_v61  ;;  %v4742_v33 = vld [vmem:[%s16279_s18 + $0x19e8] sm:$0xff]  ;;  %v4917_v61 = vld [vmem:[%s16279_s18 + $0x1f60] sm:$0xff] }
 0xb9a   :  { %6157 = vmatpush.msrb.mxu0 %v4266_v29  ;;  %6168 = vmatpush.msra.mxu1 %v4441_v34  ;;  %v4490_v29 = vld [vmem:[%s16279_s18 + $0x1208] sm:$0xff]  ;;  %v4623_v34 = vld [vmem:[%s16279_s18 + $0x1630] sm:$0xff] }
 0xb9b   :  { %6185 = vmatpush.msra.mxu2 %v4574_v48  ;;  %6138 = vmatpush.msra.mxu3 %v4147_v52  ;;  %v4735_v48 = vld [vmem:[%s16279_s18 + $0x19b0] sm:$0xff]  ;;  %v4910_v52 = vld [vmem:[%s16279_s18 + $0x1f28] sm:$0xff] }
 0xb9c   :  { %6158 = vmatpush.msrb.mxu0 %v4259_v56  ;;  %6169 = vmatpush.msra.mxu1 %v4434_v44  ;;  %v4483_v56 = vld [vmem:[%s16279_s18 + $0x11d0] sm:$0xff]  ;;  %v4616_v44 = vld [vmem:[%s16279_s18 + $0x15f8] sm:$0xff] }
 0xb9d   :  { %6186 = vmatpush.msra.mxu2 %v4567_v40  ;;  %6139 = vmatpush.msra.mxu3 %v4140_v30  ;;  %v4728_v40 = vld [vmem:[%s16279_s18 + $0x1978] sm:$0xff]  ;;  %v4903_v30 = vld [vmem:[%s16279_s18 + $0x1ef0] sm:$0xff] }
 0xb9e   :  { %6159 = vmatpush.msrb.mxu0 %v4252_v41  ;;  %6170 = vmatpush.msra.mxu1 %v4427_v27  ;;  %v4476_v41 = vld [vmem:[%s16279_s18 + $0x1198] sm:$0xff]  ;;  %v4609_v27 = vld [vmem:[%s16279_s18 + $0x15c0] sm:$0xff] }
 0xb9f   :  { %6140 = vmatmul.f32.vlgmr.msra.gmra.mxu3 %v12249_v7  ;;  %6160 = vmatmul.f32.vlgmr.msrb.gmra.mxu0 %v12223_v20 }
 0xba0   :  { %6187 = vmatpush.msra.mxu2 %v4560_v32  ;;  %6204 = vmatpush.msrb.mxu3 %v4693_v43  ;;  %v4721_v32 = vld [vmem:[%s16279_s18 + $0x1940] sm:$0xff]  ;;  %v4896_v43 = vld [vmem:[%s16279_s18 + $0x1eb8] sm:$0xff] }
 0xba1   :  { %6224 = vmatpush.msra.mxu0 %v4805_v38  ;;  %6171 = vmatpush.msra.mxu1 %v4420_v8  ;;  %v5029_v38 = vld [vmem:[%s16279_s18 + $0x22e0] sm:$0xff]  ;;  %v4602_v8 = vld [vmem:[%s16279_s18 + $0x1588] sm:$0xff] }
 0xba2   :  { %6188 = vmatpush.msra.mxu2 %v4553_v59  ;;  %6205 = vmatpush.msrb.mxu3 %v4686_v25  ;;  %v4714_v59 = vld [vmem:[%s16279_s18 + $0x1908] sm:$0xff]  ;;  %v4889_v25 = vld [vmem:[%s16279_s18 + $0x1e80] sm:$0xff] }
 0xba3   :  { %6225 = vmatpush.msra.mxu0 %v4798_v11  ;;  %6172 = vmatpush.msra.mxu1 %v4413_v9  ;;  %v5022_v11 = vld [vmem:[%s16279_s18 + $0x22a8] sm:$0xff]  ;;  %v4595_v9 = vld [vmem:[%s16279_s18 + $0x1550] sm:$0xff] }
 0xba4   :  { %6189 = vmatpush.msra.mxu2 %v4546_v55  ;;  %6206 = vmatpush.msrb.mxu3 %v4679_v21  ;;  %v4707_v55 = vld [vmem:[%s16279_s18 + $0x18d0] sm:$0xff]  ;;  %v4882_v21 = vld [vmem:[%s16279_s18 + $0x1e48] sm:$0xff] }
 0xba5   :  { %6226 = vmatpush.msra.mxu0 %v4791_v4  ;;  %6173 = vmatpush.msra.mxu1 %v4406_v12  ;;  %v5015_v4 = vld [vmem:[%s16279_s18 + $0x2270] sm:$0xff]  ;;  %v4588_v12 = vld [vmem:[%s16279_s18 + $0x1518] sm:$0xff] }
 0xba6   :  { %6190 = vmatpush.msra.mxu2 %v4539_v3  ;;  %6207 = vmatpush.msrb.mxu3 %v4672_v10  ;;  %v4700_v3 = vld [vmem:[%s16279_s18 + $0x1898] sm:$0xff]  ;;  %v4875_v10 = vld [vmem:[%s16279_s18 + $0x1e10] sm:$0xff] }
 0xba7   :  { %6227 = vmatpush.msra.mxu0 %v4784_v19  ;;  %6174 = vmatpush.msra.mxu1 %v4399_v5  ;;  %v5008_v19 = vld [vmem:[%s16279_s18 + $0x2238] sm:$0xff]  ;;  %v5141_v5 = vld [vmem:[%s16279_s18 + $0x2660] sm:$0xff] }
 0xba8   :  { %6191 = vmatpush.msra.mxu2 %v4532_v14  ;;  %6208 = vmatpush.msrb.mxu3 %v4665_v63  ;;  %v5253_v14 = vld [vmem:[%s16279_s18 + $0x29e0] sm:$0xff]  ;;  %v4868_v63 = vld [vmem:[%s16279_s18 + $0x1dd8] sm:$0xff] }
 0xba9   :  { %6228 = vmatpush.msra.mxu0 %v4777_v1  ;;  %6175 = vmatpush.msra.mxu1 %v4392_v39  ;;  %v5001_v1 = vld [vmem:[%s16279_s18 + $0x2200] sm:$0xff]  ;;  %v5134_v39 = vld [vmem:[%s16279_s18 + $0x2628] sm:$0xff] }
 0xbaa   :  { %6192 = vmatpush.msra.mxu2 %v4525_v49  ;;  %6209 = vmatpush.msrb.mxu3 %v4658_v53  ;;  %v5246_v49 = vld [vmem:[%s16279_s18 + $0x29a8] sm:$0xff]  ;;  %v4861_v53 = vld [vmem:[%s16279_s18 + $0x1da0] sm:$0xff] }
 0xbab   :  { %6229 = vmatpush.msra.mxu0 %v4770_v6  ;;  %6176 = vmatpush.msra.mxu1 %v4385_v36  ;;  %v4994_v6 = vld [vmem:[%s16279_s18 + $0x21c8] sm:$0xff]  ;;  %v5127_v36 = vld [vmem:[%s16279_s18 + $0x25f0] sm:$0xff] }
 0xbac   :  { %6193 = vmatpush.msra.mxu2 %v4518_v58  ;;  %6210 = vmatpush.msrb.mxu3 %v4651_v31  ;;  %v5239_v58 = vld [vmem:[%s16279_s18 + $0x2970] sm:$0xff]  ;;  %v4854_v31 = vld [vmem:[%s16279_s18 + $0x1d68] sm:$0xff] }
 0xbad   :  { %6230 = vmatpush.msra.mxu0 %v4763_v62  ;;  %6177 = vmatpush.msra.mxu1 %v4378_v17  ;;  %v4987_v62 = vld [vmem:[%s16279_s18 + $0x2190] sm:$0xff]  ;;  %v5120_v17 = vld [vmem:[%s16279_s18 + $0x25b8] sm:$0xff] }
 0xbae   :  { %6194 = vmatpush.msra.mxu2 %v4511_v57  ;;  %6211 = vmatpush.msrb.mxu3 %v4644_v23  ;;  %v5232_v57 = vld [vmem:[%s16279_s18 + $0x2938] sm:$0xff]  ;;  %v4847_v23 = vld [vmem:[%s16279_s18 + $0x1d30] sm:$0xff] }
 0xbaf   :  { %6231 = vmatpush.msra.mxu0 %v4756_v22  ;;  %6178 = vmatpush.msra.mxu1 %v4371_v13  ;;  %v4980_v22 = vld [vmem:[%s16279_s18 + $0x2158] sm:$0xff]  ;;  %v5113_v13 = vld [vmem:[%s16279_s18 + $0x2580] sm:$0xff] }
 0xbb0   :  { %6195 = vmatpush.msra.mxu2 %v4504_v2  ;;  %6212 = vmatpush.msrb.mxu3 %v4637_v37  ;;  %v5225_v2 = vld [vmem:[%s16279_s18 + $0x2900] sm:$0xff]  ;;  %v4840_v37 = vld [vmem:[%s16279_s18 + $0x1cf8] sm:$0xff] }
 0xbb1   :  { %6232 = vmatpush.msra.mxu0 %v4749_v42  ;;  %6179 = vmatpush.msra.mxu1 %v4364_v15  ;;  %v4973_v42 = vld [vmem:[%s16279_s18 + $0x2120] sm:$0xff]  ;;  %v5106_v15 = vld [vmem:[%s16279_s18 + $0x2548] sm:$0xff] }
 0xbb2   :  { %6180 = vmatmul.f32.vlgmr.msra.gmra.mxu1 %v12258_v47  ;;  %6196 = vmatpush.msra.mxu2 %v4497_v24  ;;  %v5218_v24 = vld [vmem:[%s16279_s18 + $0x28c8] sm:$0xff] }
 0xbb3   :  { %6213 = vmatpush.msrb.mxu3 %v4630_v28  ;;  %6233 = vmatpush.msra.mxu0 %v4742_v33  ;;  %v4833_v28 = vld [vmem:[%s16279_s18 + $0x1cc0] sm:$0xff]  ;;  %v4966_v33 = vld [vmem:[%s16279_s18 + $0x20e8] sm:$0xff] }
 0xbb4   :  { %6244 = vmatpush.msrb.mxu1 %v4917_v61  ;;  %6197 = vmatpush.msra.mxu2 %v4490_v29  ;;  %v5099_v61 = vld [vmem:[%s16279_s18 + $0x2510] sm:$0xff] }
 0xbb5   :  { %6214 = vmatpush.msrb.mxu3 %v4623_v34  ;;  %6234 = vmatpush.msra.mxu0 %v4735_v48  ;;  %v5211_v29 = vld [vmem:[%s16279_s18 + $0x2890] sm:$0xff]  ;;  %v4826_v34 = vld [vmem:[%s16279_s18 + $0x1c88] sm:$0xff] }
 0xbb6   :  { %6245 = vmatpush.msrb.mxu1 %v4910_v52  ;;  %6198 = vmatpush.msra.mxu2 %v4483_v56  ;;  %v4959_v48 = vld [vmem:[%s16279_s18 + $0x20b0] sm:$0xff]  ;;  %v5092_v52 = vld [vmem:[%s16279_s18 + $0x24d8] sm:$0xff] }
 0xbb7   :  { %6215 = vmatpush.msrb.mxu3 %v4616_v44  ;;  %6235 = vmatpush.msra.mxu0 %v4728_v40  ;;  %v5204_v56 = vld [vmem:[%s16279_s18 + $0x2858] sm:$0xff]  ;;  %v4819_v44 = vld [vmem:[%s16279_s18 + $0x1c50] sm:$0xff] }
 0xbb8   :  { %6246 = vmatpush.msrb.mxu1 %v4903_v30  ;;  %6199 = vmatpush.msra.mxu2 %v4476_v41  ;;  %v4952_v40 = vld [vmem:[%s16279_s18 + $0x2078] sm:$0xff]  ;;  %v5085_v30 = vld [vmem:[%s16279_s18 + $0x24a0] sm:$0xff] }
 0xbb9   :  { %6216 = vmatpush.msrb.mxu3 %v4609_v27  ;;  %6236 = vmatpush.msra.mxu0 %v4721_v32  ;;  %v5197_v41 = vld [vmem:[%s16279_s18 + $0x2820] sm:$0xff]  ;;  %v4812_v27 = vld [vmem:[%s16279_s18 + $0x1c18] sm:$0xff] }
 0xbba   :  { %6247 = vmatpush.msrb.mxu1 %v4896_v43  ;;  %6200 = vmatmul.f32.vlgmr.msra.gmra.mxu2 %v12298_v54  ;;  %v4945_v32 = vld [vmem:[%s16279_s18 + $0x2040] sm:$0xff]  ;;  %v5078_v43 = vld [vmem:[%s16279_s18 + $0x2468] sm:$0xff] }
 0xbbb   :  { %6264 = vmatpush.msrb.mxu2 %v5029_v38  ;;  %6217 = vmatpush.msrb.mxu3 %v4602_v8  ;;  %v5190_v38 = vld [vmem:[%s16279_s18 + $0x27e8] sm:$0xff]  ;;  %v5281_v8 = vld [vmem:[%s16279_s18 + $0x2ac0] sm:$0xff] }
 0xbbc   :  { %6237 = vmatpush.msra.mxu0 %v4714_v59  ;;  %6248 = vmatpush.msrb.mxu1 %v4889_v25  ;;  %v4938_v59 = vld [vmem:[%s16279_s18 + $0x2008] sm:$0xff]  ;;  %v5071_v25 = vld [vmem:[%s16279_s18 + $0x2430] sm:$0xff] }
 0xbbd   :  { %6265 = vmatpush.msrb.mxu2 %v5022_v11  ;;  %6218 = vmatpush.msrb.mxu3 %v4595_v9  ;;  %v5183_v11 = vld [vmem:[%s16279_s18 + $0x27b0] sm:$0xff]  ;;  %v5274_v9 = vld [vmem:[%s16279_s18 + $0x2a88] sm:$0xff] }
 0xbbe   :  { %6238 = vmatpush.msra.mxu0 %v4707_v55  ;;  %6249 = vmatpush.msrb.mxu1 %v4882_v21  ;;  %v4931_v55 = vld [vmem:[%s16279_s18 + $0x1fd0] sm:$0xff]  ;;  %v5064_v21 = vld [vmem:[%s16279_s18 + $0x23f8] sm:$0xff] }
 0xbbf   :  { %6266 = vmatpush.msrb.mxu2 %v5015_v4  ;;  %6219 = vmatpush.msrb.mxu3 %v4588_v12  ;;  %v5176_v4 = vld [vmem:[%s16279_s18 + $0x2778] sm:$0xff]  ;;  %v5267_v12 = vld [vmem:[%s16279_s18 + $0x2a50] sm:$0xff] }
 0xbc0   :  { %6239 = vmatpush.msra.mxu0 %v4700_v3  ;;  %6250 = vmatpush.msrb.mxu1 %v4875_v10  ;;  %v4924_v3 = vld [vmem:[%s16279_s18 + $0x1f98] sm:$0xff]  ;;  %v5057_v10 = vld [vmem:[%s16279_s18 + $0x23c0] sm:$0xff] }
 0xbc1   :  { %6220 = vmatmul.f32.vlgmr.msrb.gmra.mxu3 %v12307_v50  ;;  %6240 = vmatmul.f32.vlgmr.msra.gmra.mxu0 %v12265_v45 }
 0xbc2   :  { %6267 = vmatpush.msrb.mxu2 %v5008_v19  ;;  %6284 = vmatpush.msra.mxu3 %v5141_v5  ;;  %v5169_v19 = vld [vmem:[%s16279_s18 + $0x2740] sm:$0xff]  ;;  %v5260_v5 = vld [vmem:[%s16279_s18 + $0x2a18] sm:$0xff] }
 0xbc3   :  { %6304 = vmatpush.msrb.mxu0 %v5253_v14  ;;  %6251 = vmatpush.msrb.mxu1 %v4868_v63  ;;  %v4022_v14 = vld [vmem:[%s16279_s18 + $0x368] sm:$0xff] }
 0xbc4   :  { %6268 = vmatpush.msrb.mxu2 %v5001_v1  ;;  %6285 = vmatpush.msra.mxu3 %v5134_v39  ;;  %v4358_v63 = vld [vmem:[%s16279_s18 + $0xde8] sm:$0xff] }
 0xbc5   :  { %6305 = vmatpush.msrb.mxu0 %v5246_v49  ;;  %6252 = vmatpush.msrb.mxu1 %v4861_v53  ;;  %v5050_v1 = vld [vmem:[%s16279_s18 + $0x2388] sm:$0xff]  ;;  %v4015_v49 = vld [vmem:[%s16279_s18 + $0x330] sm:$0xff] }
 0xbc6   :  { %6269 = vmatpush.msrb.mxu2 %v4994_v6  ;;  %6286 = vmatpush.msra.mxu3 %v5127_v36  ;;  %v5162_v39 = vld [vmem:[%s16279_s18 + $0x2708] sm:$0xff]  ;;  %v4351_v53 = vld [vmem:[%s16279_s18 + $0xdb0] sm:$0xff] }
 0xbc7   :  { %6306 = vmatpush.msrb.mxu0 %v5239_v58  ;;  %6253 = vmatpush.msrb.mxu1 %v4854_v31  ;;  %v5043_v6 = vld [vmem:[%s16279_s18 + $0x2350] sm:$0xff]  ;;  %v4008_v58 = vld [vmem:[%s16279_s18 + $0x2f8] sm:$0xff] }
 0xbc8   :  { %6270 = vmatpush.msrb.mxu2 %v4987_v62  ;;  %6287 = vmatpush.msra.mxu3 %v5120_v17  ;;  %v5155_v36 = vld [vmem:[%s16279_s18 + $0x26d0] sm:$0xff]  ;;  %v4344_v31 = vld [vmem:[%s16279_s18 + $0xd78] sm:$0xff] }
 0xbc9   :  { %6307 = vmatpush.msrb.mxu0 %v5232_v57  ;;  %6254 = vmatpush.msrb.mxu1 %v4847_v23  ;;  %v5036_v62 = vld [vmem:[%s16279_s18 + $0x2318] sm:$0xff]  ;;  %v4001_v57 = vld [vmem:[%s16279_s18 + $0x2c0] sm:$0xff]  ;;  %v4134_v23 = vld [vmem:[%s16279_s18 + $0x6e8] sm:$0xff] }
 0xbca   :  { %6271 = vmatpush.msrb.mxu2 %v4980_v22  ;;  %6288 = vmatpush.msra.mxu3 %v5113_v13  ;;  %v5148_v17 = vld [vmem:[%s16279_s18 + $0x2698] sm:$0xff]  ;;  %v4246_v22 = vld [vmem:[%s16279_s18 + $0xa68] sm:$0xff]  ;;  %v4337_v13 = vld [vmem:[%s16279_s18 + $0xd40] sm:$0xff] }
 0xbcb   :  { %6308 = vmatpush.msrb.mxu0 %v5225_v2  ;;  %6255 = vmatpush.msrb.mxu1 %v4840_v37  ;;  %v3994_v2 = vld [vmem:[%s16279_s18 + $0x288] sm:$0xff]  ;;  %v4127_v37 = vld [vmem:[%s16279_s18 + $0x6b0] sm:$0xff] }
 0xbcc   :  { %6272 = vmatpush.msrb.mxu2 %v4973_v42  ;;  %6289 = vmatpush.msra.mxu3 %v5106_v15  ;;  %v4239_v42 = vld [vmem:[%s16279_s18 + $0xa30] sm:$0xff]  ;;  %v4330_v15 = vld [vmem:[%s16279_s18 + $0xd08] sm:$0xff] }
 0xbcd   :  { %6309 = vmatpush.msrb.mxu0 %v5218_v24  ;;  %6256 = vmatpush.msrb.mxu1 %v4833_v28  ;;  %v3987_v24 = vld [vmem:[%s16279_s18 + $0x250] sm:$0xff]  ;;  %v4120_v28 = vld [vmem:[%s16279_s18 + $0x678] sm:$0xff] }
 0xbce   :  { %6273 = vmatpush.msrb.mxu2 %v4966_v33  ;;  %6290 = vmatpush.msra.mxu3 %v5099_v61  ;;  %v4232_v33 = vld [vmem:[%s16279_s18 + $0x9f8] sm:$0xff]  ;;  %v4323_v61 = vld [vmem:[%s16279_s18 + $0xcd0] sm:$0xff] }
 0xbcf   :  { %6310 = vmatpush.msrb.mxu0 %v5211_v29  ;;  %6257 = vmatpush.msrb.mxu1 %v4826_v34  ;;  %v3980_v29 = vld [vmem:[%s16279_s18 + $0x218] sm:$0xff]  ;;  %v4113_v34 = vld [vmem:[%s16279_s18 + $0x640] sm:$0xff] }
 0xbd0   :  { %6274 = vmatpush.msrb.mxu2 %v4959_v48  ;;  %6291 = vmatpush.msra.mxu3 %v5092_v52  ;;  %v4225_v48 = vld [vmem:[%s16279_s18 + $0x9c0] sm:$0xff]  ;;  %v4316_v52 = vld [vmem:[%s16279_s18 + $0xc98] sm:$0xff] }
 0xbd1   :  { %6311 = vmatpush.msrb.mxu0 %v5204_v56  ;;  %6258 = vmatpush.msrb.mxu1 %v4819_v44  ;;  %v3973_v56 = vld [vmem:[%s16279_s18 + $0x1e0] sm:$0xff]  ;;  %v4106_v44 = vld [vmem:[%s16279_s18 + $0x608] sm:$0xff] }
 0xbd2   :  { %6275 = vmatpush.msrb.mxu2 %v4952_v40  ;;  %6292 = vmatpush.msra.mxu3 %v5085_v30  ;;  %v4218_v40 = vld [vmem:[%s16279_s18 + $0x988] sm:$0xff]  ;;  %v4309_v30 = vld [vmem:[%s16279_s18 + $0xc60] sm:$0xff] }
 0xbd3   :  { %6312 = vmatpush.msrb.mxu0 %v5197_v41  ;;  %6259 = vmatpush.msrb.mxu1 %v4812_v27  ;;  %v3966_v41 = vld [vmem:[%s16279_s18 + $0x1a8] sm:$0xff]  ;;  %v4099_v27 = vld [vmem:[%s16279_s18 + $0x5d0] sm:$0xff] }
 0xbd4   :  { %6260 = vmatmul.f32.vlgmr.msrb.gmra.mxu1 %v12423_v18  ;;  %6276 = vmatpush.msrb.mxu2 %v4945_v32  ;;  %v4211_v32 = vld [vmem:[%s16279_s18 + $0x950] sm:$0xff] }
 0xbd5   :  { %6293 = vmatpush.msra.mxu3 %v5078_v43  ;;  %6313 = vmatpush.msrb.mxu0 %v5190_v38  ;;  %v4302_v43 = vld [vmem:[%s16279_s18 + $0xc28] sm:$0xff]  ;;  %v3959_v38 = vld [vmem:[%s16279_s18 + $0x170] sm:$0xff] }
 0xbd6   :  { %6336 = vmatpush.msra.mxu1 %v5281_v8  ;;  %6277 = vmatpush.msrb.mxu2 %v4938_v59  ;;  %v4092_v8 = vld [vmem:[%s16279_s18 + $0x598] sm:$0xff] }
 0xbd7   :  { %6294 = vmatpush.msra.mxu3 %v5071_v25  ;;  %6314 = vmatpush.msrb.mxu0 %v5183_v11  ;;  %v4204_v59 = vld [vmem:[%s16279_s18 + $0x918] sm:$0xff]  ;;  %v4295_v25 = vld [vmem:[%s16279_s18 + $0xbf0] sm:$0xff] }
 0xbd8   :  { %6337 = vmatpush.msra.mxu1 %v5274_v9  ;;  %6278 = vmatpush.msrb.mxu2 %v4931_v55  ;;  %v3952_v11 = vld [vmem:[%s16279_s18 + $0x138] sm:$0xff]  ;;  %v4085_v9 = vld [vmem:[%s16279_s18 + $0x560] sm:$0xff] }
 0xbd9   :  { %6295 = vmatpush.msra.mxu3 %v5064_v21  ;;  %6315 = vmatpush.msrb.mxu0 %v5176_v4  ;;  %v4197_v55 = vld [vmem:[%s16279_s18 + $0x8e0] sm:$0xff]  ;;  %v4288_v21 = vld [vmem:[%s16279_s18 + $0xbb8] sm:$0xff] }
 0xbda   :  { %6338 = vmatpush.msra.mxu1 %v5267_v12  ;;  %6279 = vmatpush.msrb.mxu2 %v4924_v3  ;;  %v3945_v4 = vld [vmem:[%s16279_s18 + $0x100] sm:$0xff]  ;;  %v4078_v12 = vld [vmem:[%s16279_s18 + $0x528] sm:$0xff] }
 0xbdb   :  { %6296 = vmatpush.msra.mxu3 %v5057_v10  ;;  %6316 = vmatpush.msrb.mxu0 %v5169_v19  ;;  %v4190_v3 = vld [vmem:[%s16279_s18 + $0x8a8] sm:$0xff]  ;;  %v4281_v10 = vld [vmem:[%s16279_s18 + $0xb80] sm:$0xff] }
 0xbdc   :  { %6339 = vmatpush.msra.mxu1 %v5260_v5  ;;  %6280 = vmatmul.f32.vlgmr.msrb.gmra.mxu2 %v12467_v16  ;;  %v3938_v19 = vld [vmem:[%s16279_s18 + $0xc8] sm:$0xff]  ;;  %v4071_v5 = vld [vmem:[%s16279_s18 + $0x4f0] sm:$0xff] }
 0xbdd   :  { %6344 = vmatpush.msra.mxu2 %v4022_v14  ;;  %6297 = vmatpush.msra.mxu3 %v5050_v1  ;;  %v4183_v14 = vld [vmem:[%s16279_s18 + $0x870] sm:$0xff] }
 0xbde   :  { %6404 = vmatpush.msrb.mxu1 %v4358_v63  ;;  %6317 = vmatpush.msrb.mxu0 %v5162_v39  ;;  %v4274_v63 = vld [vmem:[%s16279_s18 + $0xb48] sm:$0xff]  ;;  %v3931_v1 = vld [vmem:[%s16279_s18 + $0x90] sm:$0xff]  ;;  %v4064_v39 = vld [vmem:[%s16279_s18 + $0x4b8] sm:$0xff] }
 0xbdf   :  { %7365 = vmatmul.msk.f32.vlgmr.msra.gmra.mxu1 %vm105_vm1, %v12493_v60  ;;  %6345 = vmatpush.msra.mxu2 %v4015_v49  ;;  %v4176_v49 = vld [vmem:[%s16279_s18 + $0x838] sm:$0xff] }
 0xbe0   :  { %6405 = vmatpush.msrb.mxu1 %v4351_v53  ;;  %6298 = vmatpush.msra.mxu3 %v5043_v6  ;;  %v4267_v53 = vld [vmem:[%s16279_s18 + $0xb10] sm:$0xff]  ;;  %v3924_v6 = vld [vmem:[%s16279_s18 + $0x58] sm:$0xff] }
 0xbe1   :  { %6318 = vmatpush.msrb.mxu0 %v5155_v36  ;;  %6346 = vmatpush.msra.mxu2 %v4008_v58  ;;  %v4057_v36 = vld [vmem:[%s16279_s18 + $0x480] sm:$0xff] }
 0xbe2   :  { %6406 = vmatpush.msrb.mxu1 %v4344_v31  ;;  %6299 = vmatpush.msra.mxu3 %v5036_v62  ;;  %v4169_v58 = vld [vmem:[%s16279_s18 + $0x800] sm:$0xff]  ;;  %v4260_v31 = vld [vmem:[%s16279_s18 + $0xad8] sm:$0xff] }
 0xbe3   :  { %6319 = vmatpush.msrb.mxu0 %v5148_v17  ;;  %6300 = vmatmul.f32.vlgmr.msra.gmra.mxu3 %v12473_v51  ;;  %v3917_v62 = vld [vmem:[%s16279_s18 + $0x20] sm:$0xff]  ;;  %v4050_v17 = vld [vmem:[%s16279_s18 + $0x448] sm:$0xff] }
 0xbe4   :  { %6320 = vmatmul.f32.vlgmr.msrb.gmra.mxu0 %v12429_v46  ;;  %6347 = vmatpush.msra.mxu2 %v4001_v57  ;;  %v4162_v57 = vld [vmem:[%s16279_s18 + $0x7c8] sm:$0xff] }
 0xbe5   :  { %6364 = vmatpush.msrb.mxu3 %v4134_v23  ;;  %6384 = vmatpush.msra.mxu0 %v4246_v22  ;;  %v4253_v23 = vld [vmem:[%s16279_s18 + $0xaa0] sm:$0xff]  ;;  %v4470_v22 = vld [vmem:[%s16279_s18 + $0x1168] sm:$0xff] }
 0xbe6   :  { %6407 = vmatpush.msrb.mxu1 %v4337_v13  ;;  %6348 = vmatpush.msra.mxu2 %v3994_v2  ;;  %v4806_v13 = vld [vmem:[%s16279_s18 + $0x1be8] sm:$0xff]  ;;  %v4043_v2 = vld [vmem:[%s16279_s18 + $0x410] sm:$0xff] }
 0xbe7   :  { %6365 = vmatpush.msrb.mxu3 %v4127_v37  ;;  %6385 = vmatpush.msra.mxu0 %v4239_v42  ;;  %v4155_v37 = vld [vmem:[%s16279_s18 + $0x790] sm:$0xff] }
 0xbe8   :  { %6408 = vmatpush.msrb.mxu1 %v4330_v15  ;;  %6349 = vmatpush.msra.mxu2 %v3987_v24  ;;  %v4463_v42 = vld [vmem:[%s16279_s18 + $0x1130] sm:$0xff]  ;;  %v4036_v24 = vld [vmem:[%s16279_s18 + $0x3d8] sm:$0xff] }
 0xbe9   :  { %6366 = vmatpush.msrb.mxu3 %v4120_v28  ;;  %6386 = vmatpush.msra.mxu0 %v4232_v33  ;;  %v4799_v15 = vld [vmem:[%s16279_s18 + $0x1bb0] sm:$0xff]  ;;  %v4148_v28 = vld [vmem:[%s16279_s18 + $0x758] sm:$0xff] }
 0xbea   :  { %6409 = vmatpush.msrb.mxu1 %v4323_v61  ;;  %6350 = vmatpush.msra.mxu2 %v3980_v29  ;;  %v4456_v33 = vld [vmem:[%s16279_s18 + $0x10f8] sm:$0xff]  ;;  %v4029_v29 = vld [vmem:[%s16279_s18 + $0x3a0] sm:$0xff] }
 0xbeb   :  { %6367 = vmatpush.msrb.mxu3 %v4113_v34  ;;  %6387 = vmatpush.msra.mxu0 %v4225_v48  ;;  %v4792_v61 = vld [vmem:[%s16279_s18 + $0x1b78] sm:$0xff]  ;;  %v4141_v34 = vld [vmem:[%s16279_s18 + $0x720] sm:$0xff] }
 0xbec   :  { %6410 = vmatpush.msrb.mxu1 %v4316_v52  ;;  %6351 = vmatpush.msra.mxu2 %v3973_v56  ;;  %v4449_v48 = vld [vmem:[%s16279_s18 + $0x10c0] sm:$0xff]  ;;  %v4582_v52 = vld [vmem:[%s16279_s18 + $0x14e8] sm:$0xff] }
 0xbed   :  { %6368 = vmatpush.msrb.mxu3 %v4106_v44  ;;  %6388 = vmatpush.msra.mxu0 %v4218_v40  ;;  %v4694_v56 = vld [vmem:[%s16279_s18 + $0x1868] sm:$0xff]  ;;  %v4785_v44 = vld [vmem:[%s16279_s18 + $0x1b40] sm:$0xff] }
 0xbee   :  { %6411 = vmatpush.msrb.mxu1 %v4309_v30  ;;  %6352 = vmatpush.msra.mxu2 %v3966_v41  ;;  %v4442_v40 = vld [vmem:[%s16279_s18 + $0x1088] sm:$0xff]  ;;  %v4575_v30 = vld [vmem:[%s16279_s18 + $0x14b0] sm:$0xff] }
 0xbef   :  { %6369 = vmatpush.msrb.mxu3 %v4099_v27  ;;  %6389 = vmatpush.msra.mxu0 %v4211_v32  ;;  %v4687_v41 = vld [vmem:[%s16279_s18 + $0x1830] sm:$0xff]  ;;  %v4778_v27 = vld [vmem:[%s16279_s18 + $0x1b08] sm:$0xff] }
 0xbf0   :  { %6412 = vmatpush.msrb.mxu1 %v4302_v43  ;;  %6353 = vmatpush.msra.mxu2 %v3959_v38  ;;  %v4435_v32 = vld [vmem:[%s16279_s18 + $0x1050] sm:$0xff]  ;;  %v4568_v43 = vld [vmem:[%s16279_s18 + $0x1478] sm:$0xff] }
 0xbf1   :  { %6370 = vmatpush.msrb.mxu3 %v4092_v8  ;;  %6390 = vmatpush.msra.mxu0 %v4204_v59  ;;  %v4680_v38 = vld [vmem:[%s16279_s18 + $0x17f8] sm:$0xff]  ;;  %v4771_v8 = vld [vmem:[%s16279_s18 + $0x1ad0] sm:$0xff] }
 0xbf2   :  { %6413 = vmatpush.msrb.mxu1 %v4295_v25  ;;  %6354 = vmatpush.msra.mxu2 %v3952_v11  ;;  %v4428_v59 = vld [vmem:[%s16279_s18 + $0x1018] sm:$0xff]  ;;  %v4561_v25 = vld [vmem:[%s16279_s18 + $0x1440] sm:$0xff] }
 0xbf3   :  { %6371 = vmatpush.msrb.mxu3 %v4085_v9  ;;  %6391 = vmatpush.msra.mxu0 %v4197_v55  ;;  %v4673_v11 = vld [vmem:[%s16279_s18 + $0x17c0] sm:$0xff]  ;;  %v4764_v9 = vld [vmem:[%s16279_s18 + $0x1a98] sm:$0xff] }
 0xbf4   :  { %6414 = vmatpush.msrb.mxu1 %v4288_v21  ;;  %6355 = vmatpush.msra.mxu2 %v3945_v4  ;;  %v4421_v55 = vld [vmem:[%s16279_s18 + $0xfe0] sm:$0xff]  ;;  %v4554_v21 = vld [vmem:[%s16279_s18 + $0x1408] sm:$0xff] }
 0xbf5   :  { %6372 = vmatpush.msrb.mxu3 %v4078_v12  ;;  %6392 = vmatpush.msra.mxu0 %v4190_v3  ;;  %v4666_v4 = vld [vmem:[%s16279_s18 + $0x1788] sm:$0xff]  ;;  %v4757_v12 = vld [vmem:[%s16279_s18 + $0x1a60] sm:$0xff] }
 0xbf6   :  { %6415 = vmatpush.msrb.mxu1 %v4281_v10  ;;  %6356 = vmatpush.msra.mxu2 %v3938_v19  ;;  %v4414_v3 = vld [vmem:[%s16279_s18 + $0xfa8] sm:$0xff]  ;;  %v4547_v10 = vld [vmem:[%s16279_s18 + $0x13d0] sm:$0xff] }
 0xbf7   :  { %6373 = vmatpush.msrb.mxu3 %v4071_v5  ;;  %6393 = vmatpush.msra.mxu0 %v4183_v14  ;;  %v4659_v19 = vld [vmem:[%s16279_s18 + $0x1750] sm:$0xff]  ;;  %v4750_v5 = vld [vmem:[%s16279_s18 + $0x1a28] sm:$0xff] }
 0xbf8   :  { %6416 = vmatpush.msrb.mxu1 %v4274_v63  ;;  %6357 = vmatpush.msra.mxu2 %v3931_v1  ;;  %v4407_v14 = vld [vmem:[%s16279_s18 + $0xf70] sm:$0xff]  ;;  %v4540_v63 = vld [vmem:[%s16279_s18 + $0x1398] sm:$0xff] }
 0xbf9   :  { %6374 = vmatpush.msrb.mxu3 %v4064_v39  ;;  %6394 = vmatpush.msra.mxu0 %v4176_v49  ;;  %v4652_v1 = vld [vmem:[%s16279_s18 + $0x1718] sm:$0xff]  ;;  %v4743_v39 = vld [vmem:[%s16279_s18 + $0x19f0] sm:$0xff] }
 0xbfa   :  { %6417 = vmatpush.msrb.mxu1 %v4267_v53  ;;  %6358 = vmatpush.msra.mxu2 %v3924_v6  ;;  %v4400_v49 = vld [vmem:[%s16279_s18 + $0xf38] sm:$0xff]  ;;  %v4533_v53 = vld [vmem:[%s16279_s18 + $0x1360] sm:$0xff] }
 0xbfb   :  { %6375 = vmatpush.msrb.mxu3 %v4057_v36  ;;  %6395 = vmatpush.msra.mxu0 %v4169_v58  ;;  %v4645_v6 = vld [vmem:[%s16279_s18 + $0x16e0] sm:$0xff]  ;;  %v4736_v36 = vld [vmem:[%s16279_s18 + $0x19b8] sm:$0xff] }
 0xbfc   :  { %6418 = vmatpush.msrb.mxu1 %v4260_v31  ;;  %6359 = vmatpush.msra.mxu2 %v3917_v62  ;;  %v4393_v58 = vld [vmem:[%s16279_s18 + $0xf00] sm:$0xff]  ;;  %v4526_v31 = vld [vmem:[%s16279_s18 + $0x1328] sm:$0xff] }
 0xbfd   :  { %6376 = vmatpush.msrb.mxu3 %v4050_v17  ;;  %6396 = vmatpush.msra.mxu0 %v4162_v57  ;;  %v4638_v62 = vld [vmem:[%s16279_s18 + $0x16a8] sm:$0xff]  ;;  %v4729_v17 = vld [vmem:[%s16279_s18 + $0x1980] sm:$0xff] }
 0xbfe   :  { %6419 = vmatpush.msrb.mxu1 %v4253_v23  ;;  %6360 = vmatmul.f32.vlgmr.msra.gmra.mxu2 %v12217_v35  ;;  %v4386_v57 = vld [vmem:[%s16279_s18 + $0xec8] sm:$0xff]  ;;  %v14609_v23 = vpop.f32.mrf.mxu3 }
 0xbff   :  { %6420 = vmatmul.f32.vlgmr.msrb.gmra.mxu1 %v12223_v20  ;;  %6424 = vmatpush.msrb.mxu2 %v4470_v22  ;;  %v4519_v22 = vld [vmem:[%s16279_s18 + $0x12f0] sm:$0xff] }
 0xc00   :  { %6484 = vmatpush.msra.mxu1 %v4806_v13  ;;  %6377 = vmatpush.msrb.mxu3 %v4043_v2  ;;  %v4631_v13 = vld [vmem:[%s16279_s18 + $0x1670] sm:$0xff]  ;;  %v4722_v2 = vld [vmem:[%s16279_s18 + $0x1948] sm:$0xff] }
 0xc01   :  { %6397 = vmatpush.msra.mxu0 %v4155_v37  ;;  %6425 = vmatpush.msrb.mxu2 %v4463_v42  ;;  %v4379_v37 = vld [vmem:[%s16279_s18 + $0xe90] sm:$0xff]  ;;  %v4512_v42 = vld [vmem:[%s16279_s18 + $0x12b8] sm:$0xff] }
 0xc02   :  { %6485 = vmatpush.msra.mxu1 %v4799_v15  ;;  %6378 = vmatpush.msrb.mxu3 %v4036_v24  ;;  %v4624_v15 = vld [vmem:[%s16279_s18 + $0x1638] sm:$0xff]  ;;  %v4715_v24 = vld [vmem:[%s16279_s18 + $0x1910] sm:$0xff] }
 0xc03   :  { %6398 = vmatpush.msra.mxu0 %v4148_v28  ;;  %6426 = vmatpush.msrb.mxu2 %v4456_v33  ;;  %v4372_v28 = vld [vmem:[%s16279_s18 + $0xe58] sm:$0xff]  ;;  %v14635_v33 = vpop.f32.mrf.mxu0 }
 0xc04   :  { %6486 = vmatpush.msra.mxu1 %v4792_v61  ;;  %6379 = vmatpush.msrb.mxu3 %v4029_v29  ;;  %v4505_v61 = vld [vmem:[%s16279_s18 + $0x1280] sm:$0xff] }
 0xc05   :  { %6399 = vmatpush.msra.mxu0 %v4141_v34  ;;  %6380 = vmatmul.f32.vlgmr.msrb.gmra.mxu3 %v12243_v26  ;;  %v4617_v29 = vld [vmem:[%s16279_s18 + $0x1600] sm:$0xff]  ;;  %v4708_v34 = vld [vmem:[%s16279_s18 + $0x18d8] sm:$0xff] }
 0xc06   :  { %6400 = vmatmul.f32.vlgmr.msra.gmra.mxu0 %v12249_v7  ;;  %6427 = vmatpush.msrb.mxu2 %v4449_v48  ;;  %v4365_v48 = vld [vmem:[%s16279_s18 + $0xe20] sm:$0xff] }
 0xc07   :  { %6444 = vmatpush.msra.mxu3 %v4582_v52  ;;  %6464 = vmatpush.msrb.mxu0 %v4694_v56  ;;  %v14649_v52 = vpop.f32.mrf.mxu1  ;;  %v4498_v56 = vld [vmem:[%s16279_s18 + $0x1248] sm:$0xff] }
 0xc08   :  { %6487 = vmatpush.msra.mxu1 %v4785_v44  ;;  %6428 = vmatpush.msrb.mxu2 %v4442_v40  ;;  %v4610_v44 = vld [vmem:[%s16279_s18 + $0x15c8] sm:$0xff]  ;;  %v4701_v40 = vld [vmem:[%s16279_s18 + $0x18a0] sm:$0xff] }
 0xc09   :  { %6445 = vmatpush.msra.mxu3 %v4575_v30  ;;  %6465 = vmatpush.msrb.mxu0 %v4687_v41  ;;  %v14660_v30 = vpop.f32.mrf.mxu2  ;;  %v14662_v41 = vpop.f32.mrf.mxu3 }
 0xc0a   :  { %6488 = vmatpush.msra.mxu1 %v4778_v27  ;;  %6429 = vmatpush.msrb.mxu2 %v4435_v32  ;;  %v4918_v27 = vld [vmem:[%s16279_s18 + $0x1f68] sm:$0xff] }
 0xc0b   :  { %6446 = vmatpush.msra.mxu3 %v4568_v43  ;;  %6466 = vmatpush.msrb.mxu0 %v4680_v38  ;;  %v5254_v32 = vld [vmem:[%s16279_s18 + $0x29e8] sm:$0xff]  ;;  %v4491_v43 = vld [vmem:[%s16279_s18 + $0x1210] sm:$0xff] }
 0xc0c   :  { %6489 = vmatpush.msra.mxu1 %v4771_v8  ;;  %6430 = vmatpush.msrb.mxu2 %v4428_v59  ;;  %v4603_v38 = vld [vmem:[%s16279_s18 + $0x1590] sm:$0xff] }
 0xc0d   :  { %6447 = vmatpush.msra.mxu3 %v4561_v25  ;;  %6467 = vmatpush.msrb.mxu0 %v4673_v11  ;;  %v4911_v8 = vld [vmem:[%s16279_s18 + $0x1f30] sm:$0xff]  ;;  %v4484_v25 = vld [vmem:[%s16279_s18 + $0x11d8] sm:$0xff]  ;;  %v14687_v11 = vpop.f32.mrf.mxu0 }
 0xc0e   :  { %6490 = vmatpush.msra.mxu1 %v4764_v9  ;;  %6431 = vmatpush.msrb.mxu2 %v4421_v55  ;;  %v5247_v59 = vld [vmem:[%s16279_s18 + $0x29b0] sm:$0xff]  ;;  %v4596_v9 = vld [vmem:[%s16279_s18 + $0x1558] sm:$0xff] }
 0xc0f   :  { %6448 = vmatpush.msra.mxu3 %v4554_v21  ;;  %6468 = vmatpush.msrb.mxu0 %v4666_v4  ;;  %v4904_v55 = vld [vmem:[%s16279_s18 + $0x1ef8] sm:$0xff]  ;;  %v14698_v21 = vld [vmem:[%s16280_s19] sm:$0x7f] }
 0xc10   :  { %6491 = vmatpush.msra.mxu1 %v4757_v12  ;;  %6432 = vmatpush.msrb.mxu2 %v4414_v3  ;;  %v5288_v4 = vperm.slane %v14698_v21, 1  ;;  %v5240_v12 = vld [vmem:[%s16279_s18 + $0x2978] sm:$0xff]  ;;  %v4477_v3 = vld [vmem:[%s16279_s18 + $0x11a0] sm:$0xff] }
 0xc11   :  { %6449 = vmatpush.msra.mxu3 %v4547_v10  ;;  %6469 = vmatpush.msrb.mxu0 %v4659_v19  ;;  %v14707_v10 = vpop.f32.mrf.mxu1  ;;  %v4589_v19 = vld [vmem:[%s16279_s18 + $0x1520] sm:$0xff] }
 0xc12   :  { %6492 = vmatpush.msra.mxu1 %v4750_v5  ;;  %6433 = vmatpush.msrb.mxu2 %v4407_v14  ;;  %v4897_v5 = vld [vmem:[%s16279_s18 + $0x1ec0] sm:$0xff]  ;;  %v14715_v14 = vpop.f32.mrf.mxu2 }
 0xc13   :  { %6450 = vmatpush.msra.mxu3 %v4540_v63  ;;  %6470 = vmatpush.msrb.mxu0 %v4652_v1  ;;  %v14717_v63 = vpop.f32.mrf.mxu3  ;;  %v5030_v1 = vld [vmem:[%s16279_s18 + $0x22e8] sm:$0xff] }
 0xc14   :  { %6493 = vmatpush.msra.mxu1 %v4743_v39  ;;  %6434 = vmatpush.msrb.mxu2 %v4400_v49  ;;  %v5142_v39 = vld [vmem:[%s16279_s18 + $0x2668] sm:$0xff]  ;;  %v5582_v49 = vadd.f32 %v14609_v23, %v5288_v4  ;;  %v5128_v23 = vld [vmem:[%s16279_s18 + $0x25f8] sm:$0xff] }
 0xc15   :  { %6451 = vmatpush.msra.mxu3 %v4533_v53  ;;  %6471 = vmatpush.msrb.mxu0 %v4645_v6  ;;  %v5233_v53 = vld [vmem:[%s16279_s18 + $0x2940] sm:$0xff]  ;;  %v4890_v6 = vld [vmem:[%s16279_s18 + $0x1e88] sm:$0xff] }
 0xc16   :  { %6494 = vmatpush.msra.mxu1 %v4736_v36  ;;  %6435 = vmatpush.msrb.mxu2 %v4393_v58  ;;  %v5023_v36 = vld [vmem:[%s16279_s18 + $0x22b0] sm:$0xff] }
 0xc17   :  { %6452 = vmatpush.msra.mxu3 %v4526_v31  ;;  %6472 = vmatpush.msrb.mxu0 %v4638_v62  ;;  %v5135_v58 = vld [vmem:[%s16279_s18 + $0x2630] sm:$0xff]  ;;  %v5226_v31 = vld [vmem:[%s16279_s18 + $0x2908] sm:$0xff] }
 0xc18   :  { %6495 = vmatpush.msra.mxu1 %v4729_v17  ;;  %6436 = vmatpush.msrb.mxu2 %v4386_v57  ;;  %v4883_v62 = vld [vmem:[%s16279_s18 + $0x1e50] sm:$0xff]  ;;  %v14746_v17 = vpop.f32.mrf.mxu0  ;;  %v5016_v57 = vld [vmem:[%s16279_s18 + $0x2278] sm:$0xff] }
 0xc19   :  { %6453 = vmatpush.msra.mxu3 %v4519_v22  ;;  %6473 = vmatpush.msrb.mxu0 %v4631_v13  ;;  %v5602_v22 = vadd.f32 %v14635_v33, %v5582_v49  ;;  %v5219_v13 = vld [vmem:[%s16279_s18 + $0x28d0] sm:$0xff]  ;;  %v4974_v49 = vld [vmem:[%s16279_s18 + $0x2128] sm:$0xff] }
 0xc1a   :  { %6496 = vmatpush.msra.mxu1 %v4722_v2  ;;  %6437 = vmatpush.msrb.mxu2 %v4379_v37  ;;  %v4876_v2 = vld [vmem:[%s16279_s18 + $0x1e18] sm:$0xff]  ;;  %v14761_v37 = vpop.f32.mrf.mxu1  ;;  %v14775_v33 = vpop.f32.mrf.mxu2 }
 0xc1b   :  { %6454 = vmatpush.msra.mxu3 %v4512_v42  ;;  %6474 = vmatpush.msrb.mxu0 %v4624_v15  ;;  %v5009_v42 = vld [vmem:[%s16279_s18 + $0x2240] sm:$0xff] }
 0xc1c   :  { %6497 = vmatpush.msra.mxu1 %v4715_v24  ;;  %6438 = vmatpush.msrb.mxu2 %v4372_v28  ;;  %v5121_v15 = vld [vmem:[%s16279_s18 + $0x25c0] sm:$0xff]  ;;  %v5212_v24 = vld [vmem:[%s16279_s18 + $0x2898] sm:$0xff] }
 0xc1d   :  { %6455 = vmatpush.msra.mxu3 %v4505_v61  ;;  %6475 = vmatpush.msrb.mxu0 %v4617_v29  ;;  %v4869_v28 = vld [vmem:[%s16279_s18 + $0x1de0] sm:$0xff]  ;;  %v5002_v61 = vld [vmem:[%s16279_s18 + $0x2208] sm:$0xff] }
 0xc1e   :  { %6498 = vmatpush.msra.mxu1 %v4708_v34  ;;  %6439 = vmatpush.msrb.mxu2 %v4365_v48  ;;  %v5114_v29 = vld [vmem:[%s16279_s18 + $0x2588] sm:$0xff]  ;;  %v5622_v34 = vadd.f32 %v14649_v52, %v5602_v22  ;;  %v5205_v48 = vld [vmem:[%s16279_s18 + $0x2860] sm:$0xff]  ;;  %v5107_v52 = vld [vmem:[%s16279_s18 + $0x2550] sm:$0xff] }
 0xc1f   :  { %6456 = vmatpush.msra.mxu3 %v4498_v56  ;;  %6476 = vmatpush.msrb.mxu0 %v4610_v44  ;;  %v4862_v56 = vld [vmem:[%s16279_s18 + $0x1da8] sm:$0xff]  ;;  %v14790_v44 = vpop.f32.mrf.mxu3  ;;  %v4827_v22 = vld [vmem:[%s16279_s18 + $0x1c90] sm:$0xff] }
 0xc20   :  { %6499 = vmatpush.msra.mxu1 %v4701_v40  ;;  %6440 = vmatmul.f32.vlgmr.msrb.gmra.mxu2 %v12258_v47  ;;  %v4995_v40 = vld [vmem:[%s16279_s18 + $0x21d0] sm:$0xff] }
 0xc21   :  { %6500 = vmatmul.f32.vlgmr.msra.gmra.mxu1 %v12265_v45  ;;  %6504 = vmatpush.msra.mxu2 %v4918_v27  ;;  %v5289_v27 = vperm.slane %v14698_v21, 2 }
 0xc22   :  { %6564 = vmatpush.msrb.mxu1 %v5254_v32  ;;  %6457 = vmatpush.msra.mxu3 %v4491_v43  ;;  %v5198_v32 = vld [vmem:[%s16279_s18 + $0x2828] sm:$0xff]  ;;  %v4855_v43 = vld [vmem:[%s16279_s18 + $0x1d70] sm:$0xff]  ;;  %v5861_v4 = vpop.f32.mrf.mxu1 }
 0xc23   :  { %6477 = vmatpush.msrb.mxu0 %v4603_v38  ;;  %6505 = vmatpush.msra.mxu2 %v4911_v8  ;;  %v5841_v38 = vpop.f32.mrf.mxu0  ;;  %v4988_v8 = vld [vmem:[%s16279_s18 + $0x2198] sm:$0xff] }
 0xc24   :  { %6565 = vmatpush.msrb.mxu1 %v5247_v59  ;;  %6458 = vmatpush.msra.mxu3 %v4484_v25  ;;  %v5100_v59 = vld [vmem:[%s16279_s18 + $0x2518] sm:$0xff]  ;;  %v5642_v25 = vadd.f32 %v14660_v30, %v5622_v34  ;;  %v5093_v30 = vld [vmem:[%s16279_s18 + $0x24e0] sm:$0xff] }
 0xc25   :  { %6478 = vmatpush.msrb.mxu0 %v4596_v9  ;;  %6506 = vmatpush.msra.mxu2 %v4904_v55  ;;  %v5191_v9 = vld [vmem:[%s16279_s18 + $0x27f0] sm:$0xff]  ;;  %v4848_v55 = vld [vmem:[%s16279_s18 + $0x1d38] sm:$0xff] }
 0xc26   :  { %6566 = vmatpush.msrb.mxu1 %v5240_v12  ;;  %6459 = vmatpush.msra.mxu3 %v4477_v3  ;;  %v4981_v12 = vld [vmem:[%s16279_s18 + $0x2160] sm:$0xff]  ;;  %v5662_v3 = vadd.f32 %v14662_v41, %v5642_v25  ;;  %v5086_v41 = vld [vmem:[%s16279_s18 + $0x24a8] sm:$0xff]  ;;  %v4247_v25 = vld [vmem:[%s16279_s18 + $0xa70] sm:$0xff] }
 0xc27   :  { %6479 = vmatpush.msrb.mxu0 %v4589_v19  ;;  %6460 = vmatmul.f32.vlgmr.msra.gmra.mxu3 %v12298_v54  ;;  %v5842_v19 = vadd.f32 %v5841_v38, %v5289_v27  ;;  %v4946_v27 = vld [vmem:[%s16279_s18 + $0x2048] sm:$0xff] }
 0xc28   :  { %6480 = vmatmul.f32.vlgmr.msrb.gmra.mxu0 %v12307_v50  ;;  %6507 = vmatpush.msra.mxu2 %v4897_v5  ;;  %v5184_v5 = vld [vmem:[%s16279_s18 + $0x27b8] sm:$0xff] }
 0xc29   :  { %6524 = vmatpush.msrb.mxu3 %v5030_v1  ;;  %6544 = vmatpush.msra.mxu0 %v5142_v39  ;;  %v4841_v1 = vld [vmem:[%s16279_s18 + $0x1d00] sm:$0xff]  ;;  %v5881_v39 = vpop.f32.mrf.mxu2 }
 0xc2a   :  { %6567 = vmatpush.msrb.mxu1 %v5233_v53  ;;  %6508 = vmatpush.msra.mxu2 %v4890_v6  ;;  %v5177_v53 = vld [vmem:[%s16279_s18 + $0x2780] sm:$0xff]  ;;  %v4834_v6 = vld [vmem:[%s16279_s18 + $0x1cc8] sm:$0xff] }
 0xc2b   :  { %6525 = vmatpush.msrb.mxu3 %v5023_v36  ;;  %6545 = vmatpush.msra.mxu0 %v5135_v58  ;;  %v5901_v36 = vpop.f32.mrf.mxu3  ;;  %v4967_v58 = vld [vmem:[%s16279_s18 + $0x20f0] sm:$0xff] }
 0xc2c   :  { %6568 = vmatpush.msrb.mxu1 %v5226_v31  ;;  %6509 = vmatpush.msra.mxu2 %v4883_v62  ;;  %v5079_v31 = vld [vmem:[%s16279_s18 + $0x2470] sm:$0xff]  ;;  %v5682_v62 = vadd.f32 %v14687_v11, %v5662_v3  ;;  %v5072_v11 = vld [vmem:[%s16279_s18 + $0x2438] sm:$0xff] }
 0xc2d   :  { %6526 = vmatpush.msrb.mxu3 %v5016_v57  ;;  %6546 = vmatpush.msra.mxu0 %v5128_v23  ;;  %v5862_v57 = vadd.f32 %v5861_v4, %v5842_v19  ;;  %v5170_v23 = vld [vmem:[%s16279_s18 + $0x2748] sm:$0xff]  ;;  %v4932_v3 = vld [vmem:[%s16279_s18 + $0x1fd8] sm:$0xff] }
 0xc2e   :  { %6569 = vmatpush.msrb.mxu1 %v5219_v13  ;;  %6510 = vmatpush.msra.mxu2 %v4876_v2  ;;  %v4960_v13 = vld [vmem:[%s16279_s18 + $0x20b8] sm:$0xff]  ;;  %v5702_v34 = vadd.f32 %v14707_v10, %v5682_v62  ;;  %v5058_v10 = vld [vmem:[%s16279_s18 + $0x23c8] sm:$0xff] }
 0xc2f   :  { %6527 = vmatpush.msrb.mxu3 %v5009_v42  ;;  %6547 = vmatpush.msra.mxu0 %v5121_v15  ;;  %v5882_v2 = vadd.f32 %v5881_v39, %v5862_v57  ;;  %v5163_v42 = vld [vmem:[%s16279_s18 + $0x2710] sm:$0xff]  ;;  %v4820_v15 = vld [vmem:[%s16279_s18 + $0x1c58] sm:$0xff] }
 0xc30   :  { %6570 = vmatpush.msrb.mxu1 %v5212_v24  ;;  %6511 = vmatpush.msra.mxu2 %v4869_v28  ;;  %v5941_v24 = vpop.f32.mrf.mxu1  ;;  %v5921_v28 = vpop.f32.mrf.mxu0  ;;  %v4023_v57 = vld [vmem:[%s16279_s18 + $0x370] sm:$0xff] }
 0xc31   :  { %6528 = vmatpush.msrb.mxu3 %v5002_v61  ;;  %6548 = vmatpush.msra.mxu0 %v5114_v29  ;;  %v4953_v61 = vld [vmem:[%s16279_s18 + $0x2080] sm:$0xff] }
 0xc32   :  { %6571 = vmatpush.msrb.mxu1 %v5205_v48  ;;  %6512 = vmatpush.msra.mxu2 %v4862_v56  ;;  %v5065_v29 = vld [vmem:[%s16279_s18 + $0x2400] sm:$0xff]  ;;  %v5902_v48 = vadd.f32 %v5901_v36, %v5882_v2  ;;  %v5156_v56 = vld [vmem:[%s16279_s18 + $0x26d8] sm:$0xff] }
 0xc33   :  { %6529 = vmatpush.msrb.mxu3 %v4995_v40  ;;  %6549 = vmatpush.msra.mxu0 %v5107_v52  ;;  %v4813_v40 = vld [vmem:[%s16279_s18 + $0x1c20] sm:$0xff]  ;;  %v5961_v52 = vpop.f32.mrf.mxu2  ;;  %v5981_v38 = vpop.f32.mrf.mxu3 }
 0xc34   :  { %6572 = vmatpush.msrb.mxu1 %v5198_v32  ;;  %6513 = vmatpush.msra.mxu2 %v4855_v43  ;;  %v5922_v32 = vadd.f32 %v5921_v28, %v5902_v48  ;;  %v5149_v43 = vld [vmem:[%s16279_s18 + $0x26a0] sm:$0xff] }
 0xc35   :  { %6530 = vmatpush.msrb.mxu3 %v4988_v8  ;;  %6550 = vmatpush.msra.mxu0 %v5100_v59  ;;  %v5282_v8 = vld [vmem:[%s16279_s18 + $0x2ac8] sm:$0xff]  ;;  %v5722_v59 = vadd.f32 %v14715_v14, %v5702_v34  ;;  %v5275_v14 = vld [vmem:[%s16279_s18 + $0x2a90] sm:$0xff]  ;;  %v4212_v34 = vld [vmem:[%s16279_s18 + $0x958] sm:$0xff] }
 0xc36   :  { %6573 = vmatpush.msrb.mxu1 %v5191_v9  ;;  %6514 = vmatpush.msra.mxu2 %v4848_v55  ;;  %v4939_v9 = vld [vmem:[%s16279_s18 + $0x2010] sm:$0xff] }
 0xc37   :  { %6531 = vmatpush.msrb.mxu3 %v4981_v12  ;;  %6551 = vmatpush.msra.mxu0 %v5093_v30  ;;  %v5051_v55 = vld [vmem:[%s16279_s18 + $0x2390] sm:$0xff]  ;;  %v5742_v4 = vadd.f32 %v14717_v63, %v5722_v59  ;;  %v5942_v12 = vadd.f32 %v5941_v24, %v5922_v32  ;;  %v4240_v30 = vld [vmem:[%s16279_s18 + $0xa38] sm:$0xff]  ;;  %v4338_v59 = vld [vmem:[%s16279_s18 + $0xd48] sm:$0xff] }
 0xc38   :  { %6574 = vmatpush.msrb.mxu1 %v5184_v5  ;;  %6515 = vmatpush.msra.mxu2 %v4841_v1  ;;  %v6021_v19 = vpop.f32.mrf.mxu1  ;;  %v6001_v5 = vpop.f32.mrf.mxu0  ;;  %v5044_v63 = vld [vmem:[%s16279_s18 + $0x2358] sm:$0xff]  ;;  %v4219_v24 = vld [vmem:[%s16279_s18 + $0x990] sm:$0xff] }
 0xc39   :  { %6532 = vmatpush.msrb.mxu3 %v4974_v49  ;;  %6552 = vmatpush.msra.mxu0 %v5086_v41  ;;  %v5268_v1 = vld [vmem:[%s16279_s18 + $0x2a58] sm:$0xff]  ;;  %v5962_v39 = vadd.f32 %v5961_v52, %v5942_v12  ;;  %v4233_v49 = vld [vmem:[%s16279_s18 + $0xa00] sm:$0xff]  ;;  %v5762_v36 = vadd.f32 %v14746_v17, %v5742_v4  ;;  %v4226_v17 = vld [vmem:[%s16279_s18 + $0x9c8] sm:$0xff] }
 0xc3a   :  { %6575 = vmatpush.msrb.mxu1 %v5177_v53  ;;  %6516 = vmatpush.msra.mxu2 %v4834_v6  ;;  %v4925_v41 = vld [vmem:[%s16279_s18 + $0x1fa0] sm:$0xff]  ;;  %v4002_v52 = vld [vmem:[%s16279_s18 + $0x2c8] sm:$0xff]  ;;  %v4331_v4 = vld [vmem:[%s16279_s18 + $0xd10] sm:$0xff] }
 0xc3b   :  { %6533 = vmatpush.msrb.mxu3 %v4967_v58  ;;  %6553 = vmatpush.msra.mxu0 %v5079_v31  ;;  %v6041_v53 = vpop.f32.mrf.mxu2  ;;  %v5037_v6 = vld [vmem:[%s16279_s18 + $0x2320] sm:$0xff]  ;;  %v5982_v58 = vadd.f32 %v5981_v38, %v5962_v39  ;;  %v6061_v62 = vpop.f32.mrf.mxu3  ;;  %v5782_v2 = vadd.f32 %v14761_v37, %v5762_v36  ;;  %v3988_v12 = vld [vmem:[%s16279_s18 + $0x258] sm:$0xff]  ;;  %v3974_v36 = vld [vmem:[%s16279_s18 + $0x1e8] sm:$0xff] }
 0xc3c   :  { %6576 = vmatpush.msrb.mxu1 %v5170_v23  ;;  %6517 = vmatpush.msra.mxu2 %v4827_v22  ;;  %v5261_v31 = vld [vmem:[%s16279_s18 + $0x2a20] sm:$0xff]  ;;  %v4135_v23 = vld [vmem:[%s16279_s18 + $0x6f0] sm:$0xff] }
 0xc3d   :  { %6534 = vmatpush.msrb.mxu3 %v4960_v13  ;;  %6554 = vmatpush.msra.mxu0 %v5072_v11  ;;  %v6002_v22 = vadd.f32 %v6001_v5, %v5982_v58  ;;  %v4359_v13 = vld [vmem:[%s16279_s18 + $0xdf0] sm:$0xff]  ;;  %v4016_v11 = vld [vmem:[%s16279_s18 + $0x338] sm:$0xff]  ;;  %v4205_v38 = vld [vmem:[%s16279_s18 + $0x920] sm:$0xff] }
 0xc3e   :  { %6577 = vmatpush.msrb.mxu1 %v5163_v42  ;;  %6518 = vmatpush.msra.mxu2 %v4820_v15  ;;  %v5290_v42 = vperm.slane %v14698_v21, 3  ;;  %v4128_v15 = vld [vmem:[%s16279_s18 + $0x6b8] sm:$0xff]  ;;  %v4009_v21 = vld [vmem:[%s16279_s18 + $0x300] sm:$0xff]  ;;  %v4191_v5 = vld [vmem:[%s16279_s18 + $0x8b0] sm:$0xff] }
 0xc3f   :  { %6535 = vmatpush.msrb.mxu3 %v4953_v61  ;;  %6555 = vmatpush.msra.mxu0 %v5065_v29  ;;  %v4352_v61 = vld [vmem:[%s16279_s18 + $0xdb8] sm:$0xff]  ;;  %v6022_v37 = vadd.f32 %v6021_v19, %v6002_v22  ;;  %v4121_v29 = vld [vmem:[%s16279_s18 + $0x680] sm:$0xff]  ;;  %v4310_v22 = vld [vmem:[%s16279_s18 + $0xc68] sm:$0xff] }
 0xc40   :  { %6578 = vmatpush.msrb.mxu1 %v5156_v56  ;;  %6519 = vmatpush.msra.mxu2 %v4813_v40  ;;  %v6101_v28 = vpop.f32.mrf.mxu1  ;;  %v6081_v48 = vpop.f32.mrf.mxu0  ;;  %v4345_v40 = vld [vmem:[%s16279_s18 + $0xd80] sm:$0xff]  ;;  %v4100_v19 = vld [vmem:[%s16279_s18 + $0x5d8] sm:$0xff] }
 0xc41   :  { %6536 = vmatpush.msrb.mxu3 %v4946_v27  ;;  %6556 = vmatpush.msra.mxu0 %v5058_v10  ;;  %v5802_v27 = vadd.f32 %v14775_v33, %v5782_v2  ;;  %v6042_v10 = vadd.f32 %v6041_v53, %v6022_v37  ;;  %v6102_v32 = vadd.f32 %v6101_v28, %v5290_v42  ;;  %v3995_v33 = vld [vmem:[%s16279_s18 + $0x290] sm:$0xff]  ;;  %v4093_v39 = vld [vmem:[%s16279_s18 + $0x5a0] sm:$0xff]  ;;  %v4170_v42 = vld [vmem:[%s16279_s18 + $0x808] sm:$0xff] }
 0xc42   :  { %6579 = vmatpush.msrb.mxu1 %v5149_v43  ;;  %6520 = vmatmul.f32.vlgmr.msra.gmra.mxu2 %v12423_v18  ;;  %v4114_v43 = vld [vmem:[%s16279_s18 + $0x648] sm:$0xff]  ;;  %v4079_v2 = vld [vmem:[%s16279_s18 + $0x530] sm:$0xff]  ;;  %v3960_v28 = vld [vmem:[%s16279_s18 + $0x178] sm:$0xff] }
 0xc43   :  { %6580 = vmatmul.f32.vlgmr.msrb.gmra.mxu1 %v12429_v46  ;;  %6596 = vmatpush.msrb.mxu2 %v5282_v8  ;;  %v6121_v56 = vpop.f32.mrf.mxu2  ;;  %v6141_v8 = vpop.f32.mrf.mxu3  ;;  %v4163_v37 = vld [vmem:[%s16279_s18 + $0x7d0] sm:$0xff] }
 0xc44   :  { %6644 = vmatpush.msra.mxu1 %v4247_v25  ;;  %6537 = vmatpush.msrb.mxu3 %v4939_v9  ;;  %v6062_v25 = vadd.f32 %v6061_v62, %v6042_v10  ;;  %v6122_v9 = vadd.f32 %v6121_v56, %v6102_v32  ;;  %v4086_v62 = vld [vmem:[%s16279_s18 + $0x568] sm:$0xff]  ;;  %v4149_v32 = vld [vmem:[%s16279_s18 + $0x760] sm:$0xff] }
 0xc45   :  { %6557 = vmatpush.msra.mxu0 %v5051_v55  ;;  %6597 = vmatpush.msrb.mxu2 %v5275_v14  ;;  %v4107_v55 = vld [vmem:[%s16279_s18 + $0x610] sm:$0xff]  ;;  %v4198_v14 = vld [vmem:[%s16279_s18 + $0x8e8] sm:$0xff] }
 0xc46   :  { %6645 = vmatpush.msra.mxu1 %v4240_v30  ;;  %6538 = vmatpush.msrb.mxu3 %v4932_v3  ;;  %v5822_v30 = vadd.f32 %v14790_v44, %v5802_v27  ;;  %v6142_v3 = vadd.f32 %v6141_v8, %v6122_v9  ;;  %v3981_v44 = vld [vmem:[%s16279_s18 + $0x220] sm:$0xff]  ;;  %v3946_v27 = vld [vmem:[%s16279_s18 + $0x108] sm:$0xff]  ;;  %v4051_v9 = vld [vmem:[%s16279_s18 + $0x450] sm:$0xff] }
 0xc47   :  { %6558 = vmatpush.msra.mxu0 %v5044_v63  ;;  %6598 = vmatpush.msrb.mxu2 %v5268_v1  ;;  %v4324_v63 = vld [vmem:[%s16279_s18 + $0xcd8] sm:$0xff]  ;;  %v6082_v1 = vadd.f32 %v6081_v48, %v6062_v25  ;;  %v3953_v48 = vld [vmem:[%s16279_s18 + $0x140] sm:$0xff]  ;;  %v4058_v10 = vld [vmem:[%s16279_s18 + $0x488] sm:$0xff] }
 0xc48   :  { %6646 = vmatpush.msra.mxu1 %v4233_v49  ;;  %6539 = vmatpush.msrb.mxu3 %v4925_v41  ;;  %v4184_v49 = vld [vmem:[%s16279_s18 + $0x878] sm:$0xff]  ;;  %v6161_v41 = vpop.f32.mrf.mxu0  ;;  %v6181_v53 = vpop.f32.mrf.mxu1  ;;  %v7370_v58 = vmul.f32 -1.442695, %v5822_v30  ;;  %v4282_v8 = vld [vmem:[%s16279_s18 + $0xb88] sm:$0xff] }
 0xc49   :  { %6559 = vmatpush.msra.mxu0 %v5037_v6  ;;  %6540 = vmatmul.f32.vlgmr.msrb.gmra.mxu3 %v12467_v16  ;;  %v4317_v6 = vld [vmem:[%s16279_s18 + $0xca0] sm:$0xff] }
 0xc4a   :  { %6560 = vmatmul.f32.vlgmr.msra.gmra.mxu0 %v12473_v51  ;;  %6599 = vmatpush.msrb.mxu2 %v5261_v31  ;;  %v6162_v31 = vadd.f32 %v6161_v41, %v6142_v3  ;;  %7385 = vpow2.f32 %v7370_v58  ;;  %v4695_v3 = vld [vmem:[%s16279_s18 + $0x1870] sm:$0xff] }
 0xc4b   :  { %6604 = vmatpush.msra.mxu3 %v4023_v57  ;;  %6624 = vmatpush.msrb.mxu0 %v4135_v23  ;;  %v4177_v57 = vld [vmem:[%s16279_s18 + $0x840] sm:$0xff]  ;;  %v6201_v23 = vpop.f32.mrf.mxu2 }
 0xc4c   :  { %6647 = vmatpush.msra.mxu1 %v4226_v17  ;;  %6664 = vmatpush.msra.mxu2 %v4359_v13  ;;  %v3967_v17 = vld [vmem:[%s16279_s18 + $0x1b0] sm:$0xff]  ;;  %v7371_v13 = vmul.f32 -1.442695, %v6082_v1  ;;  %v4688_v1 = vld [vmem:[%s16279_s18 + $0x1838] sm:$0xff] }
 0xc4d   :  { %7366 = vmatmul.msk.f32.vlgmr.msrb.gmra.mxu2 %vm105_vm1, %v12493_v60  ;;  %6605 = vmatpush.msra.mxu3 %v4016_v11  ;;  %v6182_v11 = vadd.f32 %v6181_v53, %v6162_v31  ;;  %v4681_v31 = vld [vmem:[%s16279_s18 + $0x1800] sm:$0xff] }
 0xc4e   :  { %6625 = vmatpush.msrb.mxu0 %v4128_v15  ;;  %6648 = vmatpush.msra.mxu1 %v4219_v24  ;;  %v6221_v15 = vpop.f32.mrf.mxu3  ;;  %v4303_v24 = vld [vmem:[%s16279_s18 + $0xc30] sm:$0xff]  ;;  %7387 = vpow2.f32 %v7371_v13  ;;  %v4254_v13 = vld [vmem:[%s16279_s18 + $0xaa8] sm:$0xff] }
 0xc4f   :  { %6665 = vmatpush.msra.mxu2 %v4352_v61  ;;  %6606 = vmatpush.msra.mxu3 %v4009_v21  ;;  %v6202_v61 = vadd.f32 %v6201_v23, %v6182_v11  ;;  %v4072_v21 = vld [vmem:[%s16279_s18 + $0x4f8] sm:$0xff]  ;;  %v4030_v23 = vld [vmem:[%s16279_s18 + $0x3a8] sm:$0xff] }
 0xc50   :  { %6626 = vmatpush.msrb.mxu0 %v4121_v29  ;;  %6649 = vmatpush.msra.mxu1 %v4212_v34  ;;  %v7369_v29 = vmul.f32 -1.442695, %v13290_v0  ;;  %v4296_v34 = vld [vmem:[%s16279_s18 + $0xbf8] sm:$0xff] }
 0xc51   :  { %6666 = vmatpush.msra.mxu2 %v4345_v40  ;;  %6607 = vmatpush.msra.mxu3 %v4002_v52  ;;  %v6222_v56 = vadd.f32 %v6221_v15, %v6202_v61  ;;  %v4065_v40 = vld [vmem:[%s16279_s18 + $0x4c0] sm:$0xff]  ;;  %v4156_v0 = vld [vmem:[%s16279_s18 + $0x798] sm:$0xff]  ;;  %v4583_v15 = vld [vmem:[%s16279_s18 + $0x14f0] sm:$0xff] }
 0xc52   :  { %6627 = vmatpush.msrb.mxu0 %v4114_v43  ;;  %6650 = vmatpush.msra.mxu1 %v4205_v38  ;;  %v4289_v52 = vld [vmem:[%s16279_s18 + $0xbc0] sm:$0xff]  ;;  %7389 = vpow2.f32 %v7369_v29  ;;  %v6241_v43 = vpop.f32.mrf.mxu0  ;;  %v6261_v38 = vpop.f32.mrf.mxu1  ;;  %v4807_v61 = vld [vmem:[%s16279_s18 + $0x1bf0] sm:$0xff] }
 0xc53   :  { %6667 = vmatpush.msra.mxu2 %v4338_v59  ;;  %6608 = vmatpush.msra.mxu3 %v3995_v33  ;;  %v3939_v59 = vld [vmem:[%s16279_s18 + $0xd0] sm:$0xff]  ;;  %v7386_v33 = vpop.eup %7385  ;;  %v6242_v25 = vadd.f32 %v6241_v43, %v6222_v56  ;;  %v4800_v56 = vld [vmem:[%s16279_s18 + $0x1bb8] sm:$0xff] }
 0xc54   :  { %6628 = vmatpush.msrb.mxu0 %v4107_v55  ;;  %6651 = vmatpush.msra.mxu1 %v4198_v14  ;;  %v4142_v55 = vld [vmem:[%s16279_s18 + $0x728] sm:$0xff]  ;;  %v4275_v14 = vld [vmem:[%s16279_s18 + $0xb50] sm:$0xff] }
 0xc55   :  { %6668 = vmatpush.msra.mxu2 %v4331_v4  ;;  %6609 = vmatpush.msra.mxu3 %v3988_v12  ;;  %v7388_v12 = vpop.eup %7387  ;;  %v6262_v30 = vadd.f32 %v6261_v38, %v6242_v25  ;;  %v4667_v29 = vld [vmem:[%s16279_s18 + $0x1790] sm:$0xff]  ;;  %v4562_v38 = vld [vmem:[%s16279_s18 + $0x1448] sm:$0xff] }
 0xc56   :  { %6629 = vmatpush.msrb.mxu0 %v4100_v19  ;;  %6652 = vmatpush.msra.mxu1 %v4191_v5  ;;  %v3932_v19 = vld [vmem:[%s16279_s18 + $0x98] sm:$0xff]  ;;  %v15105_v5 = vadd.f32 1.0, %v7386_v33  ;;  %v15120_v53 = vadd.f32 1.0, %v7388_v12  ;;  %v4443_v33 = vld [vmem:[%s16279_s18 + $0x1090] sm:$0xff] }
 0xc57   :  { %6669 = vmatpush.msra.mxu2 %v4324_v63  ;;  %6610 = vmatpush.msra.mxu3 %v3981_v44  ;;  %v4044_v63 = vld [vmem:[%s16279_s18 + $0x418] sm:$0xff] }
 0xc58   :  { %6630 = vmatpush.msrb.mxu0 %v4093_v39  ;;  %6653 = vmatpush.msra.mxu1 %v4184_v49  ;;  %v4268_v44 = vld [vmem:[%s16279_s18 + $0xb18] sm:$0xff]  ;;  %v3925_v39 = vld [vmem:[%s16279_s18 + $0x60] sm:$0xff]  ;;  %v7390_v41 = vpop.eup %7389  ;;  %7391 = vrcp.f32 %v15105_v5  ;;  %vm7172_vm14 = vweird.f32 %v15105_v5  ;;  %vm7187_vm3 = vweird.f32 %v15120_v53 }
 0xc59   :  { %6670 = vmatpush.msra.mxu2 %v4317_v6  ;;  %6611 = vmatpush.msra.mxu3 %v3974_v36  ;;  %v4037_v6 = vld [vmem:[%s16279_s18 + $0x3e0] sm:$0xff]  ;;  %7393 = vrcp.f32 %v15120_v53  ;;  %v4436_v12 = vld [vmem:[%s16279_s18 + $0x1058] sm:$0xff] }
 0xc5a   :  { %6631 = vmatpush.msrb.mxu0 %v4086_v62  ;;  %6654 = vmatpush.msra.mxu1 %v4177_v57  ;;  %v4261_v36 = vld [vmem:[%s16279_s18 + $0xae0] sm:$0xff]  ;;  %v3918_v62 = vld [vmem:[%s16279_s18 + $0x28] sm:$0xff] }
 0xc5b   :  { %6671 = vmatpush.msra.mxu2 %v4310_v22  ;;  %6612 = vmatpush.msra.mxu3 %v3967_v17  ;;  %v15138_v17 = vadd.f32 1.0, %v7390_v41 }
 0xc5c   :  { %6632 = vmatpush.msrb.mxu0 %v4079_v2  ;;  %6655 = vmatpush.msra.mxu1 %v4170_v42  ;;  %v6341_v2 = vpop.f32.mrf.mxu1  ;;  %v4471_v42 = vld [vmem:[%s16279_s18 + $0x1170] sm:$0xff] }
 0xc5d   :  { %6672 = vmatpush.msra.mxu2 %v4303_v24  ;;  %6613 = vmatpush.msra.mxu3 %v3960_v28  ;;  %v4674_v24 = vld [vmem:[%s16279_s18 + $0x17c8] sm:$0xff]  ;;  %7395 = vrcp.f32 %v15138_v17  ;;  %vm7157_vm7 = vweird.f32 %v15138_v17 }
 0xc5e   :  { %6633 = vmatpush.msrb.mxu0 %v4072_v21  ;;  %6656 = vmatpush.msra.mxu1 %v4163_v37  ;;  %v4464_v21 = vld [vmem:[%s16279_s18 + $0x1138] sm:$0xff] }
 0xc5f   :  { %6673 = vmatpush.msra.mxu2 %v4296_v34  ;;  %6614 = vmatpush.msra.mxu3 %v3953_v48  ;;  %v6281_v4 = vpop.f32.mrf.mxu2  ;;  %v4576_v37 = vld [vmem:[%s16279_s18 + $0x14b8] sm:$0xff]  ;;  %v15168_v48 = vpop.eup %7391 }
 0xc60   :  { %6634 = vmatpush.msrb.mxu0 %v4065_v40  ;;  %6657 = vmatpush.msra.mxu1 %v4156_v0  ;;  %v6282_v49 = vadd.f32 %v6281_v4, %v6262_v30  ;;  %v4457_v40 = vld [vmem:[%s16279_s18 + $0x1100] sm:$0xff]  ;;  %v7168_v43 = vmul.f32 %v15168_v48, %v15105_v5  ;;  %v4779_v4 = vld [vmem:[%s16279_s18 + $0x1b10] sm:$0xff]  ;;  %vm7173_vm13 = vweird.f32 %v15168_v48 }
 0xc61   :  { %6674 = vmatpush.msra.mxu2 %v4289_v52  ;;  %6615 = vmatpush.msra.mxu3 %v3946_v27  ;;  %v6321_v22 = vpop.f32.mrf.mxu0  ;;  %v4569_v0 = vld [vmem:[%s16279_s18 + $0x1480] sm:$0xff]  ;;  %v4660_v52 = vld [vmem:[%s16279_s18 + $0x1758] sm:$0xff]  ;;  %v15183_v27 = vpop.eup %7393  ;;  %vm15308_vm0 = vmor %vm7172_vm14, %vm7173_vm13  ;;  %vm7269_vm13 = vcmask 1041408   ;;  %vm7271_vm14 = vcmask 1045508  }
 0xc62   :  { %6635 = vmatpush.msrb.mxu0 %v4058_v10  ;;  %6658 = vmatpush.msra.mxu1 %v4149_v32  ;;  %v4793_v10 = vld [vmem:[%s16279_s18 + $0x1b80] sm:$0xff]  ;;  %v4450_v32 = vld [vmem:[%s16279_s18 + $0x10c8] sm:$0xff]  ;;  %vm7188_vm15 = vweird.f32 %v15183_v27 }
 0xc63   :  { %6675 = vmatpush.msra.mxu2 %v4282_v8  ;;  %6616 = vmatpush.msra.mxu3 %v3939_v59  ;;  %v4653_v8 = vld [vmem:[%s16279_s18 + $0x1720] sm:$0xff]  ;;  %v4786_v59 = vld [vmem:[%s16279_s18 + $0x1b48] sm:$0xff]  ;;  %v15205_v25 = vpop.eup %7395  ;;  %vm15348_vm5 = vmor %vm7187_vm3, %vm7188_vm15 }
 0xc64   :  { %6636 = vmatpush.msrb.mxu0 %v4051_v9  ;;  %6659 = vmatpush.msra.mxu1 %v4142_v55  ;;  %v7183_v9 = vmul.f32 %v15183_v27, %v15120_v53  ;;  %v4555_v55 = vld [vmem:[%s16279_s18 + $0x1410] sm:$0xff]  ;;  %vm7158_vm2 = vweird.f32 %v15205_v25 }
 0xc65   :  { %6660 = vmatmul.f32.vlgmr.msra.gmra.mxu1 %v12249_v7  ;;  %6676 = vmatpush.msra.mxu2 %v4275_v14  ;;  %v4646_v14 = vld [vmem:[%s16279_s18 + $0x16e8] sm:$0xff]  ;;  %vm15380_vm8 = vmor %vm7157_vm7, %vm7158_vm2  ;;  %vm7280_vm7 = vcmask 1043458  }
 0xc66   :  { %6724 = vmatpush.msrb.mxu1 %v4695_v3  ;;  %6617 = vmatpush.msra.mxu3 %v3932_v19  ;;  %v6301_v58 = vpop.f32.mrf.mxu3  ;;  %v7169_v3 = vsub.f32 1.0, %v7168_v43  ;;  %v4548_v19 = vld [vmem:[%s16279_s18 + $0x13d8] sm:$0xff]  ;;  %v7184_v41 = vsub.f32 1.0, %v7183_v9 }
 0xc67   :  { %6637 = vmatpush.msrb.mxu0 %v4044_v63  ;;  %6677 = vmatpush.msra.mxu2 %v4268_v44  ;;  %v6302_v57 = vadd.f32 %v6301_v58, %v6282_v49  ;;  %v4639_v63 = vld [vmem:[%s16279_s18 + $0x16b0] sm:$0xff]  ;;  %v7153_v44 = vmul.f32 %v15205_v25, %v15138_v17  ;;  %v4429_v49 = vld [vmem:[%s16279_s18 + $0x1020] sm:$0xff]  ;;  %v4604_v43 = vld [vmem:[%s16279_s18 + $0x1598] sm:$0xff] }
 0xc68   :  { %6725 = vmatpush.msrb.mxu1 %v4688_v1  ;;  %6618 = vmatpush.msra.mxu3 %v3925_v39  ;;  %v4772_v39 = vld [vmem:[%s16279_s18 + $0x1ad8] sm:$0xff]  ;;  %v4765_v58 = vld [vmem:[%s16279_s18 + $0x1aa0] sm:$0xff] }
 0xc69   :  { %6638 = vmatpush.msrb.mxu0 %v4037_v6  ;;  %6678 = vmatpush.msra.mxu2 %v4261_v36  ;;  %v6322_v11 = vadd.f32 %v6321_v22, %v6302_v57  ;;  %v4541_v6 = vld [vmem:[%s16279_s18 + $0x13a0] sm:$0xff]  ;;  %v4632_v36 = vld [vmem:[%s16279_s18 + $0x1678] sm:$0xff]  ;;  %v4534_v57 = vld [vmem:[%s16279_s18 + $0x1368] sm:$0xff]  ;;  %v7154_v22 = vsub.f32 1.0, %v7153_v44 }
 0xc6a   :  { %6726 = vmatpush.msrb.mxu1 %v4681_v31  ;;  %6619 = vmatpush.msra.mxu3 %v3918_v62  ;;  %v4422_v31 = vld [vmem:[%s16279_s18 + $0xfe8] sm:$0xff]  ;;  %v7170_v62 = vmul.f32 %v15168_v48, %v7169_v3  ;;  %v5108_v44 = vld [vmem:[%s16279_s18 + $0x2558] sm:$0xff] }
 0xc6b   :  { %6639 = vmatpush.msrb.mxu0 %v4030_v23  ;;  %6620 = vmatmul.f32.vlgmr.msra.gmra.mxu3 %v12217_v35  ;;  %v6342_v28 = vadd.f32 %v6341_v2, %v6322_v11  ;;  %v4625_v23 = vld [vmem:[%s16279_s18 + $0x1640] sm:$0xff]  ;;  %v4415_v11 = vld [vmem:[%s16279_s18 + $0xfb0] sm:$0xff]  ;;  %v7185_v2 = vmul.f32 %v15183_v27, %v7184_v41  ;;  %v4730_v3 = vld [vmem:[%s16279_s18 + $0x1988] sm:$0xff] }
 0xc6c   :  { %6640 = vmatmul.f32.vlgmr.msrb.gmra.mxu0 %v12243_v26  ;;  %6679 = vmatpush.msra.mxu2 %v4254_v13  ;;  %v4758_v13 = vld [vmem:[%s16279_s18 + $0x1a68] sm:$0xff] }
 0xc6d   :  { %6684 = vmatpush.msrb.mxu3 %v4471_v42  ;;  %6704 = vmatpush.msra.mxu0 %v4583_v15  ;;  %v7372_v34 = vmul.f32 -1.442695, %v6342_v28  ;;  %v4527_v42 = vld [vmem:[%s16279_s18 + $0x1330] sm:$0xff]  ;;  %v4618_v15 = vld [vmem:[%s16279_s18 + $0x1608] sm:$0xff]  ;;  %v4408_v28 = vld [vmem:[%s16279_s18 + $0xf78] sm:$0xff] }
 0xc6e   :  { %6727 = vmatpush.msrb.mxu1 %v4674_v24  ;;  %6680 = vmatmul.f32.vlgmr.msra.gmra.mxu2 %v12223_v20  ;;  %v4751_v24 = vld [vmem:[%s16279_s18 + $0x1a30] sm:$0xff]  ;;  %v4590_v41 = vld [vmem:[%s16279_s18 + $0x1528] sm:$0xff] }
 0xc6f   :  { %6744 = vmatpush.msrb.mxu2 %v4807_v61  ;;  %6685 = vmatpush.msrb.mxu3 %v4464_v21  ;;  %7397 = vpow2.f32 %v7372_v34  ;;  %v4520_v61 = vld [vmem:[%s16279_s18 + $0x12f8] sm:$0xff]  ;;  %v4611_v21 = vld [vmem:[%s16279_s18 + $0x15d0] sm:$0xff]  ;;  %v7155_v34 = vmul.f32 %v15205_v25, %v7154_v22  ;;  %v4877_v22 = vld [vmem:[%s16279_s18 + $0x1e20] sm:$0xff] }
 0xc70   :  { %6705 = vmatpush.msra.mxu0 %v4576_v37  ;;  %6728 = vmatpush.msrb.mxu1 %v4667_v29  ;;  %v7171_v37 = vadd.f32 %v15168_v48, %v7170_v62 }
 0xc71   :  { %6745 = vmatpush.msrb.mxu2 %v4800_v56  ;;  %6686 = vmatpush.msrb.mxu3 %v4457_v40  ;;  %v7178_v56 = vand.u32 2147483648, %v15105_v5  ;;  %v4744_v40 = vld [vmem:[%s16279_s18 + $0x19f8] sm:$0xff] }
 0xc72   :  { %6706 = vmatpush.msra.mxu0 %v4569_v0  ;;  %6729 = vmatpush.msrb.mxu1 %v4660_v52  ;;  %v4401_v0 = vld [vmem:[%s16279_s18 + $0xf40] sm:$0xff]  ;;  %v7176_v52 = vand.u32 2147483647, %v15105_v5 }
 0xc73   :  { %6746 = vmatpush.msrb.mxu2 %v4793_v10  ;;  %6687 = vmatpush.msrb.mxu3 %v4450_v32  ;;  %v4513_v32 = vld [vmem:[%s16279_s18 + $0x12c0] sm:$0xff] }
 0xc74   :  { %6707 = vmatpush.msra.mxu0 %v4562_v38  ;;  %6730 = vmatpush.msrb.mxu1 %v4653_v8  ;;  %v7186_v38 = vadd.f32 %v15183_v27, %v7185_v2  ;;  %v7193_v8 = vand.u32 2147483648, %v15120_v53  ;;  %vm15340_vm4 = vcmp.eq.f32.partialorder %v7176_v52, 8.507059e+37  ;;  %v4492_v2 = vld [vmem:[%s16279_s18 + $0x1218] sm:$0xff] }
 0xc75   :  { %v7398_v30 = vpop.eup %7397  ;;  %6747 = vmatpush.msrb.mxu2 %v4786_v59  ;;  %6688 = vmatpush.msrb.mxu3 %v4443_v33  ;;  %v4737_v59 = vld [vmem:[%s16279_s18 + $0x19c0] sm:$0xff]  ;;  %v4394_v33 = vld [vmem:[%s16279_s18 + $0xf08] sm:$0xff] }
 0xc76   :  { %v15229_v1 = vadd.f32 1.0, %v7398_v30  ;;  %6708 = vmatpush.msra.mxu0 %v4555_v55  ;;  %6731 = vmatpush.msrb.mxu1 %v4646_v14  ;;  %v4506_v55 = vld [vmem:[%s16279_s18 + $0x1288] sm:$0xff]  ;;  %v4597_v14 = vld [vmem:[%s16279_s18 + $0x1560] sm:$0xff]  ;;  %v7179_v30 = vor.u32 1.1754944e-38, %v7178_v56 }
 0xc77   :  { %6748 = vmatpush.msrb.mxu2 %v4779_v4  ;;  %6689 = vmatpush.msrb.mxu3 %v4436_v12  ;;  %v7175_v4 = vsel %vm15308_vm0, %v15168_v48, %v7171_v37  ;;  %v7191_v12 = vand.u32 2147483647, %v15120_v53  ;;  %v7190_v53 = vsel %vm15348_vm5, %v15183_v27, %v7186_v38  ;;  %v7194_v27 = vor.u32 1.1754944e-38, %v7193_v8  ;;  %v4709_v56 = vld [vmem:[%s16279_s18 + $0x18e0] sm:$0xff]  ;;  %v4702_v38 = vld [vmem:[%s16279_s18 + $0x18a8] sm:$0xff] }
 0xc78   :  { %7399 = vrcp.f32 %v15229_v1  ;;  %6709 = vmatpush.msra.mxu0 %v4548_v19  ;;  %6732 = vmatpush.msrb.mxu1 %v4639_v63  ;;  %v4387_v19 = vld [vmem:[%s16279_s18 + $0xed0] sm:$0xff]  ;;  %v15338_v63 = vadd.f32 %v15205_v25, %v7155_v34  ;;  %v7180_v62 = vsel %vm15340_vm4, %v7179_v30, %v7175_v4  ;;  %vm7202_vm10 = vweird.f32 %v15229_v1  ;;  %v4485_v34 = vld [vmem:[%s16279_s18 + $0x11e0] sm:$0xff]  ;;  %v4912_v4 = vld [vmem:[%s16279_s18 + $0x1f38] sm:$0xff] }
 0xc79   :  { %6749 = vmatpush.msrb.mxu2 %v4772_v39  ;;  %6690 = vmatpush.msrb.mxu3 %v4429_v49  ;;  %v7208_v39 = vand.u32 2147483648, %v15229_v1  ;;  %v4499_v49 = vld [vmem:[%s16279_s18 + $0x1250] sm:$0xff]  ;;  %vm7192_vm9 = vcmp.eq.f32.partialorder %v7191_v12, 8.507059e+37  ;;  %v7264_v37 = vrot.slane %v7180_v62, 6  ;;  %vm7273_vm0 = vcmask 1043456   ;;  %v5024_v12 = vld [vmem:[%s16279_s18 + $0x22b8] sm:$0xff] }
 0xc7a   :  { %6710 = vmatpush.msra.mxu0 %v4541_v6  ;;  %6733 = vmatpush.msrb.mxu1 %v4632_v36  ;;  %v7206_v36 = vand.u32 2147483647, %v15229_v1  ;;  %v5115_v30 = vld [vmem:[%s16279_s18 + $0x2590] sm:$0xff]  ;;  %v5241_v48 = vld [vmem:[%s16279_s18 + $0x2980] sm:$0xff]  ;;  %v4884_v62 = vld [vmem:[%s16279_s18 + $0x1e58] sm:$0xff] }
 0xc7b   :  { %6750 = vmatpush.msrb.mxu2 %v4765_v58  ;;  %6691 = vmatpush.msrb.mxu3 %v4422_v31  ;;  %v4723_v58 = vld [vmem:[%s16279_s18 + $0x1950] sm:$0xff]  ;;  %v7163_v31 = vand.u32 2147483648, %v15138_v17 }
 0xc7c   :  { %6711 = vmatpush.msra.mxu0 %v4534_v57  ;;  %6734 = vmatpush.msrb.mxu1 %v4625_v23  ;;  %v5143_v57 = vld [vmem:[%s16279_s18 + $0x2670] sm:$0xff]  ;;  %v4380_v23 = vld [vmem:[%s16279_s18 + $0xe98] sm:$0xff]  ;;  %vm7207_vm12 = vcmp.eq.f32.partialorder %v7206_v36, 8.507059e+37 }
 0xc7d   :  { %6751 = vmatpush.msrb.mxu2 %v4758_v13  ;;  %6692 = vmatpush.msrb.mxu3 %v4415_v11  ;;  %v7161_v13 = vand.u32 2147483647, %v15138_v17  ;;  %v5003_v36 = vld [vmem:[%s16279_s18 + $0x2210] sm:$0xff]  ;;  %v5073_v17 = vld [vmem:[%s16279_s18 + $0x2440] sm:$0xff] }
 0xc7e   :  { %v15284_v29 = vpop.eup %7399  ;;  %6712 = vmatpush.msra.mxu0 %v4527_v42  ;;  %6735 = vmatpush.msrb.mxu1 %v4618_v15  ;;  %v4716_v42 = vld [vmem:[%s16279_s18 + $0x1918] sm:$0xff]  ;;  %v7195_v15 = vsel %vm7192_vm9, %v7194_v27, %v7190_v53  ;;  %v5234_v53 = vld [vmem:[%s16279_s18 + $0x2948] sm:$0xff] }
 0xc7f   :  { %v7198_v10 = vmul.f32 %v15284_v29, %v15229_v1  ;;  %6752 = vmatpush.msrb.mxu2 %v4751_v24  ;;  %6693 = vmatpush.msrb.mxu3 %v4408_v28  ;;  %vm7203_vm6 = vweird.f32 %v15284_v29  ;;  %v7209_v24 = vor.u32 1.1754944e-38, %v7208_v39  ;;  %v5136_v1 = vld [vmem:[%s16279_s18 + $0x2638] sm:$0xff]  ;;  %v4373_v28 = vld [vmem:[%s16279_s18 + $0xe60] sm:$0xff]  ;;  %vm7162_vm15 = vcmp.eq.f32.partialorder %v7161_v13, 8.507059e+37  ;;  %v4898_v39 = vld [vmem:[%s16279_s18 + $0x1ec8] sm:$0xff] }
 0xc80   :  { %6713 = vmatpush.msra.mxu0 %v4520_v61  ;;  %6736 = vmatpush.msrb.mxu1 %v4611_v21  ;;  %vm15395_vm11 = vmor %vm7202_vm10, %vm7203_vm6  ;;  %v7160_v61 = vsel %vm15380_vm8, %v15205_v25, %v15338_v63  ;;  %v5129_v25 = vld [vmem:[%s16279_s18 + $0x2600] sm:$0xff]  ;;  %v7265_v52 = vrot.slane %v7195_v15, 4  ;;  %v4996_v27 = vld [vmem:[%s16279_s18 + $0x21d8] sm:$0xff] }
 0xc81   :  { %v7199_v9 = vsub.f32 1.0, %v7198_v10  ;;  %6753 = vmatpush.msrb.mxu2 %v4744_v40  ;;  %6694 = vmatpush.msrb.mxu3 %v4401_v0  ;;  %v7164_v40 = vor.u32 1.1754944e-38, %v7163_v31  ;;  %v5017_v63 = vld [vmem:[%s16279_s18 + $0x2280] sm:$0xff]  ;;  %v5227_v31 = vld [vmem:[%s16279_s18 + $0x2910] sm:$0xff]  ;;  %v4982_v15 = vld [vmem:[%s16279_s18 + $0x2168] sm:$0xff] }
 0xc82   :  { %6714 = vmatpush.msra.mxu0 %v4513_v32  ;;  %6737 = vmatpush.msrb.mxu1 %v4604_v43  ;;  %v4478_v32 = vld [vmem:[%s16279_s18 + $0x11a8] sm:$0xff]  ;;  %v4989_v13 = vld [vmem:[%s16279_s18 + $0x21a0] sm:$0xff] }
 0xc83   :  { %6754 = vmatpush.msrb.mxu2 %v4737_v59  ;;  %6695 = vmatpush.msrb.mxu3 %v4394_v33  ;;  %v7200_v6 = vmul.f32 %v15284_v29, %v7199_v9  ;;  %v7165_v43 = vsel %vm7162_vm15, %v7164_v40, %v7160_v61  ;;  %v4919_v59 = vld [vmem:[%s16279_s18 + $0x1f70] sm:$0xff]  ;;  %v5066_v61 = vld [vmem:[%s16279_s18 + $0x2408] sm:$0xff]  ;;  %v5192_v40 = vld [vmem:[%s16279_s18 + $0x27f8] sm:$0xff] }
 0xc84   :  { %6715 = vmatpush.msra.mxu0 %v4506_v55  ;;  %6738 = vmatpush.msrb.mxu1 %v4597_v14  ;;  %v7270_v5 = vsel %vm7269_vm13, %v7165_v43, %v7264_v37  ;;  %v5031_v33 = vld [vmem:[%s16279_s18 + $0x22f0] sm:$0xff]  ;;  %v5122_v55 = vld [vmem:[%s16279_s18 + $0x25c8] sm:$0xff]  ;;  %v4856_v37 = vld [vmem:[%s16279_s18 + $0x1d78] sm:$0xff] }
 0xc85   :  { %6755 = vmatpush.msrb.mxu2 %v4730_v3  ;;  %6696 = vmatpush.msrb.mxu3 %v4387_v19  ;;  %v7201_v11 = vadd.f32 %v15284_v29, %v7200_v6  ;;  %v5255_v14 = vld [vmem:[%s16279_s18 + $0x29f0] sm:$0xff]  ;;  %v5248_v3 = vld [vmem:[%s16279_s18 + $0x29b8] sm:$0xff]  ;;  %v4905_v19 = vld [vmem:[%s16279_s18 + $0x1f00] sm:$0xff] }
 0xc86   :  { %6716 = vmatpush.msra.mxu0 %v4499_v49  ;;  %6739 = vmatpush.msrb.mxu1 %v4590_v41  ;;  %v5010_v49 = vld [vmem:[%s16279_s18 + $0x2248] sm:$0xff]  ;;  %v5101_v41 = vld [vmem:[%s16279_s18 + $0x2520] sm:$0xff]  ;;  %v4891_v6 = vld [vmem:[%s16279_s18 + $0x1e90] sm:$0xff] }
 0xc87   :  { %6740 = vmatmul.f32.vlgmr.msrb.gmra.mxu1 %v12307_v50  ;;  %6756 = vmatpush.msrb.mxu2 %v4723_v58  ;;  %v7205_v21 = vsel %vm15395_vm11, %v15284_v29, %v7201_v11  ;;  %v4366_v29 = vld [vmem:[%s16279_s18 + $0xe28] sm:$0xff]  ;;  %v5080_v11 = vld [vmem:[%s16279_s18 + $0x2478] sm:$0xff]  ;;  %v5045_v43 = vld [vmem:[%s16279_s18 + $0x2360] sm:$0xff] }
 0xc88   :  { %6804 = vmatpush.msra.mxu1 %v5143_v57  ;;  %6697 = vmatpush.msrb.mxu3 %v4380_v23  ;;  %v7210_v0 = vsel %vm7207_vm12, %v7209_v24, %v7205_v21  ;;  %v5094_v58 = vld [vmem:[%s16279_s18 + $0x24e8] sm:$0xff]  ;;  %v5087_v57 = vld [vmem:[%s16279_s18 + $0x24b0] sm:$0xff]  ;;  %v5220_v23 = vld [vmem:[%s16279_s18 + $0x28d8] sm:$0xff] }
 0xc89   :  { %6717 = vmatpush.msra.mxu0 %v4492_v2  ;;  %6757 = vmatpush.msrb.mxu2 %v4716_v42  ;;  %v7266_v10 = vrot.slane %v7210_v0, 2  ;;  %v5213_v2 = vld [vmem:[%s16279_s18 + $0x28a0] sm:$0xff]  ;;  %v4870_v42 = vld [vmem:[%s16279_s18 + $0x1de8] sm:$0xff]  ;;  %v5199_v21 = vld [vmem:[%s16279_s18 + $0x2830] sm:$0xff] }
 0xc8a   :  { %6805 = vmatpush.msra.mxu1 %v5136_v1  ;;  %6698 = vmatpush.msrb.mxu3 %v4373_v28  ;;  %v5206_v24 = vld [vmem:[%s16279_s18 + $0x2868] sm:$0xff]  ;;  %v4863_v1 = vld [vmem:[%s16279_s18 + $0x1db0] sm:$0xff]  ;;  %v4849_v0 = vld [vmem:[%s16279_s18 + $0x1d40] sm:$0xff] }
 0xc8b   :  { %6718 = vmatpush.msra.mxu0 %v4485_v34  ;;  %6758 = vmatpush.msrb.mxu2 %v4709_v56  ;;  %v7272_v8 = vsel %vm7271_vm14, %v7265_v52, %v7266_v10  ;;  %v4975_v28 = vld [vmem:[%s16279_s18 + $0x2130] sm:$0xff]  ;;  %v4968_v34 = vld [vmem:[%s16279_s18 + $0x20f8] sm:$0xff]  ;;  %v5185_v52 = vld [vmem:[%s16279_s18 + $0x27c0] sm:$0xff]  ;;  %vm7282_vm14 = vcmask 128004  }
 0xc8c   :  { %6806 = vmatpush.msra.mxu1 %v5129_v25  ;;  %6699 = vmatpush.msrb.mxu3 %v4366_v29  ;;  %v7274_v9 = vsel %vm7273_vm0, %v7270_v5, %v7272_v8  ;;  %v5059_v56 = vld [vmem:[%s16279_s18 + $0x23d0] sm:$0xff]  ;;  %v4961_v25 = vld [vmem:[%s16279_s18 + $0x20c0] sm:$0xff]  ;;  %v5052_v29 = vld [vmem:[%s16279_s18 + $0x2398] sm:$0xff] }
 0xc8d   :  { %6719 = vmatpush.msra.mxu0 %v4478_v32  ;;  %6700 = vmatmul.f32.vlgmr.msrb.gmra.mxu3 %v12258_v47  ;;  %7279 = vst [vmem:[#allocation2] sm:$0xff] %v7274_v9  ;;  %v4842_v10 = vld [vmem:[%s16279_s18 + $0x1d08] sm:$0xff]  ;;  %v4835_v5 = vld [vmem:[%s16279_s18 + $0x1cd0] sm:$0xff]  ;;  %v4136_v9 = vld [vmem:[%s16279_s18 + $0x6f8] sm:$0xff] }
 0xc8e   :  { %6720 = vmatmul.f32.vlgmr.msra.gmra.mxu0 %v12298_v54  ;;  %6759 = vmatpush.msrb.mxu2 %v4702_v38  ;;  %v4954_v32 = vld [vmem:[%s16279_s18 + $0x2088] sm:$0xff]  ;;  %v4947_v8 = vld [vmem:[%s16279_s18 + $0x2050] sm:$0xff]  ;;  %vm16248_vm11 = vmor %vm7280_vm7, %vm7269_vm13 }
 0xc8f   :  { %6764 = vmatpush.msra.mxu3 %v4919_v59  ;;  %6784 = vmatpush.msrb.mxu0 %v5031_v33  ;;  %v5178_v38 = vld [vmem:[%s16279_s18 + $0x2788] sm:$0xff]  ;;  %v5171_v33 = vld [vmem:[%s16279_s18 + $0x2750] sm:$0xff] }
 0xc90   :  { %6807 = vmatpush.msra.mxu1 %v5122_v55  ;;  %6760 = vmatmul.f32.vlgmr.msrb.gmra.mxu2 %v12265_v45  ;;  %v5038_v59 = vld [vmem:[%s16279_s18 + $0x2328] sm:$0xff]  ;;  %v4828_v55 = vld [vmem:[%s16279_s18 + $0x1c98] sm:$0xff] }
 0xc91   :  { %6824 = vmatpush.msra.mxu2 %v5255_v14  ;;  %6765 = vmatpush.msra.mxu3 %v4912_v4  ;;  %v4940_v14 = vld [vmem:[%s16279_s18 + $0x2018] sm:$0xff] }
 0xc92   :  { %6785 = vmatpush.msrb.mxu0 %v5024_v12  ;;  %6808 = vmatpush.msra.mxu1 %v5115_v30  ;;  %v5164_v4 = vld [vmem:[%s16279_s18 + $0x2718] sm:$0xff]  ;;  %v4129_v12 = vld [vmem:[%s16279_s18 + $0x6c0] sm:$0xff] }
 0xc93   :  { %6825 = vmatpush.msra.mxu2 %v5248_v3  ;;  %6766 = vmatpush.msra.mxu3 %v4905_v19  ;;  %v4821_v30 = vld [vmem:[%s16279_s18 + $0x1c60] sm:$0xff] }
 0xc94   :  { %6786 = vmatpush.msrb.mxu0 %v5017_v63  ;;  %6809 = vmatpush.msra.mxu1 %v5108_v44  ;;  %v4933_v3 = vld [vmem:[%s16279_s18 + $0x1fe0] sm:$0xff]  ;;  %v4122_v63 = vld [vmem:[%s16279_s18 + $0x688] sm:$0xff] }
 0xc95   :  { %6826 = vmatpush.msra.mxu2 %v5241_v48  ;;  %6767 = vmatpush.msra.mxu3 %v4898_v39  ;;  %v5157_v19 = vld [vmem:[%s16279_s18 + $0x26e0] sm:$0xff]  ;;  %v4814_v44 = vld [vmem:[%s16279_s18 + $0x1c28] sm:$0xff] }
 0xc96   :  { %6787 = vmatpush.msrb.mxu0 %v5010_v49  ;;  %6810 = vmatpush.msra.mxu1 %v5101_v41  ;;  %v4926_v48 = vld [vmem:[%s16279_s18 + $0x1fa8] sm:$0xff]  ;;  %v5283_v49 = vld [vmem:[%s16279_s18 + $0x2ad0] sm:$0xff]  ;;  %v4024_v41 = vld [vmem:[%s16279_s18 + $0x378] sm:$0xff] }
 0xc97   :  { %6827 = vmatpush.msra.mxu2 %v5234_v53  ;;  %6768 = vmatpush.msra.mxu3 %v4891_v6  ;;  %v5150_v39 = vld [vmem:[%s16279_s18 + $0x26a8] sm:$0xff]  ;;  %v4115_v53 = vld [vmem:[%s16279_s18 + $0x650] sm:$0xff]  ;;  %v4248_v6 = vld [vmem:[%s16279_s18 + $0xa78] sm:$0xff] }
 0xc98   :  { %6788 = vmatpush.msrb.mxu0 %v5003_v36  ;;  %6811 = vmatpush.msra.mxu1 %v5094_v58  ;;  %v5276_v36 = vld [vmem:[%s16279_s18 + $0x2a98] sm:$0xff]  ;;  %v4017_v58 = vld [vmem:[%s16279_s18 + $0x340] sm:$0xff] }
 0xc99   :  { %6828 = vmatpush.msra.mxu2 %v5227_v31  ;;  %6769 = vmatpush.msra.mxu3 %v4884_v62  ;;  %v4108_v31 = vld [vmem:[%s16279_s18 + $0x618] sm:$0xff]  ;;  %v4241_v62 = vld [vmem:[%s16279_s18 + $0xa40] sm:$0xff] }
 0xc9a   :  { %6789 = vmatpush.msrb.mxu0 %v4996_v27  ;;  %6812 = vmatpush.msra.mxu1 %v5087_v57  ;;  %v5269_v27 = vld [vmem:[%s16279_s18 + $0x2a60] sm:$0xff]  ;;  %v4010_v57 = vld [vmem:[%s16279_s18 + $0x308] sm:$0xff] }
 0xc9b   :  { %6829 = vmatpush.msra.mxu2 %v5220_v23  ;;  %6770 = vmatpush.msra.mxu3 %v4877_v22  ;;  %v4101_v23 = vld [vmem:[%s16279_s18 + $0x5e0] sm:$0xff]  ;;  %v4234_v22 = vld [vmem:[%s16279_s18 + $0xa08] sm:$0xff] }
 0xc9c   :  { %6790 = vmatpush.msrb.mxu0 %v4989_v13  ;;  %6813 = vmatpush.msra.mxu1 %v5080_v11  ;;  %v5262_v13 = vld [vmem:[%s16279_s18 + $0x2a28] sm:$0xff]  ;;  %v4003_v11 = vld [vmem:[%s16279_s18 + $0x2d0] sm:$0xff] }
 0xc9d   :  { %6830 = vmatpush.msra.mxu2 %v5213_v2  ;;  %6771 = vmatpush.msra.mxu3 %v4870_v42  ;;  %v4094_v2 = vld [vmem:[%s16279_s18 + $0x5a8] sm:$0xff]  ;;  %v4227_v42 = vld [vmem:[%s16279_s18 + $0x9d0] sm:$0xff] }
 0xc9e   :  { %6791 = vmatpush.msrb.mxu0 %v4982_v15  ;;  %6814 = vmatpush.msra.mxu1 %v5073_v17  ;;  %v4360_v15 = vld [vmem:[%s16279_s18 + $0xdf8] sm:$0xff] }
 0xc9f   :  { %6831 = vmatpush.msra.mxu2 %v5206_v24  ;;  %6772 = vmatpush.msra.mxu3 %v4863_v1  ;;  %v3996_v17 = vld [vmem:[%s16279_s18 + $0x298] sm:$0xff]  ;;  %v4087_v24 = vld [vmem:[%s16279_s18 + $0x570] sm:$0xff] }
 0xca0   :  { %6792 = vmatpush.msrb.mxu0 %v4975_v28  ;;  %6815 = vmatpush.msra.mxu1 %v5066_v61  ;;  %v4220_v1 = vld [vmem:[%s16279_s18 + $0x998] sm:$0xff]  ;;  %v4353_v28 = vld [vmem:[%s16279_s18 + $0xdc0] sm:$0xff] }
 0xca1   :  { %6832 = vmatpush.msra.mxu2 %v5199_v21  ;;  %6773 = vmatpush.msra.mxu3 %v4856_v37  ;;  %v3989_v61 = vld [vmem:[%s16279_s18 + $0x260] sm:$0xff]  ;;  %v4080_v21 = vld [vmem:[%s16279_s18 + $0x538] sm:$0xff] }
 0xca2   :  { %6793 = vmatpush.msrb.mxu0 %v4968_v34  ;;  %6816 = vmatpush.msra.mxu1 %v5059_v56  ;;  %v4213_v37 = vld [vmem:[%s16279_s18 + $0x960] sm:$0xff]  ;;  %v4346_v34 = vld [vmem:[%s16279_s18 + $0xd88] sm:$0xff] }
 0xca3   :  { %6833 = vmatpush.msra.mxu2 %v5192_v40  ;;  %6774 = vmatpush.msra.mxu3 %v4849_v0  ;;  %v3982_v56 = vld [vmem:[%s16279_s18 + $0x228] sm:$0xff]  ;;  %v4073_v40 = vld [vmem:[%s16279_s18 + $0x500] sm:$0xff] }
 0xca4   :  { %6794 = vmatpush.msrb.mxu0 %v4961_v25  ;;  %6817 = vmatpush.msra.mxu1 %v5052_v29  ;;  %v4206_v0 = vld [vmem:[%s16279_s18 + $0x928] sm:$0xff]  ;;  %v4339_v25 = vld [vmem:[%s16279_s18 + $0xd50] sm:$0xff] }
 0xca5   :  { %6834 = vmatpush.msra.mxu2 %v5185_v52  ;;  %6775 = vmatpush.msra.mxu3 %v4842_v10  ;;  %v3975_v29 = vld [vmem:[%s16279_s18 + $0x1f0] sm:$0xff]  ;;  %v4066_v52 = vld [vmem:[%s16279_s18 + $0x4c8] sm:$0xff] }
 0xca6   :  { %6795 = vmatpush.msrb.mxu0 %v4954_v32  ;;  %6818 = vmatpush.msra.mxu1 %v5045_v43  ;;  %v4199_v10 = vld [vmem:[%s16279_s18 + $0x8f0] sm:$0xff]  ;;  %v4332_v32 = vld [vmem:[%s16279_s18 + $0xd18] sm:$0xff] }
 0xca7   :  { %6835 = vmatpush.msra.mxu2 %v5178_v38  ;;  %6776 = vmatpush.msra.mxu3 %v4835_v5  ;;  %v3968_v43 = vld [vmem:[%s16279_s18 + $0x1b8] sm:$0xff]  ;;  %v4059_v38 = vld [vmem:[%s16279_s18 + $0x490] sm:$0xff] }
 0xca8   :  { %6796 = vmatpush.msrb.mxu0 %v4947_v8  ;;  %6819 = vmatpush.msra.mxu1 %v5038_v59  ;;  %v4192_v5 = vld [vmem:[%s16279_s18 + $0x8b8] sm:$0xff]  ;;  %v4325_v8 = vld [vmem:[%s16279_s18 + $0xce0] sm:$0xff] }
 0xca9   :  { %6820 = vmatmul.f32.vlgmr.msra.gmra.mxu1 %v12473_v51  ;;  %6836 = vmatpush.msra.mxu2 %v5171_v33  ;;  %v3961_v59 = vld [vmem:[%s16279_s18 + $0x180] sm:$0xff]  ;;  %v4052_v33 = vld [vmem:[%s16279_s18 + $0x458] sm:$0xff] }
 0xcaa   :  { %6884 = vmatpush.msrb.mxu1 %v4136_v9  ;;  %6777 = vmatpush.msra.mxu3 %v4828_v55  ;;  %v4185_v9 = vld [vmem:[%s16279_s18 + $0x880] sm:$0xff]  ;;  %v4318_v55 = vld [vmem:[%s16279_s18 + $0xca8] sm:$0xff] }
 0xcab   :  { %6797 = vmatpush.msrb.mxu0 %v4940_v14  ;;  %6837 = vmatpush.msra.mxu2 %v5164_v4  ;;  %v3954_v14 = vld [vmem:[%s16279_s18 + $0x148] sm:$0xff]  ;;  %v4045_v4 = vld [vmem:[%s16279_s18 + $0x420] sm:$0xff] }
 0xcac   :  { %6885 = vmatpush.msrb.mxu1 %v4129_v12  ;;  %6778 = vmatpush.msra.mxu3 %v4821_v30  ;;  %v4178_v12 = vld [vmem:[%s16279_s18 + $0x848] sm:$0xff]  ;;  %v4311_v30 = vld [vmem:[%s16279_s18 + $0xc70] sm:$0xff] }
 0xcad   :  { %6798 = vmatpush.msrb.mxu0 %v4933_v3  ;;  %6838 = vmatpush.msra.mxu2 %v5157_v19  ;;  %v3947_v3 = vld [vmem:[%s16279_s18 + $0x110] sm:$0xff]  ;;  %v4038_v19 = vld [vmem:[%s16279_s18 + $0x3e8] sm:$0xff] }
 0xcae   :  { %6886 = vmatpush.msrb.mxu1 %v4122_v63  ;;  %6779 = vmatpush.msra.mxu3 %v4814_v44  ;;  %v4171_v63 = vld [vmem:[%s16279_s18 + $0x810] sm:$0xff]  ;;  %v4304_v44 = vld [vmem:[%s16279_s18 + $0xc38] sm:$0xff] }
 0xcaf   :  { %6799 = vmatpush.msrb.mxu0 %v4926_v48  ;;  %6780 = vmatmul.f32.vlgmr.msra.gmra.mxu3 %v12423_v18  ;;  %v3940_v48 = vld [vmem:[%s16279_s18 + $0xd8] sm:$0xff] }
 0xcb0   :  { %6800 = vmatmul.f32.vlgmr.msrb.gmra.mxu0 %v12467_v16  ;;  %6839 = vmatpush.msra.mxu2 %v5150_v39  ;;  %v4031_v39 = vld [vmem:[%s16279_s18 + $0x3b0] sm:$0xff] }
 0xcb1   :  { %6856 = vmatpush.msrb.mxu3 %v5283_v49  ;;  %6864 = vmatpush.msra.mxu0 %v4024_v41  ;;  %v4164_v49 = vld [vmem:[%s16279_s18 + $0x7d8] sm:$0xff]  ;;  %v4297_v41 = vld [vmem:[%s16279_s18 + $0xc00] sm:$0xff] }
 0xcb2   :  { %6887 = vmatpush.msrb.mxu1 %v4115_v53  ;;  %6840 = vmatmul.f32.vlgmr.msra.gmra.mxu2 %v12429_v46  ;;  %v4584_v53 = vld [vmem:[%s16279_s18 + $0x14f8] sm:$0xff] }
 0xcb3   :  { %6904 = vmatpush.msrb.mxu2 %v4248_v6  ;;  %6857 = vmatpush.msrb.mxu3 %v5276_v36  ;;  %v3933_v6 = vld [vmem:[%s16279_s18 + $0xa0] sm:$0xff] }
 0xcb4   :  { %6865 = vmatpush.msra.mxu0 %v4017_v58  ;;  %6888 = vmatpush.msrb.mxu1 %v4108_v31  ;;  %v4157_v36 = vld [vmem:[%s16279_s18 + $0x7a0] sm:$0xff]  ;;  %v4290_v58 = vld [vmem:[%s16279_s18 + $0xbc8] sm:$0xff] }
 0xcb5   :  { %6905 = vmatpush.msrb.mxu2 %v4241_v62  ;;  %6858 = vmatpush.msrb.mxu3 %v5269_v27  ;;  %v4577_v31 = vld [vmem:[%s16279_s18 + $0x14c0] sm:$0xff]  ;;  %v3926_v62 = vld [vmem:[%s16279_s18 + $0x68] sm:$0xff] }
 0xcb6   :  { %6866 = vmatpush.msra.mxu0 %v4010_v57  ;;  %6889 = vmatpush.msrb.mxu1 %v4101_v23  ;;  %v4150_v27 = vld [vmem:[%s16279_s18 + $0x768] sm:$0xff]  ;;  %v4283_v57 = vld [vmem:[%s16279_s18 + $0xb90] sm:$0xff] }
 0xcb7   :  { %6906 = vmatpush.msrb.mxu2 %v4234_v22  ;;  %6859 = vmatpush.msrb.mxu3 %v5262_v13  ;;  %v3919_v23 = vld [vmem:[%s16279_s18 + $0x30] sm:$0xff]  ;;  %v4276_v13 = vld [vmem:[%s16279_s18 + $0xb58] sm:$0xff] }
 0xcb8   :  { %6867 = vmatpush.msra.mxu0 %v4003_v11  ;;  %6890 = vmatpush.msrb.mxu1 %v4094_v2  ;;  %v4143_v22 = vld [vmem:[%s16279_s18 + $0x730] sm:$0xff]  ;;  %v4472_v11 = vld [vmem:[%s16279_s18 + $0x1178] sm:$0xff] }
 0xcb9   :  { %6907 = vmatpush.msrb.mxu2 %v4227_v42  ;;  %6924 = vmatpush.msra.mxu3 %v4360_v15  ;;  %v4563_v2 = vld [vmem:[%s16279_s18 + $0x1450] sm:$0xff]  ;;  %v4696_v42 = vld [vmem:[%s16279_s18 + $0x1878] sm:$0xff]  ;;  %v4269_v15 = vld [vmem:[%s16279_s18 + $0xb20] sm:$0xff] }
 0xcba   :  { %7367 = vmatmul.msk.f32.vlgmr.msrb.gmra.mxu3 %vm105_vm1, %v12493_v60  ;;  %6868 = vmatpush.msra.mxu0 %v3996_v17  ;;  %v4465_v17 = vld [vmem:[%s16279_s18 + $0x1140] sm:$0xff] }
 0xcbb   :  { %6891 = vmatpush.msrb.mxu1 %v4087_v24  ;;  %6908 = vmatpush.msrb.mxu2 %v4220_v1  ;;  %v4556_v24 = vld [vmem:[%s16279_s18 + $0x1418] sm:$0xff]  ;;  %v4262_v1 = vld [vmem:[%s16279_s18 + $0xae8] sm:$0xff] }
 0xcbc   :  { %6925 = vmatpush.msra.mxu3 %v4353_v28  ;;  %6869 = vmatpush.msra.mxu0 %v3989_v61  ;;  %v4458_v28 = vld [vmem:[%s16279_s18 + $0x1108] sm:$0xff]  ;;  %v4549_v61 = vld [vmem:[%s16279_s18 + $0x13e0] sm:$0xff] }
 0xcbd   :  { %6892 = vmatpush.msrb.mxu1 %v4080_v21  ;;  %6909 = vmatpush.msrb.mxu2 %v4213_v37  ;;  %v4255_v21 = vld [vmem:[%s16279_s18 + $0xab0] sm:$0xff] }
 0xcbe   :  { %6926 = vmatpush.msra.mxu3 %v4346_v34  ;;  %6870 = vmatpush.msra.mxu0 %v3982_v56  ;;  %v4451_v37 = vld [vmem:[%s16279_s18 + $0x10d0] sm:$0xff]  ;;  %v4542_v34 = vld [vmem:[%s16279_s18 + $0x13a8] sm:$0xff] }
 0xcbf   :  { %6893 = vmatpush.msrb.mxu1 %v4073_v40  ;;  %6910 = vmatpush.msrb.mxu2 %v4206_v0  ;;  %v4675_v56 = vld [vmem:[%s16279_s18 + $0x17d0] sm:$0xff]  ;;  %v4808_v40 = vld [vmem:[%s16279_s18 + $0x1bf8] sm:$0xff] }
 0xcc0   :  { %6927 = vmatpush.msra.mxu3 %v4339_v25  ;;  %6871 = vmatpush.msra.mxu0 %v3975_v29  ;;  %v4444_v0 = vld [vmem:[%s16279_s18 + $0x1098] sm:$0xff]  ;;  %v4535_v25 = vld [vmem:[%s16279_s18 + $0x1370] sm:$0xff] }
 0xcc1   :  { %6894 = vmatpush.msrb.mxu1 %v4066_v52  ;;  %6911 = vmatpush.msrb.mxu2 %v4199_v10  ;;  %v4668_v29 = vld [vmem:[%s16279_s18 + $0x1798] sm:$0xff]  ;;  %v4801_v52 = vld [vmem:[%s16279_s18 + $0x1bc0] sm:$0xff] }
 0xcc2   :  { %6928 = vmatpush.msra.mxu3 %v4332_v32  ;;  %6872 = vmatpush.msra.mxu0 %v3968_v43  ;;  %v4437_v10 = vld [vmem:[%s16279_s18 + $0x1060] sm:$0xff]  ;;  %v4528_v32 = vld [vmem:[%s16279_s18 + $0x1338] sm:$0xff] }
 0xcc3   :  { %6895 = vmatpush.msrb.mxu1 %v4059_v38  ;;  %6912 = vmatpush.msrb.mxu2 %v4192_v5  ;;  %v4661_v43 = vld [vmem:[%s16279_s18 + $0x1760] sm:$0xff]  ;;  %v4430_v38 = vld [vmem:[%s16279_s18 + $0x1028] sm:$0xff] }
 0xcc4   :  { %6929 = vmatpush.msra.mxu3 %v4325_v8  ;;  %6873 = vmatpush.msra.mxu0 %v3961_v59  ;;  %v4521_v5 = vld [vmem:[%s16279_s18 + $0x1300] sm:$0xff]  ;;  %v4654_v8 = vld [vmem:[%s16279_s18 + $0x1728] sm:$0xff]  ;;  %v4787_v59 = vld [vmem:[%s16279_s18 + $0x1b50] sm:$0xff] }
 0xcc5   :  { %6896 = vmatpush.msrb.mxu1 %v4052_v33  ;;  %6913 = vmatpush.msrb.mxu2 %v4185_v9  ;;  %v4423_v33 = vld [vmem:[%s16279_s18 + $0xff0] sm:$0xff]  ;;  %v4514_v9 = vld [vmem:[%s16279_s18 + $0x12c8] sm:$0xff] }
 0xcc6   :  { %6930 = vmatpush.msra.mxu3 %v4318_v55  ;;  %6874 = vmatpush.msra.mxu0 %v3954_v14  ;;  %v4647_v55 = vld [vmem:[%s16279_s18 + $0x16f0] sm:$0xff]  ;;  %v4780_v14 = vld [vmem:[%s16279_s18 + $0x1b18] sm:$0xff] }
 0xcc7   :  { %6897 = vmatpush.msrb.mxu1 %v4045_v4  ;;  %6914 = vmatpush.msrb.mxu2 %v4178_v12  ;;  %v4416_v4 = vld [vmem:[%s16279_s18 + $0xfb8] sm:$0xff]  ;;  %v4507_v12 = vld [vmem:[%s16279_s18 + $0x1290] sm:$0xff] }
 0xcc8   :  { %6931 = vmatpush.msra.mxu3 %v4311_v30  ;;  %6875 = vmatpush.msra.mxu0 %v3947_v3  ;;  %v4640_v30 = vld [vmem:[%s16279_s18 + $0x16b8] sm:$0xff]  ;;  %v4773_v3 = vld [vmem:[%s16279_s18 + $0x1ae0] sm:$0xff] }
 0xcc9   :  { %6898 = vmatpush.msrb.mxu1 %v4038_v19  ;;  %6915 = vmatpush.msrb.mxu2 %v4171_v63  ;;  %v4409_v19 = vld [vmem:[%s16279_s18 + $0xf80] sm:$0xff]  ;;  %v4500_v63 = vld [vmem:[%s16279_s18 + $0x1258] sm:$0xff] }
 0xcca   :  { %6932 = vmatpush.msra.mxu3 %v4304_v44  ;;  %6876 = vmatpush.msra.mxu0 %v3940_v48  ;;  %v4633_v44 = vld [vmem:[%s16279_s18 + $0x1680] sm:$0xff]  ;;  %v4766_v48 = vld [vmem:[%s16279_s18 + $0x1aa8] sm:$0xff] }
 0xccb   :  { %6899 = vmatpush.msrb.mxu1 %v4031_v39  ;;  %6916 = vmatpush.msrb.mxu2 %v4164_v49  ;;  %v4402_v39 = vld [vmem:[%s16279_s18 + $0xf48] sm:$0xff]  ;;  %v4493_v49 = vld [vmem:[%s16279_s18 + $0x1220] sm:$0xff] }
 0xccc   :  { %6900 = vmatmul.f32.vlgmr.msrb.gmra.mxu1 %v12243_v26  ;;  %6933 = vmatpush.msra.mxu3 %v4297_v41  ;;  %v4570_v26 = vld [vmem:[%s16279_s18 + $0x1488] sm:$0xff] }
 0xccd   :  { %6964 = vmatpush.msra.mxu1 %v4584_v53  ;;  %6877 = vmatpush.msra.mxu0 %v3933_v6  ;;  %v4626_v41 = vld [vmem:[%s16279_s18 + $0x1648] sm:$0xff]  ;;  %v4759_v53 = vld [vmem:[%s16279_s18 + $0x1a70] sm:$0xff] }
 0xcce   :  { %6917 = vmatpush.msrb.mxu2 %v4157_v36  ;;  %6934 = vmatpush.msra.mxu3 %v4290_v58  ;;  %v4395_v6 = vld [vmem:[%s16279_s18 + $0xf10] sm:$0xff]  ;;  %v4486_v36 = vld [vmem:[%s16279_s18 + $0x11e8] sm:$0xff] }
 0xccf   :  { %6965 = vmatpush.msra.mxu1 %v4577_v31  ;;  %6878 = vmatpush.msra.mxu0 %v3926_v62  ;;  %v4619_v58 = vld [vmem:[%s16279_s18 + $0x1610] sm:$0xff]  ;;  %v4752_v31 = vld [vmem:[%s16279_s18 + $0x1a38] sm:$0xff] }
 0xcd0   :  { %6918 = vmatpush.msrb.mxu2 %v4150_v27  ;;  %6935 = vmatpush.msra.mxu3 %v4283_v57  ;;  %v4388_v62 = vld [vmem:[%s16279_s18 + $0xed8] sm:$0xff]  ;;  %v4479_v27 = vld [vmem:[%s16279_s18 + $0x11b0] sm:$0xff] }
 0xcd1   :  { %6966 = vmatpush.msra.mxu1 %v4570_v26  ;;  %6879 = vmatpush.msra.mxu0 %v3919_v23  ;;  %v4612_v57 = vld [vmem:[%s16279_s18 + $0x15d8] sm:$0xff]  ;;  %v4745_v26 = vld [vmem:[%s16279_s18 + $0x1a00] sm:$0xff] }
 0xcd2   :  { %6880 = vmatmul.f32.vlgmr.msra.gmra.mxu0 %v12217_v35  ;;  %6919 = vmatpush.msrb.mxu2 %v4143_v22  ;;  %v4689_v35 = vld [vmem:[%s16279_s18 + $0x1840] sm:$0xff]  ;;  %v5032_v23 = vld [vmem:[%s16279_s18 + $0x22f8] sm:$0xff] }
 0xcd3   :  { %6936 = vmatpush.msra.mxu3 %v4276_v13  ;;  %6944 = vmatpush.msrb.mxu0 %v4472_v11  ;;  %v4381_v22 = vld [vmem:[%s16279_s18 + $0xea0] sm:$0xff]  ;;  %v4738_v11 = vld [vmem:[%s16279_s18 + $0x19c8] sm:$0xff] }
 0xcd4   :  { %6967 = vmatpush.msra.mxu1 %v4563_v2  ;;  %6920 = vmatmul.f32.vlgmr.msrb.gmra.mxu2 %v12249_v7  ;;  %v4682_v7 = vld [vmem:[%s16279_s18 + $0x1808] sm:$0xff]  ;;  %v4605_v13 = vld [vmem:[%s16279_s18 + $0x15a0] sm:$0xff] }
 0xcd5   :  { %6984 = vmatpush.msra.mxu2 %v4696_v42  ;;  %6937 = vmatpush.msra.mxu3 %v4269_v15  ;;  %v5025_v2 = vld [vmem:[%s16279_s18 + $0x22c0] sm:$0xff]  ;;  %v4374_v42 = vld [vmem:[%s16279_s18 + $0xe68] sm:$0xff] }
 0xcd6   :  { %6945 = vmatpush.msrb.mxu0 %v4465_v17  ;;  %6968 = vmatpush.msra.mxu1 %v4556_v24  ;;  %v4598_v15 = vld [vmem:[%s16279_s18 + $0x1568] sm:$0xff]  ;;  %v4731_v17 = vld [vmem:[%s16279_s18 + $0x1990] sm:$0xff] }
 0xcd7   :  { %6985 = vmatpush.msra.mxu2 %v4689_v35  ;;  %6938 = vmatpush.msra.mxu3 %v4262_v1  ;;  %v4367_v24 = vld [vmem:[%s16279_s18 + $0xe30] sm:$0xff]  ;;  %v4724_v1 = vld [vmem:[%s16279_s18 + $0x1958] sm:$0xff] }
 0xcd8   :  { %6946 = vmatpush.msrb.mxu0 %v4458_v28  ;;  %6969 = vmatpush.msra.mxu1 %v4549_v61  ;;  %v4591_v35 = vld [vmem:[%s16279_s18 + $0x1530] sm:$0xff]  ;;  %v4920_v28 = vld [vmem:[%s16279_s18 + $0x1f78] sm:$0xff] }
 0xcd9   :  { %6986 = vmatpush.msra.mxu2 %v4682_v7  ;;  %6939 = vmatpush.msra.mxu3 %v4255_v21  ;;  %v5011_v61 = vld [vmem:[%s16279_s18 + $0x2250] sm:$0xff]  ;;  %v5144_v7 = vld [vmem:[%s16279_s18 + $0x2678] sm:$0xff]  ;;  %v4717_v21 = vld [vmem:[%s16279_s18 + $0x1920] sm:$0xff] }
 0xcda   :  { %6947 = vmatpush.msrb.mxu0 %v4451_v37  ;;  %6970 = vmatpush.msra.mxu1 %v4542_v34  ;;  %v4913_v37 = vld [vmem:[%s16279_s18 + $0x1f40] sm:$0xff]  ;;  %v5004_v34 = vld [vmem:[%s16279_s18 + $0x2218] sm:$0xff] }
 0xcdb   :  { %6940 = vmatmul.f32.vlgmr.msra.gmra.mxu3 %v12223_v20  ;;  %6987 = vmatpush.msra.mxu2 %v4675_v56  ;;  %v4794_v20 = vld [vmem:[%s16279_s18 + $0x1b88] sm:$0xff] }
 0xcdc   :  { %7004 = vmatpush.msrb.mxu3 %v4808_v40  ;;  %6948 = vmatpush.msrb.mxu0 %v4444_v0  ;;  %v4710_v56 = vld [vmem:[%s16279_s18 + $0x18e8] sm:$0xff]  ;;  %v4997_v0 = vld [vmem:[%s16279_s18 + $0x21e0] sm:$0xff] }
 0xcdd   :  { %6971 = vmatpush.msra.mxu1 %v4535_v25  ;;  %6988 = vmatpush.msra.mxu2 %v4668_v29  ;;  %v4906_v40 = vld [vmem:[%s16279_s18 + $0x1f08] sm:$0xff]  ;;  %v4703_v25 = vld [vmem:[%s16279_s18 + $0x18b0] sm:$0xff] }
 0xcde   :  { %7005 = vmatpush.msrb.mxu3 %v4801_v52  ;;  %6949 = vmatpush.msrb.mxu0 %v4437_v10  ;;  %v4899_v29 = vld [vmem:[%s16279_s18 + $0x1ed0] sm:$0xff]  ;;  %v4990_v52 = vld [vmem:[%s16279_s18 + $0x21a8] sm:$0xff] }
 0xcdf   :  { %6972 = vmatpush.msra.mxu1 %v4528_v32  ;;  %6989 = vmatpush.msra.mxu2 %v4661_v43  ;;  %v5123_v10 = vld [vmem:[%s16279_s18 + $0x25d0] sm:$0xff]  ;;  %v5256_v32 = vld [vmem:[%s16279_s18 + $0x29f8] sm:$0xff] }
 0xce0   :  { %7006 = vmatpush.msrb.mxu3 %v4794_v20  ;;  %6950 = vmatpush.msrb.mxu0 %v4430_v38  ;;  %v4892_v43 = vld [vmem:[%s16279_s18 + $0x1e98] sm:$0xff]  ;;  %v4983_v20 = vld [vmem:[%s16279_s18 + $0x2170] sm:$0xff] }
 0xce1   :  { %6973 = vmatpush.msra.mxu1 %v4521_v5  ;;  %6990 = vmatpush.msra.mxu2 %v4654_v8  ;;  %v5116_v38 = vld [vmem:[%s16279_s18 + $0x2598] sm:$0xff]  ;;  %v5249_v5 = vld [vmem:[%s16279_s18 + $0x29c0] sm:$0xff] }
 0xce2   :  { %7007 = vmatpush.msrb.mxu3 %v4787_v59  ;;  %6951 = vmatpush.msrb.mxu0 %v4423_v33  ;;  %v4885_v8 = vld [vmem:[%s16279_s18 + $0x1e60] sm:$0xff]  ;;  %v4976_v59 = vld [vmem:[%s16279_s18 + $0x2138] sm:$0xff] }
 0xce3   :  { %6974 = vmatpush.msra.mxu1 %v4514_v9  ;;  %6991 = vmatpush.msra.mxu2 %v4647_v55  ;;  %v5109_v33 = vld [vmem:[%s16279_s18 + $0x2560] sm:$0xff]  ;;  %v4878_v9 = vld [vmem:[%s16279_s18 + $0x1e28] sm:$0xff] }
 0xce4   :  { %7008 = vmatpush.msrb.mxu3 %v4780_v14  ;;  %6952 = vmatpush.msrb.mxu0 %v4416_v4  ;;  %v4969_v55 = vld [vmem:[%s16279_s18 + $0x2100] sm:$0xff]  ;;  %v5102_v14 = vld [vmem:[%s16279_s18 + $0x2528] sm:$0xff]  ;;  %v5235_v4 = vld [vmem:[%s16279_s18 + $0x2950] sm:$0xff] }
 0xce5   :  { %6975 = vmatpush.msra.mxu1 %v4507_v12  ;;  %6992 = vmatpush.msra.mxu2 %v4640_v30  ;;  %v4871_v12 = vld [vmem:[%s16279_s18 + $0x1df0] sm:$0xff]  ;;  %v4962_v30 = vld [vmem:[%s16279_s18 + $0x20c8] sm:$0xff] }
 0xce6   :  { %7009 = vmatpush.msrb.mxu3 %v4773_v3  ;;  %6953 = vmatpush.msrb.mxu0 %v4409_v19  ;;  %v5095_v3 = vld [vmem:[%s16279_s18 + $0x24f0] sm:$0xff]  ;;  %v5228_v19 = vld [vmem:[%s16279_s18 + $0x2918] sm:$0xff] }
 0xce7   :  { %6976 = vmatpush.msra.mxu1 %v4500_v63  ;;  %6993 = vmatpush.msra.mxu2 %v4633_v44  ;;  %v4864_v63 = vld [vmem:[%s16279_s18 + $0x1db8] sm:$0xff]  ;;  %v4955_v44 = vld [vmem:[%s16279_s18 + $0x2090] sm:$0xff] }
 0xce8   :  { %7010 = vmatpush.msrb.mxu3 %v4766_v48  ;;  %6954 = vmatpush.msrb.mxu0 %v4402_v39  ;;  %v5088_v48 = vld [vmem:[%s16279_s18 + $0x24b8] sm:$0xff]  ;;  %v5221_v39 = vld [vmem:[%s16279_s18 + $0x28e0] sm:$0xff] }
 0xce9   :  { %6977 = vmatpush.msra.mxu1 %v4493_v49  ;;  %6994 = vmatpush.msra.mxu2 %v4626_v41  ;;  %v4857_v49 = vld [vmem:[%s16279_s18 + $0x1d80] sm:$0xff]  ;;  %v4948_v41 = vld [vmem:[%s16279_s18 + $0x2058] sm:$0xff] }
 0xcea   :  { %7011 = vmatpush.msrb.mxu3 %v4759_v53  ;;  %6955 = vmatpush.msrb.mxu0 %v4395_v6  ;;  %v5081_v53 = vld [vmem:[%s16279_s18 + $0x2480] sm:$0xff]  ;;  %v5214_v6 = vld [vmem:[%s16279_s18 + $0x28a8] sm:$0xff] }
 0xceb   :  { %6978 = vmatpush.msra.mxu1 %v4486_v36  ;;  %6995 = vmatpush.msra.mxu2 %v4619_v58  ;;  %v4850_v36 = vld [vmem:[%s16279_s18 + $0x1d48] sm:$0xff]  ;;  %v4941_v58 = vld [vmem:[%s16279_s18 + $0x2020] sm:$0xff] }
 0xcec   :  { %7012 = vmatpush.msrb.mxu3 %v4752_v31  ;;  %6956 = vmatpush.msrb.mxu0 %v4388_v62  ;;  %v5074_v31 = vld [vmem:[%s16279_s18 + $0x2448] sm:$0xff]  ;;  %v5207_v62 = vld [vmem:[%s16279_s18 + $0x2870] sm:$0xff] }
 0xced   :  { %6979 = vmatpush.msra.mxu1 %v4479_v27  ;;  %6996 = vmatpush.msra.mxu2 %v4612_v57  ;;  %v4843_v27 = vld [vmem:[%s16279_s18 + $0x1d10] sm:$0xff]  ;;  %v4934_v57 = vld [vmem:[%s16279_s18 + $0x1fe8] sm:$0xff] }
 0xcee   :  { %6980 = vmatmul.f32.vlgmr.msra.gmra.mxu1 %v12298_v54  ;;  %7013 = vmatpush.msrb.mxu3 %v4745_v26  ;;  %v5018_v54 = vld [vmem:[%s16279_s18 + $0x2288] sm:$0xff]  ;;  %v5067_v26 = vld [vmem:[%s16279_s18 + $0x2410] sm:$0xff] }
 0xcef   :  { %7044 = vmatpush.msrb.mxu1 %v5032_v23  ;;  %6957 = vmatpush.msrb.mxu0 %v4381_v22  ;;  %v5200_v23 = vld [vmem:[%s16279_s18 + $0x2838] sm:$0xff] }
 0xcf0   :  { %6997 = vmatpush.msra.mxu2 %v4605_v13  ;;  %7014 = vmatpush.msrb.mxu3 %v4738_v11  ;;  %v4836_v22 = vld [vmem:[%s16279_s18 + $0x1cd8] sm:$0xff]  ;;  %v4927_v13 = vld [vmem:[%s16279_s18 + $0x1fb0] sm:$0xff] }
 0xcf1   :  { %7045 = vmatpush.msrb.mxu1 %v5025_v2  ;;  %6958 = vmatpush.msrb.mxu0 %v4374_v42  ;;  %v5060_v11 = vld [vmem:[%s16279_s18 + $0x23d8] sm:$0xff]  ;;  %v5193_v2 = vld [vmem:[%s16279_s18 + $0x2800] sm:$0xff] }
 0xcf2   :  { %6998 = vmatpush.msra.mxu2 %v4598_v15  ;;  %7015 = vmatpush.msrb.mxu3 %v4731_v17  ;;  %v4829_v42 = vld [vmem:[%s16279_s18 + $0x1ca0] sm:$0xff]  ;;  %v5186_v17 = vld [vmem:[%s16279_s18 + $0x27c8] sm:$0xff] }
 0xcf3   :  { %7046 = vmatpush.msrb.mxu1 %v5018_v54  ;;  %6959 = vmatpush.msrb.mxu0 %v4367_v24  ;;  %v5053_v15 = vld [vmem:[%s16279_s18 + $0x23a0] sm:$0xff]  ;;  %v4822_v54 = vld [vmem:[%s16279_s18 + $0x1c68] sm:$0xff] }
 0xcf4   :  { %6960 = vmatmul.f32.vlgmr.msrb.gmra.mxu0 %v12258_v47  ;;  %6999 = vmatpush.msra.mxu2 %v4591_v35  ;;  %v5137_v47 = vld [vmem:[%s16279_s18 + $0x2640] sm:$0xff]  ;;  %v5046_v24 = vld [vmem:[%s16279_s18 + $0x2368] sm:$0xff]  ;;  %v5179_v35 = vld [vmem:[%s16279_s18 + $0x2790] sm:$0xff] }
 0xcf5   :  { %7016 = vmatpush.msrb.mxu3 %v4724_v1  ;;  %7024 = vmatpush.msra.mxu0 %v4920_v28  ;;  %v5039_v1 = vld [vmem:[%s16279_s18 + $0x2330] sm:$0xff]  ;;  %v5172_v28 = vld [vmem:[%s16279_s18 + $0x2758] sm:$0xff] }
 0xcf6   :  { %7047 = vmatpush.msrb.mxu1 %v5011_v61  ;;  %7000 = vmatmul.f32.vlgmr.msra.gmra.mxu2 %v12307_v50  ;;  %v5130_v50 = vld [vmem:[%s16279_s18 + $0x2608] sm:$0xff]  ;;  %v5284_v61 = vld [vmem:[%s16279_s18 + $0x2ad8] sm:$0xff] }
 0xcf7   :  { %7064 = vmatpush.msrb.mxu2 %v5144_v7  ;;  %7017 = vmatpush.msrb.mxu3 %v4717_v21  ;;  %v5165_v7 = vld [vmem:[%s16279_s18 + $0x2720] sm:$0xff] }
 0xcf8   :  { %7025 = vmatpush.msra.mxu0 %v4913_v37  ;;  %7048 = vmatpush.msrb.mxu1 %v5004_v34  ;;  %v5277_v21 = vld [vmem:[%s16279_s18 + $0x2aa0] sm:$0xff]  ;;  %v5158_v37 = vld [vmem:[%s16279_s18 + $0x26e8] sm:$0xff] }
 0xcf9   :  { %7065 = vmatpush.msrb.mxu2 %v5137_v47  ;;  %7018 = vmatpush.msrb.mxu3 %v4710_v56  ;;  %v5270_v34 = vld [vmem:[%s16279_s18 + $0x2a68] sm:$0xff]  ;;  %v6381_v47 = vpop.f32.mrf.mxu3  ;;  %v6361_v56 = vpop.f32.mrf.mxu2 }
 0xcfa   :  { %7026 = vmatpush.msra.mxu0 %v4906_v40  ;;  %7049 = vmatpush.msrb.mxu1 %v4997_v0  ;;  %v6401_v40 = vpop.f32.mrf.mxu0 }
 0xcfb   :  { %7066 = vmatpush.msrb.mxu2 %v5130_v50  ;;  %7019 = vmatpush.msrb.mxu3 %v4703_v25  ;;  %v6421_v50 = vpop.f32.mrf.mxu1 }
 0xcfc   :  { %7027 = vmatpush.msra.mxu0 %v4899_v29  ;;  %7050 = vmatpush.msrb.mxu1 %v4990_v52 }
 0xcfd   :  { %7020 = vmatmul.f32.vlgmr.msrb.gmra.mxu3 %v12265_v45  ;;  %7067 = vmatpush.msrb.mxu2 %v5123_v10  ;;  %v5242_v45 = vld [vmem:[%s16279_s18 + $0x2988] sm:$0xff] }
 0xcfe   :  { %7084 = vmatpush.msra.mxu3 %v5256_v32  ;;  %7028 = vmatpush.msra.mxu0 %v4892_v43 }
 0xcff   :  { %7051 = vmatpush.msrb.mxu1 %v4983_v20  ;;  %7068 = vmatpush.msrb.mxu2 %v5116_v38  ;;  %v7489_v20 = vld [vmem:[%s16280_s19] sm:$0x7f]  ;;  %s7516_s19 = smov [#allocation2]  }
 0xd00   :  { %7085 = vmatpush.msra.mxu3 %v5249_v5  ;;  %7029 = vmatpush.msra.mxu0 %v4885_v8  ;;  %s7290_s27 = sshll.u32 %s7516_s19, 4  ;;  %s7291_s27 = int_to_ptr.vmem [resolvable:$true] %s7290_s27 }
 0xd01   :  { %7052 = vmatpush.msrb.mxu1 %v4976_v59  ;;  %7069 = vmatpush.msrb.mxu2 %v5109_v33  ;;  %v6461_v0 = vpop.f32.mrf.mxu3  ;;  %v6441_v25 = vpop.f32.mrf.mxu2 }
 0xd02   :  { %7086 = vmatpush.msra.mxu3 %v5242_v45  ;;  %7030 = vmatpush.msra.mxu0 %v4878_v9  ;;  %v6481_v29 = vpop.f32.mrf.mxu0  ;;  %v5291_v9 = vperm.slane %v7489_v20, 4 }
 0xd03   :  { %7053 = vmatpush.msrb.mxu1 %v4969_v55  ;;  %7070 = vmatpush.msrb.mxu2 %v5102_v14  ;;  %v6501_v10 = vpop.f32.mrf.mxu1 }
 0xd04   :  { %7087 = vmatpush.msra.mxu3 %v5235_v4  ;;  %7031 = vmatpush.msra.mxu0 %v4871_v12  ;;  %v6362_v12 = vadd.f32 %v6361_v56, %v5291_v9 }
 0xd05   :  { %7054 = vmatpush.msrb.mxu1 %v4962_v30  ;;  %7071 = vmatpush.msrb.mxu2 %v5095_v3 }
 0xd06   :  { %7088 = vmatpush.msra.mxu3 %v5228_v19  ;;  %7032 = vmatpush.msra.mxu0 %v4864_v63  ;;  %v6382_v3 = vadd.f32 %v6381_v47, %v6362_v12 }
 0xd07   :  { %7055 = vmatpush.msrb.mxu1 %v4955_v44  ;;  %7072 = vmatpush.msrb.mxu2 %v5088_v48 }
 0xd08   :  { %7089 = vmatpush.msra.mxu3 %v5221_v39  ;;  %7033 = vmatpush.msra.mxu0 %v4857_v49  ;;  %v6402_v44 = vadd.f32 %v6401_v40, %v6382_v3 }
 0xd09   :  { %7056 = vmatpush.msrb.mxu1 %v4948_v41  ;;  %7073 = vmatpush.msrb.mxu2 %v5081_v53  ;;  %v6541_v52 = vpop.f32.mrf.mxu3  ;;  %v6521_v32 = vpop.f32.mrf.mxu2 }
 0xd0a   :  { %7090 = vmatpush.msra.mxu3 %v5214_v6  ;;  %7034 = vmatpush.msra.mxu0 %v4850_v36  ;;  %v6561_v43 = vpop.f32.mrf.mxu0  ;;  %v6422_v49 = vadd.f32 %v6421_v50, %v6402_v44 }
 0xd0b   :  { %7057 = vmatpush.msrb.mxu1 %v4941_v58  ;;  %7074 = vmatpush.msrb.mxu2 %v5074_v31  ;;  %v6581_v5 = vpop.f32.mrf.mxu1 }
 0xd0c   :  { %7091 = vmatpush.msra.mxu3 %v5207_v62  ;;  %7035 = vmatpush.msra.mxu0 %v4843_v27  ;;  %v6442_v53 = vadd.f32 %v6441_v25, %v6422_v49 }
 0xd0d   :  { %7058 = vmatpush.msrb.mxu1 %v4934_v57  ;;  %7075 = vmatpush.msrb.mxu2 %v5067_v26 }
 0xd0e   :  { %7092 = vmatpush.msra.mxu3 %v5200_v23  ;;  %7036 = vmatpush.msra.mxu0 %v4836_v22  ;;  %v6462_v58 = vadd.f32 %v6461_v0, %v6442_v53 }
 0xd0f   :  { %7059 = vmatpush.msrb.mxu1 %v4927_v13  ;;  %7076 = vmatpush.msrb.mxu2 %v5060_v11  ;;  %v5293_v11 = vperm.slane %v7489_v20, 6 }
 0xd10   :  { %7060 = vmatmul.f32.vlgmr.msrb.gmra.mxu1 %v12467_v16  ;;  %7093 = vmatpush.msra.mxu3 %v5193_v2  ;;  %v4815_v16 = vld [vmem:[%s16279_s18 + $0x1c30] sm:$0xff]  ;;  %v6482_v57 = vadd.f32 %v6481_v29, %v6462_v58 }
 0xd11   :  { %7037 = vmatpush.msra.mxu0 %v4829_v42  ;;  %7077 = vmatpush.msrb.mxu2 %v5053_v15  ;;  %v6621_v38 = vpop.f32.mrf.mxu3 }
 0xd12   :  { %7094 = vmatpush.msra.mxu3 %v5186_v17  ;;  %v6641_v59 = vpop.f32.mrf.mxu0  ;;  %v6502_v23 = vadd.f32 %v6501_v10, %v6482_v57 }
 0xd13   :  { %7038 = vmatpush.msra.mxu0 %v4822_v54  ;;  %7078 = vmatpush.msrb.mxu2 %v5046_v24  ;;  %v6661_v45 = vpop.f32.mrf.mxu1 }
 0xd14   :  { %7095 = vmatpush.msra.mxu3 %v5179_v35  ;;  %v6522_v2 = vadd.f32 %v6521_v32, %v6502_v23 }
 0xd15   :  { %7039 = vmatpush.msra.mxu0 %v4815_v16  ;;  %7079 = vmatpush.msrb.mxu2 %v5039_v1 }
 0xd16   :  { %7040 = vmatmul.f32.vlgmr.msra.gmra.mxu0 %v12423_v18  ;;  %7096 = vmatpush.msra.mxu3 %v5172_v28  ;;  %v5151_v18 = vld [vmem:[%s16279_s18 + $0x26b0] sm:$0xff]  ;;  %v6542_v54 = vadd.f32 %v6541_v52, %v6522_v2 }
 0xd17   :  { %7080 = vmatmul.f32.vlgmr.msrb.gmra.mxu2 %v12473_v51  ;;  %7116 = vmatpush.msrb.mxu0 %v5284_v61  ;;  %v5263_v51 = vld [vmem:[%s16279_s18 + $0x2a30] sm:$0xff] }
 0xd18   :  { %7097 = vmatpush.msra.mxu3 %v5165_v7  ;;  %v6562_v16 = vadd.f32 %v6561_v43, %v6542_v54 }
 0xd19   :  { %7117 = vmatpush.msrb.mxu0 %v5277_v21  ;;  %v6701_v4 = vpop.f32.mrf.mxu3 }
 0xd1a   :  { %7098 = vmatpush.msra.mxu3 %v5158_v37  ;;  %v6721_v63 = vpop.f32.mrf.mxu0 }
 0xd1b   :  { %7118 = vmatpush.msrb.mxu0 %v5270_v34  ;;  %v6741_v39 = vpop.f32.mrf.mxu1  ;;  %v6582_v34 = vadd.f32 %v6581_v5, %v6562_v16 }
 0xd1c   :  { %7099 = vmatpush.msra.mxu3 %v5151_v18 }
 0xd1d   :  { %7100 = vmatmul.f32.vlgmr.msra.gmra.mxu3 %v12429_v46  ;;  %7119 = vmatpush.msrb.mxu0 %v5263_v51  ;;  %v5292_v46 = vperm.slane %v7489_v20, 5 }
 0xd1e   :  { %7368 = vmatmul.msk.f32.vlgmr.msrb.gmra.mxu0 %vm105_vm1, %v12493_v60  ;;  %v6601_v60 = vpop.f32.mrf.mxu2 }
 0xd1f   :  { %v6622_v8 = vadd.f32 %v6621_v38, %v5292_v46  ;;  %v6602_v40 = vadd.f32 %v6601_v60, %v6582_v34 }
 0xd21   :  { %v6642_v33 = vadd.f32 %v6641_v59, %v6622_v8  ;;  %v7373_v29 = vmul.f32 -1.442695, %v6602_v40 }
 0xd23   :  { %v6662_v55 = vadd.f32 %v6661_v45, %v6642_v33 }
 0xd26   :  { %v6681_v14 = vpop.f32.mrf.mxu2  ;;  %v6821_v22 = vpop.f32.mrf.mxu1 }
 0xd27   :  { %v6682_v30 = vadd.f32 %v6681_v14, %v6662_v55 }
 0xd29   :  { %v6702_v19 = vadd.f32 %v6701_v4, %v6682_v30 }
 0xd2b   :  { %v6722_v48 = vadd.f32 %v6721_v63, %v6702_v19 }
 0xd2d   :  { %v6742_v41 = vadd.f32 %v6741_v39, %v6722_v48  ;;  %v6801_v62 = vpop.f32.mrf.mxu0 }
 0xd2e   :  { %v6761_v6 = vpop.f32.mrf.mxu2 }
 0xd2f   :  { %v6762_v31 = vadd.f32 %v6761_v6, %v6742_v41 }
 0xd32   :  { %v6781_v36 = vpop.f32.mrf.mxu3 }
 0xd33   :  { %v6782_v27 = vadd.f32 %v6781_v36, %v6762_v31 }
 0xd35   :  { %v6802_v26 = vadd.f32 %v6801_v62, %v6782_v27 }
 0xd36   :  { %v6841_v13 = vpop.f32.mrf.mxu2 }
 0xd37   :  { %v6822_v42 = vadd.f32 %v6821_v22, %v6802_v26 }
 0xd39   :  { %v6842_v35 = vadd.f32 %v6841_v13, %v6822_v42 }
 0xd3d   :  { %v6861_v15 = vpop.f32.mrf.mxu3 }
 0xd3e   :  { %v6862_v7 = vadd.f32 %v6861_v15, %v6842_v35 }
 0xd40   :  { %v7374_v47 = vmul.f32 -1.442695, %v6862_v7 }
 0xd42   :  { %7401 = vpow2.f32 %v7374_v47 }
 0xd43   :  { %7403 = vpow2.f32 %v7373_v29 }
 0xd48   :  { %v7402_v20 = vpop.eup %7401 }
 0xd49   :  { %v6901_v1 = vpop.f32.mrf.mxu1  ;;  %v7150_v38 = vadd.f32 1.0, %v7402_v20  ;;  %v7404_v33 = vpop.eup %7403 }
 0xd4a   :  { %v7149_v9 = vadd.f32 1.0, %v7404_v33 }
 0xd4b   :  { %7405 = vrcp.f32 %v7150_v38  ;;  %v7238_v6 = vand.u32 2147483648, %v7150_v38  ;;  %vm7232_vm2 = vweird.f32 %v7150_v38  ;;  %v7236_v31 = vand.u32 2147483647, %v7150_v38 }
 0xd4c   :  { %7407 = vrcp.f32 %v7149_v9  ;;  %vm7217_vm4 = vweird.f32 %v7149_v9  ;;  %v7223_v57 = vand.u32 2147483648, %v7149_v9 }
 0xd4d   :  { %v7239_v26 = vor.u32 1.1754944e-38, %v7238_v6  ;;  %vm7237_vm6 = vcmp.eq.f32.partialorder %v7236_v31, 8.507059e+37 }
 0xd4f   :  { %v6881_v17 = vpop.f32.mrf.mxu0 }
 0xd50   :  { %v6882_v24 = vadd.f32 %v6881_v17, %v5293_v11  ;;  %v7221_v17 = vand.u32 2147483647, %v7149_v9 }
 0xd51   :  { %v7406_v12 = vpop.eup %7405 }
 0xd52   :  { %v6902_v61 = vadd.f32 %v6901_v1, %v6882_v24  ;;  %v7228_v3 = vmul.f32 %v7406_v12, %v7150_v38  ;;  %v7408_v19 = vpop.eup %7407  ;;  %vm7233_vm1 = vweird.f32 %v7406_v12 }
 0xd53   :  { %v7213_v48 = vmul.f32 %v7408_v19, %v7149_v9  ;;  %vm7234_vm3 = vmor %vm7232_vm2, %vm7233_vm1  ;;  %vm7218_vm5 = vweird.f32 %v7408_v19  ;;  %vm7222_vm1 = vcmp.eq.f32.partialorder %v7221_v17, 8.507059e+37 }
 0xd54   :  { %v7229_v63 = vsub.f32 1.0, %v7228_v3  ;;  %vm16243_vm9 = vmor %vm7217_vm4, %vm7218_vm5 }
 0xd55   :  { %v7214_v41 = vsub.f32 1.0, %v7213_v48  ;;  %vm7283_vm2 = vmor %vm7282_vm14, %vm16248_vm11 }
 0xd56   :  { %v7230_v49 = vmul.f32 %v7406_v12, %v7229_v63 }
 0xd57   :  { %v6921_v28 = vpop.f32.mrf.mxu2  ;;  %v7215_v58 = vmul.f32 %v7408_v19, %v7214_v41 }
 0xd58   :  { %v6922_v37 = vadd.f32 %v6921_v28, %v6902_v61  ;;  %v7231_v53 = vadd.f32 %v7406_v12, %v7230_v49  ;;  %v7224_v28 = vor.u32 1.1754944e-38, %v7223_v57 }
 0xd59   :  { %v7216_v22 = vadd.f32 %v7408_v19, %v7215_v58 }
 0xd5a   :  { %v7235_v27 = vsel %vm7234_vm3, %v7406_v12, %v7231_v53 }
 0xd5b   :  { %v7240_v11 = vsel %vm7237_vm6, %v7239_v26, %v7235_v27  ;;  %v7220_v35 = vsel %vm16243_vm9, %v7408_v19, %v7216_v22 }
 0xd5c   :  { %v7267_v1 = vrot.slane %v7240_v11, 6 }
 0xd5e   :  { %v6941_v21 = vpop.f32.mrf.mxu3 }
 0xd5f   :  { %v6942_v51 = vadd.f32 %v6941_v21, %v6922_v37  ;;  %v7225_v21 = vsel %vm7222_vm1, %v7224_v28, %v7220_v35 }
 0xd60   :  { %v7275_v34 = vsel %vm7269_vm13, %v7225_v21, %v7267_v1 }
 0xd6b   :  { %v6981_v0 = vpop.f32.mrf.mxu1 }
 0xd71   :  { %v6961_v18 = vpop.f32.mrf.mxu0 }
 0xd72   :  { %v6962_v56 = vadd.f32 %v6961_v18, %v6942_v51 }
 0xd74   :  { %v6982_v25 = vadd.f32 %v6981_v0, %v6962_v56 }
 0xd79   :  { %v7001_v50 = vpop.f32.mrf.mxu2 }
 0xd7a   :  { %v7002_v10 = vadd.f32 %v7001_v50, %v6982_v25 }
 0xd80   :  { %v7021_v52 = vpop.f32.mrf.mxu3 }
 0xd81   :  { %v7022_v43 = vadd.f32 %v7021_v52, %v7002_v10 }
 0xd8d   :  { %v7061_v8 = vpop.f32.mrf.mxu1 }
 0xd93   :  { %v7041_v32 = vpop.f32.mrf.mxu0 }
 0xd94   :  { %v7042_v46 = vadd.f32 %v7041_v32, %v7022_v43 }
 0xd96   :  { %v7062_v59 = vadd.f32 %v7061_v8, %v7042_v46 }
 0xd9a   :  { %v7081_v5 = vpop.f32.mrf.mxu2 }
 0xd9b   :  { %v7082_v45 = vadd.f32 %v7081_v5, %v7062_v59  ;;  %v7121_v14 = vpop.f32.mrf.mxu0 }
 0xda0   :  { %v7101_v60 = vpop.f32.mrf.mxu3 }
 0xda1   :  { %v7102_v55 = vadd.f32 %v7101_v60, %v7082_v45 }
 0xda3   :  { %v7122_v4 = vadd.f32 %v7121_v14, %v7102_v55 }
 0xda5   :  { %v7375_v30 = vmul.f32 -1.442695, %v7122_v4 }
 0xda7   :  { %7409 = vpow2.f32 %v7375_v30 }
 0xdad   :  { %v7410_v44 = vpop.eup %7409 }
 0xdae   :  { %v7151_v39 = vadd.f32 1.0, %v7410_v44 }
 0xdb0   :  { %7411 = vrcp.f32 %v7151_v39  ;;  %v7253_v13 = vand.u32 2147483648, %v7151_v39  ;;  %v7251_v42 = vand.u32 2147483647, %v7151_v39  ;;  %vm7247_vm10 = vweird.f32 %v7151_v39 }
 0xdb2   :  { %v7254_v16 = vor.u32 1.1754944e-38, %v7253_v13  ;;  %vm7252_vm15 = vcmp.eq.f32.partialorder %v7251_v42, 8.507059e+37 }
 0xdb6   :  { %v7412_v36 = vpop.eup %7411 }
 0xdb7   :  { %v7243_v62 = vmul.f32 %v7412_v36, %v7151_v39  ;;  %vm7248_vm8 = vweird.f32 %v7412_v36 }
 0xdb8   :  { %vm7249_vm12 = vmor %vm7247_vm10, %vm7248_vm8 }
 0xdb9   :  { %v7244_v23 = vsub.f32 1.0, %v7243_v62 }
 0xdbb   :  { %v7245_v2 = vmul.f32 %v7412_v36, %v7244_v23 }
 0xdbd   :  { %v7246_v54 = vadd.f32 %v7412_v36, %v7245_v2 }
 0xdbf   :  { %v7250_v61 = vsel %vm7249_vm12, %v7412_v36, %v7246_v54 }
 0xdc0   :  { %v7255_v7 = vsel %vm7252_vm15, %v7254_v16, %v7250_v61 }
 0xdc1   :  { %v7268_v37 = vrot.slane %v7255_v7, 4 }
 0xdc3   :  { %v7276_v18 = vsel %vm7273_vm0, %v7275_v34, %v7268_v37 }
 0xdc4   :  { %7284 = vst.msk [vmem:[#allocation2 + $0x8] sm:$0x3f] %vm7283_vm2, %v7276_v18 }
 0xdc5   :  { %7295 = dma.vmem_to_hbm [thread:$0]  %s7291_s27, 224, %s7293_s4, [#allocation3]  }
 0xdc6   :  { %7514 = dma.done.wait [#allocation3], 224  }
 0xdc7   :  { %7515 = vsyncadd [#allocation3], 4294967072 }
 0xdc8   :  { %7300 = vsyncpa [#allocation3], 1 }

</bundles_post_ra>
